<compile_context>
chip_gen: v5e
topology: v5e:2x2
jax: 0.10.0
libtpu: 0.0.40
codegen_flags: <defaults>
</compile_context>

<pallas_src>
import jax
import jax.numpy as jnp
from jax.experimental import pallas as pl
from jax.experimental.pallas import tpu as pltpu

# ---------------- model hyper-parameters (small synthetic sizes) -------------
B   = 8    # batch
T   = 8    # sequence length (also target length)
DIN = 2    # trajectory feature dim (x, y)
ES  = 32   # embedding size
HS  = 32   # GRU hidden size
NL  = 2    # number of GRU layers (decoder.nl)

# Stacked (NL, ES, 3*HS) input weights assume ES == HS for layers > 0.
assert ES == HS, "stacked GRU input weights require ES == HS for layers > 0"


# --------------------------- reference GRU cell -------------------------------
def _gru_cell(x, h, w_ih, w_hh, b_ih, b_hh):
    """PyTorch GRU cell semantics; gates ordered [r, z, n]."""
    gi = jnp.dot(x, w_ih, preferred_element_type=jnp.float32) + b_ih
    gh = jnp.dot(h, w_hh, preferred_element_type=jnp.float32) + b_hh
    i_r, i_z, i_n = gi[:, :HS], gi[:, HS:2 * HS], gi[:, 2 * HS:]
    h_r, h_z, h_n = gh[:, :HS], gh[:, HS:2 * HS], gh[:, 2 * HS:]
    r = jax.nn.sigmoid(i_r + h_r)
    z = jax.nn.sigmoid(i_z + h_z)
    n = jnp.tanh(i_n + r * h_n)
    return (1.0 - z) * n + z * h


# ------------------------- in-kernel GRU cell helpers --------------------------
def _gates(gx_rz, i_n, h, gh_rz, gh_n):
    """Fused-gate nonlinearity.  gx_rz:(B,2HS)  i_n,gh_n,h:(B,HS)  gh_rz:(B,2HS).

    Exact PyTorch GRU:
      r = sigmoid(i_r + h_r); z = sigmoid(i_z + h_z)
      n = tanh(i_n + r * h_n); h' = (1-z)*n + z*h  ==  n + z*(h - n)
    """
    rz = jax.nn.sigmoid(gx_rz + gh_rz)          # one EUP push over 2*HS lanes
    r = rz[:, :HS]                              # lane offset 0
    z = rz[:, HS:]                              # relayout overlaps the tanh below
    n = jnp.tanh(i_n + r * gh_n)
    return n + z * (h - n)


def _cell(xin, h, gh_rz, gh_n, wx_rz, wx_n, bx_n):
    """Serial x-chain of one GRU cell; the h-side gates arrive precomputed."""
    f32 = jnp.float32
    gx_rz = jnp.dot(xin, wx_rz, preferred_element_type=f32)      # K=32 chain matmul
    i_n = jnp.dot(xin, wx_n, preferred_element_type=f32) + bx_n  # overlaps sigmoid
    return _gates(gx_rz, i_n, h, gh_rz, gh_n)


# ------------------------------- Pallas kernel --------------------------------
def seq2seq_kernel(
    traj_ref,                                            # (B, T, DIN)
    we_emb, be_emb,                                      # encoder embedding
    e_wx_rz, e_wx_n, e_wh_rz, e_wh_n, e_b_rz, e_bx_n, e_bh_n,   # encoder GRU
    wd_emb, bd_emb,                                      # decoder embedding
    d_wx_rz, d_wx_n, d_wh_rz, d_wh_n, d_b_rz, d_bx_n, d_bh_n,   # decoder GRU
    w_out, b_out,                                        # output projection
    out_ref,                                             # (B, T, 2)
):
    f32 = jnp.float32

    # ---- tiny one-time reorder of the input to time-major ---------------------
    x_bt = traj_ref[...]                                               # (B, T, DIN)
    x_tm = jnp.concatenate([x_bt[:, t, :] for t in range(T)], axis=0)  # (T*B, DIN)

    # ---- batched precompute (carry-independent, off the serial chain) ---------
    emb = jnp.maximum(
        jnp.dot(x_tm, we_emb[...], preferred_element_type=f32) + be_emb[...],
        0.0)                                                           # (T*B, ES)
    # encoder layer-0 x-side gates for every step (kept in registers, ~6 vregs)
    gx0_rz = jnp.dot(emb, e_wx_rz[0], preferred_element_type=f32)              # (T*B, 2HS)
    gx0_n = jnp.dot(emb, e_wx_n[0], preferred_element_type=f32) + e_bx_n[0]    # (T*B, HS)

    # ---- encoder recurrence (state in registers; loops fully unrolled) --------
    hs = [jnp.zeros((B, HS), f32) for _ in range(NL)]
    for t in range(T):
        new_hs = []
        x = None
        for l in range(NL):
            # h-side gates depend only on the previous step -> overlap the x-chain
            gh_rz = jnp.dot(hs[l], e_wh_rz[l], preferred_element_type=f32) + e_b_rz[l]
            gh_n = jnp.dot(hs[l], e_wh_n[l], preferred_element_type=f32) + e_bh_n[l]
            if l == 0:
                h_new = _gates(gx0_rz[t * B:(t + 1) * B, :],
                               gx0_n[t * B:(t + 1) * B, :],
                               hs[l], gh_rz, gh_n)
            else:
                h_new = _cell(x, hs[l], gh_rz, gh_n,
                              e_wx_rz[l], e_wx_n[l], e_bx_n[l])
            new_hs.append(h_new)
            x = h_new
        hs = new_hs

    seed = hs[NL - 1]                     # x_enc[:, -1]

    # ---- autoregressive decoder (hidden = tile(seed, NL); x = seed) -----------
    hs = [seed for _ in range(NL)]
    x = seed
    htops = []
    for t in range(T):
        # step-top work: depends only on previous-step carries
        e = jnp.maximum(
            jnp.dot(x, wd_emb[...], preferred_element_type=f32) + bd_emb[...],
            0.0)                                                       # (B, ES)
        new_hs = []
        xin = e
        for l in range(NL):
            gh_rz = jnp.dot(hs[l], d_wh_rz[l], preferred_element_type=f32) + d_b_rz[l]
            gh_n = jnp.dot(hs[l], d_wh_n[l], preferred_element_type=f32) + d_bh_n[l]
            h_new = _cell(xin, hs[l], gh_rz, gh_n,
                          d_wx_rz[l], d_wx_n[l], d_bx_n[l])
            new_hs.append(h_new)
            xin = h_new
        hs = new_hs
        htops.append(hs[NL - 1])          # stash for the batched projection
        x = hs[NL - 1]                    # x = hidden[-1]

    # ---- batched output projection + direct (B, T, 2) write -------------------
    htop = jnp.concatenate(htops, axis=0)                              # (T*B, HS)
    proj = jnp.dot(htop, w_out[...], preferred_element_type=f32) + b_out[...]
    proj = proj.reshape(T, B, 2)
    out_ref[...] = jnp.stack([proj[:, b, :] for b in range(B)], axis=0)  # (B, T, 2)


# ----------------------- host-side one-time weight prep ------------------------
def _split_gru_params(w_ih, w_hh, b_ih, b_hh):
    """Split stacked GRU weights into [rz | n] blocks with pre-summed rz bias."""
    return (
        w_ih[..., :2 * HS],                        # wx_rz (NL, IN, 2HS)
        w_ih[..., 2 * HS:],                        # wx_n  (NL, IN, HS)
        w_hh[..., :2 * HS],                        # wh_rz (NL, HS, 2HS)
        w_hh[..., 2 * HS:],                        # wh_n  (NL, HS, HS)
        b_ih[..., :2 * HS] + b_hh[..., :2 * HS],   # b_rz  (NL, 1, 2HS)
        b_ih[..., 2 * HS:],                        # bx_n  (NL, 1, HS)  (= b_ih_n)
        b_hh[..., 2 * HS:],                        # bh_n  (NL, 1, HS)  (= b_hh_n)
    )


def prepare_params(params):
    """One-time weight prep; keeps the jitted forward to a single pallas_call."""
    enc = _split_gru_params(params["we_ih"], params["we_hh"],
                            params["be_ih"], params["be_hh"])
    dec = _split_gru_params(params["wd_ih"], params["wd_hh"],
                            params["bd_ih"], params["bd_hh"])
    return (params["we_emb"], params["be_emb"], *enc,
            params["wd_emb"], params["bd_emb"], *dec,
            params["w_out"], params["b_out"])


def future_seq2seq(traj, prepped):
    """traj: (B, T, DIN) float32.  Returns (outputs (B,T,2), x_in (B,T,DIN))."""
    ordered = [traj, *prepped]
    # TODO(synk): for large trajectory counts, add a "parallel" batch-chunk grid
    # axis (fills the 256-wide MXUs on v6e/v7x and uses v7x's 2nd TensorCore)
    # and size blocks for v7x's 64 MiB VMEM via
    # pltpu.CompilerParams(vmem_limit_bytes=...).
    outputs = pl.pallas_call(
        seq2seq_kernel,
        out_shape=jax.ShapeDtypeStruct((B, T, 2), jnp.float32),
        in_specs=[pl.BlockSpec(memory_space=pltpu.MemorySpace.VMEM)
                  for _ in ordered],
        out_specs=pl.BlockSpec(memory_space=pltpu.MemorySpace.VMEM),
    )(*ordered)
    return outputs, traj


# ----------------------------- pure-JAX reference -----------------------------
def reference(traj, p):
    h = jnp.zeros((NL, B, HS), jnp.float32)
    for t in range(T):
        x = jnp.maximum(traj[:, t] @ p["we_emb"] + p["be_emb"], 0.0)
        for l in range(NL):
            hn = _gru_cell(x, h[l], p["we_ih"][l], p["we_hh"][l],
                           p["be_ih"][l], p["be_hh"][l])
            h = h.at[l].set(hn)
            x = hn
    seed = h[NL - 1]
    hd = jnp.tile(seed[None], (NL, 1, 1))
    xb = seed
    outs = []
    for t in range(T):
        x = jnp.maximum(xb @ p["wd_emb"] + p["bd_emb"], 0.0)
        for l in range(NL):
            hn = _gru_cell(x, hd[l], p["wd_ih"][l], p["wd_hh"][l],
                           p["bd_ih"][l], p["bd_hh"][l])
            hd = hd.at[l].set(hn)
            x = hn
        outs.append(x @ p["w_out"] + p["b_out"])
        xb = hd[NL - 1]
    return jnp.stack(outs, axis=1), traj


# ------------------------------ parameter init ---------------------------------
def init_params(key):
    scale = 1.0 / jnp.sqrt(jnp.float32(HS))

    def u(key, shape):
        return jax.random.uniform(key, shape, jnp.float32, -scale, scale)

    keys = jax.random.split(key, 16)
    return {
        # encoder
        "we_emb": u(keys[0], (DIN, ES)),
        "be_emb": u(keys[1], (1, ES)),
        "we_ih":  u(keys[2], (NL, ES, 3 * HS)),   # layer 0 in = ES, others = HS (ES==HS)
        "we_hh":  u(keys[3], (NL, HS, 3 * HS)),
        "be_ih":  u(keys[4], (NL, 1, 3 * HS)),
        "be_hh":  u(keys[5], (NL, 1, 3 * HS)),
        # decoder
        "wd_emb": u(keys[6], (HS, ES)),
        "bd_emb": u(keys[7], (1, ES)),
        "wd_ih":  u(keys[8], (NL, ES, 3 * HS)),
        "wd_hh":  u(keys[9], (NL, HS, 3 * HS)),
        "bd_ih":  u(keys[10], (NL, 1, 3 * HS)),
        "bd_hh":  u(keys[11], (NL, 1, 3 * HS)),
        "w_out":  u(keys[12], (HS, 2)),
        "b_out":  u(keys[13], (1, 2)),
    }


if __name__ == "__main__":
    key = jax.random.PRNGKey(0)
    pkey, xkey = jax.random.split(key)
    params = init_params(pkey)
    traj = jax.random.normal(xkey, (B, T, DIN), jnp.float32)

    prepped = prepare_params(params)              # one-time weight prep
    outputs, x_in = jax.jit(future_seq2seq)(traj, prepped)
    outputs = jax.block_until_ready(outputs)

    ref_out, ref_xin = reference(traj, params)
    assert outputs.shape == (B, T, 2)
    assert x_in.shape == traj.shape
    assert jnp.allclose(outputs, ref_out, atol=1e-5, rtol=1e-5)
    assert jnp.allclose(x_in, traj)

    print("KERNEL_OK")
</pallas_src>

<mosaic_0001>
module attributes {stable_mosaic.version = 11 : i64} {
  func.func @seq2seq_kernel(%arg0: memref<8x8x2xf32, #tpu.memory_space<vmem>>, %arg1: memref<2x32xf32, #tpu.memory_space<vmem>>, %arg2: memref<1x32xf32, #tpu.memory_space<vmem>>, %arg3: memref<2x32x64xf32, #tpu.memory_space<vmem>>, %arg4: memref<2x32x32xf32, #tpu.memory_space<vmem>>, %arg5: memref<2x32x64xf32, #tpu.memory_space<vmem>>, %arg6: memref<2x32x32xf32, #tpu.memory_space<vmem>>, %arg7: memref<2x1x64xf32, #tpu.memory_space<vmem>>, %arg8: memref<2x1x32xf32, #tpu.memory_space<vmem>>, %arg9: memref<2x1x32xf32, #tpu.memory_space<vmem>>, %arg10: memref<32x32xf32, #tpu.memory_space<vmem>>, %arg11: memref<1x32xf32, #tpu.memory_space<vmem>>, %arg12: memref<2x32x64xf32, #tpu.memory_space<vmem>>, %arg13: memref<2x32x32xf32, #tpu.memory_space<vmem>>, %arg14: memref<2x32x64xf32, #tpu.memory_space<vmem>>, %arg15: memref<2x32x32xf32, #tpu.memory_space<vmem>>, %arg16: memref<2x1x64xf32, #tpu.memory_space<vmem>>, %arg17: memref<2x1x32xf32, #tpu.memory_space<vmem>>, %arg18: memref<2x1x32xf32, #tpu.memory_space<vmem>>, %arg19: memref<32x2xf32, #tpu.memory_space<vmem>>, %arg20: memref<1x2xf32, #tpu.memory_space<vmem>>, %arg21: memref<8x8x2xf32, #tpu.memory_space<vmem>>) attributes {dimension_semantics = [], scalar_prefetch = 0 : i64, scratch_operands = 0 : i64, tpu.core_type = #tpu.core_type<tc>} {
    %c0 = arith.constant 0 : index
    %c0_0 = arith.constant 0 : index
    %c0_1 = arith.constant 0 : index
    %0 = vector.load %arg0[%c0, %c0_0, %c0_1] : memref<8x8x2xf32, #tpu.memory_space<vmem>>, vector<8x8x2xf32>
    %1 = vector.extract_strided_slice %0 {offsets = [0, 0, 0], sizes = [8, 1, 2], strides = [1, 1, 1]} : vector<8x8x2xf32> to vector<8x1x2xf32>
    %2 = vector.shape_cast %1 : vector<8x1x2xf32> to vector<8x2xf32>
    %3 = vector.extract_strided_slice %0 {offsets = [0, 1, 0], sizes = [8, 1, 2], strides = [1, 1, 1]} : vector<8x8x2xf32> to vector<8x1x2xf32>
    %4 = vector.shape_cast %3 : vector<8x1x2xf32> to vector<8x2xf32>
    %5 = vector.extract_strided_slice %0 {offsets = [0, 2, 0], sizes = [8, 1, 2], strides = [1, 1, 1]} : vector<8x8x2xf32> to vector<8x1x2xf32>
    %6 = vector.shape_cast %5 : vector<8x1x2xf32> to vector<8x2xf32>
    %7 = vector.extract_strided_slice %0 {offsets = [0, 3, 0], sizes = [8, 1, 2], strides = [1, 1, 1]} : vector<8x8x2xf32> to vector<8x1x2xf32>
    %8 = vector.shape_cast %7 : vector<8x1x2xf32> to vector<8x2xf32>
    %9 = vector.extract_strided_slice %0 {offsets = [0, 4, 0], sizes = [8, 1, 2], strides = [1, 1, 1]} : vector<8x8x2xf32> to vector<8x1x2xf32>
    %10 = vector.shape_cast %9 : vector<8x1x2xf32> to vector<8x2xf32>
    %11 = vector.extract_strided_slice %0 {offsets = [0, 5, 0], sizes = [8, 1, 2], strides = [1, 1, 1]} : vector<8x8x2xf32> to vector<8x1x2xf32>
    %12 = vector.shape_cast %11 : vector<8x1x2xf32> to vector<8x2xf32>
    %13 = vector.extract_strided_slice %0 {offsets = [0, 6, 0], sizes = [8, 1, 2], strides = [1, 1, 1]} : vector<8x8x2xf32> to vector<8x1x2xf32>
    %14 = vector.shape_cast %13 : vector<8x1x2xf32> to vector<8x2xf32>
    %15 = vector.extract_strided_slice %0 {offsets = [0, 7, 0], sizes = [8, 1, 2], strides = [1, 1, 1]} : vector<8x8x2xf32> to vector<8x1x2xf32>
    %16 = vector.shape_cast %15 : vector<8x1x2xf32> to vector<8x2xf32>
    %17 = tpu.concatenate %2, %4, %6, %8, %10, %12, %14, %16 in 0 : vector<8x2xf32>, vector<8x2xf32>, vector<8x2xf32>, vector<8x2xf32>, vector<8x2xf32>, vector<8x2xf32>, vector<8x2xf32>, vector<8x2xf32> -> vector<64x2xf32>
    %c0_2 = arith.constant 0 : index
    %c0_3 = arith.constant 0 : index
    %18 = vector.load %arg1[%c0_2, %c0_3] : memref<2x32xf32, #tpu.memory_space<vmem>>, vector<2x32xf32>
    %cst = arith.constant dense<0.000000e+00> : vector<64x32xf32>
    %19 = tpu.matmul %17, %18, %cst {dimension_numbers = #tpu.dot_dimension_numbers<[1], [0], [0], [1], [0, 0, 1, 1], [], []>} : vector<64x2xf32>, vector<2x32xf32>, vector<64x32xf32> -> vector<64x32xf32>
    %c0_4 = arith.constant 0 : index
    %c0_5 = arith.constant 0 : index
    %20 = vector.load %arg2[%c0_4, %c0_5] : memref<1x32xf32, #tpu.memory_space<vmem>>, vector<1x32xf32>
    %21 = vector.broadcast %20 : vector<1x32xf32> to vector<64x32xf32>
    %22 = arith.addf %19, %21 : vector<64x32xf32>
    %cst_6 = arith.constant 0.000000e+00 : f32
    %23 = vector.broadcast %cst_6 : f32 to vector<64x32xf32>
    %24 = arith.maximumf %22, %23 : vector<64x32xf32>
    %c0_7 = arith.constant 0 : index
    %c0_8 = arith.constant 0 : index
    %c0_9 = arith.constant 0 : index
    %25 = vector.load %arg3[%c0_7, %c0_8, %c0_9] : memref<2x32x64xf32, #tpu.memory_space<vmem>>, vector<1x32x64xf32>
    %26 = vector.shape_cast %25 : vector<1x32x64xf32> to vector<32x64xf32>
    %cst_10 = arith.constant dense<0.000000e+00> : vector<64x64xf32>
    %27 = tpu.matmul %24, %26, %cst_10 {dimension_numbers = #tpu.dot_dimension_numbers<[1], [0], [0], [1], [0, 0, 1, 1], [], []>} : vector<64x32xf32>, vector<32x64xf32>, vector<64x64xf32> -> vector<64x64xf32>
    %c0_11 = arith.constant 0 : index
    %c0_12 = arith.constant 0 : index
    %c0_13 = arith.constant 0 : index
    %28 = vector.load %arg4[%c0_11, %c0_12, %c0_13] : memref<2x32x32xf32, #tpu.memory_space<vmem>>, vector<1x32x32xf32>
    %29 = vector.shape_cast %28 : vector<1x32x32xf32> to vector<32x32xf32>
    %cst_14 = arith.constant dense<0.000000e+00> : vector<64x32xf32>
    %30 = tpu.matmul %24, %29, %cst_14 {dimension_numbers = #tpu.dot_dimension_numbers<[1], [0], [0], [1], [0, 0, 1, 1], [], []>} : vector<64x32xf32>, vector<32x32xf32>, vector<64x32xf32> -> vector<64x32xf32>
    %c0_15 = arith.constant 0 : index
    %c0_16 = arith.constant 0 : index
    %c0_17 = arith.constant 0 : index
    %31 = vector.load %arg8[%c0_15, %c0_16, %c0_17] : memref<2x1x32xf32, #tpu.memory_space<vmem>>, vector<1x1x32xf32>
    %32 = vector.shape_cast %31 : vector<1x1x32xf32> to vector<1x32xf32>
    %33 = vector.broadcast %32 : vector<1x32xf32> to vector<64x32xf32>
    %34 = arith.addf %30, %33 : vector<64x32xf32>
    %cst_18 = arith.constant 0.000000e+00 : f32
    %35 = vector.broadcast %cst_18 : f32 to vector<8x32xf32>
    %cst_19 = arith.constant 0.000000e+00 : f32
    %36 = vector.broadcast %cst_19 : f32 to vector<8x32xf32>
    %c0_20 = arith.constant 0 : index
    %c0_21 = arith.constant 0 : index
    %c0_22 = arith.constant 0 : index
    %37 = vector.load %arg5[%c0_20, %c0_21, %c0_22] : memref<2x32x64xf32, #tpu.memory_space<vmem>>, vector<1x32x64xf32>
    %38 = vector.shape_cast %37 : vector<1x32x64xf32> to vector<32x64xf32>
    %cst_23 = arith.constant dense<0.000000e+00> : vector<8x64xf32>
    %39 = tpu.matmul %35, %38, %cst_23 {dimension_numbers = #tpu.dot_dimension_numbers<[1], [0], [0], [1], [0, 0, 1, 1], [], []>} : vector<8x32xf32>, vector<32x64xf32>, vector<8x64xf32> -> vector<8x64xf32>
    %c0_24 = arith.constant 0 : index
    %c0_25 = arith.constant 0 : index
    %c0_26 = arith.constant 0 : index
    %40 = vector.load %arg7[%c0_24, %c0_25, %c0_26] : memref<2x1x64xf32, #tpu.memory_space<vmem>>, vector<1x1x64xf32>
    %41 = vector.shape_cast %40 : vector<1x1x64xf32> to vector<1x64xf32>
    %42 = vector.broadcast %41 : vector<1x64xf32> to vector<8x64xf32>
    %43 = arith.addf %39, %42 : vector<8x64xf32>
    %c0_27 = arith.constant 0 : index
    %c0_28 = arith.constant 0 : index
    %c0_29 = arith.constant 0 : index
    %44 = vector.load %arg6[%c0_27, %c0_28, %c0_29] : memref<2x32x32xf32, #tpu.memory_space<vmem>>, vector<1x32x32xf32>
    %45 = vector.shape_cast %44 : vector<1x32x32xf32> to vector<32x32xf32>
    %cst_30 = arith.constant dense<0.000000e+00> : vector<8x32xf32>
    %46 = tpu.matmul %35, %45, %cst_30 {dimension_numbers = #tpu.dot_dimension_numbers<[1], [0], [0], [1], [0, 0, 1, 1], [], []>} : vector<8x32xf32>, vector<32x32xf32>, vector<8x32xf32> -> vector<8x32xf32>
    %c0_31 = arith.constant 0 : index
    %c0_32 = arith.constant 0 : index
    %c0_33 = arith.constant 0 : index
    %47 = vector.load %arg9[%c0_31, %c0_32, %c0_33] : memref<2x1x32xf32, #tpu.memory_space<vmem>>, vector<1x1x32xf32>
    %48 = vector.shape_cast %47 : vector<1x1x32xf32> to vector<1x32xf32>
    %49 = vector.broadcast %48 : vector<1x32xf32> to vector<8x32xf32>
    %50 = arith.addf %46, %49 : vector<8x32xf32>
    %51 = vector.extract_strided_slice %27 {offsets = [0, 0], sizes = [8, 64], strides = [1, 1]} : vector<64x64xf32> to vector<8x64xf32>
    %52 = vector.extract_strided_slice %34 {offsets = [0, 0], sizes = [8, 32], strides = [1, 1]} : vector<64x32xf32> to vector<8x32xf32>
    %53 = arith.addf %51, %43 : vector<8x64xf32>
    %54 = arith.negf %53 : vector<8x64xf32>
    %55 = math.exp %54 : vector<8x64xf32>
    %cst_34 = arith.constant 1.000000e+00 : f32
    %56 = vector.broadcast %cst_34 : f32 to vector<8x64xf32>
    %57 = arith.addf %56, %55 : vector<8x64xf32>
    %58 = arith.divf %56, %57 : vector<8x64xf32>
    %59 = vector.extract_strided_slice %58 {offsets = [0, 0], sizes = [8, 32], strides = [1, 1]} : vector<8x64xf32> to vector<8x32xf32>
    %60 = vector.extract_strided_slice %58 {offsets = [0, 32], sizes = [8, 32], strides = [1, 1]} : vector<8x64xf32> to vector<8x32xf32>
    %61 = arith.mulf %59, %50 : vector<8x32xf32>
    %62 = arith.addf %52, %61 : vector<8x32xf32>
    %63 = math.tanh %62 : vector<8x32xf32>
    %64 = arith.subf %35, %63 : vector<8x32xf32>
    %65 = arith.mulf %60, %64 : vector<8x32xf32>
    %66 = arith.addf %63, %65 : vector<8x32xf32>
    %c1 = arith.constant 1 : index
    %c0_35 = arith.constant 0 : index
    %c0_36 = arith.constant 0 : index
    %67 = vector.load %arg5[%c1, %c0_35, %c0_36] : memref<2x32x64xf32, #tpu.memory_space<vmem>>, vector<1x32x64xf32>
    %68 = vector.shape_cast %67 : vector<1x32x64xf32> to vector<32x64xf32>
    %cst_37 = arith.constant dense<0.000000e+00> : vector<8x64xf32>
    %69 = tpu.matmul %36, %68, %cst_37 {dimension_numbers = #tpu.dot_dimension_numbers<[1], [0], [0], [1], [0, 0, 1, 1], [], []>} : vector<8x32xf32>, vector<32x64xf32>, vector<8x64xf32> -> vector<8x64xf32>
    %c1_38 = arith.constant 1 : index
    %c0_39 = arith.constant 0 : index
    %c0_40 = arith.constant 0 : index
    %70 = vector.load %arg7[%c1_38, %c0_39, %c0_40] : memref<2x1x64xf32, #tpu.memory_space<vmem>>, vector<1x1x64xf32>
    %71 = vector.shape_cast %70 : vector<1x1x64xf32> to vector<1x64xf32>
    %72 = vector.broadcast %71 : vector<1x64xf32> to vector<8x64xf32>
    %73 = arith.addf %69, %72 : vector<8x64xf32>
    %c1_41 = arith.constant 1 : index
    %c0_42 = arith.constant 0 : index
    %c0_43 = arith.constant 0 : index
    %74 = vector.load %arg6[%c1_41, %c0_42, %c0_43] : memref<2x32x32xf32, #tpu.memory_space<vmem>>, vector<1x32x32xf32>
    %75 = vector.shape_cast %74 : vector<1x32x32xf32> to vector<32x32xf32>
    %cst_44 = arith.constant dense<0.000000e+00> : vector<8x32xf32>
    %76 = tpu.matmul %36, %75, %cst_44 {dimension_numbers = #tpu.dot_dimension_numbers<[1], [0], [0], [1], [0, 0, 1, 1], [], []>} : vector<8x32xf32>, vector<32x32xf32>, vector<8x32xf32> -> vector<8x32xf32>
    %c1_45 = arith.constant 1 : index
    %c0_46 = arith.constant 0 : index
    %c0_47 = arith.constant 0 : index
    %77 = vector.load %arg9[%c1_45, %c0_46, %c0_47] : memref<2x1x32xf32, #tpu.memory_space<vmem>>, vector<1x1x32xf32>
    %78 = vector.shape_cast %77 : vector<1x1x32xf32> to vector<1x32xf32>
    %79 = vector.broadcast %78 : vector<1x32xf32> to vector<8x32xf32>
    %80 = arith.addf %76, %79 : vector<8x32xf32>
    %c1_48 = arith.constant 1 : index
    %c0_49 = arith.constant 0 : index
    %c0_50 = arith.constant 0 : index
    %81 = vector.load %arg3[%c1_48, %c0_49, %c0_50] : memref<2x32x64xf32, #tpu.memory_space<vmem>>, vector<1x32x64xf32>
    %82 = vector.shape_cast %81 : vector<1x32x64xf32> to vector<32x64xf32>
    %c1_51 = arith.constant 1 : index
    %c0_52 = arith.constant 0 : index
    %c0_53 = arith.constant 0 : index
    %83 = vector.load %arg4[%c1_51, %c0_52, %c0_53] : memref<2x32x32xf32, #tpu.memory_space<vmem>>, vector<1x32x32xf32>
    %84 = vector.shape_cast %83 : vector<1x32x32xf32> to vector<32x32xf32>
    %c1_54 = arith.constant 1 : index
    %c0_55 = arith.constant 0 : index
    %c0_56 = arith.constant 0 : index
    %85 = vector.load %arg8[%c1_54, %c0_55, %c0_56] : memref<2x1x32xf32, #tpu.memory_space<vmem>>, vector<1x1x32xf32>
    %86 = vector.shape_cast %85 : vector<1x1x32xf32> to vector<1x32xf32>
    %cst_57 = arith.constant dense<0.000000e+00> : vector<8x64xf32>
    %87 = tpu.matmul %66, %82, %cst_57 {dimension_numbers = #tpu.dot_dimension_numbers<[1], [0], [0], [1], [0, 0, 1, 1], [], []>} : vector<8x32xf32>, vector<32x64xf32>, vector<8x64xf32> -> vector<8x64xf32>
    %cst_58 = arith.constant dense<0.000000e+00> : vector<8x32xf32>
    %88 = tpu.matmul %66, %84, %cst_58 {dimension_numbers = #tpu.dot_dimension_numbers<[1], [0], [0], [1], [0, 0, 1, 1], [], []>} : vector<8x32xf32>, vector<32x32xf32>, vector<8x32xf32> -> vector<8x32xf32>
    %89 = vector.broadcast %86 : vector<1x32xf32> to vector<8x32xf32>
    %90 = arith.addf %88, %89 : vector<8x32xf32>
    %91 = arith.addf %87, %73 : vector<8x64xf32>
    %92 = arith.negf %91 : vector<8x64xf32>
    %93 = math.exp %92 : vector<8x64xf32>
    %cst_59 = arith.constant 1.000000e+00 : f32
    %94 = vector.broadcast %cst_59 : f32 to vector<8x64xf32>
    %95 = arith.addf %94, %93 : vector<8x64xf32>
    %96 = arith.divf %94, %95 : vector<8x64xf32>
    %97 = vector.extract_strided_slice %96 {offsets = [0, 0], sizes = [8, 32], strides = [1, 1]} : vector<8x64xf32> to vector<8x32xf32>
    %98 = vector.extract_strided_slice %96 {offsets = [0, 32], sizes = [8, 32], strides = [1, 1]} : vector<8x64xf32> to vector<8x32xf32>
    %99 = arith.mulf %97, %80 : vector<8x32xf32>
    %100 = arith.addf %90, %99 : vector<8x32xf32>
    %101 = math.tanh %100 : vector<8x32xf32>
    %102 = arith.subf %36, %101 : vector<8x32xf32>
    %103 = arith.mulf %98, %102 : vector<8x32xf32>
    %104 = arith.addf %101, %103 : vector<8x32xf32>
    %c0_60 = arith.constant 0 : index
    %c0_61 = arith.constant 0 : index
    %c0_62 = arith.constant 0 : index
    %105 = vector.load %arg5[%c0_60, %c0_61, %c0_62] : memref<2x32x64xf32, #tpu.memory_space<vmem>>, vector<1x32x64xf32>
    %106 = vector.shape_cast %105 : vector<1x32x64xf32> to vector<32x64xf32>
    %cst_63 = arith.constant dense<0.000000e+00> : vector<8x64xf32>
    %107 = tpu.matmul %66, %106, %cst_63 {dimension_numbers = #tpu.dot_dimension_numbers<[1], [0], [0], [1], [0, 0, 1, 1], [], []>} : vector<8x32xf32>, vector<32x64xf32>, vector<8x64xf32> -> vector<8x64xf32>
    %c0_64 = arith.constant 0 : index
    %c0_65 = arith.constant 0 : index
    %c0_66 = arith.constant 0 : index
    %108 = vector.load %arg7[%c0_64, %c0_65, %c0_66] : memref<2x1x64xf32, #tpu.memory_space<vmem>>, vector<1x1x64xf32>
    %109 = vector.shape_cast %108 : vector<1x1x64xf32> to vector<1x64xf32>
    %110 = vector.broadcast %109 : vector<1x64xf32> to vector<8x64xf32>
    %111 = arith.addf %107, %110 : vector<8x64xf32>
    %c0_67 = arith.constant 0 : index
    %c0_68 = arith.constant 0 : index
    %c0_69 = arith.constant 0 : index
    %112 = vector.load %arg6[%c0_67, %c0_68, %c0_69] : memref<2x32x32xf32, #tpu.memory_space<vmem>>, vector<1x32x32xf32>
    %113 = vector.shape_cast %112 : vector<1x32x32xf32> to vector<32x32xf32>
    %cst_70 = arith.constant dense<0.000000e+00> : vector<8x32xf32>
    %114 = tpu.matmul %66, %113, %cst_70 {dimension_numbers = #tpu.dot_dimension_numbers<[1], [0], [0], [1], [0, 0, 1, 1], [], []>} : vector<8x32xf32>, vector<32x32xf32>, vector<8x32xf32> -> vector<8x32xf32>
    %c0_71 = arith.constant 0 : index
    %c0_72 = arith.constant 0 : index
    %c0_73 = arith.constant 0 : index
    %115 = vector.load %arg9[%c0_71, %c0_72, %c0_73] : memref<2x1x32xf32, #tpu.memory_space<vmem>>, vector<1x1x32xf32>
    %116 = vector.shape_cast %115 : vector<1x1x32xf32> to vector<1x32xf32>
    %117 = vector.broadcast %116 : vector<1x32xf32> to vector<8x32xf32>
    %118 = arith.addf %114, %117 : vector<8x32xf32>
    %119 = vector.extract_strided_slice %27 {offsets = [8, 0], sizes = [8, 64], strides = [1, 1]} : vector<64x64xf32> to vector<8x64xf32>
    %120 = vector.extract_strided_slice %34 {offsets = [8, 0], sizes = [8, 32], strides = [1, 1]} : vector<64x32xf32> to vector<8x32xf32>
    %121 = arith.addf %119, %111 : vector<8x64xf32>
    %122 = arith.negf %121 : vector<8x64xf32>
    %123 = math.exp %122 : vector<8x64xf32>
    %cst_74 = arith.constant 1.000000e+00 : f32
    %124 = vector.broadcast %cst_74 : f32 to vector<8x64xf32>
    %125 = arith.addf %124, %123 : vector<8x64xf32>
    %126 = arith.divf %124, %125 : vector<8x64xf32>
    %127 = vector.extract_strided_slice %126 {offsets = [0, 0], sizes = [8, 32], strides = [1, 1]} : vector<8x64xf32> to vector<8x32xf32>
    %128 = vector.extract_strided_slice %126 {offsets = [0, 32], sizes = [8, 32], strides = [1, 1]} : vector<8x64xf32> to vector<8x32xf32>
    %129 = arith.mulf %127, %118 : vector<8x32xf32>
    %130 = arith.addf %120, %129 : vector<8x32xf32>
    %131 = math.tanh %130 : vector<8x32xf32>
    %132 = arith.subf %66, %131 : vector<8x32xf32>
    %133 = arith.mulf %128, %132 : vector<8x32xf32>
    %134 = arith.addf %131, %133 : vector<8x32xf32>
    %c1_75 = arith.constant 1 : index
    %c0_76 = arith.constant 0 : index
    %c0_77 = arith.constant 0 : index
    %135 = vector.load %arg5[%c1_75, %c0_76, %c0_77] : memref<2x32x64xf32, #tpu.memory_space<vmem>>, vector<1x32x64xf32>
    %136 = vector.shape_cast %135 : vector<1x32x64xf32> to vector<32x64xf32>
    %cst_78 = arith.constant dense<0.000000e+00> : vector<8x64xf32>
    %137 = tpu.matmul %104, %136, %cst_78 {dimension_numbers = #tpu.dot_dimension_numbers<[1], [0], [0], [1], [0, 0, 1, 1], [], []>} : vector<8x32xf32>, vector<32x64xf32>, vector<8x64xf32> -> vector<8x64xf32>
    %c1_79 = arith.constant 1 : index
    %c0_80 = arith.constant 0 : index
    %c0_81 = arith.constant 0 : index
    %138 = vector.load %arg7[%c1_79, %c0_80, %c0_81] : memref<2x1x64xf32, #tpu.memory_space<vmem>>, vector<1x1x64xf32>
    %139 = vector.shape_cast %138 : vector<1x1x64xf32> to vector<1x64xf32>
    %140 = vector.broadcast %139 : vector<1x64xf32> to vector<8x64xf32>
    %141 = arith.addf %137, %140 : vector<8x64xf32>
    %c1_82 = arith.constant 1 : index
    %c0_83 = arith.constant 0 : index
    %c0_84 = arith.constant 0 : index
    %142 = vector.load %arg6[%c1_82, %c0_83, %c0_84] : memref<2x32x32xf32, #tpu.memory_space<vmem>>, vector<1x32x32xf32>
    %143 = vector.shape_cast %142 : vector<1x32x32xf32> to vector<32x32xf32>
    %cst_85 = arith.constant dense<0.000000e+00> : vector<8x32xf32>
    %144 = tpu.matmul %104, %143, %cst_85 {dimension_numbers = #tpu.dot_dimension_numbers<[1], [0], [0], [1], [0, 0, 1, 1], [], []>} : vector<8x32xf32>, vector<32x32xf32>, vector<8x32xf32> -> vector<8x32xf32>
    %c1_86 = arith.constant 1 : index
    %c0_87 = arith.constant 0 : index
    %c0_88 = arith.constant 0 : index
    %145 = vector.load %arg9[%c1_86, %c0_87, %c0_88] : memref<2x1x32xf32, #tpu.memory_space<vmem>>, vector<1x1x32xf32>
    %146 = vector.shape_cast %145 : vector<1x1x32xf32> to vector<1x32xf32>
    %147 = vector.broadcast %146 : vector<1x32xf32> to vector<8x32xf32>
    %148 = arith.addf %144, %147 : vector<8x32xf32>
    %c1_89 = arith.constant 1 : index
    %c0_90 = arith.constant 0 : index
    %c0_91 = arith.constant 0 : index
    %149 = vector.load %arg3[%c1_89, %c0_90, %c0_91] : memref<2x32x64xf32, #tpu.memory_space<vmem>>, vector<1x32x64xf32>
    %150 = vector.shape_cast %149 : vector<1x32x64xf32> to vector<32x64xf32>
    %c1_92 = arith.constant 1 : index
    %c0_93 = arith.constant 0 : index
    %c0_94 = arith.constant 0 : index
    %151 = vector.load %arg4[%c1_92, %c0_93, %c0_94] : memref<2x32x32xf32, #tpu.memory_space<vmem>>, vector<1x32x32xf32>
    %152 = vector.shape_cast %151 : vector<1x32x32xf32> to vector<32x32xf32>
    %c1_95 = arith.constant 1 : index
    %c0_96 = arith.constant 0 : index
    %c0_97 = arith.constant 0 : index
    %153 = vector.load %arg8[%c1_95, %c0_96, %c0_97] : memref<2x1x32xf32, #tpu.memory_space<vmem>>, vector<1x1x32xf32>
    %154 = vector.shape_cast %153 : vector<1x1x32xf32> to vector<1x32xf32>
    %cst_98 = arith.constant dense<0.000000e+00> : vector<8x64xf32>
    %155 = tpu.matmul %134, %150, %cst_98 {dimension_numbers = #tpu.dot_dimension_numbers<[1], [0], [0], [1], [0, 0, 1, 1], [], []>} : vector<8x32xf32>, vector<32x64xf32>, vector<8x64xf32> -> vector<8x64xf32>
    %cst_99 = arith.constant dense<0.000000e+00> : vector<8x32xf32>
    %156 = tpu.matmul %134, %152, %cst_99 {dimension_numbers = #tpu.dot_dimension_numbers<[1], [0], [0], [1], [0, 0, 1, 1], [], []>} : vector<8x32xf32>, vector<32x32xf32>, vector<8x32xf32> -> vector<8x32xf32>
    %157 = vector.broadcast %154 : vector<1x32xf32> to vector<8x32xf32>
    %158 = arith.addf %156, %157 : vector<8x32xf32>
    %159 = arith.addf %155, %141 : vector<8x64xf32>
    %160 = arith.negf %159 : vector<8x64xf32>
    %161 = math.exp %160 : vector<8x64xf32>
    %cst_100 = arith.constant 1.000000e+00 : f32
    %162 = vector.broadcast %cst_100 : f32 to vector<8x64xf32>
    %163 = arith.addf %162, %161 : vector<8x64xf32>
    %164 = arith.divf %162, %163 : vector<8x64xf32>
    %165 = vector.extract_strided_slice %164 {offsets = [0, 0], sizes = [8, 32], strides = [1, 1]} : vector<8x64xf32> to vector<8x32xf32>
    %166 = vector.extract_strided_slice %164 {offsets = [0, 32], sizes = [8, 32], strides = [1, 1]} : vector<8x64xf32> to vector<8x32xf32>
    %167 = arith.mulf %165, %148 : vector<8x32xf32>
    %168 = arith.addf %158, %167 : vector<8x32xf32>
    %169 = math.tanh %168 : vector<8x32xf32>
    %170 = arith.subf %104, %169 : vector<8x32xf32>
    %171 = arith.mulf %166, %170 : vector<8x32xf32>
    %172 = arith.addf %169, %171 : vector<8x32xf32>
    %c0_101 = arith.constant 0 : index
    %c0_102 = arith.constant 0 : index
    %c0_103 = arith.constant 0 : index
    %173 = vector.load %arg5[%c0_101, %c0_102, %c0_103] : memref<2x32x64xf32, #tpu.memory_space<vmem>>, vector<1x32x64xf32>
    %174 = vector.shape_cast %173 : vector<1x32x64xf32> to vector<32x64xf32>
    %cst_104 = arith.constant dense<0.000000e+00> : vector<8x64xf32>
    %175 = tpu.matmul %134, %174, %cst_104 {dimension_numbers = #tpu.dot_dimension_numbers<[1], [0], [0], [1], [0, 0, 1, 1], [], []>} : vector<8x32xf32>, vector<32x64xf32>, vector<8x64xf32> -> vector<8x64xf32>
    %c0_105 = arith.constant 0 : index
    %c0_106 = arith.constant 0 : index
    %c0_107 = arith.constant 0 : index
    %176 = vector.load %arg7[%c0_105, %c0_106, %c0_107] : memref<2x1x64xf32, #tpu.memory_space<vmem>>, vector<1x1x64xf32>
    %177 = vector.shape_cast %176 : vector<1x1x64xf32> to vector<1x64xf32>
    %178 = vector.broadcast %177 : vector<1x64xf32> to vector<8x64xf32>
    %179 = arith.addf %175, %178 : vector<8x64xf32>
    %c0_108 = arith.constant 0 : index
    %c0_109 = arith.constant 0 : index
    %c0_110 = arith.constant 0 : index
    %180 = vector.load %arg6[%c0_108, %c0_109, %c0_110] : memref<2x32x32xf32, #tpu.memory_space<vmem>>, vector<1x32x32xf32>
    %181 = vector.shape_cast %180 : vector<1x32x32xf32> to vector<32x32xf32>
    %cst_111 = arith.constant dense<0.000000e+00> : vector<8x32xf32>
    %182 = tpu.matmul %134, %181, %cst_111 {dimension_numbers = #tpu.dot_dimension_numbers<[1], [0], [0], [1], [0, 0, 1, 1], [], []>} : vector<8x32xf32>, vector<32x32xf32>, vector<8x32xf32> -> vector<8x32xf32>
    %c0_112 = arith.constant 0 : index
    %c0_113 = arith.constant 0 : index
    %c0_114 = arith.constant 0 : index
    %183 = vector.load %arg9[%c0_112, %c0_113, %c0_114] : memref<2x1x32xf32, #tpu.memory_space<vmem>>, vector<1x1x32xf32>
    %184 = vector.shape_cast %183 : vector<1x1x32xf32> to vector<1x32xf32>
    %185 = vector.broadcast %184 : vector<1x32xf32> to vector<8x32xf32>
    %186 = arith.addf %182, %185 : vector<8x32xf32>
    %187 = vector.extract_strided_slice %27 {offsets = [16, 0], sizes = [8, 64], strides = [1, 1]} : vector<64x64xf32> to vector<8x64xf32>
    %188 = vector.extract_strided_slice %34 {offsets = [16, 0], sizes = [8, 32], strides = [1, 1]} : vector<64x32xf32> to vector<8x32xf32>
    %189 = arith.addf %187, %179 : vector<8x64xf32>
    %190 = arith.negf %189 : vector<8x64xf32>
    %191 = math.exp %190 : vector<8x64xf32>
    %cst_115 = arith.constant 1.000000e+00 : f32
    %192 = vector.broadcast %cst_115 : f32 to vector<8x64xf32>
    %193 = arith.addf %192, %191 : vector<8x64xf32>
    %194 = arith.divf %192, %193 : vector<8x64xf32>
    %195 = vector.extract_strided_slice %194 {offsets = [0, 0], sizes = [8, 32], strides = [1, 1]} : vector<8x64xf32> to vector<8x32xf32>
    %196 = vector.extract_strided_slice %194 {offsets = [0, 32], sizes = [8, 32], strides = [1, 1]} : vector<8x64xf32> to vector<8x32xf32>
    %197 = arith.mulf %195, %186 : vector<8x32xf32>
    %198 = arith.addf %188, %197 : vector<8x32xf32>
    %199 = math.tanh %198 : vector<8x32xf32>
    %200 = arith.subf %134, %199 : vector<8x32xf32>
    %201 = arith.mulf %196, %200 : vector<8x32xf32>
    %202 = arith.addf %199, %201 : vector<8x32xf32>
    %c1_116 = arith.constant 1 : index
    %c0_117 = arith.constant 0 : index
    %c0_118 = arith.constant 0 : index
    %203 = vector.load %arg5[%c1_116, %c0_117, %c0_118] : memref<2x32x64xf32, #tpu.memory_space<vmem>>, vector<1x32x64xf32>
    %204 = vector.shape_cast %203 : vector<1x32x64xf32> to vector<32x64xf32>
    %cst_119 = arith.constant dense<0.000000e+00> : vector<8x64xf32>
    %205 = tpu.matmul %172, %204, %cst_119 {dimension_numbers = #tpu.dot_dimension_numbers<[1], [0], [0], [1], [0, 0, 1, 1], [], []>} : vector<8x32xf32>, vector<32x64xf32>, vector<8x64xf32> -> vector<8x64xf32>
    %c1_120 = arith.constant 1 : index
    %c0_121 = arith.constant 0 : index
    %c0_122 = arith.constant 0 : index
    %206 = vector.load %arg7[%c1_120, %c0_121, %c0_122] : memref<2x1x64xf32, #tpu.memory_space<vmem>>, vector<1x1x64xf32>
    %207 = vector.shape_cast %206 : vector<1x1x64xf32> to vector<1x64xf32>
    %208 = vector.broadcast %207 : vector<1x64xf32> to vector<8x64xf32>
    %209 = arith.addf %205, %208 : vector<8x64xf32>
    %c1_123 = arith.constant 1 : index
    %c0_124 = arith.constant 0 : index
    %c0_125 = arith.constant 0 : index
    %210 = vector.load %arg6[%c1_123, %c0_124, %c0_125] : memref<2x32x32xf32, #tpu.memory_space<vmem>>, vector<1x32x32xf32>
    %211 = vector.shape_cast %210 : vector<1x32x32xf32> to vector<32x32xf32>
    %cst_126 = arith.constant dense<0.000000e+00> : vector<8x32xf32>
    %212 = tpu.matmul %172, %211, %cst_126 {dimension_numbers = #tpu.dot_dimension_numbers<[1], [0], [0], [1], [0, 0, 1, 1], [], []>} : vector<8x32xf32>, vector<32x32xf32>, vector<8x32xf32> -> vector<8x32xf32>
    %c1_127 = arith.constant 1 : index
    %c0_128 = arith.constant 0 : index
    %c0_129 = arith.constant 0 : index
    %213 = vector.load %arg9[%c1_127, %c0_128, %c0_129] : memref<2x1x32xf32, #tpu.memory_space<vmem>>, vector<1x1x32xf32>
    %214 = vector.shape_cast %213 : vector<1x1x32xf32> to vector<1x32xf32>
    %215 = vector.broadcast %214 : vector<1x32xf32> to vector<8x32xf32>
    %216 = arith.addf %212, %215 : vector<8x32xf32>
    %c1_130 = arith.constant 1 : index
    %c0_131 = arith.constant 0 : index
    %c0_132 = arith.constant 0 : index
    %217 = vector.load %arg3[%c1_130, %c0_131, %c0_132] : memref<2x32x64xf32, #tpu.memory_space<vmem>>, vector<1x32x64xf32>
    %218 = vector.shape_cast %217 : vector<1x32x64xf32> to vector<32x64xf32>
    %c1_133 = arith.constant 1 : index
    %c0_134 = arith.constant 0 : index
    %c0_135 = arith.constant 0 : index
    %219 = vector.load %arg4[%c1_133, %c0_134, %c0_135] : memref<2x32x32xf32, #tpu.memory_space<vmem>>, vector<1x32x32xf32>
    %220 = vector.shape_cast %219 : vector<1x32x32xf32> to vector<32x32xf32>
    %c1_136 = arith.constant 1 : index
    %c0_137 = arith.constant 0 : index
    %c0_138 = arith.constant 0 : index
    %221 = vector.load %arg8[%c1_136, %c0_137, %c0_138] : memref<2x1x32xf32, #tpu.memory_space<vmem>>, vector<1x1x32xf32>
    %222 = vector.shape_cast %221 : vector<1x1x32xf32> to vector<1x32xf32>
    %cst_139 = arith.constant dense<0.000000e+00> : vector<8x64xf32>
    %223 = tpu.matmul %202, %218, %cst_139 {dimension_numbers = #tpu.dot_dimension_numbers<[1], [0], [0], [1], [0, 0, 1, 1], [], []>} : vector<8x32xf32>, vector<32x64xf32>, vector<8x64xf32> -> vector<8x64xf32>
    %cst_140 = arith.constant dense<0.000000e+00> : vector<8x32xf32>
    %224 = tpu.matmul %202, %220, %cst_140 {dimension_numbers = #tpu.dot_dimension_numbers<[1], [0], [0], [1], [0, 0, 1, 1], [], []>} : vector<8x32xf32>, vector<32x32xf32>, vector<8x32xf32> -> vector<8x32xf32>
    %225 = vector.broadcast %222 : vector<1x32xf32> to vector<8x32xf32>
    %226 = arith.addf %224, %225 : vector<8x32xf32>
    %227 = arith.addf %223, %209 : vector<8x64xf32>
    %228 = arith.negf %227 : vector<8x64xf32>
    %229 = math.exp %228 : vector<8x64xf32>
    %cst_141 = arith.constant 1.000000e+00 : f32
    %230 = vector.broadcast %cst_141 : f32 to vector<8x64xf32>
    %231 = arith.addf %230, %229 : vector<8x64xf32>
    %232 = arith.divf %230, %231 : vector<8x64xf32>
    %233 = vector.extract_strided_slice %232 {offsets = [0, 0], sizes = [8, 32], strides = [1, 1]} : vector<8x64xf32> to vector<8x32xf32>
    %234 = vector.extract_strided_slice %232 {offsets = [0, 32], sizes = [8, 32], strides = [1, 1]} : vector<8x64xf32> to vector<8x32xf32>
    %235 = arith.mulf %233, %216 : vector<8x32xf32>
    %236 = arith.addf %226, %235 : vector<8x32xf32>
    %237 = math.tanh %236 : vector<8x32xf32>
    %238 = arith.subf %172, %237 : vector<8x32xf32>
    %239 = arith.mulf %234, %238 : vector<8x32xf32>
    %240 = arith.addf %237, %239 : vector<8x32xf32>
    %c0_142 = arith.constant 0 : index
    %c0_143 = arith.constant 0 : index
    %c0_144 = arith.constant 0 : index
    %241 = vector.load %arg5[%c0_142, %c0_143, %c0_144] : memref<2x32x64xf32, #tpu.memory_space<vmem>>, vector<1x32x64xf32>
    %242 = vector.shape_cast %241 : vector<1x32x64xf32> to vector<32x64xf32>
    %cst_145 = arith.constant dense<0.000000e+00> : vector<8x64xf32>
    %243 = tpu.matmul %202, %242, %cst_145 {dimension_numbers = #tpu.dot_dimension_numbers<[1], [0], [0], [1], [0, 0, 1, 1], [], []>} : vector<8x32xf32>, vector<32x64xf32>, vector<8x64xf32> -> vector<8x64xf32>
    %c0_146 = arith.constant 0 : index
    %c0_147 = arith.constant 0 : index
    %c0_148 = arith.constant 0 : index
    %244 = vector.load %arg7[%c0_146, %c0_147, %c0_148] : memref<2x1x64xf32, #tpu.memory_space<vmem>>, vector<1x1x64xf32>
    %245 = vector.shape_cast %244 : vector<1x1x64xf32> to vector<1x64xf32>
    %246 = vector.broadcast %245 : vector<1x64xf32> to vector<8x64xf32>
    %247 = arith.addf %243, %246 : vector<8x64xf32>
    %c0_149 = arith.constant 0 : index
    %c0_150 = arith.constant 0 : index
    %c0_151 = arith.constant 0 : index
    %248 = vector.load %arg6[%c0_149, %c0_150, %c0_151] : memref<2x32x32xf32, #tpu.memory_space<vmem>>, vector<1x32x32xf32>
    %249 = vector.shape_cast %248 : vector<1x32x32xf32> to vector<32x32xf32>
    %cst_152 = arith.constant dense<0.000000e+00> : vector<8x32xf32>
    %250 = tpu.matmul %202, %249, %cst_152 {dimension_numbers = #tpu.dot_dimension_numbers<[1], [0], [0], [1], [0, 0, 1, 1], [], []>} : vector<8x32xf32>, vector<32x32xf32>, vector<8x32xf32> -> vector<8x32xf32>
    %c0_153 = arith.constant 0 : index
    %c0_154 = arith.constant 0 : index
    %c0_155 = arith.constant 0 : index
    %251 = vector.load %arg9[%c0_153, %c0_154, %c0_155] : memref<2x1x32xf32, #tpu.memory_space<vmem>>, vector<1x1x32xf32>
    %252 = vector.shape_cast %251 : vector<1x1x32xf32> to vector<1x32xf32>
    %253 = vector.broadcast %252 : vector<1x32xf32> to vector<8x32xf32>
    %254 = arith.addf %250, %253 : vector<8x32xf32>
    %255 = vector.extract_strided_slice %27 {offsets = [24, 0], sizes = [8, 64], strides = [1, 1]} : vector<64x64xf32> to vector<8x64xf32>
    %256 = vector.extract_strided_slice %34 {offsets = [24, 0], sizes = [8, 32], strides = [1, 1]} : vector<64x32xf32> to vector<8x32xf32>
    %257 = arith.addf %255, %247 : vector<8x64xf32>
    %258 = arith.negf %257 : vector<8x64xf32>
    %259 = math.exp %258 : vector<8x64xf32>
    %cst_156 = arith.constant 1.000000e+00 : f32
    %260 = vector.broadcast %cst_156 : f32 to vector<8x64xf32>
    %261 = arith.addf %260, %259 : vector<8x64xf32>
    %262 = arith.divf %260, %261 : vector<8x64xf32>
    %263 = vector.extract_strided_slice %262 {offsets = [0, 0], sizes = [8, 32], strides = [1, 1]} : vector<8x64xf32> to vector<8x32xf32>
    %264 = vector.extract_strided_slice %262 {offsets = [0, 32], sizes = [8, 32], strides = [1, 1]} : vector<8x64xf32> to vector<8x32xf32>
    %265 = arith.mulf %263, %254 : vector<8x32xf32>
    %266 = arith.addf %256, %265 : vector<8x32xf32>
    %267 = math.tanh %266 : vector<8x32xf32>
    %268 = arith.subf %202, %267 : vector<8x32xf32>
    %269 = arith.mulf %264, %268 : vector<8x32xf32>
    %270 = arith.addf %267, %269 : vector<8x32xf32>
    %c1_157 = arith.constant 1 : index
    %c0_158 = arith.constant 0 : index
    %c0_159 = arith.constant 0 : index
    %271 = vector.load %arg5[%c1_157, %c0_158, %c0_159] : memref<2x32x64xf32, #tpu.memory_space<vmem>>, vector<1x32x64xf32>
    %272 = vector.shape_cast %271 : vector<1x32x64xf32> to vector<32x64xf32>
    %cst_160 = arith.constant dense<0.000000e+00> : vector<8x64xf32>
    %273 = tpu.matmul %240, %272, %cst_160 {dimension_numbers = #tpu.dot_dimension_numbers<[1], [0], [0], [1], [0, 0, 1, 1], [], []>} : vector<8x32xf32>, vector<32x64xf32>, vector<8x64xf32> -> vector<8x64xf32>
    %c1_161 = arith.constant 1 : index
    %c0_162 = arith.constant 0 : index
    %c0_163 = arith.constant 0 : index
    %274 = vector.load %arg7[%c1_161, %c0_162, %c0_163] : memref<2x1x64xf32, #tpu.memory_space<vmem>>, vector<1x1x64xf32>
    %275 = vector.shape_cast %274 : vector<1x1x64xf32> to vector<1x64xf32>
    %276 = vector.broadcast %275 : vector<1x64xf32> to vector<8x64xf32>
    %277 = arith.addf %273, %276 : vector<8x64xf32>
    %c1_164 = arith.constant 1 : index
    %c0_165 = arith.constant 0 : index
    %c0_166 = arith.constant 0 : index
    %278 = vector.load %arg6[%c1_164, %c0_165, %c0_166] : memref<2x32x32xf32, #tpu.memory_space<vmem>>, vector<1x32x32xf32>
    %279 = vector.shape_cast %278 : vector<1x32x32xf32> to vector<32x32xf32>
    %cst_167 = arith.constant dense<0.000000e+00> : vector<8x32xf32>
    %280 = tpu.matmul %240, %279, %cst_167 {dimension_numbers = #tpu.dot_dimension_numbers<[1], [0], [0], [1], [0, 0, 1, 1], [], []>} : vector<8x32xf32>, vector<32x32xf32>, vector<8x32xf32> -> vector<8x32xf32>
    %c1_168 = arith.constant 1 : index
    %c0_169 = arith.constant 0 : index
    %c0_170 = arith.constant 0 : index
    %281 = vector.load %arg9[%c1_168, %c0_169, %c0_170] : memref<2x1x32xf32, #tpu.memory_space<vmem>>, vector<1x1x32xf32>
    %282 = vector.shape_cast %281 : vector<1x1x32xf32> to vector<1x32xf32>
    %283 = vector.broadcast %282 : vector<1x32xf32> to vector<8x32xf32>
    %284 = arith.addf %280, %283 : vector<8x32xf32>
    %c1_171 = arith.constant 1 : index
    %c0_172 = arith.constant 0 : index
    %c0_173 = arith.constant 0 : index
    %285 = vector.load %arg3[%c1_171, %c0_172, %c0_173] : memref<2x32x64xf32, #tpu.memory_space<vmem>>, vector<1x32x64xf32>
    %286 = vector.shape_cast %285 : vector<1x32x64xf32> to vector<32x64xf32>
    %c1_174 = arith.constant 1 : index
    %c0_175 = arith.constant 0 : index
    %c0_176 = arith.constant 0 : index
    %287 = vector.load %arg4[%c1_174, %c0_175, %c0_176] : memref<2x32x32xf32, #tpu.memory_space<vmem>>, vector<1x32x32xf32>
    %288 = vector.shape_cast %287 : vector<1x32x32xf32> to vector<32x32xf32>
    %c1_177 = arith.constant 1 : index
    %c0_178 = arith.constant 0 : index
    %c0_179 = arith.constant 0 : index
    %289 = vector.load %arg8[%c1_177, %c0_178, %c0_179] : memref<2x1x32xf32, #tpu.memory_space<vmem>>, vector<1x1x32xf32>
    %290 = vector.shape_cast %289 : vector<1x1x32xf32> to vector<1x32xf32>
    %cst_180 = arith.constant dense<0.000000e+00> : vector<8x64xf32>
    %291 = tpu.matmul %270, %286, %cst_180 {dimension_numbers = #tpu.dot_dimension_numbers<[1], [0], [0], [1], [0, 0, 1, 1], [], []>} : vector<8x32xf32>, vector<32x64xf32>, vector<8x64xf32> -> vector<8x64xf32>
    %cst_181 = arith.constant dense<0.000000e+00> : vector<8x32xf32>
    %292 = tpu.matmul %270, %288, %cst_181 {dimension_numbers = #tpu.dot_dimension_numbers<[1], [0], [0], [1], [0, 0, 1, 1], [], []>} : vector<8x32xf32>, vector<32x32xf32>, vector<8x32xf32> -> vector<8x32xf32>
    %293 = vector.broadcast %290 : vector<1x32xf32> to vector<8x32xf32>
    %294 = arith.addf %292, %293 : vector<8x32xf32>
    %295 = arith.addf %291, %277 : vector<8x64xf32>
    %296 = arith.negf %295 : vector<8x64xf32>
    %297 = math.exp %296 : vector<8x64xf32>
    %cst_182 = arith.constant 1.000000e+00 : f32
    %298 = vector.broadcast %cst_182 : f32 to vector<8x64xf32>
    %299 = arith.addf %298, %297 : vector<8x64xf32>
    %300 = arith.divf %298, %299 : vector<8x64xf32>
    %301 = vector.extract_strided_slice %300 {offsets = [0, 0], sizes = [8, 32], strides = [1, 1]} : vector<8x64xf32> to vector<8x32xf32>
    %302 = vector.extract_strided_slice %300 {offsets = [0, 32], sizes = [8, 32], strides = [1, 1]} : vector<8x64xf32> to vector<8x32xf32>
    %303 = arith.mulf %301, %284 : vector<8x32xf32>
    %304 = arith.addf %294, %303 : vector<8x32xf32>
    %305 = math.tanh %304 : vector<8x32xf32>
    %306 = arith.subf %240, %305 : vector<8x32xf32>
    %307 = arith.mulf %302, %306 : vector<8x32xf32>
    %308 = arith.addf %305, %307 : vector<8x32xf32>
    %c0_183 = arith.constant 0 : index
    %c0_184 = arith.constant 0 : index
    %c0_185 = arith.constant 0 : index
    %309 = vector.load %arg5[%c0_183, %c0_184, %c0_185] : memref<2x32x64xf32, #tpu.memory_space<vmem>>, vector<1x32x64xf32>
    %310 = vector.shape_cast %309 : vector<1x32x64xf32> to vector<32x64xf32>
    %cst_186 = arith.constant dense<0.000000e+00> : vector<8x64xf32>
    %311 = tpu.matmul %270, %310, %cst_186 {dimension_numbers = #tpu.dot_dimension_numbers<[1], [0], [0], [1], [0, 0, 1, 1], [], []>} : vector<8x32xf32>, vector<32x64xf32>, vector<8x64xf32> -> vector<8x64xf32>
    %c0_187 = arith.constant 0 : index
    %c0_188 = arith.constant 0 : index
    %c0_189 = arith.constant 0 : index
    %312 = vector.load %arg7[%c0_187, %c0_188, %c0_189] : memref<2x1x64xf32, #tpu.memory_space<vmem>>, vector<1x1x64xf32>
    %313 = vector.shape_cast %312 : vector<1x1x64xf32> to vector<1x64xf32>
    %314 = vector.broadcast %313 : vector<1x64xf32> to vector<8x64xf32>
    %315 = arith.addf %311, %314 : vector<8x64xf32>
    %c0_190 = arith.constant 0 : index
    %c0_191 = arith.constant 0 : index
    %c0_192 = arith.constant 0 : index
    %316 = vector.load %arg6[%c0_190, %c0_191, %c0_192] : memref<2x32x32xf32, #tpu.memory_space<vmem>>, vector<1x32x32xf32>
    %317 = vector.shape_cast %316 : vector<1x32x32xf32> to vector<32x32xf32>
    %cst_193 = arith.constant dense<0.000000e+00> : vector<8x32xf32>
    %318 = tpu.matmul %270, %317, %cst_193 {dimension_numbers = #tpu.dot_dimension_numbers<[1], [0], [0], [1], [0, 0, 1, 1], [], []>} : vector<8x32xf32>, vector<32x32xf32>, vector<8x32xf32> -> vector<8x32xf32>
    %c0_194 = arith.constant 0 : index
    %c0_195 = arith.constant 0 : index
    %c0_196 = arith.constant 0 : index
    %319 = vector.load %arg9[%c0_194, %c0_195, %c0_196] : memref<2x1x32xf32, #tpu.memory_space<vmem>>, vector<1x1x32xf32>
    %320 = vector.shape_cast %319 : vector<1x1x32xf32> to vector<1x32xf32>
    %321 = vector.broadcast %320 : vector<1x32xf32> to vector<8x32xf32>
    %322 = arith.addf %318, %321 : vector<8x32xf32>
    %323 = vector.extract_strided_slice %27 {offsets = [32, 0], sizes = [8, 64], strides = [1, 1]} : vector<64x64xf32> to vector<8x64xf32>
    %324 = vector.extract_strided_slice %34 {offsets = [32, 0], sizes = [8, 32], strides = [1, 1]} : vector<64x32xf32> to vector<8x32xf32>
    %325 = arith.addf %323, %315 : vector<8x64xf32>
    %326 = arith.negf %325 : vector<8x64xf32>
    %327 = math.exp %326 : vector<8x64xf32>
    %cst_197 = arith.constant 1.000000e+00 : f32
    %328 = vector.broadcast %cst_197 : f32 to vector<8x64xf32>
    %329 = arith.addf %328, %327 : vector<8x64xf32>
    %330 = arith.divf %328, %329 : vector<8x64xf32>
    %331 = vector.extract_strided_slice %330 {offsets = [0, 0], sizes = [8, 32], strides = [1, 1]} : vector<8x64xf32> to vector<8x32xf32>
    %332 = vector.extract_strided_slice %330 {offsets = [0, 32], sizes = [8, 32], strides = [1, 1]} : vector<8x64xf32> to vector<8x32xf32>
    %333 = arith.mulf %331, %322 : vector<8x32xf32>
    %334 = arith.addf %324, %333 : vector<8x32xf32>
    %335 = math.tanh %334 : vector<8x32xf32>
    %336 = arith.subf %270, %335 : vector<8x32xf32>
    %337 = arith.mulf %332, %336 : vector<8x32xf32>
    %338 = arith.addf %335, %337 : vector<8x32xf32>
    %c1_198 = arith.constant 1 : index
    %c0_199 = arith.constant 0 : index
    %c0_200 = arith.constant 0 : index
    %339 = vector.load %arg5[%c1_198, %c0_199, %c0_200] : memref<2x32x64xf32, #tpu.memory_space<vmem>>, vector<1x32x64xf32>
    %340 = vector.shape_cast %339 : vector<1x32x64xf32> to vector<32x64xf32>
    %cst_201 = arith.constant dense<0.000000e+00> : vector<8x64xf32>
    %341 = tpu.matmul %308, %340, %cst_201 {dimension_numbers = #tpu.dot_dimension_numbers<[1], [0], [0], [1], [0, 0, 1, 1], [], []>} : vector<8x32xf32>, vector<32x64xf32>, vector<8x64xf32> -> vector<8x64xf32>
    %c1_202 = arith.constant 1 : index
    %c0_203 = arith.constant 0 : index
    %c0_204 = arith.constant 0 : index
    %342 = vector.load %arg7[%c1_202, %c0_203, %c0_204] : memref<2x1x64xf32, #tpu.memory_space<vmem>>, vector<1x1x64xf32>
    %343 = vector.shape_cast %342 : vector<1x1x64xf32> to vector<1x64xf32>
    %344 = vector.broadcast %343 : vector<1x64xf32> to vector<8x64xf32>
    %345 = arith.addf %341, %344 : vector<8x64xf32>
    %c1_205 = arith.constant 1 : index
    %c0_206 = arith.constant 0 : index
    %c0_207 = arith.constant 0 : index
    %346 = vector.load %arg6[%c1_205, %c0_206, %c0_207] : memref<2x32x32xf32, #tpu.memory_space<vmem>>, vector<1x32x32xf32>
    %347 = vector.shape_cast %346 : vector<1x32x32xf32> to vector<32x32xf32>
    %cst_208 = arith.constant dense<0.000000e+00> : vector<8x32xf32>
    %348 = tpu.matmul %308, %347, %cst_208 {dimension_numbers = #tpu.dot_dimension_numbers<[1], [0], [0], [1], [0, 0, 1, 1], [], []>} : vector<8x32xf32>, vector<32x32xf32>, vector<8x32xf32> -> vector<8x32xf32>
    %c1_209 = arith.constant 1 : index
    %c0_210 = arith.constant 0 : index
    %c0_211 = arith.constant 0 : index
    %349 = vector.load %arg9[%c1_209, %c0_210, %c0_211] : memref<2x1x32xf32, #tpu.memory_space<vmem>>, vector<1x1x32xf32>
    %350 = vector.shape_cast %349 : vector<1x1x32xf32> to vector<1x32xf32>
    %351 = vector.broadcast %350 : vector<1x32xf32> to vector<8x32xf32>
    %352 = arith.addf %348, %351 : vector<8x32xf32>
    %c1_212 = arith.constant 1 : index
    %c0_213 = arith.constant 0 : index
    %c0_214 = arith.constant 0 : index
    %353 = vector.load %arg3[%c1_212, %c0_213, %c0_214] : memref<2x32x64xf32, #tpu.memory_space<vmem>>, vector<1x32x64xf32>
    %354 = vector.shape_cast %353 : vector<1x32x64xf32> to vector<32x64xf32>
    %c1_215 = arith.constant 1 : index
    %c0_216 = arith.constant 0 : index
    %c0_217 = arith.constant 0 : index
    %355 = vector.load %arg4[%c1_215, %c0_216, %c0_217] : memref<2x32x32xf32, #tpu.memory_space<vmem>>, vector<1x32x32xf32>
    %356 = vector.shape_cast %355 : vector<1x32x32xf32> to vector<32x32xf32>
    %c1_218 = arith.constant 1 : index
    %c0_219 = arith.constant 0 : index
    %c0_220 = arith.constant 0 : index
    %357 = vector.load %arg8[%c1_218, %c0_219, %c0_220] : memref<2x1x32xf32, #tpu.memory_space<vmem>>, vector<1x1x32xf32>
    %358 = vector.shape_cast %357 : vector<1x1x32xf32> to vector<1x32xf32>
    %cst_221 = arith.constant dense<0.000000e+00> : vector<8x64xf32>
    %359 = tpu.matmul %338, %354, %cst_221 {dimension_numbers = #tpu.dot_dimension_numbers<[1], [0], [0], [1], [0, 0, 1, 1], [], []>} : vector<8x32xf32>, vector<32x64xf32>, vector<8x64xf32> -> vector<8x64xf32>
    %cst_222 = arith.constant dense<0.000000e+00> : vector<8x32xf32>
    %360 = tpu.matmul %338, %356, %cst_222 {dimension_numbers = #tpu.dot_dimension_numbers<[1], [0], [0], [1], [0, 0, 1, 1], [], []>} : vector<8x32xf32>, vector<32x32xf32>, vector<8x32xf32> -> vector<8x32xf32>
    %361 = vector.broadcast %358 : vector<1x32xf32> to vector<8x32xf32>
    %362 = arith.addf %360, %361 : vector<8x32xf32>
    %363 = arith.addf %359, %345 : vector<8x64xf32>
    %364 = arith.negf %363 : vector<8x64xf32>
    %365 = math.exp %364 : vector<8x64xf32>
    %cst_223 = arith.constant 1.000000e+00 : f32
    %366 = vector.broadcast %cst_223 : f32 to vector<8x64xf32>
    %367 = arith.addf %366, %365 : vector<8x64xf32>
    %368 = arith.divf %366, %367 : vector<8x64xf32>
    %369 = vector.extract_strided_slice %368 {offsets = [0, 0], sizes = [8, 32], strides = [1, 1]} : vector<8x64xf32> to vector<8x32xf32>
    %370 = vector.extract_strided_slice %368 {offsets = [0, 32], sizes = [8, 32], strides = [1, 1]} : vector<8x64xf32> to vector<8x32xf32>
    %371 = arith.mulf %369, %352 : vector<8x32xf32>
    %372 = arith.addf %362, %371 : vector<8x32xf32>
    %373 = math.tanh %372 : vector<8x32xf32>
    %374 = arith.subf %308, %373 : vector<8x32xf32>
    %375 = arith.mulf %370, %374 : vector<8x32xf32>
    %376 = arith.addf %373, %375 : vector<8x32xf32>
    %c0_224 = arith.constant 0 : index
    %c0_225 = arith.constant 0 : index
    %c0_226 = arith.constant 0 : index
    %377 = vector.load %arg5[%c0_224, %c0_225, %c0_226] : memref<2x32x64xf32, #tpu.memory_space<vmem>>, vector<1x32x64xf32>
    %378 = vector.shape_cast %377 : vector<1x32x64xf32> to vector<32x64xf32>
    %cst_227 = arith.constant dense<0.000000e+00> : vector<8x64xf32>
    %379 = tpu.matmul %338, %378, %cst_227 {dimension_numbers = #tpu.dot_dimension_numbers<[1], [0], [0], [1], [0, 0, 1, 1], [], []>} : vector<8x32xf32>, vector<32x64xf32>, vector<8x64xf32> -> vector<8x64xf32>
    %c0_228 = arith.constant 0 : index
    %c0_229 = arith.constant 0 : index
    %c0_230 = arith.constant 0 : index
    %380 = vector.load %arg7[%c0_228, %c0_229, %c0_230] : memref<2x1x64xf32, #tpu.memory_space<vmem>>, vector<1x1x64xf32>
    %381 = vector.shape_cast %380 : vector<1x1x64xf32> to vector<1x64xf32>
    %382 = vector.broadcast %381 : vector<1x64xf32> to vector<8x64xf32>
    %383 = arith.addf %379, %382 : vector<8x64xf32>
    %c0_231 = arith.constant 0 : index
    %c0_232 = arith.constant 0 : index
    %c0_233 = arith.constant 0 : index
    %384 = vector.load %arg6[%c0_231, %c0_232, %c0_233] : memref<2x32x32xf32, #tpu.memory_space<vmem>>, vector<1x32x32xf32>
    %385 = vector.shape_cast %384 : vector<1x32x32xf32> to vector<32x32xf32>
    %cst_234 = arith.constant dense<0.000000e+00> : vector<8x32xf32>
    %386 = tpu.matmul %338, %385, %cst_234 {dimension_numbers = #tpu.dot_dimension_numbers<[1], [0], [0], [1], [0, 0, 1, 1], [], []>} : vector<8x32xf32>, vector<32x32xf32>, vector<8x32xf32> -> vector<8x32xf32>
    %c0_235 = arith.constant 0 : index
    %c0_236 = arith.constant 0 : index
    %c0_237 = arith.constant 0 : index
    %387 = vector.load %arg9[%c0_235, %c0_236, %c0_237] : memref<2x1x32xf32, #tpu.memory_space<vmem>>, vector<1x1x32xf32>
    %388 = vector.shape_cast %387 : vector<1x1x32xf32> to vector<1x32xf32>
    %389 = vector.broadcast %388 : vector<1x32xf32> to vector<8x32xf32>
    %390 = arith.addf %386, %389 : vector<8x32xf32>
    %391 = vector.extract_strided_slice %27 {offsets = [40, 0], sizes = [8, 64], strides = [1, 1]} : vector<64x64xf32> to vector<8x64xf32>
    %392 = vector.extract_strided_slice %34 {offsets = [40, 0], sizes = [8, 32], strides = [1, 1]} : vector<64x32xf32> to vector<8x32xf32>
    %393 = arith.addf %391, %383 : vector<8x64xf32>
    %394 = arith.negf %393 : vector<8x64xf32>
    %395 = math.exp %394 : vector<8x64xf32>
    %cst_238 = arith.constant 1.000000e+00 : f32
    %396 = vector.broadcast %cst_238 : f32 to vector<8x64xf32>
    %397 = arith.addf %396, %395 : vector<8x64xf32>
    %398 = arith.divf %396, %397 : vector<8x64xf32>
    %399 = vector.extract_strided_slice %398 {offsets = [0, 0], sizes = [8, 32], strides = [1, 1]} : vector<8x64xf32> to vector<8x32xf32>
    %400 = vector.extract_strided_slice %398 {offsets = [0, 32], sizes = [8, 32], strides = [1, 1]} : vector<8x64xf32> to vector<8x32xf32>
    %401 = arith.mulf %399, %390 : vector<8x32xf32>
    %402 = arith.addf %392, %401 : vector<8x32xf32>
    %403 = math.tanh %402 : vector<8x32xf32>
    %404 = arith.subf %338, %403 : vector<8x32xf32>
    %405 = arith.mulf %400, %404 : vector<8x32xf32>
    %406 = arith.addf %403, %405 : vector<8x32xf32>
    %c1_239 = arith.constant 1 : index
    %c0_240 = arith.constant 0 : index
    %c0_241 = arith.constant 0 : index
    %407 = vector.load %arg5[%c1_239, %c0_240, %c0_241] : memref<2x32x64xf32, #tpu.memory_space<vmem>>, vector<1x32x64xf32>
    %408 = vector.shape_cast %407 : vector<1x32x64xf32> to vector<32x64xf32>
    %cst_242 = arith.constant dense<0.000000e+00> : vector<8x64xf32>
    %409 = tpu.matmul %376, %408, %cst_242 {dimension_numbers = #tpu.dot_dimension_numbers<[1], [0], [0], [1], [0, 0, 1, 1], [], []>} : vector<8x32xf32>, vector<32x64xf32>, vector<8x64xf32> -> vector<8x64xf32>
    %c1_243 = arith.constant 1 : index
    %c0_244 = arith.constant 0 : index
    %c0_245 = arith.constant 0 : index
    %410 = vector.load %arg7[%c1_243, %c0_244, %c0_245] : memref<2x1x64xf32, #tpu.memory_space<vmem>>, vector<1x1x64xf32>
    %411 = vector.shape_cast %410 : vector<1x1x64xf32> to vector<1x64xf32>
    %412 = vector.broadcast %411 : vector<1x64xf32> to vector<8x64xf32>
    %413 = arith.addf %409, %412 : vector<8x64xf32>
    %c1_246 = arith.constant 1 : index
    %c0_247 = arith.constant 0 : index
    %c0_248 = arith.constant 0 : index
    %414 = vector.load %arg6[%c1_246, %c0_247, %c0_248] : memref<2x32x32xf32, #tpu.memory_space<vmem>>, vector<1x32x32xf32>
    %415 = vector.shape_cast %414 : vector<1x32x32xf32> to vector<32x32xf32>
    %cst_249 = arith.constant dense<0.000000e+00> : vector<8x32xf32>
    %416 = tpu.matmul %376, %415, %cst_249 {dimension_numbers = #tpu.dot_dimension_numbers<[1], [0], [0], [1], [0, 0, 1, 1], [], []>} : vector<8x32xf32>, vector<32x32xf32>, vector<8x32xf32> -> vector<8x32xf32>
    %c1_250 = arith.constant 1 : index
    %c0_251 = arith.constant 0 : index
    %c0_252 = arith.constant 0 : index
    %417 = vector.load %arg9[%c1_250, %c0_251, %c0_252] : memref<2x1x32xf32, #tpu.memory_space<vmem>>, vector<1x1x32xf32>
    %418 = vector.shape_cast %417 : vector<1x1x32xf32> to vector<1x32xf32>
    %419 = vector.broadcast %418 : vector<1x32xf32> to vector<8x32xf32>
    %420 = arith.addf %416, %419 : vector<8x32xf32>
    %c1_253 = arith.constant 1 : index
    %c0_254 = arith.constant 0 : index
    %c0_255 = arith.constant 0 : index
    %421 = vector.load %arg3[%c1_253, %c0_254, %c0_255] : memref<2x32x64xf32, #tpu.memory_space<vmem>>, vector<1x32x64xf32>
    %422 = vector.shape_cast %421 : vector<1x32x64xf32> to vector<32x64xf32>
    %c1_256 = arith.constant 1 : index
    %c0_257 = arith.constant 0 : index
    %c0_258 = arith.constant 0 : index
    %423 = vector.load %arg4[%c1_256, %c0_257, %c0_258] : memref<2x32x32xf32, #tpu.memory_space<vmem>>, vector<1x32x32xf32>
    %424 = vector.shape_cast %423 : vector<1x32x32xf32> to vector<32x32xf32>
    %c1_259 = arith.constant 1 : index
    %c0_260 = arith.constant 0 : index
    %c0_261 = arith.constant 0 : index
    %425 = vector.load %arg8[%c1_259, %c0_260, %c0_261] : memref<2x1x32xf32, #tpu.memory_space<vmem>>, vector<1x1x32xf32>
    %426 = vector.shape_cast %425 : vector<1x1x32xf32> to vector<1x32xf32>
    %cst_262 = arith.constant dense<0.000000e+00> : vector<8x64xf32>
    %427 = tpu.matmul %406, %422, %cst_262 {dimension_numbers = #tpu.dot_dimension_numbers<[1], [0], [0], [1], [0, 0, 1, 1], [], []>} : vector<8x32xf32>, vector<32x64xf32>, vector<8x64xf32> -> vector<8x64xf32>
    %cst_263 = arith.constant dense<0.000000e+00> : vector<8x32xf32>
    %428 = tpu.matmul %406, %424, %cst_263 {dimension_numbers = #tpu.dot_dimension_numbers<[1], [0], [0], [1], [0, 0, 1, 1], [], []>} : vector<8x32xf32>, vector<32x32xf32>, vector<8x32xf32> -> vector<8x32xf32>
    %429 = vector.broadcast %426 : vector<1x32xf32> to vector<8x32xf32>
    %430 = arith.addf %428, %429 : vector<8x32xf32>
    %431 = arith.addf %427, %413 : vector<8x64xf32>
    %432 = arith.negf %431 : vector<8x64xf32>
    %433 = math.exp %432 : vector<8x64xf32>
    %cst_264 = arith.constant 1.000000e+00 : f32
    %434 = vector.broadcast %cst_264 : f32 to vector<8x64xf32>
    %435 = arith.addf %434, %433 : vector<8x64xf32>
    %436 = arith.divf %434, %435 : vector<8x64xf32>
    %437 = vector.extract_strided_slice %436 {offsets = [0, 0], sizes = [8, 32], strides = [1, 1]} : vector<8x64xf32> to vector<8x32xf32>
    %438 = vector.extract_strided_slice %436 {offsets = [0, 32], sizes = [8, 32], strides = [1, 1]} : vector<8x64xf32> to vector<8x32xf32>
    %439 = arith.mulf %437, %420 : vector<8x32xf32>
    %440 = arith.addf %430, %439 : vector<8x32xf32>
    %441 = math.tanh %440 : vector<8x32xf32>
    %442 = arith.subf %376, %441 : vector<8x32xf32>
    %443 = arith.mulf %438, %442 : vector<8x32xf32>
    %444 = arith.addf %441, %443 : vector<8x32xf32>
    %c0_265 = arith.constant 0 : index
    %c0_266 = arith.constant 0 : index
    %c0_267 = arith.constant 0 : index
    %445 = vector.load %arg5[%c0_265, %c0_266, %c0_267] : memref<2x32x64xf32, #tpu.memory_space<vmem>>, vector<1x32x64xf32>
    %446 = vector.shape_cast %445 : vector<1x32x64xf32> to vector<32x64xf32>
    %cst_268 = arith.constant dense<0.000000e+00> : vector<8x64xf32>
    %447 = tpu.matmul %406, %446, %cst_268 {dimension_numbers = #tpu.dot_dimension_numbers<[1], [0], [0], [1], [0, 0, 1, 1], [], []>} : vector<8x32xf32>, vector<32x64xf32>, vector<8x64xf32> -> vector<8x64xf32>
    %c0_269 = arith.constant 0 : index
    %c0_270 = arith.constant 0 : index
    %c0_271 = arith.constant 0 : index
    %448 = vector.load %arg7[%c0_269, %c0_270, %c0_271] : memref<2x1x64xf32, #tpu.memory_space<vmem>>, vector<1x1x64xf32>
    %449 = vector.shape_cast %448 : vector<1x1x64xf32> to vector<1x64xf32>
    %450 = vector.broadcast %449 : vector<1x64xf32> to vector<8x64xf32>
    %451 = arith.addf %447, %450 : vector<8x64xf32>
    %c0_272 = arith.constant 0 : index
    %c0_273 = arith.constant 0 : index
    %c0_274 = arith.constant 0 : index
    %452 = vector.load %arg6[%c0_272, %c0_273, %c0_274] : memref<2x32x32xf32, #tpu.memory_space<vmem>>, vector<1x32x32xf32>
    %453 = vector.shape_cast %452 : vector<1x32x32xf32> to vector<32x32xf32>
    %cst_275 = arith.constant dense<0.000000e+00> : vector<8x32xf32>
    %454 = tpu.matmul %406, %453, %cst_275 {dimension_numbers = #tpu.dot_dimension_numbers<[1], [0], [0], [1], [0, 0, 1, 1], [], []>} : vector<8x32xf32>, vector<32x32xf32>, vector<8x32xf32> -> vector<8x32xf32>
    %c0_276 = arith.constant 0 : index
    %c0_277 = arith.constant 0 : index
    %c0_278 = arith.constant 0 : index
    %455 = vector.load %arg9[%c0_276, %c0_277, %c0_278] : memref<2x1x32xf32, #tpu.memory_space<vmem>>, vector<1x1x32xf32>
    %456 = vector.shape_cast %455 : vector<1x1x32xf32> to vector<1x32xf32>
    %457 = vector.broadcast %456 : vector<1x32xf32> to vector<8x32xf32>
    %458 = arith.addf %454, %457 : vector<8x32xf32>
    %459 = vector.extract_strided_slice %27 {offsets = [48, 0], sizes = [8, 64], strides = [1, 1]} : vector<64x64xf32> to vector<8x64xf32>
    %460 = vector.extract_strided_slice %34 {offsets = [48, 0], sizes = [8, 32], strides = [1, 1]} : vector<64x32xf32> to vector<8x32xf32>
    %461 = arith.addf %459, %451 : vector<8x64xf32>
    %462 = arith.negf %461 : vector<8x64xf32>
    %463 = math.exp %462 : vector<8x64xf32>
    %cst_279 = arith.constant 1.000000e+00 : f32
    %464 = vector.broadcast %cst_279 : f32 to vector<8x64xf32>
    %465 = arith.addf %464, %463 : vector<8x64xf32>
    %466 = arith.divf %464, %465 : vector<8x64xf32>
    %467 = vector.extract_strided_slice %466 {offsets = [0, 0], sizes = [8, 32], strides = [1, 1]} : vector<8x64xf32> to vector<8x32xf32>
    %468 = vector.extract_strided_slice %466 {offsets = [0, 32], sizes = [8, 32], strides = [1, 1]} : vector<8x64xf32> to vector<8x32xf32>
    %469 = arith.mulf %467, %458 : vector<8x32xf32>
    %470 = arith.addf %460, %469 : vector<8x32xf32>
    %471 = math.tanh %470 : vector<8x32xf32>
    %472 = arith.subf %406, %471 : vector<8x32xf32>
    %473 = arith.mulf %468, %472 : vector<8x32xf32>
    %474 = arith.addf %471, %473 : vector<8x32xf32>
    %c1_280 = arith.constant 1 : index
    %c0_281 = arith.constant 0 : index
    %c0_282 = arith.constant 0 : index
    %475 = vector.load %arg5[%c1_280, %c0_281, %c0_282] : memref<2x32x64xf32, #tpu.memory_space<vmem>>, vector<1x32x64xf32>
    %476 = vector.shape_cast %475 : vector<1x32x64xf32> to vector<32x64xf32>
    %cst_283 = arith.constant dense<0.000000e+00> : vector<8x64xf32>
    %477 = tpu.matmul %444, %476, %cst_283 {dimension_numbers = #tpu.dot_dimension_numbers<[1], [0], [0], [1], [0, 0, 1, 1], [], []>} : vector<8x32xf32>, vector<32x64xf32>, vector<8x64xf32> -> vector<8x64xf32>
    %c1_284 = arith.constant 1 : index
    %c0_285 = arith.constant 0 : index
    %c0_286 = arith.constant 0 : index
    %478 = vector.load %arg7[%c1_284, %c0_285, %c0_286] : memref<2x1x64xf32, #tpu.memory_space<vmem>>, vector<1x1x64xf32>
    %479 = vector.shape_cast %478 : vector<1x1x64xf32> to vector<1x64xf32>
    %480 = vector.broadcast %479 : vector<1x64xf32> to vector<8x64xf32>
    %481 = arith.addf %477, %480 : vector<8x64xf32>
    %c1_287 = arith.constant 1 : index
    %c0_288 = arith.constant 0 : index
    %c0_289 = arith.constant 0 : index
    %482 = vector.load %arg6[%c1_287, %c0_288, %c0_289] : memref<2x32x32xf32, #tpu.memory_space<vmem>>, vector<1x32x32xf32>
    %483 = vector.shape_cast %482 : vector<1x32x32xf32> to vector<32x32xf32>
    %cst_290 = arith.constant dense<0.000000e+00> : vector<8x32xf32>
    %484 = tpu.matmul %444, %483, %cst_290 {dimension_numbers = #tpu.dot_dimension_numbers<[1], [0], [0], [1], [0, 0, 1, 1], [], []>} : vector<8x32xf32>, vector<32x32xf32>, vector<8x32xf32> -> vector<8x32xf32>
    %c1_291 = arith.constant 1 : index
    %c0_292 = arith.constant 0 : index
    %c0_293 = arith.constant 0 : index
    %485 = vector.load %arg9[%c1_291, %c0_292, %c0_293] : memref<2x1x32xf32, #tpu.memory_space<vmem>>, vector<1x1x32xf32>
    %486 = vector.shape_cast %485 : vector<1x1x32xf32> to vector<1x32xf32>
    %487 = vector.broadcast %486 : vector<1x32xf32> to vector<8x32xf32>
    %488 = arith.addf %484, %487 : vector<8x32xf32>
    %c1_294 = arith.constant 1 : index
    %c0_295 = arith.constant 0 : index
    %c0_296 = arith.constant 0 : index
    %489 = vector.load %arg3[%c1_294, %c0_295, %c0_296] : memref<2x32x64xf32, #tpu.memory_space<vmem>>, vector<1x32x64xf32>
    %490 = vector.shape_cast %489 : vector<1x32x64xf32> to vector<32x64xf32>
    %c1_297 = arith.constant 1 : index
    %c0_298 = arith.constant 0 : index
    %c0_299 = arith.constant 0 : index
    %491 = vector.load %arg4[%c1_297, %c0_298, %c0_299] : memref<2x32x32xf32, #tpu.memory_space<vmem>>, vector<1x32x32xf32>
    %492 = vector.shape_cast %491 : vector<1x32x32xf32> to vector<32x32xf32>
    %c1_300 = arith.constant 1 : index
    %c0_301 = arith.constant 0 : index
    %c0_302 = arith.constant 0 : index
    %493 = vector.load %arg8[%c1_300, %c0_301, %c0_302] : memref<2x1x32xf32, #tpu.memory_space<vmem>>, vector<1x1x32xf32>
    %494 = vector.shape_cast %493 : vector<1x1x32xf32> to vector<1x32xf32>
    %cst_303 = arith.constant dense<0.000000e+00> : vector<8x64xf32>
    %495 = tpu.matmul %474, %490, %cst_303 {dimension_numbers = #tpu.dot_dimension_numbers<[1], [0], [0], [1], [0, 0, 1, 1], [], []>} : vector<8x32xf32>, vector<32x64xf32>, vector<8x64xf32> -> vector<8x64xf32>
    %cst_304 = arith.constant dense<0.000000e+00> : vector<8x32xf32>
    %496 = tpu.matmul %474, %492, %cst_304 {dimension_numbers = #tpu.dot_dimension_numbers<[1], [0], [0], [1], [0, 0, 1, 1], [], []>} : vector<8x32xf32>, vector<32x32xf32>, vector<8x32xf32> -> vector<8x32xf32>
    %497 = vector.broadcast %494 : vector<1x32xf32> to vector<8x32xf32>
    %498 = arith.addf %496, %497 : vector<8x32xf32>
    %499 = arith.addf %495, %481 : vector<8x64xf32>
    %500 = arith.negf %499 : vector<8x64xf32>
    %501 = math.exp %500 : vector<8x64xf32>
    %cst_305 = arith.constant 1.000000e+00 : f32
    %502 = vector.broadcast %cst_305 : f32 to vector<8x64xf32>
    %503 = arith.addf %502, %501 : vector<8x64xf32>
    %504 = arith.divf %502, %503 : vector<8x64xf32>
    %505 = vector.extract_strided_slice %504 {offsets = [0, 0], sizes = [8, 32], strides = [1, 1]} : vector<8x64xf32> to vector<8x32xf32>
    %506 = vector.extract_strided_slice %504 {offsets = [0, 32], sizes = [8, 32], strides = [1, 1]} : vector<8x64xf32> to vector<8x32xf32>
    %507 = arith.mulf %505, %488 : vector<8x32xf32>
    %508 = arith.addf %498, %507 : vector<8x32xf32>
    %509 = math.tanh %508 : vector<8x32xf32>
    %510 = arith.subf %444, %509 : vector<8x32xf32>
    %511 = arith.mulf %506, %510 : vector<8x32xf32>
    %512 = arith.addf %509, %511 : vector<8x32xf32>
    %c0_306 = arith.constant 0 : index
    %c0_307 = arith.constant 0 : index
    %c0_308 = arith.constant 0 : index
    %513 = vector.load %arg5[%c0_306, %c0_307, %c0_308] : memref<2x32x64xf32, #tpu.memory_space<vmem>>, vector<1x32x64xf32>
    %514 = vector.shape_cast %513 : vector<1x32x64xf32> to vector<32x64xf32>
    %cst_309 = arith.constant dense<0.000000e+00> : vector<8x64xf32>
    %515 = tpu.matmul %474, %514, %cst_309 {dimension_numbers = #tpu.dot_dimension_numbers<[1], [0], [0], [1], [0, 0, 1, 1], [], []>} : vector<8x32xf32>, vector<32x64xf32>, vector<8x64xf32> -> vector<8x64xf32>
    %c0_310 = arith.constant 0 : index
    %c0_311 = arith.constant 0 : index
    %c0_312 = arith.constant 0 : index
    %516 = vector.load %arg7[%c0_310, %c0_311, %c0_312] : memref<2x1x64xf32, #tpu.memory_space<vmem>>, vector<1x1x64xf32>
    %517 = vector.shape_cast %516 : vector<1x1x64xf32> to vector<1x64xf32>
    %518 = vector.broadcast %517 : vector<1x64xf32> to vector<8x64xf32>
    %519 = arith.addf %515, %518 : vector<8x64xf32>
    %c0_313 = arith.constant 0 : index
    %c0_314 = arith.constant 0 : index
    %c0_315 = arith.constant 0 : index
    %520 = vector.load %arg6[%c0_313, %c0_314, %c0_315] : memref<2x32x32xf32, #tpu.memory_space<vmem>>, vector<1x32x32xf32>
    %521 = vector.shape_cast %520 : vector<1x32x32xf32> to vector<32x32xf32>
    %cst_316 = arith.constant dense<0.000000e+00> : vector<8x32xf32>
    %522 = tpu.matmul %474, %521, %cst_316 {dimension_numbers = #tpu.dot_dimension_numbers<[1], [0], [0], [1], [0, 0, 1, 1], [], []>} : vector<8x32xf32>, vector<32x32xf32>, vector<8x32xf32> -> vector<8x32xf32>
    %c0_317 = arith.constant 0 : index
    %c0_318 = arith.constant 0 : index
    %c0_319 = arith.constant 0 : index
    %523 = vector.load %arg9[%c0_317, %c0_318, %c0_319] : memref<2x1x32xf32, #tpu.memory_space<vmem>>, vector<1x1x32xf32>
    %524 = vector.shape_cast %523 : vector<1x1x32xf32> to vector<1x32xf32>
    %525 = vector.broadcast %524 : vector<1x32xf32> to vector<8x32xf32>
    %526 = arith.addf %522, %525 : vector<8x32xf32>
    %527 = vector.extract_strided_slice %27 {offsets = [56, 0], sizes = [8, 64], strides = [1, 1]} : vector<64x64xf32> to vector<8x64xf32>
    %528 = vector.extract_strided_slice %34 {offsets = [56, 0], sizes = [8, 32], strides = [1, 1]} : vector<64x32xf32> to vector<8x32xf32>
    %529 = arith.addf %527, %519 : vector<8x64xf32>
    %530 = arith.negf %529 : vector<8x64xf32>
    %531 = math.exp %530 : vector<8x64xf32>
    %cst_320 = arith.constant 1.000000e+00 : f32
    %532 = vector.broadcast %cst_320 : f32 to vector<8x64xf32>
    %533 = arith.addf %532, %531 : vector<8x64xf32>
    %534 = arith.divf %532, %533 : vector<8x64xf32>
    %535 = vector.extract_strided_slice %534 {offsets = [0, 0], sizes = [8, 32], strides = [1, 1]} : vector<8x64xf32> to vector<8x32xf32>
    %536 = vector.extract_strided_slice %534 {offsets = [0, 32], sizes = [8, 32], strides = [1, 1]} : vector<8x64xf32> to vector<8x32xf32>
    %537 = arith.mulf %535, %526 : vector<8x32xf32>
    %538 = arith.addf %528, %537 : vector<8x32xf32>
    %539 = math.tanh %538 : vector<8x32xf32>
    %540 = arith.subf %474, %539 : vector<8x32xf32>
    %541 = arith.mulf %536, %540 : vector<8x32xf32>
    %542 = arith.addf %539, %541 : vector<8x32xf32>
    %c1_321 = arith.constant 1 : index
    %c0_322 = arith.constant 0 : index
    %c0_323 = arith.constant 0 : index
    %543 = vector.load %arg5[%c1_321, %c0_322, %c0_323] : memref<2x32x64xf32, #tpu.memory_space<vmem>>, vector<1x32x64xf32>
    %544 = vector.shape_cast %543 : vector<1x32x64xf32> to vector<32x64xf32>
    %cst_324 = arith.constant dense<0.000000e+00> : vector<8x64xf32>
    %545 = tpu.matmul %512, %544, %cst_324 {dimension_numbers = #tpu.dot_dimension_numbers<[1], [0], [0], [1], [0, 0, 1, 1], [], []>} : vector<8x32xf32>, vector<32x64xf32>, vector<8x64xf32> -> vector<8x64xf32>
    %c1_325 = arith.constant 1 : index
    %c0_326 = arith.constant 0 : index
    %c0_327 = arith.constant 0 : index
    %546 = vector.load %arg7[%c1_325, %c0_326, %c0_327] : memref<2x1x64xf32, #tpu.memory_space<vmem>>, vector<1x1x64xf32>
    %547 = vector.shape_cast %546 : vector<1x1x64xf32> to vector<1x64xf32>
    %548 = vector.broadcast %547 : vector<1x64xf32> to vector<8x64xf32>
    %549 = arith.addf %545, %548 : vector<8x64xf32>
    %c1_328 = arith.constant 1 : index
    %c0_329 = arith.constant 0 : index
    %c0_330 = arith.constant 0 : index
    %550 = vector.load %arg6[%c1_328, %c0_329, %c0_330] : memref<2x32x32xf32, #tpu.memory_space<vmem>>, vector<1x32x32xf32>
    %551 = vector.shape_cast %550 : vector<1x32x32xf32> to vector<32x32xf32>
    %cst_331 = arith.constant dense<0.000000e+00> : vector<8x32xf32>
    %552 = tpu.matmul %512, %551, %cst_331 {dimension_numbers = #tpu.dot_dimension_numbers<[1], [0], [0], [1], [0, 0, 1, 1], [], []>} : vector<8x32xf32>, vector<32x32xf32>, vector<8x32xf32> -> vector<8x32xf32>
    %c1_332 = arith.constant 1 : index
    %c0_333 = arith.constant 0 : index
    %c0_334 = arith.constant 0 : index
    %553 = vector.load %arg9[%c1_332, %c0_333, %c0_334] : memref<2x1x32xf32, #tpu.memory_space<vmem>>, vector<1x1x32xf32>
    %554 = vector.shape_cast %553 : vector<1x1x32xf32> to vector<1x32xf32>
    %555 = vector.broadcast %554 : vector<1x32xf32> to vector<8x32xf32>
    %556 = arith.addf %552, %555 : vector<8x32xf32>
    %c1_335 = arith.constant 1 : index
    %c0_336 = arith.constant 0 : index
    %c0_337 = arith.constant 0 : index
    %557 = vector.load %arg3[%c1_335, %c0_336, %c0_337] : memref<2x32x64xf32, #tpu.memory_space<vmem>>, vector<1x32x64xf32>
    %558 = vector.shape_cast %557 : vector<1x32x64xf32> to vector<32x64xf32>
    %c1_338 = arith.constant 1 : index
    %c0_339 = arith.constant 0 : index
    %c0_340 = arith.constant 0 : index
    %559 = vector.load %arg4[%c1_338, %c0_339, %c0_340] : memref<2x32x32xf32, #tpu.memory_space<vmem>>, vector<1x32x32xf32>
    %560 = vector.shape_cast %559 : vector<1x32x32xf32> to vector<32x32xf32>
    %c1_341 = arith.constant 1 : index
    %c0_342 = arith.constant 0 : index
    %c0_343 = arith.constant 0 : index
    %561 = vector.load %arg8[%c1_341, %c0_342, %c0_343] : memref<2x1x32xf32, #tpu.memory_space<vmem>>, vector<1x1x32xf32>
    %562 = vector.shape_cast %561 : vector<1x1x32xf32> to vector<1x32xf32>
    %cst_344 = arith.constant dense<0.000000e+00> : vector<8x64xf32>
    %563 = tpu.matmul %542, %558, %cst_344 {dimension_numbers = #tpu.dot_dimension_numbers<[1], [0], [0], [1], [0, 0, 1, 1], [], []>} : vector<8x32xf32>, vector<32x64xf32>, vector<8x64xf32> -> vector<8x64xf32>
    %cst_345 = arith.constant dense<0.000000e+00> : vector<8x32xf32>
    %564 = tpu.matmul %542, %560, %cst_345 {dimension_numbers = #tpu.dot_dimension_numbers<[1], [0], [0], [1], [0, 0, 1, 1], [], []>} : vector<8x32xf32>, vector<32x32xf32>, vector<8x32xf32> -> vector<8x32xf32>
    %565 = vector.broadcast %562 : vector<1x32xf32> to vector<8x32xf32>
    %566 = arith.addf %564, %565 : vector<8x32xf32>
    %567 = arith.addf %563, %549 : vector<8x64xf32>
    %568 = arith.negf %567 : vector<8x64xf32>
    %569 = math.exp %568 : vector<8x64xf32>
    %cst_346 = arith.constant 1.000000e+00 : f32
    %570 = vector.broadcast %cst_346 : f32 to vector<8x64xf32>
    %571 = arith.addf %570, %569 : vector<8x64xf32>
    %572 = arith.divf %570, %571 : vector<8x64xf32>
    %573 = vector.extract_strided_slice %572 {offsets = [0, 0], sizes = [8, 32], strides = [1, 1]} : vector<8x64xf32> to vector<8x32xf32>
    %574 = vector.extract_strided_slice %572 {offsets = [0, 32], sizes = [8, 32], strides = [1, 1]} : vector<8x64xf32> to vector<8x32xf32>
    %575 = arith.mulf %573, %556 : vector<8x32xf32>
    %576 = arith.addf %566, %575 : vector<8x32xf32>
    %577 = math.tanh %576 : vector<8x32xf32>
    %578 = arith.subf %512, %577 : vector<8x32xf32>
    %579 = arith.mulf %574, %578 : vector<8x32xf32>
    %580 = arith.addf %577, %579 : vector<8x32xf32>
    %c0_347 = arith.constant 0 : index
    %c0_348 = arith.constant 0 : index
    %581 = vector.load %arg10[%c0_347, %c0_348] : memref<32x32xf32, #tpu.memory_space<vmem>>, vector<32x32xf32>
    %cst_349 = arith.constant dense<0.000000e+00> : vector<8x32xf32>
    %582 = tpu.matmul %580, %581, %cst_349 {dimension_numbers = #tpu.dot_dimension_numbers<[1], [0], [0], [1], [0, 0, 1, 1], [], []>} : vector<8x32xf32>, vector<32x32xf32>, vector<8x32xf32> -> vector<8x32xf32>
    %c0_350 = arith.constant 0 : index
    %c0_351 = arith.constant 0 : index
    %583 = vector.load %arg11[%c0_350, %c0_351] : memref<1x32xf32, #tpu.memory_space<vmem>>, vector<1x32xf32>
    %584 = vector.broadcast %583 : vector<1x32xf32> to vector<8x32xf32>
    %585 = arith.addf %582, %584 : vector<8x32xf32>
    %cst_352 = arith.constant 0.000000e+00 : f32
    %586 = vector.broadcast %cst_352 : f32 to vector<8x32xf32>
    %587 = arith.maximumf %585, %586 : vector<8x32xf32>
    %c0_353 = arith.constant 0 : index
    %c0_354 = arith.constant 0 : index
    %c0_355 = arith.constant 0 : index
    %588 = vector.load %arg14[%c0_353, %c0_354, %c0_355] : memref<2x32x64xf32, #tpu.memory_space<vmem>>, vector<1x32x64xf32>
    %589 = vector.shape_cast %588 : vector<1x32x64xf32> to vector<32x64xf32>
    %cst_356 = arith.constant dense<0.000000e+00> : vector<8x64xf32>
    %590 = tpu.matmul %580, %589, %cst_356 {dimension_numbers = #tpu.dot_dimension_numbers<[1], [0], [0], [1], [0, 0, 1, 1], [], []>} : vector<8x32xf32>, vector<32x64xf32>, vector<8x64xf32> -> vector<8x64xf32>
    %c0_357 = arith.constant 0 : index
    %c0_358 = arith.constant 0 : index
    %c0_359 = arith.constant 0 : index
    %591 = vector.load %arg16[%c0_357, %c0_358, %c0_359] : memref<2x1x64xf32, #tpu.memory_space<vmem>>, vector<1x1x64xf32>
    %592 = vector.shape_cast %591 : vector<1x1x64xf32> to vector<1x64xf32>
    %593 = vector.broadcast %592 : vector<1x64xf32> to vector<8x64xf32>
    %594 = arith.addf %590, %593 : vector<8x64xf32>
    %c0_360 = arith.constant 0 : index
    %c0_361 = arith.constant 0 : index
    %c0_362 = arith.constant 0 : index
    %595 = vector.load %arg15[%c0_360, %c0_361, %c0_362] : memref<2x32x32xf32, #tpu.memory_space<vmem>>, vector<1x32x32xf32>
    %596 = vector.shape_cast %595 : vector<1x32x32xf32> to vector<32x32xf32>
    %cst_363 = arith.constant dense<0.000000e+00> : vector<8x32xf32>
    %597 = tpu.matmul %580, %596, %cst_363 {dimension_numbers = #tpu.dot_dimension_numbers<[1], [0], [0], [1], [0, 0, 1, 1], [], []>} : vector<8x32xf32>, vector<32x32xf32>, vector<8x32xf32> -> vector<8x32xf32>
    %c0_364 = arith.constant 0 : index
    %c0_365 = arith.constant 0 : index
    %c0_366 = arith.constant 0 : index
    %598 = vector.load %arg18[%c0_364, %c0_365, %c0_366] : memref<2x1x32xf32, #tpu.memory_space<vmem>>, vector<1x1x32xf32>
    %599 = vector.shape_cast %598 : vector<1x1x32xf32> to vector<1x32xf32>
    %600 = vector.broadcast %599 : vector<1x32xf32> to vector<8x32xf32>
    %601 = arith.addf %597, %600 : vector<8x32xf32>
    %c0_367 = arith.constant 0 : index
    %c0_368 = arith.constant 0 : index
    %c0_369 = arith.constant 0 : index
    %602 = vector.load %arg12[%c0_367, %c0_368, %c0_369] : memref<2x32x64xf32, #tpu.memory_space<vmem>>, vector<1x32x64xf32>
    %603 = vector.shape_cast %602 : vector<1x32x64xf32> to vector<32x64xf32>
    %c0_370 = arith.constant 0 : index
    %c0_371 = arith.constant 0 : index
    %c0_372 = arith.constant 0 : index
    %604 = vector.load %arg13[%c0_370, %c0_371, %c0_372] : memref<2x32x32xf32, #tpu.memory_space<vmem>>, vector<1x32x32xf32>
    %605 = vector.shape_cast %604 : vector<1x32x32xf32> to vector<32x32xf32>
    %c0_373 = arith.constant 0 : index
    %c0_374 = arith.constant 0 : index
    %c0_375 = arith.constant 0 : index
    %606 = vector.load %arg17[%c0_373, %c0_374, %c0_375] : memref<2x1x32xf32, #tpu.memory_space<vmem>>, vector<1x1x32xf32>
    %607 = vector.shape_cast %606 : vector<1x1x32xf32> to vector<1x32xf32>
    %cst_376 = arith.constant dense<0.000000e+00> : vector<8x64xf32>
    %608 = tpu.matmul %587, %603, %cst_376 {dimension_numbers = #tpu.dot_dimension_numbers<[1], [0], [0], [1], [0, 0, 1, 1], [], []>} : vector<8x32xf32>, vector<32x64xf32>, vector<8x64xf32> -> vector<8x64xf32>
    %cst_377 = arith.constant dense<0.000000e+00> : vector<8x32xf32>
    %609 = tpu.matmul %587, %605, %cst_377 {dimension_numbers = #tpu.dot_dimension_numbers<[1], [0], [0], [1], [0, 0, 1, 1], [], []>} : vector<8x32xf32>, vector<32x32xf32>, vector<8x32xf32> -> vector<8x32xf32>
    %610 = vector.broadcast %607 : vector<1x32xf32> to vector<8x32xf32>
    %611 = arith.addf %609, %610 : vector<8x32xf32>
    %612 = arith.addf %608, %594 : vector<8x64xf32>
    %613 = arith.negf %612 : vector<8x64xf32>
    %614 = math.exp %613 : vector<8x64xf32>
    %cst_378 = arith.constant 1.000000e+00 : f32
    %615 = vector.broadcast %cst_378 : f32 to vector<8x64xf32>
    %616 = arith.addf %615, %614 : vector<8x64xf32>
    %617 = arith.divf %615, %616 : vector<8x64xf32>
    %618 = vector.extract_strided_slice %617 {offsets = [0, 0], sizes = [8, 32], strides = [1, 1]} : vector<8x64xf32> to vector<8x32xf32>
    %619 = vector.extract_strided_slice %617 {offsets = [0, 32], sizes = [8, 32], strides = [1, 1]} : vector<8x64xf32> to vector<8x32xf32>
    %620 = arith.mulf %618, %601 : vector<8x32xf32>
    %621 = arith.addf %611, %620 : vector<8x32xf32>
    %622 = math.tanh %621 : vector<8x32xf32>
    %623 = arith.subf %580, %622 : vector<8x32xf32>
    %624 = arith.mulf %619, %623 : vector<8x32xf32>
    %625 = arith.addf %622, %624 : vector<8x32xf32>
    %c1_379 = arith.constant 1 : index
    %c0_380 = arith.constant 0 : index
    %c0_381 = arith.constant 0 : index
    %626 = vector.load %arg14[%c1_379, %c0_380, %c0_381] : memref<2x32x64xf32, #tpu.memory_space<vmem>>, vector<1x32x64xf32>
    %627 = vector.shape_cast %626 : vector<1x32x64xf32> to vector<32x64xf32>
    %cst_382 = arith.constant dense<0.000000e+00> : vector<8x64xf32>
    %628 = tpu.matmul %580, %627, %cst_382 {dimension_numbers = #tpu.dot_dimension_numbers<[1], [0], [0], [1], [0, 0, 1, 1], [], []>} : vector<8x32xf32>, vector<32x64xf32>, vector<8x64xf32> -> vector<8x64xf32>
    %c1_383 = arith.constant 1 : index
    %c0_384 = arith.constant 0 : index
    %c0_385 = arith.constant 0 : index
    %629 = vector.load %arg16[%c1_383, %c0_384, %c0_385] : memref<2x1x64xf32, #tpu.memory_space<vmem>>, vector<1x1x64xf32>
    %630 = vector.shape_cast %629 : vector<1x1x64xf32> to vector<1x64xf32>
    %631 = vector.broadcast %630 : vector<1x64xf32> to vector<8x64xf32>
    %632 = arith.addf %628, %631 : vector<8x64xf32>
    %c1_386 = arith.constant 1 : index
    %c0_387 = arith.constant 0 : index
    %c0_388 = arith.constant 0 : index
    %633 = vector.load %arg15[%c1_386, %c0_387, %c0_388] : memref<2x32x32xf32, #tpu.memory_space<vmem>>, vector<1x32x32xf32>
    %634 = vector.shape_cast %633 : vector<1x32x32xf32> to vector<32x32xf32>
    %cst_389 = arith.constant dense<0.000000e+00> : vector<8x32xf32>
    %635 = tpu.matmul %580, %634, %cst_389 {dimension_numbers = #tpu.dot_dimension_numbers<[1], [0], [0], [1], [0, 0, 1, 1], [], []>} : vector<8x32xf32>, vector<32x32xf32>, vector<8x32xf32> -> vector<8x32xf32>
    %c1_390 = arith.constant 1 : index
    %c0_391 = arith.constant 0 : index
    %c0_392 = arith.constant 0 : index
    %636 = vector.load %arg18[%c1_390, %c0_391, %c0_392] : memref<2x1x32xf32, #tpu.memory_space<vmem>>, vector<1x1x32xf32>
    %637 = vector.shape_cast %636 : vector<1x1x32xf32> to vector<1x32xf32>
    %638 = vector.broadcast %637 : vector<1x32xf32> to vector<8x32xf32>
    %639 = arith.addf %635, %638 : vector<8x32xf32>
    %c1_393 = arith.constant 1 : index
    %c0_394 = arith.constant 0 : index
    %c0_395 = arith.constant 0 : index
    %640 = vector.load %arg12[%c1_393, %c0_394, %c0_395] : memref<2x32x64xf32, #tpu.memory_space<vmem>>, vector<1x32x64xf32>
    %641 = vector.shape_cast %640 : vector<1x32x64xf32> to vector<32x64xf32>
    %c1_396 = arith.constant 1 : index
    %c0_397 = arith.constant 0 : index
    %c0_398 = arith.constant 0 : index
    %642 = vector.load %arg13[%c1_396, %c0_397, %c0_398] : memref<2x32x32xf32, #tpu.memory_space<vmem>>, vector<1x32x32xf32>
    %643 = vector.shape_cast %642 : vector<1x32x32xf32> to vector<32x32xf32>
    %c1_399 = arith.constant 1 : index
    %c0_400 = arith.constant 0 : index
    %c0_401 = arith.constant 0 : index
    %644 = vector.load %arg17[%c1_399, %c0_400, %c0_401] : memref<2x1x32xf32, #tpu.memory_space<vmem>>, vector<1x1x32xf32>
    %645 = vector.shape_cast %644 : vector<1x1x32xf32> to vector<1x32xf32>
    %cst_402 = arith.constant dense<0.000000e+00> : vector<8x64xf32>
    %646 = tpu.matmul %625, %641, %cst_402 {dimension_numbers = #tpu.dot_dimension_numbers<[1], [0], [0], [1], [0, 0, 1, 1], [], []>} : vector<8x32xf32>, vector<32x64xf32>, vector<8x64xf32> -> vector<8x64xf32>
    %cst_403 = arith.constant dense<0.000000e+00> : vector<8x32xf32>
    %647 = tpu.matmul %625, %643, %cst_403 {dimension_numbers = #tpu.dot_dimension_numbers<[1], [0], [0], [1], [0, 0, 1, 1], [], []>} : vector<8x32xf32>, vector<32x32xf32>, vector<8x32xf32> -> vector<8x32xf32>
    %648 = vector.broadcast %645 : vector<1x32xf32> to vector<8x32xf32>
    %649 = arith.addf %647, %648 : vector<8x32xf32>
    %650 = arith.addf %646, %632 : vector<8x64xf32>
    %651 = arith.negf %650 : vector<8x64xf32>
    %652 = math.exp %651 : vector<8x64xf32>
    %cst_404 = arith.constant 1.000000e+00 : f32
    %653 = vector.broadcast %cst_404 : f32 to vector<8x64xf32>
    %654 = arith.addf %653, %652 : vector<8x64xf32>
    %655 = arith.divf %653, %654 : vector<8x64xf32>
    %656 = vector.extract_strided_slice %655 {offsets = [0, 0], sizes = [8, 32], strides = [1, 1]} : vector<8x64xf32> to vector<8x32xf32>
    %657 = vector.extract_strided_slice %655 {offsets = [0, 32], sizes = [8, 32], strides = [1, 1]} : vector<8x64xf32> to vector<8x32xf32>
    %658 = arith.mulf %656, %639 : vector<8x32xf32>
    %659 = arith.addf %649, %658 : vector<8x32xf32>
    %660 = math.tanh %659 : vector<8x32xf32>
    %661 = arith.subf %580, %660 : vector<8x32xf32>
    %662 = arith.mulf %657, %661 : vector<8x32xf32>
    %663 = arith.addf %660, %662 : vector<8x32xf32>
    %c0_405 = arith.constant 0 : index
    %c0_406 = arith.constant 0 : index
    %664 = vector.load %arg10[%c0_405, %c0_406] : memref<32x32xf32, #tpu.memory_space<vmem>>, vector<32x32xf32>
    %cst_407 = arith.constant dense<0.000000e+00> : vector<8x32xf32>
    %665 = tpu.matmul %663, %664, %cst_407 {dimension_numbers = #tpu.dot_dimension_numbers<[1], [0], [0], [1], [0, 0, 1, 1], [], []>} : vector<8x32xf32>, vector<32x32xf32>, vector<8x32xf32> -> vector<8x32xf32>
    %c0_408 = arith.constant 0 : index
    %c0_409 = arith.constant 0 : index
    %666 = vector.load %arg11[%c0_408, %c0_409] : memref<1x32xf32, #tpu.memory_space<vmem>>, vector<1x32xf32>
    %667 = vector.broadcast %666 : vector<1x32xf32> to vector<8x32xf32>
    %668 = arith.addf %665, %667 : vector<8x32xf32>
    %cst_410 = arith.constant 0.000000e+00 : f32
    %669 = vector.broadcast %cst_410 : f32 to vector<8x32xf32>
    %670 = arith.maximumf %668, %669 : vector<8x32xf32>
    %c0_411 = arith.constant 0 : index
    %c0_412 = arith.constant 0 : index
    %c0_413 = arith.constant 0 : index
    %671 = vector.load %arg14[%c0_411, %c0_412, %c0_413] : memref<2x32x64xf32, #tpu.memory_space<vmem>>, vector<1x32x64xf32>
    %672 = vector.shape_cast %671 : vector<1x32x64xf32> to vector<32x64xf32>
    %cst_414 = arith.constant dense<0.000000e+00> : vector<8x64xf32>
    %673 = tpu.matmul %625, %672, %cst_414 {dimension_numbers = #tpu.dot_dimension_numbers<[1], [0], [0], [1], [0, 0, 1, 1], [], []>} : vector<8x32xf32>, vector<32x64xf32>, vector<8x64xf32> -> vector<8x64xf32>
    %c0_415 = arith.constant 0 : index
    %c0_416 = arith.constant 0 : index
    %c0_417 = arith.constant 0 : index
    %674 = vector.load %arg16[%c0_415, %c0_416, %c0_417] : memref<2x1x64xf32, #tpu.memory_space<vmem>>, vector<1x1x64xf32>
    %675 = vector.shape_cast %674 : vector<1x1x64xf32> to vector<1x64xf32>
    %676 = vector.broadcast %675 : vector<1x64xf32> to vector<8x64xf32>
    %677 = arith.addf %673, %676 : vector<8x64xf32>
    %c0_418 = arith.constant 0 : index
    %c0_419 = arith.constant 0 : index
    %c0_420 = arith.constant 0 : index
    %678 = vector.load %arg15[%c0_418, %c0_419, %c0_420] : memref<2x32x32xf32, #tpu.memory_space<vmem>>, vector<1x32x32xf32>
    %679 = vector.shape_cast %678 : vector<1x32x32xf32> to vector<32x32xf32>
    %cst_421 = arith.constant dense<0.000000e+00> : vector<8x32xf32>
    %680 = tpu.matmul %625, %679, %cst_421 {dimension_numbers = #tpu.dot_dimension_numbers<[1], [0], [0], [1], [0, 0, 1, 1], [], []>} : vector<8x32xf32>, vector<32x32xf32>, vector<8x32xf32> -> vector<8x32xf32>
    %c0_422 = arith.constant 0 : index
    %c0_423 = arith.constant 0 : index
    %c0_424 = arith.constant 0 : index
    %681 = vector.load %arg18[%c0_422, %c0_423, %c0_424] : memref<2x1x32xf32, #tpu.memory_space<vmem>>, vector<1x1x32xf32>
    %682 = vector.shape_cast %681 : vector<1x1x32xf32> to vector<1x32xf32>
    %683 = vector.broadcast %682 : vector<1x32xf32> to vector<8x32xf32>
    %684 = arith.addf %680, %683 : vector<8x32xf32>
    %c0_425 = arith.constant 0 : index
    %c0_426 = arith.constant 0 : index
    %c0_427 = arith.constant 0 : index
    %685 = vector.load %arg12[%c0_425, %c0_426, %c0_427] : memref<2x32x64xf32, #tpu.memory_space<vmem>>, vector<1x32x64xf32>
    %686 = vector.shape_cast %685 : vector<1x32x64xf32> to vector<32x64xf32>
    %c0_428 = arith.constant 0 : index
    %c0_429 = arith.constant 0 : index
    %c0_430 = arith.constant 0 : index
    %687 = vector.load %arg13[%c0_428, %c0_429, %c0_430] : memref<2x32x32xf32, #tpu.memory_space<vmem>>, vector<1x32x32xf32>
    %688 = vector.shape_cast %687 : vector<1x32x32xf32> to vector<32x32xf32>
    %c0_431 = arith.constant 0 : index
    %c0_432 = arith.constant 0 : index
    %c0_433 = arith.constant 0 : index
    %689 = vector.load %arg17[%c0_431, %c0_432, %c0_433] : memref<2x1x32xf32, #tpu.memory_space<vmem>>, vector<1x1x32xf32>
    %690 = vector.shape_cast %689 : vector<1x1x32xf32> to vector<1x32xf32>
    %cst_434 = arith.constant dense<0.000000e+00> : vector<8x64xf32>
    %691 = tpu.matmul %670, %686, %cst_434 {dimension_numbers = #tpu.dot_dimension_numbers<[1], [0], [0], [1], [0, 0, 1, 1], [], []>} : vector<8x32xf32>, vector<32x64xf32>, vector<8x64xf32> -> vector<8x64xf32>
    %cst_435 = arith.constant dense<0.000000e+00> : vector<8x32xf32>
    %692 = tpu.matmul %670, %688, %cst_435 {dimension_numbers = #tpu.dot_dimension_numbers<[1], [0], [0], [1], [0, 0, 1, 1], [], []>} : vector<8x32xf32>, vector<32x32xf32>, vector<8x32xf32> -> vector<8x32xf32>
    %693 = vector.broadcast %690 : vector<1x32xf32> to vector<8x32xf32>
    %694 = arith.addf %692, %693 : vector<8x32xf32>
    %695 = arith.addf %691, %677 : vector<8x64xf32>
    %696 = arith.negf %695 : vector<8x64xf32>
    %697 = math.exp %696 : vector<8x64xf32>
    %cst_436 = arith.constant 1.000000e+00 : f32
    %698 = vector.broadcast %cst_436 : f32 to vector<8x64xf32>
    %699 = arith.addf %698, %697 : vector<8x64xf32>
    %700 = arith.divf %698, %699 : vector<8x64xf32>
    %701 = vector.extract_strided_slice %700 {offsets = [0, 0], sizes = [8, 32], strides = [1, 1]} : vector<8x64xf32> to vector<8x32xf32>
    %702 = vector.extract_strided_slice %700 {offsets = [0, 32], sizes = [8, 32], strides = [1, 1]} : vector<8x64xf32> to vector<8x32xf32>
    %703 = arith.mulf %701, %684 : vector<8x32xf32>
    %704 = arith.addf %694, %703 : vector<8x32xf32>
    %705 = math.tanh %704 : vector<8x32xf32>
    %706 = arith.subf %625, %705 : vector<8x32xf32>
    %707 = arith.mulf %702, %706 : vector<8x32xf32>
    %708 = arith.addf %705, %707 : vector<8x32xf32>
    %c1_437 = arith.constant 1 : index
    %c0_438 = arith.constant 0 : index
    %c0_439 = arith.constant 0 : index
    %709 = vector.load %arg14[%c1_437, %c0_438, %c0_439] : memref<2x32x64xf32, #tpu.memory_space<vmem>>, vector<1x32x64xf32>
    %710 = vector.shape_cast %709 : vector<1x32x64xf32> to vector<32x64xf32>
    %cst_440 = arith.constant dense<0.000000e+00> : vector<8x64xf32>
    %711 = tpu.matmul %663, %710, %cst_440 {dimension_numbers = #tpu.dot_dimension_numbers<[1], [0], [0], [1], [0, 0, 1, 1], [], []>} : vector<8x32xf32>, vector<32x64xf32>, vector<8x64xf32> -> vector<8x64xf32>
    %c1_441 = arith.constant 1 : index
    %c0_442 = arith.constant 0 : index
    %c0_443 = arith.constant 0 : index
    %712 = vector.load %arg16[%c1_441, %c0_442, %c0_443] : memref<2x1x64xf32, #tpu.memory_space<vmem>>, vector<1x1x64xf32>
    %713 = vector.shape_cast %712 : vector<1x1x64xf32> to vector<1x64xf32>
    %714 = vector.broadcast %713 : vector<1x64xf32> to vector<8x64xf32>
    %715 = arith.addf %711, %714 : vector<8x64xf32>
    %c1_444 = arith.constant 1 : index
    %c0_445 = arith.constant 0 : index
    %c0_446 = arith.constant 0 : index
    %716 = vector.load %arg15[%c1_444, %c0_445, %c0_446] : memref<2x32x32xf32, #tpu.memory_space<vmem>>, vector<1x32x32xf32>
    %717 = vector.shape_cast %716 : vector<1x32x32xf32> to vector<32x32xf32>
    %cst_447 = arith.constant dense<0.000000e+00> : vector<8x32xf32>
    %718 = tpu.matmul %663, %717, %cst_447 {dimension_numbers = #tpu.dot_dimension_numbers<[1], [0], [0], [1], [0, 0, 1, 1], [], []>} : vector<8x32xf32>, vector<32x32xf32>, vector<8x32xf32> -> vector<8x32xf32>
    %c1_448 = arith.constant 1 : index
    %c0_449 = arith.constant 0 : index
    %c0_450 = arith.constant 0 : index
    %719 = vector.load %arg18[%c1_448, %c0_449, %c0_450] : memref<2x1x32xf32, #tpu.memory_space<vmem>>, vector<1x1x32xf32>
    %720 = vector.shape_cast %719 : vector<1x1x32xf32> to vector<1x32xf32>
    %721 = vector.broadcast %720 : vector<1x32xf32> to vector<8x32xf32>
    %722 = arith.addf %718, %721 : vector<8x32xf32>
    %c1_451 = arith.constant 1 : index
    %c0_452 = arith.constant 0 : index
    %c0_453 = arith.constant 0 : index
    %723 = vector.load %arg12[%c1_451, %c0_452, %c0_453] : memref<2x32x64xf32, #tpu.memory_space<vmem>>, vector<1x32x64xf32>
    %724 = vector.shape_cast %723 : vector<1x32x64xf32> to vector<32x64xf32>
    %c1_454 = arith.constant 1 : index
    %c0_455 = arith.constant 0 : index
    %c0_456 = arith.constant 0 : index
    %725 = vector.load %arg13[%c1_454, %c0_455, %c0_456] : memref<2x32x32xf32, #tpu.memory_space<vmem>>, vector<1x32x32xf32>
    %726 = vector.shape_cast %725 : vector<1x32x32xf32> to vector<32x32xf32>
    %c1_457 = arith.constant 1 : index
    %c0_458 = arith.constant 0 : index
    %c0_459 = arith.constant 0 : index
    %727 = vector.load %arg17[%c1_457, %c0_458, %c0_459] : memref<2x1x32xf32, #tpu.memory_space<vmem>>, vector<1x1x32xf32>
    %728 = vector.shape_cast %727 : vector<1x1x32xf32> to vector<1x32xf32>
    %cst_460 = arith.constant dense<0.000000e+00> : vector<8x64xf32>
    %729 = tpu.matmul %708, %724, %cst_460 {dimension_numbers = #tpu.dot_dimension_numbers<[1], [0], [0], [1], [0, 0, 1, 1], [], []>} : vector<8x32xf32>, vector<32x64xf32>, vector<8x64xf32> -> vector<8x64xf32>
    %cst_461 = arith.constant dense<0.000000e+00> : vector<8x32xf32>
    %730 = tpu.matmul %708, %726, %cst_461 {dimension_numbers = #tpu.dot_dimension_numbers<[1], [0], [0], [1], [0, 0, 1, 1], [], []>} : vector<8x32xf32>, vector<32x32xf32>, vector<8x32xf32> -> vector<8x32xf32>
    %731 = vector.broadcast %728 : vector<1x32xf32> to vector<8x32xf32>
    %732 = arith.addf %730, %731 : vector<8x32xf32>
    %733 = arith.addf %729, %715 : vector<8x64xf32>
    %734 = arith.negf %733 : vector<8x64xf32>
    %735 = math.exp %734 : vector<8x64xf32>
    %cst_462 = arith.constant 1.000000e+00 : f32
    %736 = vector.broadcast %cst_462 : f32 to vector<8x64xf32>
    %737 = arith.addf %736, %735 : vector<8x64xf32>
    %738 = arith.divf %736, %737 : vector<8x64xf32>
    %739 = vector.extract_strided_slice %738 {offsets = [0, 0], sizes = [8, 32], strides = [1, 1]} : vector<8x64xf32> to vector<8x32xf32>
    %740 = vector.extract_strided_slice %738 {offsets = [0, 32], sizes = [8, 32], strides = [1, 1]} : vector<8x64xf32> to vector<8x32xf32>
    %741 = arith.mulf %739, %722 : vector<8x32xf32>
    %742 = arith.addf %732, %741 : vector<8x32xf32>
    %743 = math.tanh %742 : vector<8x32xf32>
    %744 = arith.subf %663, %743 : vector<8x32xf32>
    %745 = arith.mulf %740, %744 : vector<8x32xf32>
    %746 = arith.addf %743, %745 : vector<8x32xf32>
    %c0_463 = arith.constant 0 : index
    %c0_464 = arith.constant 0 : index
    %747 = vector.load %arg10[%c0_463, %c0_464] : memref<32x32xf32, #tpu.memory_space<vmem>>, vector<32x32xf32>
    %cst_465 = arith.constant dense<0.000000e+00> : vector<8x32xf32>
    %748 = tpu.matmul %746, %747, %cst_465 {dimension_numbers = #tpu.dot_dimension_numbers<[1], [0], [0], [1], [0, 0, 1, 1], [], []>} : vector<8x32xf32>, vector<32x32xf32>, vector<8x32xf32> -> vector<8x32xf32>
    %c0_466 = arith.constant 0 : index
    %c0_467 = arith.constant 0 : index
    %749 = vector.load %arg11[%c0_466, %c0_467] : memref<1x32xf32, #tpu.memory_space<vmem>>, vector<1x32xf32>
    %750 = vector.broadcast %749 : vector<1x32xf32> to vector<8x32xf32>
    %751 = arith.addf %748, %750 : vector<8x32xf32>
    %cst_468 = arith.constant 0.000000e+00 : f32
    %752 = vector.broadcast %cst_468 : f32 to vector<8x32xf32>
    %753 = arith.maximumf %751, %752 : vector<8x32xf32>
    %c0_469 = arith.constant 0 : index
    %c0_470 = arith.constant 0 : index
    %c0_471 = arith.constant 0 : index
    %754 = vector.load %arg14[%c0_469, %c0_470, %c0_471] : memref<2x32x64xf32, #tpu.memory_space<vmem>>, vector<1x32x64xf32>
    %755 = vector.shape_cast %754 : vector<1x32x64xf32> to vector<32x64xf32>
    %cst_472 = arith.constant dense<0.000000e+00> : vector<8x64xf32>
    %756 = tpu.matmul %708, %755, %cst_472 {dimension_numbers = #tpu.dot_dimension_numbers<[1], [0], [0], [1], [0, 0, 1, 1], [], []>} : vector<8x32xf32>, vector<32x64xf32>, vector<8x64xf32> -> vector<8x64xf32>
    %c0_473 = arith.constant 0 : index
    %c0_474 = arith.constant 0 : index
    %c0_475 = arith.constant 0 : index
    %757 = vector.load %arg16[%c0_473, %c0_474, %c0_475] : memref<2x1x64xf32, #tpu.memory_space<vmem>>, vector<1x1x64xf32>
    %758 = vector.shape_cast %757 : vector<1x1x64xf32> to vector<1x64xf32>
    %759 = vector.broadcast %758 : vector<1x64xf32> to vector<8x64xf32>
    %760 = arith.addf %756, %759 : vector<8x64xf32>
    %c0_476 = arith.constant 0 : index
    %c0_477 = arith.constant 0 : index
    %c0_478 = arith.constant 0 : index
    %761 = vector.load %arg15[%c0_476, %c0_477, %c0_478] : memref<2x32x32xf32, #tpu.memory_space<vmem>>, vector<1x32x32xf32>
    %762 = vector.shape_cast %761 : vector<1x32x32xf32> to vector<32x32xf32>
    %cst_479 = arith.constant dense<0.000000e+00> : vector<8x32xf32>
    %763 = tpu.matmul %708, %762, %cst_479 {dimension_numbers = #tpu.dot_dimension_numbers<[1], [0], [0], [1], [0, 0, 1, 1], [], []>} : vector<8x32xf32>, vector<32x32xf32>, vector<8x32xf32> -> vector<8x32xf32>
    %c0_480 = arith.constant 0 : index
    %c0_481 = arith.constant 0 : index
    %c0_482 = arith.constant 0 : index
    %764 = vector.load %arg18[%c0_480, %c0_481, %c0_482] : memref<2x1x32xf32, #tpu.memory_space<vmem>>, vector<1x1x32xf32>
    %765 = vector.shape_cast %764 : vector<1x1x32xf32> to vector<1x32xf32>
    %766 = vector.broadcast %765 : vector<1x32xf32> to vector<8x32xf32>
    %767 = arith.addf %763, %766 : vector<8x32xf32>
    %c0_483 = arith.constant 0 : index
    %c0_484 = arith.constant 0 : index
    %c0_485 = arith.constant 0 : index
    %768 = vector.load %arg12[%c0_483, %c0_484, %c0_485] : memref<2x32x64xf32, #tpu.memory_space<vmem>>, vector<1x32x64xf32>
    %769 = vector.shape_cast %768 : vector<1x32x64xf32> to vector<32x64xf32>
    %c0_486 = arith.constant 0 : index
    %c0_487 = arith.constant 0 : index
    %c0_488 = arith.constant 0 : index
    %770 = vector.load %arg13[%c0_486, %c0_487, %c0_488] : memref<2x32x32xf32, #tpu.memory_space<vmem>>, vector<1x32x32xf32>
    %771 = vector.shape_cast %770 : vector<1x32x32xf32> to vector<32x32xf32>
    %c0_489 = arith.constant 0 : index
    %c0_490 = arith.constant 0 : index
    %c0_491 = arith.constant 0 : index
    %772 = vector.load %arg17[%c0_489, %c0_490, %c0_491] : memref<2x1x32xf32, #tpu.memory_space<vmem>>, vector<1x1x32xf32>
    %773 = vector.shape_cast %772 : vector<1x1x32xf32> to vector<1x32xf32>
    %cst_492 = arith.constant dense<0.000000e+00> : vector<8x64xf32>
    %774 = tpu.matmul %753, %769, %cst_492 {dimension_numbers = #tpu.dot_dimension_numbers<[1], [0], [0], [1], [0, 0, 1, 1], [], []>} : vector<8x32xf32>, vector<32x64xf32>, vector<8x64xf32> -> vector<8x64xf32>
    %cst_493 = arith.constant dense<0.000000e+00> : vector<8x32xf32>
    %775 = tpu.matmul %753, %771, %cst_493 {dimension_numbers = #tpu.dot_dimension_numbers<[1], [0], [0], [1], [0, 0, 1, 1], [], []>} : vector<8x32xf32>, vector<32x32xf32>, vector<8x32xf32> -> vector<8x32xf32>
    %776 = vector.broadcast %773 : vector<1x32xf32> to vector<8x32xf32>
    %777 = arith.addf %775, %776 : vector<8x32xf32>
    %778 = arith.addf %774, %760 : vector<8x64xf32>
    %779 = arith.negf %778 : vector<8x64xf32>
    %780 = math.exp %779 : vector<8x64xf32>
    %cst_494 = arith.constant 1.000000e+00 : f32
    %781 = vector.broadcast %cst_494 : f32 to vector<8x64xf32>
    %782 = arith.addf %781, %780 : vector<8x64xf32>
    %783 = arith.divf %781, %782 : vector<8x64xf32>
    %784 = vector.extract_strided_slice %783 {offsets = [0, 0], sizes = [8, 32], strides = [1, 1]} : vector<8x64xf32> to vector<8x32xf32>
    %785 = vector.extract_strided_slice %783 {offsets = [0, 32], sizes = [8, 32], strides = [1, 1]} : vector<8x64xf32> to vector<8x32xf32>
    %786 = arith.mulf %784, %767 : vector<8x32xf32>
    %787 = arith.addf %777, %786 : vector<8x32xf32>
    %788 = math.tanh %787 : vector<8x32xf32>
    %789 = arith.subf %708, %788 : vector<8x32xf32>
    %790 = arith.mulf %785, %789 : vector<8x32xf32>
    %791 = arith.addf %788, %790 : vector<8x32xf32>
    %c1_495 = arith.constant 1 : index
    %c0_496 = arith.constant 0 : index
    %c0_497 = arith.constant 0 : index
    %792 = vector.load %arg14[%c1_495, %c0_496, %c0_497] : memref<2x32x64xf32, #tpu.memory_space<vmem>>, vector<1x32x64xf32>
    %793 = vector.shape_cast %792 : vector<1x32x64xf32> to vector<32x64xf32>
    %cst_498 = arith.constant dense<0.000000e+00> : vector<8x64xf32>
    %794 = tpu.matmul %746, %793, %cst_498 {dimension_numbers = #tpu.dot_dimension_numbers<[1], [0], [0], [1], [0, 0, 1, 1], [], []>} : vector<8x32xf32>, vector<32x64xf32>, vector<8x64xf32> -> vector<8x64xf32>
    %c1_499 = arith.constant 1 : index
    %c0_500 = arith.constant 0 : index
    %c0_501 = arith.constant 0 : index
    %795 = vector.load %arg16[%c1_499, %c0_500, %c0_501] : memref<2x1x64xf32, #tpu.memory_space<vmem>>, vector<1x1x64xf32>
    %796 = vector.shape_cast %795 : vector<1x1x64xf32> to vector<1x64xf32>
    %797 = vector.broadcast %796 : vector<1x64xf32> to vector<8x64xf32>
    %798 = arith.addf %794, %797 : vector<8x64xf32>
    %c1_502 = arith.constant 1 : index
    %c0_503 = arith.constant 0 : index
    %c0_504 = arith.constant 0 : index
    %799 = vector.load %arg15[%c1_502, %c0_503, %c0_504] : memref<2x32x32xf32, #tpu.memory_space<vmem>>, vector<1x32x32xf32>
    %800 = vector.shape_cast %799 : vector<1x32x32xf32> to vector<32x32xf32>
    %cst_505 = arith.constant dense<0.000000e+00> : vector<8x32xf32>
    %801 = tpu.matmul %746, %800, %cst_505 {dimension_numbers = #tpu.dot_dimension_numbers<[1], [0], [0], [1], [0, 0, 1, 1], [], []>} : vector<8x32xf32>, vector<32x32xf32>, vector<8x32xf32> -> vector<8x32xf32>
    %c1_506 = arith.constant 1 : index
    %c0_507 = arith.constant 0 : index
    %c0_508 = arith.constant 0 : index
    %802 = vector.load %arg18[%c1_506, %c0_507, %c0_508] : memref<2x1x32xf32, #tpu.memory_space<vmem>>, vector<1x1x32xf32>
    %803 = vector.shape_cast %802 : vector<1x1x32xf32> to vector<1x32xf32>
    %804 = vector.broadcast %803 : vector<1x32xf32> to vector<8x32xf32>
    %805 = arith.addf %801, %804 : vector<8x32xf32>
    %c1_509 = arith.constant 1 : index
    %c0_510 = arith.constant 0 : index
    %c0_511 = arith.constant 0 : index
    %806 = vector.load %arg12[%c1_509, %c0_510, %c0_511] : memref<2x32x64xf32, #tpu.memory_space<vmem>>, vector<1x32x64xf32>
    %807 = vector.shape_cast %806 : vector<1x32x64xf32> to vector<32x64xf32>
    %c1_512 = arith.constant 1 : index
    %c0_513 = arith.constant 0 : index
    %c0_514 = arith.constant 0 : index
    %808 = vector.load %arg13[%c1_512, %c0_513, %c0_514] : memref<2x32x32xf32, #tpu.memory_space<vmem>>, vector<1x32x32xf32>
    %809 = vector.shape_cast %808 : vector<1x32x32xf32> to vector<32x32xf32>
    %c1_515 = arith.constant 1 : index
    %c0_516 = arith.constant 0 : index
    %c0_517 = arith.constant 0 : index
    %810 = vector.load %arg17[%c1_515, %c0_516, %c0_517] : memref<2x1x32xf32, #tpu.memory_space<vmem>>, vector<1x1x32xf32>
    %811 = vector.shape_cast %810 : vector<1x1x32xf32> to vector<1x32xf32>
    %cst_518 = arith.constant dense<0.000000e+00> : vector<8x64xf32>
    %812 = tpu.matmul %791, %807, %cst_518 {dimension_numbers = #tpu.dot_dimension_numbers<[1], [0], [0], [1], [0, 0, 1, 1], [], []>} : vector<8x32xf32>, vector<32x64xf32>, vector<8x64xf32> -> vector<8x64xf32>
    %cst_519 = arith.constant dense<0.000000e+00> : vector<8x32xf32>
    %813 = tpu.matmul %791, %809, %cst_519 {dimension_numbers = #tpu.dot_dimension_numbers<[1], [0], [0], [1], [0, 0, 1, 1], [], []>} : vector<8x32xf32>, vector<32x32xf32>, vector<8x32xf32> -> vector<8x32xf32>
    %814 = vector.broadcast %811 : vector<1x32xf32> to vector<8x32xf32>
    %815 = arith.addf %813, %814 : vector<8x32xf32>
    %816 = arith.addf %812, %798 : vector<8x64xf32>
    %817 = arith.negf %816 : vector<8x64xf32>
    %818 = math.exp %817 : vector<8x64xf32>
    %cst_520 = arith.constant 1.000000e+00 : f32
    %819 = vector.broadcast %cst_520 : f32 to vector<8x64xf32>
    %820 = arith.addf %819, %818 : vector<8x64xf32>
    %821 = arith.divf %819, %820 : vector<8x64xf32>
    %822 = vector.extract_strided_slice %821 {offsets = [0, 0], sizes = [8, 32], strides = [1, 1]} : vector<8x64xf32> to vector<8x32xf32>
    %823 = vector.extract_strided_slice %821 {offsets = [0, 32], sizes = [8, 32], strides = [1, 1]} : vector<8x64xf32> to vector<8x32xf32>
    %824 = arith.mulf %822, %805 : vector<8x32xf32>
    %825 = arith.addf %815, %824 : vector<8x32xf32>
    %826 = math.tanh %825 : vector<8x32xf32>
    %827 = arith.subf %746, %826 : vector<8x32xf32>
    %828 = arith.mulf %823, %827 : vector<8x32xf32>
    %829 = arith.addf %826, %828 : vector<8x32xf32>
    %c0_521 = arith.constant 0 : index
    %c0_522 = arith.constant 0 : index
    %830 = vector.load %arg10[%c0_521, %c0_522] : memref<32x32xf32, #tpu.memory_space<vmem>>, vector<32x32xf32>
    %cst_523 = arith.constant dense<0.000000e+00> : vector<8x32xf32>
    %831 = tpu.matmul %829, %830, %cst_523 {dimension_numbers = #tpu.dot_dimension_numbers<[1], [0], [0], [1], [0, 0, 1, 1], [], []>} : vector<8x32xf32>, vector<32x32xf32>, vector<8x32xf32> -> vector<8x32xf32>
    %c0_524 = arith.constant 0 : index
    %c0_525 = arith.constant 0 : index
    %832 = vector.load %arg11[%c0_524, %c0_525] : memref<1x32xf32, #tpu.memory_space<vmem>>, vector<1x32xf32>
    %833 = vector.broadcast %832 : vector<1x32xf32> to vector<8x32xf32>
    %834 = arith.addf %831, %833 : vector<8x32xf32>
    %cst_526 = arith.constant 0.000000e+00 : f32
    %835 = vector.broadcast %cst_526 : f32 to vector<8x32xf32>
    %836 = arith.maximumf %834, %835 : vector<8x32xf32>
    %c0_527 = arith.constant 0 : index
    %c0_528 = arith.constant 0 : index
    %c0_529 = arith.constant 0 : index
    %837 = vector.load %arg14[%c0_527, %c0_528, %c0_529] : memref<2x32x64xf32, #tpu.memory_space<vmem>>, vector<1x32x64xf32>
    %838 = vector.shape_cast %837 : vector<1x32x64xf32> to vector<32x64xf32>
    %cst_530 = arith.constant dense<0.000000e+00> : vector<8x64xf32>
    %839 = tpu.matmul %791, %838, %cst_530 {dimension_numbers = #tpu.dot_dimension_numbers<[1], [0], [0], [1], [0, 0, 1, 1], [], []>} : vector<8x32xf32>, vector<32x64xf32>, vector<8x64xf32> -> vector<8x64xf32>
    %c0_531 = arith.constant 0 : index
    %c0_532 = arith.constant 0 : index
    %c0_533 = arith.constant 0 : index
    %840 = vector.load %arg16[%c0_531, %c0_532, %c0_533] : memref<2x1x64xf32, #tpu.memory_space<vmem>>, vector<1x1x64xf32>
    %841 = vector.shape_cast %840 : vector<1x1x64xf32> to vector<1x64xf32>
    %842 = vector.broadcast %841 : vector<1x64xf32> to vector<8x64xf32>
    %843 = arith.addf %839, %842 : vector<8x64xf32>
    %c0_534 = arith.constant 0 : index
    %c0_535 = arith.constant 0 : index
    %c0_536 = arith.constant 0 : index
    %844 = vector.load %arg15[%c0_534, %c0_535, %c0_536] : memref<2x32x32xf32, #tpu.memory_space<vmem>>, vector<1x32x32xf32>
    %845 = vector.shape_cast %844 : vector<1x32x32xf32> to vector<32x32xf32>
    %cst_537 = arith.constant dense<0.000000e+00> : vector<8x32xf32>
    %846 = tpu.matmul %791, %845, %cst_537 {dimension_numbers = #tpu.dot_dimension_numbers<[1], [0], [0], [1], [0, 0, 1, 1], [], []>} : vector<8x32xf32>, vector<32x32xf32>, vector<8x32xf32> -> vector<8x32xf32>
    %c0_538 = arith.constant 0 : index
    %c0_539 = arith.constant 0 : index
    %c0_540 = arith.constant 0 : index
    %847 = vector.load %arg18[%c0_538, %c0_539, %c0_540] : memref<2x1x32xf32, #tpu.memory_space<vmem>>, vector<1x1x32xf32>
    %848 = vector.shape_cast %847 : vector<1x1x32xf32> to vector<1x32xf32>
    %849 = vector.broadcast %848 : vector<1x32xf32> to vector<8x32xf32>
    %850 = arith.addf %846, %849 : vector<8x32xf32>
    %c0_541 = arith.constant 0 : index
    %c0_542 = arith.constant 0 : index
    %c0_543 = arith.constant 0 : index
    %851 = vector.load %arg12[%c0_541, %c0_542, %c0_543] : memref<2x32x64xf32, #tpu.memory_space<vmem>>, vector<1x32x64xf32>
    %852 = vector.shape_cast %851 : vector<1x32x64xf32> to vector<32x64xf32>
    %c0_544 = arith.constant 0 : index
    %c0_545 = arith.constant 0 : index
    %c0_546 = arith.constant 0 : index
    %853 = vector.load %arg13[%c0_544, %c0_545, %c0_546] : memref<2x32x32xf32, #tpu.memory_space<vmem>>, vector<1x32x32xf32>
    %854 = vector.shape_cast %853 : vector<1x32x32xf32> to vector<32x32xf32>
    %c0_547 = arith.constant 0 : index
    %c0_548 = arith.constant 0 : index
    %c0_549 = arith.constant 0 : index
    %855 = vector.load %arg17[%c0_547, %c0_548, %c0_549] : memref<2x1x32xf32, #tpu.memory_space<vmem>>, vector<1x1x32xf32>
    %856 = vector.shape_cast %855 : vector<1x1x32xf32> to vector<1x32xf32>
    %cst_550 = arith.constant dense<0.000000e+00> : vector<8x64xf32>
    %857 = tpu.matmul %836, %852, %cst_550 {dimension_numbers = #tpu.dot_dimension_numbers<[1], [0], [0], [1], [0, 0, 1, 1], [], []>} : vector<8x32xf32>, vector<32x64xf32>, vector<8x64xf32> -> vector<8x64xf32>
    %cst_551 = arith.constant dense<0.000000e+00> : vector<8x32xf32>
    %858 = tpu.matmul %836, %854, %cst_551 {dimension_numbers = #tpu.dot_dimension_numbers<[1], [0], [0], [1], [0, 0, 1, 1], [], []>} : vector<8x32xf32>, vector<32x32xf32>, vector<8x32xf32> -> vector<8x32xf32>
    %859 = vector.broadcast %856 : vector<1x32xf32> to vector<8x32xf32>
    %860 = arith.addf %858, %859 : vector<8x32xf32>
    %861 = arith.addf %857, %843 : vector<8x64xf32>
    %862 = arith.negf %861 : vector<8x64xf32>
    %863 = math.exp %862 : vector<8x64xf32>
    %cst_552 = arith.constant 1.000000e+00 : f32
    %864 = vector.broadcast %cst_552 : f32 to vector<8x64xf32>
    %865 = arith.addf %864, %863 : vector<8x64xf32>
    %866 = arith.divf %864, %865 : vector<8x64xf32>
    %867 = vector.extract_strided_slice %866 {offsets = [0, 0], sizes = [8, 32], strides = [1, 1]} : vector<8x64xf32> to vector<8x32xf32>
    %868 = vector.extract_strided_slice %866 {offsets = [0, 32], sizes = [8, 32], strides = [1, 1]} : vector<8x64xf32> to vector<8x32xf32>
    %869 = arith.mulf %867, %850 : vector<8x32xf32>
    %870 = arith.addf %860, %869 : vector<8x32xf32>
    %871 = math.tanh %870 : vector<8x32xf32>
    %872 = arith.subf %791, %871 : vector<8x32xf32>
    %873 = arith.mulf %868, %872 : vector<8x32xf32>
    %874 = arith.addf %871, %873 : vector<8x32xf32>
    %c1_553 = arith.constant 1 : index
    %c0_554 = arith.constant 0 : index
    %c0_555 = arith.constant 0 : index
    %875 = vector.load %arg14[%c1_553, %c0_554, %c0_555] : memref<2x32x64xf32, #tpu.memory_space<vmem>>, vector<1x32x64xf32>
    %876 = vector.shape_cast %875 : vector<1x32x64xf32> to vector<32x64xf32>
    %cst_556 = arith.constant dense<0.000000e+00> : vector<8x64xf32>
    %877 = tpu.matmul %829, %876, %cst_556 {dimension_numbers = #tpu.dot_dimension_numbers<[1], [0], [0], [1], [0, 0, 1, 1], [], []>} : vector<8x32xf32>, vector<32x64xf32>, vector<8x64xf32> -> vector<8x64xf32>
    %c1_557 = arith.constant 1 : index
    %c0_558 = arith.constant 0 : index
    %c0_559 = arith.constant 0 : index
    %878 = vector.load %arg16[%c1_557, %c0_558, %c0_559] : memref<2x1x64xf32, #tpu.memory_space<vmem>>, vector<1x1x64xf32>
    %879 = vector.shape_cast %878 : vector<1x1x64xf32> to vector<1x64xf32>
    %880 = vector.broadcast %879 : vector<1x64xf32> to vector<8x64xf32>
    %881 = arith.addf %877, %880 : vector<8x64xf32>
    %c1_560 = arith.constant 1 : index
    %c0_561 = arith.constant 0 : index
    %c0_562 = arith.constant 0 : index
    %882 = vector.load %arg15[%c1_560, %c0_561, %c0_562] : memref<2x32x32xf32, #tpu.memory_space<vmem>>, vector<1x32x32xf32>
    %883 = vector.shape_cast %882 : vector<1x32x32xf32> to vector<32x32xf32>
    %cst_563 = arith.constant dense<0.000000e+00> : vector<8x32xf32>
    %884 = tpu.matmul %829, %883, %cst_563 {dimension_numbers = #tpu.dot_dimension_numbers<[1], [0], [0], [1], [0, 0, 1, 1], [], []>} : vector<8x32xf32>, vector<32x32xf32>, vector<8x32xf32> -> vector<8x32xf32>
    %c1_564 = arith.constant 1 : index
    %c0_565 = arith.constant 0 : index
    %c0_566 = arith.constant 0 : index
    %885 = vector.load %arg18[%c1_564, %c0_565, %c0_566] : memref<2x1x32xf32, #tpu.memory_space<vmem>>, vector<1x1x32xf32>
    %886 = vector.shape_cast %885 : vector<1x1x32xf32> to vector<1x32xf32>
    %887 = vector.broadcast %886 : vector<1x32xf32> to vector<8x32xf32>
    %888 = arith.addf %884, %887 : vector<8x32xf32>
    %c1_567 = arith.constant 1 : index
    %c0_568 = arith.constant 0 : index
    %c0_569 = arith.constant 0 : index
    %889 = vector.load %arg12[%c1_567, %c0_568, %c0_569] : memref<2x32x64xf32, #tpu.memory_space<vmem>>, vector<1x32x64xf32>
    %890 = vector.shape_cast %889 : vector<1x32x64xf32> to vector<32x64xf32>
    %c1_570 = arith.constant 1 : index
    %c0_571 = arith.constant 0 : index
    %c0_572 = arith.constant 0 : index
    %891 = vector.load %arg13[%c1_570, %c0_571, %c0_572] : memref<2x32x32xf32, #tpu.memory_space<vmem>>, vector<1x32x32xf32>
    %892 = vector.shape_cast %891 : vector<1x32x32xf32> to vector<32x32xf32>
    %c1_573 = arith.constant 1 : index
    %c0_574 = arith.constant 0 : index
    %c0_575 = arith.constant 0 : index
    %893 = vector.load %arg17[%c1_573, %c0_574, %c0_575] : memref<2x1x32xf32, #tpu.memory_space<vmem>>, vector<1x1x32xf32>
    %894 = vector.shape_cast %893 : vector<1x1x32xf32> to vector<1x32xf32>
    %cst_576 = arith.constant dense<0.000000e+00> : vector<8x64xf32>
    %895 = tpu.matmul %874, %890, %cst_576 {dimension_numbers = #tpu.dot_dimension_numbers<[1], [0], [0], [1], [0, 0, 1, 1], [], []>} : vector<8x32xf32>, vector<32x64xf32>, vector<8x64xf32> -> vector<8x64xf32>
    %cst_577 = arith.constant dense<0.000000e+00> : vector<8x32xf32>
    %896 = tpu.matmul %874, %892, %cst_577 {dimension_numbers = #tpu.dot_dimension_numbers<[1], [0], [0], [1], [0, 0, 1, 1], [], []>} : vector<8x32xf32>, vector<32x32xf32>, vector<8x32xf32> -> vector<8x32xf32>
    %897 = vector.broadcast %894 : vector<1x32xf32> to vector<8x32xf32>
    %898 = arith.addf %896, %897 : vector<8x32xf32>
    %899 = arith.addf %895, %881 : vector<8x64xf32>
    %900 = arith.negf %899 : vector<8x64xf32>
    %901 = math.exp %900 : vector<8x64xf32>
    %cst_578 = arith.constant 1.000000e+00 : f32
    %902 = vector.broadcast %cst_578 : f32 to vector<8x64xf32>
    %903 = arith.addf %902, %901 : vector<8x64xf32>
    %904 = arith.divf %902, %903 : vector<8x64xf32>
    %905 = vector.extract_strided_slice %904 {offsets = [0, 0], sizes = [8, 32], strides = [1, 1]} : vector<8x64xf32> to vector<8x32xf32>
    %906 = vector.extract_strided_slice %904 {offsets = [0, 32], sizes = [8, 32], strides = [1, 1]} : vector<8x64xf32> to vector<8x32xf32>
    %907 = arith.mulf %905, %888 : vector<8x32xf32>
    %908 = arith.addf %898, %907 : vector<8x32xf32>
    %909 = math.tanh %908 : vector<8x32xf32>
    %910 = arith.subf %829, %909 : vector<8x32xf32>
    %911 = arith.mulf %906, %910 : vector<8x32xf32>
    %912 = arith.addf %909, %911 : vector<8x32xf32>
    %c0_579 = arith.constant 0 : index
    %c0_580 = arith.constant 0 : index
    %913 = vector.load %arg10[%c0_579, %c0_580] : memref<32x32xf32, #tpu.memory_space<vmem>>, vector<32x32xf32>
    %cst_581 = arith.constant dense<0.000000e+00> : vector<8x32xf32>
    %914 = tpu.matmul %912, %913, %cst_581 {dimension_numbers = #tpu.dot_dimension_numbers<[1], [0], [0], [1], [0, 0, 1, 1], [], []>} : vector<8x32xf32>, vector<32x32xf32>, vector<8x32xf32> -> vector<8x32xf32>
    %c0_582 = arith.constant 0 : index
    %c0_583 = arith.constant 0 : index
    %915 = vector.load %arg11[%c0_582, %c0_583] : memref<1x32xf32, #tpu.memory_space<vmem>>, vector<1x32xf32>
    %916 = vector.broadcast %915 : vector<1x32xf32> to vector<8x32xf32>
    %917 = arith.addf %914, %916 : vector<8x32xf32>
    %cst_584 = arith.constant 0.000000e+00 : f32
    %918 = vector.broadcast %cst_584 : f32 to vector<8x32xf32>
    %919 = arith.maximumf %917, %918 : vector<8x32xf32>
    %c0_585 = arith.constant 0 : index
    %c0_586 = arith.constant 0 : index
    %c0_587 = arith.constant 0 : index
    %920 = vector.load %arg14[%c0_585, %c0_586, %c0_587] : memref<2x32x64xf32, #tpu.memory_space<vmem>>, vector<1x32x64xf32>
    %921 = vector.shape_cast %920 : vector<1x32x64xf32> to vector<32x64xf32>
    %cst_588 = arith.constant dense<0.000000e+00> : vector<8x64xf32>
    %922 = tpu.matmul %874, %921, %cst_588 {dimension_numbers = #tpu.dot_dimension_numbers<[1], [0], [0], [1], [0, 0, 1, 1], [], []>} : vector<8x32xf32>, vector<32x64xf32>, vector<8x64xf32> -> vector<8x64xf32>
    %c0_589 = arith.constant 0 : index
    %c0_590 = arith.constant 0 : index
    %c0_591 = arith.constant 0 : index
    %923 = vector.load %arg16[%c0_589, %c0_590, %c0_591] : memref<2x1x64xf32, #tpu.memory_space<vmem>>, vector<1x1x64xf32>
    %924 = vector.shape_cast %923 : vector<1x1x64xf32> to vector<1x64xf32>
    %925 = vector.broadcast %924 : vector<1x64xf32> to vector<8x64xf32>
    %926 = arith.addf %922, %925 : vector<8x64xf32>
    %c0_592 = arith.constant 0 : index
    %c0_593 = arith.constant 0 : index
    %c0_594 = arith.constant 0 : index
    %927 = vector.load %arg15[%c0_592, %c0_593, %c0_594] : memref<2x32x32xf32, #tpu.memory_space<vmem>>, vector<1x32x32xf32>
    %928 = vector.shape_cast %927 : vector<1x32x32xf32> to vector<32x32xf32>
    %cst_595 = arith.constant dense<0.000000e+00> : vector<8x32xf32>
    %929 = tpu.matmul %874, %928, %cst_595 {dimension_numbers = #tpu.dot_dimension_numbers<[1], [0], [0], [1], [0, 0, 1, 1], [], []>} : vector<8x32xf32>, vector<32x32xf32>, vector<8x32xf32> -> vector<8x32xf32>
    %c0_596 = arith.constant 0 : index
    %c0_597 = arith.constant 0 : index
    %c0_598 = arith.constant 0 : index
    %930 = vector.load %arg18[%c0_596, %c0_597, %c0_598] : memref<2x1x32xf32, #tpu.memory_space<vmem>>, vector<1x1x32xf32>
    %931 = vector.shape_cast %930 : vector<1x1x32xf32> to vector<1x32xf32>
    %932 = vector.broadcast %931 : vector<1x32xf32> to vector<8x32xf32>
    %933 = arith.addf %929, %932 : vector<8x32xf32>
    %c0_599 = arith.constant 0 : index
    %c0_600 = arith.constant 0 : index
    %c0_601 = arith.constant 0 : index
    %934 = vector.load %arg12[%c0_599, %c0_600, %c0_601] : memref<2x32x64xf32, #tpu.memory_space<vmem>>, vector<1x32x64xf32>
    %935 = vector.shape_cast %934 : vector<1x32x64xf32> to vector<32x64xf32>
    %c0_602 = arith.constant 0 : index
    %c0_603 = arith.constant 0 : index
    %c0_604 = arith.constant 0 : index
    %936 = vector.load %arg13[%c0_602, %c0_603, %c0_604] : memref<2x32x32xf32, #tpu.memory_space<vmem>>, vector<1x32x32xf32>
    %937 = vector.shape_cast %936 : vector<1x32x32xf32> to vector<32x32xf32>
    %c0_605 = arith.constant 0 : index
    %c0_606 = arith.constant 0 : index
    %c0_607 = arith.constant 0 : index
    %938 = vector.load %arg17[%c0_605, %c0_606, %c0_607] : memref<2x1x32xf32, #tpu.memory_space<vmem>>, vector<1x1x32xf32>
    %939 = vector.shape_cast %938 : vector<1x1x32xf32> to vector<1x32xf32>
    %cst_608 = arith.constant dense<0.000000e+00> : vector<8x64xf32>
    %940 = tpu.matmul %919, %935, %cst_608 {dimension_numbers = #tpu.dot_dimension_numbers<[1], [0], [0], [1], [0, 0, 1, 1], [], []>} : vector<8x32xf32>, vector<32x64xf32>, vector<8x64xf32> -> vector<8x64xf32>
    %cst_609 = arith.constant dense<0.000000e+00> : vector<8x32xf32>
    %941 = tpu.matmul %919, %937, %cst_609 {dimension_numbers = #tpu.dot_dimension_numbers<[1], [0], [0], [1], [0, 0, 1, 1], [], []>} : vector<8x32xf32>, vector<32x32xf32>, vector<8x32xf32> -> vector<8x32xf32>
    %942 = vector.broadcast %939 : vector<1x32xf32> to vector<8x32xf32>
    %943 = arith.addf %941, %942 : vector<8x32xf32>
    %944 = arith.addf %940, %926 : vector<8x64xf32>
    %945 = arith.negf %944 : vector<8x64xf32>
    %946 = math.exp %945 : vector<8x64xf32>
    %cst_610 = arith.constant 1.000000e+00 : f32
    %947 = vector.broadcast %cst_610 : f32 to vector<8x64xf32>
    %948 = arith.addf %947, %946 : vector<8x64xf32>
    %949 = arith.divf %947, %948 : vector<8x64xf32>
    %950 = vector.extract_strided_slice %949 {offsets = [0, 0], sizes = [8, 32], strides = [1, 1]} : vector<8x64xf32> to vector<8x32xf32>
    %951 = vector.extract_strided_slice %949 {offsets = [0, 32], sizes = [8, 32], strides = [1, 1]} : vector<8x64xf32> to vector<8x32xf32>
    %952 = arith.mulf %950, %933 : vector<8x32xf32>
    %953 = arith.addf %943, %952 : vector<8x32xf32>
    %954 = math.tanh %953 : vector<8x32xf32>
    %955 = arith.subf %874, %954 : vector<8x32xf32>
    %956 = arith.mulf %951, %955 : vector<8x32xf32>
    %957 = arith.addf %954, %956 : vector<8x32xf32>
    %c1_611 = arith.constant 1 : index
    %c0_612 = arith.constant 0 : index
    %c0_613 = arith.constant 0 : index
    %958 = vector.load %arg14[%c1_611, %c0_612, %c0_613] : memref<2x32x64xf32, #tpu.memory_space<vmem>>, vector<1x32x64xf32>
    %959 = vector.shape_cast %958 : vector<1x32x64xf32> to vector<32x64xf32>
    %cst_614 = arith.constant dense<0.000000e+00> : vector<8x64xf32>
    %960 = tpu.matmul %912, %959, %cst_614 {dimension_numbers = #tpu.dot_dimension_numbers<[1], [0], [0], [1], [0, 0, 1, 1], [], []>} : vector<8x32xf32>, vector<32x64xf32>, vector<8x64xf32> -> vector<8x64xf32>
    %c1_615 = arith.constant 1 : index
    %c0_616 = arith.constant 0 : index
    %c0_617 = arith.constant 0 : index
    %961 = vector.load %arg16[%c1_615, %c0_616, %c0_617] : memref<2x1x64xf32, #tpu.memory_space<vmem>>, vector<1x1x64xf32>
    %962 = vector.shape_cast %961 : vector<1x1x64xf32> to vector<1x64xf32>
    %963 = vector.broadcast %962 : vector<1x64xf32> to vector<8x64xf32>
    %964 = arith.addf %960, %963 : vector<8x64xf32>
    %c1_618 = arith.constant 1 : index
    %c0_619 = arith.constant 0 : index
    %c0_620 = arith.constant 0 : index
    %965 = vector.load %arg15[%c1_618, %c0_619, %c0_620] : memref<2x32x32xf32, #tpu.memory_space<vmem>>, vector<1x32x32xf32>
    %966 = vector.shape_cast %965 : vector<1x32x32xf32> to vector<32x32xf32>
    %cst_621 = arith.constant dense<0.000000e+00> : vector<8x32xf32>
    %967 = tpu.matmul %912, %966, %cst_621 {dimension_numbers = #tpu.dot_dimension_numbers<[1], [0], [0], [1], [0, 0, 1, 1], [], []>} : vector<8x32xf32>, vector<32x32xf32>, vector<8x32xf32> -> vector<8x32xf32>
    %c1_622 = arith.constant 1 : index
    %c0_623 = arith.constant 0 : index
    %c0_624 = arith.constant 0 : index
    %968 = vector.load %arg18[%c1_622, %c0_623, %c0_624] : memref<2x1x32xf32, #tpu.memory_space<vmem>>, vector<1x1x32xf32>
    %969 = vector.shape_cast %968 : vector<1x1x32xf32> to vector<1x32xf32>
    %970 = vector.broadcast %969 : vector<1x32xf32> to vector<8x32xf32>
    %971 = arith.addf %967, %970 : vector<8x32xf32>
    %c1_625 = arith.constant 1 : index
    %c0_626 = arith.constant 0 : index
    %c0_627 = arith.constant 0 : index
    %972 = vector.load %arg12[%c1_625, %c0_626, %c0_627] : memref<2x32x64xf32, #tpu.memory_space<vmem>>, vector<1x32x64xf32>
    %973 = vector.shape_cast %972 : vector<1x32x64xf32> to vector<32x64xf32>
    %c1_628 = arith.constant 1 : index
    %c0_629 = arith.constant 0 : index
    %c0_630 = arith.constant 0 : index
    %974 = vector.load %arg13[%c1_628, %c0_629, %c0_630] : memref<2x32x32xf32, #tpu.memory_space<vmem>>, vector<1x32x32xf32>
    %975 = vector.shape_cast %974 : vector<1x32x32xf32> to vector<32x32xf32>
    %c1_631 = arith.constant 1 : index
    %c0_632 = arith.constant 0 : index
    %c0_633 = arith.constant 0 : index
    %976 = vector.load %arg17[%c1_631, %c0_632, %c0_633] : memref<2x1x32xf32, #tpu.memory_space<vmem>>, vector<1x1x32xf32>
    %977 = vector.shape_cast %976 : vector<1x1x32xf32> to vector<1x32xf32>
    %cst_634 = arith.constant dense<0.000000e+00> : vector<8x64xf32>
    %978 = tpu.matmul %957, %973, %cst_634 {dimension_numbers = #tpu.dot_dimension_numbers<[1], [0], [0], [1], [0, 0, 1, 1], [], []>} : vector<8x32xf32>, vector<32x64xf32>, vector<8x64xf32> -> vector<8x64xf32>
    %cst_635 = arith.constant dense<0.000000e+00> : vector<8x32xf32>
    %979 = tpu.matmul %957, %975, %cst_635 {dimension_numbers = #tpu.dot_dimension_numbers<[1], [0], [0], [1], [0, 0, 1, 1], [], []>} : vector<8x32xf32>, vector<32x32xf32>, vector<8x32xf32> -> vector<8x32xf32>
    %980 = vector.broadcast %977 : vector<1x32xf32> to vector<8x32xf32>
    %981 = arith.addf %979, %980 : vector<8x32xf32>
    %982 = arith.addf %978, %964 : vector<8x64xf32>
    %983 = arith.negf %982 : vector<8x64xf32>
    %984 = math.exp %983 : vector<8x64xf32>
    %cst_636 = arith.constant 1.000000e+00 : f32
    %985 = vector.broadcast %cst_636 : f32 to vector<8x64xf32>
    %986 = arith.addf %985, %984 : vector<8x64xf32>
    %987 = arith.divf %985, %986 : vector<8x64xf32>
    %988 = vector.extract_strided_slice %987 {offsets = [0, 0], sizes = [8, 32], strides = [1, 1]} : vector<8x64xf32> to vector<8x32xf32>
    %989 = vector.extract_strided_slice %987 {offsets = [0, 32], sizes = [8, 32], strides = [1, 1]} : vector<8x64xf32> to vector<8x32xf32>
    %990 = arith.mulf %988, %971 : vector<8x32xf32>
    %991 = arith.addf %981, %990 : vector<8x32xf32>
    %992 = math.tanh %991 : vector<8x32xf32>
    %993 = arith.subf %912, %992 : vector<8x32xf32>
    %994 = arith.mulf %989, %993 : vector<8x32xf32>
    %995 = arith.addf %992, %994 : vector<8x32xf32>
    %c0_637 = arith.constant 0 : index
    %c0_638 = arith.constant 0 : index
    %996 = vector.load %arg10[%c0_637, %c0_638] : memref<32x32xf32, #tpu.memory_space<vmem>>, vector<32x32xf32>
    %cst_639 = arith.constant dense<0.000000e+00> : vector<8x32xf32>
    %997 = tpu.matmul %995, %996, %cst_639 {dimension_numbers = #tpu.dot_dimension_numbers<[1], [0], [0], [1], [0, 0, 1, 1], [], []>} : vector<8x32xf32>, vector<32x32xf32>, vector<8x32xf32> -> vector<8x32xf32>
    %c0_640 = arith.constant 0 : index
    %c0_641 = arith.constant 0 : index
    %998 = vector.load %arg11[%c0_640, %c0_641] : memref<1x32xf32, #tpu.memory_space<vmem>>, vector<1x32xf32>
    %999 = vector.broadcast %998 : vector<1x32xf32> to vector<8x32xf32>
    %1000 = arith.addf %997, %999 : vector<8x32xf32>
    %cst_642 = arith.constant 0.000000e+00 : f32
    %1001 = vector.broadcast %cst_642 : f32 to vector<8x32xf32>
    %1002 = arith.maximumf %1000, %1001 : vector<8x32xf32>
    %c0_643 = arith.constant 0 : index
    %c0_644 = arith.constant 0 : index
    %c0_645 = arith.constant 0 : index
    %1003 = vector.load %arg14[%c0_643, %c0_644, %c0_645] : memref<2x32x64xf32, #tpu.memory_space<vmem>>, vector<1x32x64xf32>
    %1004 = vector.shape_cast %1003 : vector<1x32x64xf32> to vector<32x64xf32>
    %cst_646 = arith.constant dense<0.000000e+00> : vector<8x64xf32>
    %1005 = tpu.matmul %957, %1004, %cst_646 {dimension_numbers = #tpu.dot_dimension_numbers<[1], [0], [0], [1], [0, 0, 1, 1], [], []>} : vector<8x32xf32>, vector<32x64xf32>, vector<8x64xf32> -> vector<8x64xf32>
    %c0_647 = arith.constant 0 : index
    %c0_648 = arith.constant 0 : index
    %c0_649 = arith.constant 0 : index
    %1006 = vector.load %arg16[%c0_647, %c0_648, %c0_649] : memref<2x1x64xf32, #tpu.memory_space<vmem>>, vector<1x1x64xf32>
    %1007 = vector.shape_cast %1006 : vector<1x1x64xf32> to vector<1x64xf32>
    %1008 = vector.broadcast %1007 : vector<1x64xf32> to vector<8x64xf32>
    %1009 = arith.addf %1005, %1008 : vector<8x64xf32>
    %c0_650 = arith.constant 0 : index
    %c0_651 = arith.constant 0 : index
    %c0_652 = arith.constant 0 : index
    %1010 = vector.load %arg15[%c0_650, %c0_651, %c0_652] : memref<2x32x32xf32, #tpu.memory_space<vmem>>, vector<1x32x32xf32>
    %1011 = vector.shape_cast %1010 : vector<1x32x32xf32> to vector<32x32xf32>
    %cst_653 = arith.constant dense<0.000000e+00> : vector<8x32xf32>
    %1012 = tpu.matmul %957, %1011, %cst_653 {dimension_numbers = #tpu.dot_dimension_numbers<[1], [0], [0], [1], [0, 0, 1, 1], [], []>} : vector<8x32xf32>, vector<32x32xf32>, vector<8x32xf32> -> vector<8x32xf32>
    %c0_654 = arith.constant 0 : index
    %c0_655 = arith.constant 0 : index
    %c0_656 = arith.constant 0 : index
    %1013 = vector.load %arg18[%c0_654, %c0_655, %c0_656] : memref<2x1x32xf32, #tpu.memory_space<vmem>>, vector<1x1x32xf32>
    %1014 = vector.shape_cast %1013 : vector<1x1x32xf32> to vector<1x32xf32>
    %1015 = vector.broadcast %1014 : vector<1x32xf32> to vector<8x32xf32>
    %1016 = arith.addf %1012, %1015 : vector<8x32xf32>
    %c0_657 = arith.constant 0 : index
    %c0_658 = arith.constant 0 : index
    %c0_659 = arith.constant 0 : index
    %1017 = vector.load %arg12[%c0_657, %c0_658, %c0_659] : memref<2x32x64xf32, #tpu.memory_space<vmem>>, vector<1x32x64xf32>
    %1018 = vector.shape_cast %1017 : vector<1x32x64xf32> to vector<32x64xf32>
    %c0_660 = arith.constant 0 : index
    %c0_661 = arith.constant 0 : index
    %c0_662 = arith.constant 0 : index
    %1019 = vector.load %arg13[%c0_660, %c0_661, %c0_662] : memref<2x32x32xf32, #tpu.memory_space<vmem>>, vector<1x32x32xf32>
    %1020 = vector.shape_cast %1019 : vector<1x32x32xf32> to vector<32x32xf32>
    %c0_663 = arith.constant 0 : index
    %c0_664 = arith.constant 0 : index
    %c0_665 = arith.constant 0 : index
    %1021 = vector.load %arg17[%c0_663, %c0_664, %c0_665] : memref<2x1x32xf32, #tpu.memory_space<vmem>>, vector<1x1x32xf32>
    %1022 = vector.shape_cast %1021 : vector<1x1x32xf32> to vector<1x32xf32>
    %cst_666 = arith.constant dense<0.000000e+00> : vector<8x64xf32>
    %1023 = tpu.matmul %1002, %1018, %cst_666 {dimension_numbers = #tpu.dot_dimension_numbers<[1], [0], [0], [1], [0, 0, 1, 1], [], []>} : vector<8x32xf32>, vector<32x64xf32>, vector<8x64xf32> -> vector<8x64xf32>
    %cst_667 = arith.constant dense<0.000000e+00> : vector<8x32xf32>
    %1024 = tpu.matmul %1002, %1020, %cst_667 {dimension_numbers = #tpu.dot_dimension_numbers<[1], [0], [0], [1], [0, 0, 1, 1], [], []>} : vector<8x32xf32>, vector<32x32xf32>, vector<8x32xf32> -> vector<8x32xf32>
    %1025 = vector.broadcast %1022 : vector<1x32xf32> to vector<8x32xf32>
    %1026 = arith.addf %1024, %1025 : vector<8x32xf32>
    %1027 = arith.addf %1023, %1009 : vector<8x64xf32>
    %1028 = arith.negf %1027 : vector<8x64xf32>
    %1029 = math.exp %1028 : vector<8x64xf32>
    %cst_668 = arith.constant 1.000000e+00 : f32
    %1030 = vector.broadcast %cst_668 : f32 to vector<8x64xf32>
    %1031 = arith.addf %1030, %1029 : vector<8x64xf32>
    %1032 = arith.divf %1030, %1031 : vector<8x64xf32>
    %1033 = vector.extract_strided_slice %1032 {offsets = [0, 0], sizes = [8, 32], strides = [1, 1]} : vector<8x64xf32> to vector<8x32xf32>
    %1034 = vector.extract_strided_slice %1032 {offsets = [0, 32], sizes = [8, 32], strides = [1, 1]} : vector<8x64xf32> to vector<8x32xf32>
    %1035 = arith.mulf %1033, %1016 : vector<8x32xf32>
    %1036 = arith.addf %1026, %1035 : vector<8x32xf32>
    %1037 = math.tanh %1036 : vector<8x32xf32>
    %1038 = arith.subf %957, %1037 : vector<8x32xf32>
    %1039 = arith.mulf %1034, %1038 : vector<8x32xf32>
    %1040 = arith.addf %1037, %1039 : vector<8x32xf32>
    %c1_669 = arith.constant 1 : index
    %c0_670 = arith.constant 0 : index
    %c0_671 = arith.constant 0 : index
    %1041 = vector.load %arg14[%c1_669, %c0_670, %c0_671] : memref<2x32x64xf32, #tpu.memory_space<vmem>>, vector<1x32x64xf32>
    %1042 = vector.shape_cast %1041 : vector<1x32x64xf32> to vector<32x64xf32>
    %cst_672 = arith.constant dense<0.000000e+00> : vector<8x64xf32>
    %1043 = tpu.matmul %995, %1042, %cst_672 {dimension_numbers = #tpu.dot_dimension_numbers<[1], [0], [0], [1], [0, 0, 1, 1], [], []>} : vector<8x32xf32>, vector<32x64xf32>, vector<8x64xf32> -> vector<8x64xf32>
    %c1_673 = arith.constant 1 : index
    %c0_674 = arith.constant 0 : index
    %c0_675 = arith.constant 0 : index
    %1044 = vector.load %arg16[%c1_673, %c0_674, %c0_675] : memref<2x1x64xf32, #tpu.memory_space<vmem>>, vector<1x1x64xf32>
    %1045 = vector.shape_cast %1044 : vector<1x1x64xf32> to vector<1x64xf32>
    %1046 = vector.broadcast %1045 : vector<1x64xf32> to vector<8x64xf32>
    %1047 = arith.addf %1043, %1046 : vector<8x64xf32>
    %c1_676 = arith.constant 1 : index
    %c0_677 = arith.constant 0 : index
    %c0_678 = arith.constant 0 : index
    %1048 = vector.load %arg15[%c1_676, %c0_677, %c0_678] : memref<2x32x32xf32, #tpu.memory_space<vmem>>, vector<1x32x32xf32>
    %1049 = vector.shape_cast %1048 : vector<1x32x32xf32> to vector<32x32xf32>
    %cst_679 = arith.constant dense<0.000000e+00> : vector<8x32xf32>
    %1050 = tpu.matmul %995, %1049, %cst_679 {dimension_numbers = #tpu.dot_dimension_numbers<[1], [0], [0], [1], [0, 0, 1, 1], [], []>} : vector<8x32xf32>, vector<32x32xf32>, vector<8x32xf32> -> vector<8x32xf32>
    %c1_680 = arith.constant 1 : index
    %c0_681 = arith.constant 0 : index
    %c0_682 = arith.constant 0 : index
    %1051 = vector.load %arg18[%c1_680, %c0_681, %c0_682] : memref<2x1x32xf32, #tpu.memory_space<vmem>>, vector<1x1x32xf32>
    %1052 = vector.shape_cast %1051 : vector<1x1x32xf32> to vector<1x32xf32>
    %1053 = vector.broadcast %1052 : vector<1x32xf32> to vector<8x32xf32>
    %1054 = arith.addf %1050, %1053 : vector<8x32xf32>
    %c1_683 = arith.constant 1 : index
    %c0_684 = arith.constant 0 : index
    %c0_685 = arith.constant 0 : index
    %1055 = vector.load %arg12[%c1_683, %c0_684, %c0_685] : memref<2x32x64xf32, #tpu.memory_space<vmem>>, vector<1x32x64xf32>
    %1056 = vector.shape_cast %1055 : vector<1x32x64xf32> to vector<32x64xf32>
    %c1_686 = arith.constant 1 : index
    %c0_687 = arith.constant 0 : index
    %c0_688 = arith.constant 0 : index
    %1057 = vector.load %arg13[%c1_686, %c0_687, %c0_688] : memref<2x32x32xf32, #tpu.memory_space<vmem>>, vector<1x32x32xf32>
    %1058 = vector.shape_cast %1057 : vector<1x32x32xf32> to vector<32x32xf32>
    %c1_689 = arith.constant 1 : index
    %c0_690 = arith.constant 0 : index
    %c0_691 = arith.constant 0 : index
    %1059 = vector.load %arg17[%c1_689, %c0_690, %c0_691] : memref<2x1x32xf32, #tpu.memory_space<vmem>>, vector<1x1x32xf32>
    %1060 = vector.shape_cast %1059 : vector<1x1x32xf32> to vector<1x32xf32>
    %cst_692 = arith.constant dense<0.000000e+00> : vector<8x64xf32>
    %1061 = tpu.matmul %1040, %1056, %cst_692 {dimension_numbers = #tpu.dot_dimension_numbers<[1], [0], [0], [1], [0, 0, 1, 1], [], []>} : vector<8x32xf32>, vector<32x64xf32>, vector<8x64xf32> -> vector<8x64xf32>
    %cst_693 = arith.constant dense<0.000000e+00> : vector<8x32xf32>
    %1062 = tpu.matmul %1040, %1058, %cst_693 {dimension_numbers = #tpu.dot_dimension_numbers<[1], [0], [0], [1], [0, 0, 1, 1], [], []>} : vector<8x32xf32>, vector<32x32xf32>, vector<8x32xf32> -> vector<8x32xf32>
    %1063 = vector.broadcast %1060 : vector<1x32xf32> to vector<8x32xf32>
    %1064 = arith.addf %1062, %1063 : vector<8x32xf32>
    %1065 = arith.addf %1061, %1047 : vector<8x64xf32>
    %1066 = arith.negf %1065 : vector<8x64xf32>
    %1067 = math.exp %1066 : vector<8x64xf32>
    %cst_694 = arith.constant 1.000000e+00 : f32
    %1068 = vector.broadcast %cst_694 : f32 to vector<8x64xf32>
    %1069 = arith.addf %1068, %1067 : vector<8x64xf32>
    %1070 = arith.divf %1068, %1069 : vector<8x64xf32>
    %1071 = vector.extract_strided_slice %1070 {offsets = [0, 0], sizes = [8, 32], strides = [1, 1]} : vector<8x64xf32> to vector<8x32xf32>
    %1072 = vector.extract_strided_slice %1070 {offsets = [0, 32], sizes = [8, 32], strides = [1, 1]} : vector<8x64xf32> to vector<8x32xf32>
    %1073 = arith.mulf %1071, %1054 : vector<8x32xf32>
    %1074 = arith.addf %1064, %1073 : vector<8x32xf32>
    %1075 = math.tanh %1074 : vector<8x32xf32>
    %1076 = arith.subf %995, %1075 : vector<8x32xf32>
    %1077 = arith.mulf %1072, %1076 : vector<8x32xf32>
    %1078 = arith.addf %1075, %1077 : vector<8x32xf32>
    %c0_695 = arith.constant 0 : index
    %c0_696 = arith.constant 0 : index
    %1079 = vector.load %arg10[%c0_695, %c0_696] : memref<32x32xf32, #tpu.memory_space<vmem>>, vector<32x32xf32>
    %cst_697 = arith.constant dense<0.000000e+00> : vector<8x32xf32>
    %1080 = tpu.matmul %1078, %1079, %cst_697 {dimension_numbers = #tpu.dot_dimension_numbers<[1], [0], [0], [1], [0, 0, 1, 1], [], []>} : vector<8x32xf32>, vector<32x32xf32>, vector<8x32xf32> -> vector<8x32xf32>
    %c0_698 = arith.constant 0 : index
    %c0_699 = arith.constant 0 : index
    %1081 = vector.load %arg11[%c0_698, %c0_699] : memref<1x32xf32, #tpu.memory_space<vmem>>, vector<1x32xf32>
    %1082 = vector.broadcast %1081 : vector<1x32xf32> to vector<8x32xf32>
    %1083 = arith.addf %1080, %1082 : vector<8x32xf32>
    %cst_700 = arith.constant 0.000000e+00 : f32
    %1084 = vector.broadcast %cst_700 : f32 to vector<8x32xf32>
    %1085 = arith.maximumf %1083, %1084 : vector<8x32xf32>
    %c0_701 = arith.constant 0 : index
    %c0_702 = arith.constant 0 : index
    %c0_703 = arith.constant 0 : index
    %1086 = vector.load %arg14[%c0_701, %c0_702, %c0_703] : memref<2x32x64xf32, #tpu.memory_space<vmem>>, vector<1x32x64xf32>
    %1087 = vector.shape_cast %1086 : vector<1x32x64xf32> to vector<32x64xf32>
    %cst_704 = arith.constant dense<0.000000e+00> : vector<8x64xf32>
    %1088 = tpu.matmul %1040, %1087, %cst_704 {dimension_numbers = #tpu.dot_dimension_numbers<[1], [0], [0], [1], [0, 0, 1, 1], [], []>} : vector<8x32xf32>, vector<32x64xf32>, vector<8x64xf32> -> vector<8x64xf32>
    %c0_705 = arith.constant 0 : index
    %c0_706 = arith.constant 0 : index
    %c0_707 = arith.constant 0 : index
    %1089 = vector.load %arg16[%c0_705, %c0_706, %c0_707] : memref<2x1x64xf32, #tpu.memory_space<vmem>>, vector<1x1x64xf32>
    %1090 = vector.shape_cast %1089 : vector<1x1x64xf32> to vector<1x64xf32>
    %1091 = vector.broadcast %1090 : vector<1x64xf32> to vector<8x64xf32>
    %1092 = arith.addf %1088, %1091 : vector<8x64xf32>
    %c0_708 = arith.constant 0 : index
    %c0_709 = arith.constant 0 : index
    %c0_710 = arith.constant 0 : index
    %1093 = vector.load %arg15[%c0_708, %c0_709, %c0_710] : memref<2x32x32xf32, #tpu.memory_space<vmem>>, vector<1x32x32xf32>
    %1094 = vector.shape_cast %1093 : vector<1x32x32xf32> to vector<32x32xf32>
    %cst_711 = arith.constant dense<0.000000e+00> : vector<8x32xf32>
    %1095 = tpu.matmul %1040, %1094, %cst_711 {dimension_numbers = #tpu.dot_dimension_numbers<[1], [0], [0], [1], [0, 0, 1, 1], [], []>} : vector<8x32xf32>, vector<32x32xf32>, vector<8x32xf32> -> vector<8x32xf32>
    %c0_712 = arith.constant 0 : index
    %c0_713 = arith.constant 0 : index
    %c0_714 = arith.constant 0 : index
    %1096 = vector.load %arg18[%c0_712, %c0_713, %c0_714] : memref<2x1x32xf32, #tpu.memory_space<vmem>>, vector<1x1x32xf32>
    %1097 = vector.shape_cast %1096 : vector<1x1x32xf32> to vector<1x32xf32>
    %1098 = vector.broadcast %1097 : vector<1x32xf32> to vector<8x32xf32>
    %1099 = arith.addf %1095, %1098 : vector<8x32xf32>
    %c0_715 = arith.constant 0 : index
    %c0_716 = arith.constant 0 : index
    %c0_717 = arith.constant 0 : index
    %1100 = vector.load %arg12[%c0_715, %c0_716, %c0_717] : memref<2x32x64xf32, #tpu.memory_space<vmem>>, vector<1x32x64xf32>
    %1101 = vector.shape_cast %1100 : vector<1x32x64xf32> to vector<32x64xf32>
    %c0_718 = arith.constant 0 : index
    %c0_719 = arith.constant 0 : index
    %c0_720 = arith.constant 0 : index
    %1102 = vector.load %arg13[%c0_718, %c0_719, %c0_720] : memref<2x32x32xf32, #tpu.memory_space<vmem>>, vector<1x32x32xf32>
    %1103 = vector.shape_cast %1102 : vector<1x32x32xf32> to vector<32x32xf32>
    %c0_721 = arith.constant 0 : index
    %c0_722 = arith.constant 0 : index
    %c0_723 = arith.constant 0 : index
    %1104 = vector.load %arg17[%c0_721, %c0_722, %c0_723] : memref<2x1x32xf32, #tpu.memory_space<vmem>>, vector<1x1x32xf32>
    %1105 = vector.shape_cast %1104 : vector<1x1x32xf32> to vector<1x32xf32>
    %cst_724 = arith.constant dense<0.000000e+00> : vector<8x64xf32>
    %1106 = tpu.matmul %1085, %1101, %cst_724 {dimension_numbers = #tpu.dot_dimension_numbers<[1], [0], [0], [1], [0, 0, 1, 1], [], []>} : vector<8x32xf32>, vector<32x64xf32>, vector<8x64xf32> -> vector<8x64xf32>
    %cst_725 = arith.constant dense<0.000000e+00> : vector<8x32xf32>
    %1107 = tpu.matmul %1085, %1103, %cst_725 {dimension_numbers = #tpu.dot_dimension_numbers<[1], [0], [0], [1], [0, 0, 1, 1], [], []>} : vector<8x32xf32>, vector<32x32xf32>, vector<8x32xf32> -> vector<8x32xf32>
    %1108 = vector.broadcast %1105 : vector<1x32xf32> to vector<8x32xf32>
    %1109 = arith.addf %1107, %1108 : vector<8x32xf32>
    %1110 = arith.addf %1106, %1092 : vector<8x64xf32>
    %1111 = arith.negf %1110 : vector<8x64xf32>
    %1112 = math.exp %1111 : vector<8x64xf32>
    %cst_726 = arith.constant 1.000000e+00 : f32
    %1113 = vector.broadcast %cst_726 : f32 to vector<8x64xf32>
    %1114 = arith.addf %1113, %1112 : vector<8x64xf32>
    %1115 = arith.divf %1113, %1114 : vector<8x64xf32>
    %1116 = vector.extract_strided_slice %1115 {offsets = [0, 0], sizes = [8, 32], strides = [1, 1]} : vector<8x64xf32> to vector<8x32xf32>
    %1117 = vector.extract_strided_slice %1115 {offsets = [0, 32], sizes = [8, 32], strides = [1, 1]} : vector<8x64xf32> to vector<8x32xf32>
    %1118 = arith.mulf %1116, %1099 : vector<8x32xf32>
    %1119 = arith.addf %1109, %1118 : vector<8x32xf32>
    %1120 = math.tanh %1119 : vector<8x32xf32>
    %1121 = arith.subf %1040, %1120 : vector<8x32xf32>
    %1122 = arith.mulf %1117, %1121 : vector<8x32xf32>
    %1123 = arith.addf %1120, %1122 : vector<8x32xf32>
    %c1_727 = arith.constant 1 : index
    %c0_728 = arith.constant 0 : index
    %c0_729 = arith.constant 0 : index
    %1124 = vector.load %arg14[%c1_727, %c0_728, %c0_729] : memref<2x32x64xf32, #tpu.memory_space<vmem>>, vector<1x32x64xf32>
    %1125 = vector.shape_cast %1124 : vector<1x32x64xf32> to vector<32x64xf32>
    %cst_730 = arith.constant dense<0.000000e+00> : vector<8x64xf32>
    %1126 = tpu.matmul %1078, %1125, %cst_730 {dimension_numbers = #tpu.dot_dimension_numbers<[1], [0], [0], [1], [0, 0, 1, 1], [], []>} : vector<8x32xf32>, vector<32x64xf32>, vector<8x64xf32> -> vector<8x64xf32>
    %c1_731 = arith.constant 1 : index
    %c0_732 = arith.constant 0 : index
    %c0_733 = arith.constant 0 : index
    %1127 = vector.load %arg16[%c1_731, %c0_732, %c0_733] : memref<2x1x64xf32, #tpu.memory_space<vmem>>, vector<1x1x64xf32>
    %1128 = vector.shape_cast %1127 : vector<1x1x64xf32> to vector<1x64xf32>
    %1129 = vector.broadcast %1128 : vector<1x64xf32> to vector<8x64xf32>
    %1130 = arith.addf %1126, %1129 : vector<8x64xf32>
    %c1_734 = arith.constant 1 : index
    %c0_735 = arith.constant 0 : index
    %c0_736 = arith.constant 0 : index
    %1131 = vector.load %arg15[%c1_734, %c0_735, %c0_736] : memref<2x32x32xf32, #tpu.memory_space<vmem>>, vector<1x32x32xf32>
    %1132 = vector.shape_cast %1131 : vector<1x32x32xf32> to vector<32x32xf32>
    %cst_737 = arith.constant dense<0.000000e+00> : vector<8x32xf32>
    %1133 = tpu.matmul %1078, %1132, %cst_737 {dimension_numbers = #tpu.dot_dimension_numbers<[1], [0], [0], [1], [0, 0, 1, 1], [], []>} : vector<8x32xf32>, vector<32x32xf32>, vector<8x32xf32> -> vector<8x32xf32>
    %c1_738 = arith.constant 1 : index
    %c0_739 = arith.constant 0 : index
    %c0_740 = arith.constant 0 : index
    %1134 = vector.load %arg18[%c1_738, %c0_739, %c0_740] : memref<2x1x32xf32, #tpu.memory_space<vmem>>, vector<1x1x32xf32>
    %1135 = vector.shape_cast %1134 : vector<1x1x32xf32> to vector<1x32xf32>
    %1136 = vector.broadcast %1135 : vector<1x32xf32> to vector<8x32xf32>
    %1137 = arith.addf %1133, %1136 : vector<8x32xf32>
    %c1_741 = arith.constant 1 : index
    %c0_742 = arith.constant 0 : index
    %c0_743 = arith.constant 0 : index
    %1138 = vector.load %arg12[%c1_741, %c0_742, %c0_743] : memref<2x32x64xf32, #tpu.memory_space<vmem>>, vector<1x32x64xf32>
    %1139 = vector.shape_cast %1138 : vector<1x32x64xf32> to vector<32x64xf32>
    %c1_744 = arith.constant 1 : index
    %c0_745 = arith.constant 0 : index
    %c0_746 = arith.constant 0 : index
    %1140 = vector.load %arg13[%c1_744, %c0_745, %c0_746] : memref<2x32x32xf32, #tpu.memory_space<vmem>>, vector<1x32x32xf32>
    %1141 = vector.shape_cast %1140 : vector<1x32x32xf32> to vector<32x32xf32>
    %c1_747 = arith.constant 1 : index
    %c0_748 = arith.constant 0 : index
    %c0_749 = arith.constant 0 : index
    %1142 = vector.load %arg17[%c1_747, %c0_748, %c0_749] : memref<2x1x32xf32, #tpu.memory_space<vmem>>, vector<1x1x32xf32>
    %1143 = vector.shape_cast %1142 : vector<1x1x32xf32> to vector<1x32xf32>
    %cst_750 = arith.constant dense<0.000000e+00> : vector<8x64xf32>
    %1144 = tpu.matmul %1123, %1139, %cst_750 {dimension_numbers = #tpu.dot_dimension_numbers<[1], [0], [0], [1], [0, 0, 1, 1], [], []>} : vector<8x32xf32>, vector<32x64xf32>, vector<8x64xf32> -> vector<8x64xf32>
    %cst_751 = arith.constant dense<0.000000e+00> : vector<8x32xf32>
    %1145 = tpu.matmul %1123, %1141, %cst_751 {dimension_numbers = #tpu.dot_dimension_numbers<[1], [0], [0], [1], [0, 0, 1, 1], [], []>} : vector<8x32xf32>, vector<32x32xf32>, vector<8x32xf32> -> vector<8x32xf32>
    %1146 = vector.broadcast %1143 : vector<1x32xf32> to vector<8x32xf32>
    %1147 = arith.addf %1145, %1146 : vector<8x32xf32>
    %1148 = arith.addf %1144, %1130 : vector<8x64xf32>
    %1149 = arith.negf %1148 : vector<8x64xf32>
    %1150 = math.exp %1149 : vector<8x64xf32>
    %cst_752 = arith.constant 1.000000e+00 : f32
    %1151 = vector.broadcast %cst_752 : f32 to vector<8x64xf32>
    %1152 = arith.addf %1151, %1150 : vector<8x64xf32>
    %1153 = arith.divf %1151, %1152 : vector<8x64xf32>
    %1154 = vector.extract_strided_slice %1153 {offsets = [0, 0], sizes = [8, 32], strides = [1, 1]} : vector<8x64xf32> to vector<8x32xf32>
    %1155 = vector.extract_strided_slice %1153 {offsets = [0, 32], sizes = [8, 32], strides = [1, 1]} : vector<8x64xf32> to vector<8x32xf32>
    %1156 = arith.mulf %1154, %1137 : vector<8x32xf32>
    %1157 = arith.addf %1147, %1156 : vector<8x32xf32>
    %1158 = math.tanh %1157 : vector<8x32xf32>
    %1159 = arith.subf %1078, %1158 : vector<8x32xf32>
    %1160 = arith.mulf %1155, %1159 : vector<8x32xf32>
    %1161 = arith.addf %1158, %1160 : vector<8x32xf32>
    %c0_753 = arith.constant 0 : index
    %c0_754 = arith.constant 0 : index
    %1162 = vector.load %arg10[%c0_753, %c0_754] : memref<32x32xf32, #tpu.memory_space<vmem>>, vector<32x32xf32>
    %cst_755 = arith.constant dense<0.000000e+00> : vector<8x32xf32>
    %1163 = tpu.matmul %1161, %1162, %cst_755 {dimension_numbers = #tpu.dot_dimension_numbers<[1], [0], [0], [1], [0, 0, 1, 1], [], []>} : vector<8x32xf32>, vector<32x32xf32>, vector<8x32xf32> -> vector<8x32xf32>
    %c0_756 = arith.constant 0 : index
    %c0_757 = arith.constant 0 : index
    %1164 = vector.load %arg11[%c0_756, %c0_757] : memref<1x32xf32, #tpu.memory_space<vmem>>, vector<1x32xf32>
    %1165 = vector.broadcast %1164 : vector<1x32xf32> to vector<8x32xf32>
    %1166 = arith.addf %1163, %1165 : vector<8x32xf32>
    %cst_758 = arith.constant 0.000000e+00 : f32
    %1167 = vector.broadcast %cst_758 : f32 to vector<8x32xf32>
    %1168 = arith.maximumf %1166, %1167 : vector<8x32xf32>
    %c0_759 = arith.constant 0 : index
    %c0_760 = arith.constant 0 : index
    %c0_761 = arith.constant 0 : index
    %1169 = vector.load %arg14[%c0_759, %c0_760, %c0_761] : memref<2x32x64xf32, #tpu.memory_space<vmem>>, vector<1x32x64xf32>
    %1170 = vector.shape_cast %1169 : vector<1x32x64xf32> to vector<32x64xf32>
    %cst_762 = arith.constant dense<0.000000e+00> : vector<8x64xf32>
    %1171 = tpu.matmul %1123, %1170, %cst_762 {dimension_numbers = #tpu.dot_dimension_numbers<[1], [0], [0], [1], [0, 0, 1, 1], [], []>} : vector<8x32xf32>, vector<32x64xf32>, vector<8x64xf32> -> vector<8x64xf32>
    %c0_763 = arith.constant 0 : index
    %c0_764 = arith.constant 0 : index
    %c0_765 = arith.constant 0 : index
    %1172 = vector.load %arg16[%c0_763, %c0_764, %c0_765] : memref<2x1x64xf32, #tpu.memory_space<vmem>>, vector<1x1x64xf32>
    %1173 = vector.shape_cast %1172 : vector<1x1x64xf32> to vector<1x64xf32>
    %1174 = vector.broadcast %1173 : vector<1x64xf32> to vector<8x64xf32>
    %1175 = arith.addf %1171, %1174 : vector<8x64xf32>
    %c0_766 = arith.constant 0 : index
    %c0_767 = arith.constant 0 : index
    %c0_768 = arith.constant 0 : index
    %1176 = vector.load %arg15[%c0_766, %c0_767, %c0_768] : memref<2x32x32xf32, #tpu.memory_space<vmem>>, vector<1x32x32xf32>
    %1177 = vector.shape_cast %1176 : vector<1x32x32xf32> to vector<32x32xf32>
    %cst_769 = arith.constant dense<0.000000e+00> : vector<8x32xf32>
    %1178 = tpu.matmul %1123, %1177, %cst_769 {dimension_numbers = #tpu.dot_dimension_numbers<[1], [0], [0], [1], [0, 0, 1, 1], [], []>} : vector<8x32xf32>, vector<32x32xf32>, vector<8x32xf32> -> vector<8x32xf32>
    %c0_770 = arith.constant 0 : index
    %c0_771 = arith.constant 0 : index
    %c0_772 = arith.constant 0 : index
    %1179 = vector.load %arg18[%c0_770, %c0_771, %c0_772] : memref<2x1x32xf32, #tpu.memory_space<vmem>>, vector<1x1x32xf32>
    %1180 = vector.shape_cast %1179 : vector<1x1x32xf32> to vector<1x32xf32>
    %1181 = vector.broadcast %1180 : vector<1x32xf32> to vector<8x32xf32>
    %1182 = arith.addf %1178, %1181 : vector<8x32xf32>
    %c0_773 = arith.constant 0 : index
    %c0_774 = arith.constant 0 : index
    %c0_775 = arith.constant 0 : index
    %1183 = vector.load %arg12[%c0_773, %c0_774, %c0_775] : memref<2x32x64xf32, #tpu.memory_space<vmem>>, vector<1x32x64xf32>
    %1184 = vector.shape_cast %1183 : vector<1x32x64xf32> to vector<32x64xf32>
    %c0_776 = arith.constant 0 : index
    %c0_777 = arith.constant 0 : index
    %c0_778 = arith.constant 0 : index
    %1185 = vector.load %arg13[%c0_776, %c0_777, %c0_778] : memref<2x32x32xf32, #tpu.memory_space<vmem>>, vector<1x32x32xf32>
    %1186 = vector.shape_cast %1185 : vector<1x32x32xf32> to vector<32x32xf32>
    %c0_779 = arith.constant 0 : index
    %c0_780 = arith.constant 0 : index
    %c0_781 = arith.constant 0 : index
    %1187 = vector.load %arg17[%c0_779, %c0_780, %c0_781] : memref<2x1x32xf32, #tpu.memory_space<vmem>>, vector<1x1x32xf32>
    %1188 = vector.shape_cast %1187 : vector<1x1x32xf32> to vector<1x32xf32>
    %cst_782 = arith.constant dense<0.000000e+00> : vector<8x64xf32>
    %1189 = tpu.matmul %1168, %1184, %cst_782 {dimension_numbers = #tpu.dot_dimension_numbers<[1], [0], [0], [1], [0, 0, 1, 1], [], []>} : vector<8x32xf32>, vector<32x64xf32>, vector<8x64xf32> -> vector<8x64xf32>
    %cst_783 = arith.constant dense<0.000000e+00> : vector<8x32xf32>
    %1190 = tpu.matmul %1168, %1186, %cst_783 {dimension_numbers = #tpu.dot_dimension_numbers<[1], [0], [0], [1], [0, 0, 1, 1], [], []>} : vector<8x32xf32>, vector<32x32xf32>, vector<8x32xf32> -> vector<8x32xf32>
    %1191 = vector.broadcast %1188 : vector<1x32xf32> to vector<8x32xf32>
    %1192 = arith.addf %1190, %1191 : vector<8x32xf32>
    %1193 = arith.addf %1189, %1175 : vector<8x64xf32>
    %1194 = arith.negf %1193 : vector<8x64xf32>
    %1195 = math.exp %1194 : vector<8x64xf32>
    %cst_784 = arith.constant 1.000000e+00 : f32
    %1196 = vector.broadcast %cst_784 : f32 to vector<8x64xf32>
    %1197 = arith.addf %1196, %1195 : vector<8x64xf32>
    %1198 = arith.divf %1196, %1197 : vector<8x64xf32>
    %1199 = vector.extract_strided_slice %1198 {offsets = [0, 0], sizes = [8, 32], strides = [1, 1]} : vector<8x64xf32> to vector<8x32xf32>
    %1200 = vector.extract_strided_slice %1198 {offsets = [0, 32], sizes = [8, 32], strides = [1, 1]} : vector<8x64xf32> to vector<8x32xf32>
    %1201 = arith.mulf %1199, %1182 : vector<8x32xf32>
    %1202 = arith.addf %1192, %1201 : vector<8x32xf32>
    %1203 = math.tanh %1202 : vector<8x32xf32>
    %1204 = arith.subf %1123, %1203 : vector<8x32xf32>
    %1205 = arith.mulf %1200, %1204 : vector<8x32xf32>
    %1206 = arith.addf %1203, %1205 : vector<8x32xf32>
    %c1_785 = arith.constant 1 : index
    %c0_786 = arith.constant 0 : index
    %c0_787 = arith.constant 0 : index
    %1207 = vector.load %arg14[%c1_785, %c0_786, %c0_787] : memref<2x32x64xf32, #tpu.memory_space<vmem>>, vector<1x32x64xf32>
    %1208 = vector.shape_cast %1207 : vector<1x32x64xf32> to vector<32x64xf32>
    %cst_788 = arith.constant dense<0.000000e+00> : vector<8x64xf32>
    %1209 = tpu.matmul %1161, %1208, %cst_788 {dimension_numbers = #tpu.dot_dimension_numbers<[1], [0], [0], [1], [0, 0, 1, 1], [], []>} : vector<8x32xf32>, vector<32x64xf32>, vector<8x64xf32> -> vector<8x64xf32>
    %c1_789 = arith.constant 1 : index
    %c0_790 = arith.constant 0 : index
    %c0_791 = arith.constant 0 : index
    %1210 = vector.load %arg16[%c1_789, %c0_790, %c0_791] : memref<2x1x64xf32, #tpu.memory_space<vmem>>, vector<1x1x64xf32>
    %1211 = vector.shape_cast %1210 : vector<1x1x64xf32> to vector<1x64xf32>
    %1212 = vector.broadcast %1211 : vector<1x64xf32> to vector<8x64xf32>
    %1213 = arith.addf %1209, %1212 : vector<8x64xf32>
    %c1_792 = arith.constant 1 : index
    %c0_793 = arith.constant 0 : index
    %c0_794 = arith.constant 0 : index
    %1214 = vector.load %arg15[%c1_792, %c0_793, %c0_794] : memref<2x32x32xf32, #tpu.memory_space<vmem>>, vector<1x32x32xf32>
    %1215 = vector.shape_cast %1214 : vector<1x32x32xf32> to vector<32x32xf32>
    %cst_795 = arith.constant dense<0.000000e+00> : vector<8x32xf32>
    %1216 = tpu.matmul %1161, %1215, %cst_795 {dimension_numbers = #tpu.dot_dimension_numbers<[1], [0], [0], [1], [0, 0, 1, 1], [], []>} : vector<8x32xf32>, vector<32x32xf32>, vector<8x32xf32> -> vector<8x32xf32>
    %c1_796 = arith.constant 1 : index
    %c0_797 = arith.constant 0 : index
    %c0_798 = arith.constant 0 : index
    %1217 = vector.load %arg18[%c1_796, %c0_797, %c0_798] : memref<2x1x32xf32, #tpu.memory_space<vmem>>, vector<1x1x32xf32>
    %1218 = vector.shape_cast %1217 : vector<1x1x32xf32> to vector<1x32xf32>
    %1219 = vector.broadcast %1218 : vector<1x32xf32> to vector<8x32xf32>
    %1220 = arith.addf %1216, %1219 : vector<8x32xf32>
    %c1_799 = arith.constant 1 : index
    %c0_800 = arith.constant 0 : index
    %c0_801 = arith.constant 0 : index
    %1221 = vector.load %arg12[%c1_799, %c0_800, %c0_801] : memref<2x32x64xf32, #tpu.memory_space<vmem>>, vector<1x32x64xf32>
    %1222 = vector.shape_cast %1221 : vector<1x32x64xf32> to vector<32x64xf32>
    %c1_802 = arith.constant 1 : index
    %c0_803 = arith.constant 0 : index
    %c0_804 = arith.constant 0 : index
    %1223 = vector.load %arg13[%c1_802, %c0_803, %c0_804] : memref<2x32x32xf32, #tpu.memory_space<vmem>>, vector<1x32x32xf32>
    %1224 = vector.shape_cast %1223 : vector<1x32x32xf32> to vector<32x32xf32>
    %c1_805 = arith.constant 1 : index
    %c0_806 = arith.constant 0 : index
    %c0_807 = arith.constant 0 : index
    %1225 = vector.load %arg17[%c1_805, %c0_806, %c0_807] : memref<2x1x32xf32, #tpu.memory_space<vmem>>, vector<1x1x32xf32>
    %1226 = vector.shape_cast %1225 : vector<1x1x32xf32> to vector<1x32xf32>
    %cst_808 = arith.constant dense<0.000000e+00> : vector<8x64xf32>
    %1227 = tpu.matmul %1206, %1222, %cst_808 {dimension_numbers = #tpu.dot_dimension_numbers<[1], [0], [0], [1], [0, 0, 1, 1], [], []>} : vector<8x32xf32>, vector<32x64xf32>, vector<8x64xf32> -> vector<8x64xf32>
    %cst_809 = arith.constant dense<0.000000e+00> : vector<8x32xf32>
    %1228 = tpu.matmul %1206, %1224, %cst_809 {dimension_numbers = #tpu.dot_dimension_numbers<[1], [0], [0], [1], [0, 0, 1, 1], [], []>} : vector<8x32xf32>, vector<32x32xf32>, vector<8x32xf32> -> vector<8x32xf32>
    %1229 = vector.broadcast %1226 : vector<1x32xf32> to vector<8x32xf32>
    %1230 = arith.addf %1228, %1229 : vector<8x32xf32>
    %1231 = arith.addf %1227, %1213 : vector<8x64xf32>
    %1232 = arith.negf %1231 : vector<8x64xf32>
    %1233 = math.exp %1232 : vector<8x64xf32>
    %cst_810 = arith.constant 1.000000e+00 : f32
    %1234 = vector.broadcast %cst_810 : f32 to vector<8x64xf32>
    %1235 = arith.addf %1234, %1233 : vector<8x64xf32>
    %1236 = arith.divf %1234, %1235 : vector<8x64xf32>
    %1237 = vector.extract_strided_slice %1236 {offsets = [0, 0], sizes = [8, 32], strides = [1, 1]} : vector<8x64xf32> to vector<8x32xf32>
    %1238 = vector.extract_strided_slice %1236 {offsets = [0, 32], sizes = [8, 32], strides = [1, 1]} : vector<8x64xf32> to vector<8x32xf32>
    %1239 = arith.mulf %1237, %1220 : vector<8x32xf32>
    %1240 = arith.addf %1230, %1239 : vector<8x32xf32>
    %1241 = math.tanh %1240 : vector<8x32xf32>
    %1242 = arith.subf %1161, %1241 : vector<8x32xf32>
    %1243 = arith.mulf %1238, %1242 : vector<8x32xf32>
    %1244 = arith.addf %1241, %1243 : vector<8x32xf32>
    %1245 = tpu.concatenate %663, %746, %829, %912, %995, %1078, %1161, %1244 in 0 : vector<8x32xf32>, vector<8x32xf32>, vector<8x32xf32>, vector<8x32xf32>, vector<8x32xf32>, vector<8x32xf32>, vector<8x32xf32>, vector<8x32xf32> -> vector<64x32xf32>
    %c0_811 = arith.constant 0 : index
    %c0_812 = arith.constant 0 : index
    %1246 = vector.load %arg19[%c0_811, %c0_812] : memref<32x2xf32, #tpu.memory_space<vmem>>, vector<32x2xf32>
    %cst_813 = arith.constant dense<0.000000e+00> : vector<64x2xf32>
    %1247 = tpu.matmul %1245, %1246, %cst_813 {dimension_numbers = #tpu.dot_dimension_numbers<[1], [0], [0], [1], [0, 0, 1, 1], [], []>} : vector<64x32xf32>, vector<32x2xf32>, vector<64x2xf32> -> vector<64x2xf32>
    %c0_814 = arith.constant 0 : index
    %c0_815 = arith.constant 0 : index
    %1248 = vector.load %arg20[%c0_814, %c0_815] : memref<1x2xf32, #tpu.memory_space<vmem>>, vector<1x2xf32>
    %1249 = vector.broadcast %1248 : vector<1x2xf32> to vector<64x2xf32>
    %1250 = arith.addf %1247, %1249 : vector<64x2xf32>
    %1251 = vector.shape_cast %1250 : vector<64x2xf32> to vector<8x8x2xf32>
    %1252 = vector.extract_strided_slice %1251 {offsets = [0, 0, 0], sizes = [8, 1, 2], strides = [1, 1, 1]} : vector<8x8x2xf32> to vector<8x1x2xf32>
    %1253 = vector.shape_cast %1252 : vector<8x1x2xf32> to vector<8x2xf32>
    %1254 = vector.extract_strided_slice %1251 {offsets = [0, 1, 0], sizes = [8, 1, 2], strides = [1, 1, 1]} : vector<8x8x2xf32> to vector<8x1x2xf32>
    %1255 = vector.shape_cast %1254 : vector<8x1x2xf32> to vector<8x2xf32>
    %1256 = vector.extract_strided_slice %1251 {offsets = [0, 2, 0], sizes = [8, 1, 2], strides = [1, 1, 1]} : vector<8x8x2xf32> to vector<8x1x2xf32>
    %1257 = vector.shape_cast %1256 : vector<8x1x2xf32> to vector<8x2xf32>
    %1258 = vector.extract_strided_slice %1251 {offsets = [0, 3, 0], sizes = [8, 1, 2], strides = [1, 1, 1]} : vector<8x8x2xf32> to vector<8x1x2xf32>
    %1259 = vector.shape_cast %1258 : vector<8x1x2xf32> to vector<8x2xf32>
    %1260 = vector.extract_strided_slice %1251 {offsets = [0, 4, 0], sizes = [8, 1, 2], strides = [1, 1, 1]} : vector<8x8x2xf32> to vector<8x1x2xf32>
    %1261 = vector.shape_cast %1260 : vector<8x1x2xf32> to vector<8x2xf32>
    %1262 = vector.extract_strided_slice %1251 {offsets = [0, 5, 0], sizes = [8, 1, 2], strides = [1, 1, 1]} : vector<8x8x2xf32> to vector<8x1x2xf32>
    %1263 = vector.shape_cast %1262 : vector<8x1x2xf32> to vector<8x2xf32>
    %1264 = vector.extract_strided_slice %1251 {offsets = [0, 6, 0], sizes = [8, 1, 2], strides = [1, 1, 1]} : vector<8x8x2xf32> to vector<8x1x2xf32>
    %1265 = vector.shape_cast %1264 : vector<8x1x2xf32> to vector<8x2xf32>
    %1266 = vector.extract_strided_slice %1251 {offsets = [0, 7, 0], sizes = [8, 1, 2], strides = [1, 1, 1]} : vector<8x8x2xf32> to vector<8x1x2xf32>
    %1267 = vector.shape_cast %1266 : vector<8x1x2xf32> to vector<8x2xf32>
    %1268 = vector.shape_cast %1253 : vector<8x2xf32> to vector<1x8x2xf32>
    %1269 = vector.shape_cast %1255 : vector<8x2xf32> to vector<1x8x2xf32>
    %1270 = vector.shape_cast %1257 : vector<8x2xf32> to vector<1x8x2xf32>
    %1271 = vector.shape_cast %1259 : vector<8x2xf32> to vector<1x8x2xf32>
    %1272 = vector.shape_cast %1261 : vector<8x2xf32> to vector<1x8x2xf32>
    %1273 = vector.shape_cast %1263 : vector<8x2xf32> to vector<1x8x2xf32>
    %1274 = vector.shape_cast %1265 : vector<8x2xf32> to vector<1x8x2xf32>
    %1275 = vector.shape_cast %1267 : vector<8x2xf32> to vector<1x8x2xf32>
    %1276 = tpu.concatenate %1268, %1269, %1270, %1271, %1272, %1273, %1274, %1275 in 0 : vector<1x8x2xf32>, vector<1x8x2xf32>, vector<1x8x2xf32>, vector<1x8x2xf32>, vector<1x8x2xf32>, vector<1x8x2xf32>, vector<1x8x2xf32>, vector<1x8x2xf32> -> vector<8x8x2xf32>
    %c0_816 = arith.constant 0 : index
    %c0_817 = arith.constant 0 : index
    %c0_818 = arith.constant 0 : index
    %1277 = vector.load %arg21[%c0_816, %c0_817, %c0_818] : memref<8x8x2xf32, #tpu.memory_space<vmem>>, vector<8x8x2xf32>
    tpu.vector_store %arg21[%c0_816, %c0_817, %c0_818], %1276 {strides = array<i32>} : memref<8x8x2xf32, #tpu.memory_space<vmem>>, vector<8x8x2xf32>,
    return
  }
}

</mosaic_0001>

<bundles_post_ra>
// kernel: future_seq2seq.1
= control target key start
LH: loop header
LB: loop body
LE: loop exit
PB: predicated region body
PF: predicated region fallthrough
CT: control target
= control target key end

     0   :  { %s7069_s0 = inlined_call_operand.vmem [shape: f32[8,8,2], index: 0, kind: input, shape index: {}]   ;;  %s7070_s1 = inlined_call_operand.vmem [shape: f32[2,32], index: 1, kind: input, shape index: {}]   ;;  %s7071_s2 = inlined_call_operand.vmem [shape: f32[1,32], index: 2, kind: input, shape index: {}]   ;;  %s7072_s3 = inlined_call_operand.vmem [shape: f32[2,32,64], index: 3, kind: input, shape index: {}]   ;;  %s7073_s4 = inlined_call_operand.hbm [shape: f32[2,32,32], index: 4, kind: input, shape index: {}]   ;;  %s7074_s5 = inlined_call_operand.hbm [shape: f32[2,32,64], index: 5, kind: input, shape index: {}]   ;;  %s7075_s6 = inlined_call_operand.hbm [shape: f32[2,32,32], index: 6, kind: input, shape index: {}]   ;;  %s7076_s7 = inlined_call_operand.vmem [shape: f32[2,1,64], index: 7, kind: input, shape index: {}]   ;;  %s7077_s8 = inlined_call_operand.vmem [shape: f32[2,1,32], index: 8, kind: input, shape index: {}]   ;;  %s7078_s9 = inlined_call_operand.vmem [shape: f32[2,1,32], index: 9, kind: input, shape index: {}]   ;;  %s7079_s10 = inlined_call_operand.vmem [shape: f32[32,32], index: 10, kind: input, shape index: {}]   ;;  %s7080_s11 = inlined_call_operand.vmem [shape: f32[1,32], index: 11, kind: input, shape index: {}]   ;;  %s7081_s12 = inlined_call_operand.hbm [shape: f32[2,32,64], index: 12, kind: input, shape index: {}]   ;;  %s7082_s13 = inlined_call_operand.hbm [shape: f32[2,32,32], index: 13, kind: input, shape index: {}]   ;;  %s7083_s14 = inlined_call_operand.hbm [shape: f32[2,32,64], index: 14, kind: input, shape index: {}]   ;;  %s7084_s15 = inlined_call_operand.hbm [shape: f32[2,32,32], index: 15, kind: input, shape index: {}]   ;;  %s7085_s16 = inlined_call_operand.vmem [shape: f32[2,1,64], index: 16, kind: input, shape index: {}]   ;;  %s7086_s17 = inlined_call_operand.vmem [shape: f32[2,1,32], index: 17, kind: input, shape index: {}]   ;;  %s7087_s18 = inlined_call_operand.vmem [shape: f32[2,1,32], index: 18, kind: input, shape index: {}]   ;;  %s7088_s19 = inlined_call_operand.vmem [shape: f32[32,2], index: 19, kind: input, shape index: {}]   ;;  %s7089_s20 = inlined_call_operand.vmem [shape: f32[1,2], index: 20, kind: input, shape index: {}]   ;;  %s7090_s21 = inlined_call_operand.vmem [shape: f32[8,8,2], index: 21, kind: output, shape index: {}]  }
   0x1   :  { %7093 = sst [smem:[#allocation17_spill]] %s7069_s0 }
   0x2   :  { %7094 = sst [smem:[#allocation18_spill]] %s7070_s1 }
   0x3   :  { %7095 = sst [smem:[#allocation19_spill]] %s7071_s2 }
   0x4   :  { %7096 = sst [smem:[#allocation20_spill]] %s7072_s3 }
   0x5   :  { %7097 = sst [smem:[#allocation21_spill]] %s7073_s4 }
   0x6   :  { %7098 = sst [smem:[#allocation22_spill]] %s7074_s5 }
   0x7   :  { %26 = vsyncpa [#allocation3], 0 }
   0x8   :  { %27 = vsyncpa [#allocation5], 0 }
   0x9   :  { %28 = vsyncpa [#allocation8], 0 }
   0xa   :  { %29 = vsyncpa [#allocation11], 0  ;;  %s7099_s26 = sld [smem:[#allocation22_spill]]  ;;  %s5169_s3 = smov [#allocation4]  }
   0xb   :  { %s57_s28 = sshll.u32 %s5169_s3, 4  ;;  %s91_s4 = sshll.u32 %s7081_s12, 4  ;;  %s58_s28 = int_to_ptr.vmem [resolvable:$true] %s57_s28  ;;  %s92_s4 = int_to_ptr.hbm [resolvable:$true] %s91_s4 }
   0xc   :  { %s5170_s30 = smov 128   ;;  %s5171_s5 = smov 8  }
   0xd   :  { %s5172_s22 = smov [#allocation7]   ;;  %s117_s2 = sshll.u32 %s7083_s14, 4  ;;  %s118_s2 = int_to_ptr.hbm [resolvable:$true] %s117_s2 }
   0xe   :  { %s93_s23 = sshll.u32 %s5172_s22, 4  ;;  %s5173_s29 = smov [#allocation10]   ;;  %s94_s23 = int_to_ptr.vmem [resolvable:$true] %s93_s23 }
   0xf   :  { %99 = dma.hbm_to_vmem [thread:$0]  %s92_s4, 1024, %s94_s23, [#allocation8], %s5170_s30, %s5170_s30, %s5171_s5  }
  0x10   :  { %s55_s27 = sshll.u32 %s7099_s26, 4  ;;  %s7100_s26 = sld [smem:[#allocation21_spill]]  ;;  %s56_s27 = int_to_ptr.hbm [resolvable:$true] %s55_s27 }
  0x11   :  { %63 = dma.hbm_to_vmem [thread:$0]  %s56_s27, 1024, %s58_s28, [#allocation5], %s5170_s30, %s5170_s30, %s5171_s5  }
  0x12   :  { %s119_s0 = sshll.u32 %s5173_s29, 4  ;;  %s5174_s27 = smov [#allocation2]   ;;  %s120_s0 = int_to_ptr.vmem [resolvable:$true] %s119_s0 }
  0x13   :  { %125 = dma.hbm_to_vmem [thread:$0]  %s118_s2, 1024, %s120_s0, [#allocation11], %s5170_s30, %s5170_s30, %s5171_s5  }
  0x14   :  { %s44_s14 = sshll.u32 %s5174_s27, 4  ;;  %s68_s1 = sshll.u32 %s7075_s6, 4  ;;  %s45_s14 = int_to_ptr.vmem [resolvable:$true] %s44_s14  ;;  %s69_s1 = int_to_ptr.hbm [resolvable:$true] %s68_s1 }
  0x15   :  { %s104_s24 = sshll.u32 %s7082_s13, 4  ;;  %s5175_s12 = smov [#allocation6]   ;;  %s105_s24 = int_to_ptr.hbm [resolvable:$true] %s104_s24 }
  0x16   :  { %s42_s3 = sshll.u32 %s7100_s26, 4  ;;  %s70_s25 = sshll.u32 %s5175_s12, 4  ;;  %s43_s3 = int_to_ptr.hbm [resolvable:$true] %s42_s3  ;;  %s71_s25 = int_to_ptr.vmem [resolvable:$true] %s70_s25 }
  0x17   :  { %50 = dma.hbm_to_vmem [thread:$0]  %s43_s3, 1024, %s45_s14, [#allocation3], %s5170_s30, %s5170_s30, %s5171_s5  }
  0x18   :  { %76 = dma.hbm_to_vmem [thread:$0]  %s69_s1, 1024, %s71_s25, [#allocation5], %s5170_s30, %s5170_s30, %s5171_s5  }
  0x19   :  { %s5176_s2 = smov [#allocation9]   ;;  %s130_s0 = sshll.u32 %s7084_s15, 4  ;;  %s131_s0 = int_to_ptr.hbm [resolvable:$true] %s130_s0 }
  0x1a   :  { %s106_s6 = sshll.u32 %s5176_s2, 4  ;;  %s5177_s13 = smov [#allocation12]   ;;  %s107_s6 = int_to_ptr.vmem [resolvable:$true] %s106_s6 }
  0x1b   :  { %112 = dma.hbm_to_vmem [thread:$0]  %s105_s24, 1024, %s107_s6, [#allocation8], %s5170_s30, %s5170_s30, %s5171_s5  }
  0x1c   :  { %s132_s3 = sshll.u32 %s5177_s13, 4  ;;  %s133_s3 = int_to_ptr.vmem [resolvable:$true] %s132_s3 }
  0x1d   :  { %138 = dma.hbm_to_vmem [thread:$0]  %s131_s0, 1024, %s133_s3, [#allocation11], %s5170_s30, %s5170_s30, %s5171_s5  }
  0x1e   :  { %5161 = dma.done.wait [#allocation3], 1024  }
  0x1f   :  { %5162 = vsyncadd [#allocation3], 4294966272 }
  0x20   :  { %5163 = dma.done.wait [#allocation5], 2048  }
  0x21   :  { %5164 = vsyncadd [#allocation5], 4294965248 }
  0x22   :  { %5165 = dma.done.wait [#allocation8], 2048  }
  0x23   :  { %5166 = vsyncadd [#allocation8], 4294965248 }
  0x24   :  { %5167 = dma.done.wait [#allocation11], 2048  }
  0x25   :  { %5168 = vsyncadd [#allocation11], 4294965248  ;;  %vm334_vm0 = vcmask 1041408   ;;  %vm194_vm1 = vcmask 1041409   ;;  %vm197_vm2 = vcmask 1042434   ;;  %vm200_vm3 = vcmask 1043459  }
  0x26   :  { %vm203_vm4 = vcmask 1044484   ;;  %vm206_vm5 = vcmask 1045509   ;;  %vm209_vm6 = vcmask 1046534   ;;  %s7101_s14 = sld [smem:[#allocation18_spill]]  ;;  %vm212_vm7 = vcmask 1047559   ;;  %v5391_v19 = vld [vmem:[#allocation4 + $0x18] sm:$0xff] }
  0x27   :  { %s7102_s28 = sld [smem:[#allocation17_spill]]  ;;  %vm317_vm8 = vcmask 15360   ;;  %v5393_v20 = vld [vmem:[#allocation4 + $0x10] sm:$0xff]  ;;  %v5413_v34 = vld [vmem:[#allocation4 + $0x8] sm:$0xff]  ;;  %v5422_v40 = vld [vmem:[#allocation4] sm:$0xff]  ;;  %vm391_vm9 = vcmask 261120  }
  0x28   :  { %s7104_s12 = sld [smem:[#allocation19_spill]]  ;;  %s5179_s13 = smov 32  }
  0x29   :  { %s5180_s3 = smov 96  }
  0x2c   :  { %v312_v0 = vld [vmem:[%s7101_s14] sm:$0x3]  ;;  %s7103_s14 = sld [smem:[#allocation20_spill]] }
  0x2d   :  { %v5339_v1 = vld [vmem:[%s7102_s28] sm:$0xff]  ;;  %v5344_v2 = vld [vmem:[%s7102_s28 + $0x8] sm:$0xff]  ;;  %4465 = vmatpush.msk.msra.mxu0 %vm334_vm0, %v312_v0  ;;  %v5350_v3 = vld [vmem:[%s7102_s28 + $0x10] sm:$0xff]  ;;  %4698 = vmatpush.msk.msra.mxu1 %vm334_vm0, %v312_v0 }
  0x2e   :  { %v5355_v4 = vld [vmem:[%s7102_s28 + $0x18] sm:$0xff]  ;;  %v5360_v5 = vld [vmem:[%s7102_s28 + $0x20] sm:$0xff]  ;;  %v193_v6 = vrot.slane %v5344_v2, 7  ;;  %v214_v7 = vrot.slane %v5339_v1, 1  ;;  %v228_v8 = vrot.slane %v5339_v1, 2  ;;  %v5369_v9 = vld [vmem:[%s7102_s28 + $0x28] sm:$0xff]  ;;  %4699 = vmatpush.msk.msra.mxu2 %vm334_vm0, %v312_v0  ;;  %4700 = vmatpush.msk.msra.mxu3 %vm334_vm0, %v312_v0 }
  0x2f   :  { %v5374_v10 = vld [vmem:[%s7102_s28 + $0x30] sm:$0xff]  ;;  %v5379_v11 = vld [vmem:[%s7102_s28 + $0x38] sm:$0xff]  ;;  %v196_v12 = vrot.slane %v5350_v3, 6  ;;  %v199_v13 = vrot.slane %v5355_v4, 5  ;;  %v202_v14 = vrot.slane %v5360_v5, 4  ;;  %v205_v16 = vrot.slane %v5369_v9, 3 }
  0x30   :  { %v195_v15 = vsel %vm194_vm1, %v193_v6, %v5339_v1  ;;  %v208_v17 = vrot.slane %v5374_v10, 2  ;;  %v211_v18 = vrot.slane %v5379_v11, 1  ;;  %v215_v22 = vsel %vm194_vm1, %v5344_v2, %v214_v7  ;;  %529 = vmatpush.msrb.mxu3 %v5391_v19 }
  0x31   :  { %v198_v21 = vsel %vm197_vm2, %v196_v12, %v195_v15  ;;  %v216_v23 = vrot.slane %v5350_v3, 7  ;;  %v218_v24 = vrot.slane %v5355_v4, 6  ;;  %v220_v26 = vrot.slane %v5360_v5, 5 }
  0x32   :  { %v201_v25 = vsel %vm200_vm3, %v199_v13, %v198_v21  ;;  %v222_v27 = vrot.slane %v5369_v9, 4  ;;  %v224_v28 = vrot.slane %v5374_v10, 3  ;;  %v226_v31 = vrot.slane %v5379_v11, 2  ;;  %530 = vmatpush.msrb.mxu3 %v5393_v20  ;;  %v390_v33 = vld [vmem:[%s7103_s14 + $0x18] sm:$0xff]  ;;  %v389_v35 = vld [vmem:[%s7103_s14 + $0x10] sm:$0xff]  ;;  %v388_v45 = vld [vmem:[%s7103_s14 + $0x8] sm:$0xff] }
  0x33   :  { %v204_v29 = vsel %vm203_vm4, %v202_v14, %v201_v25  ;;  %v217_v30 = vsel %vm197_vm2, %v216_v23, %v215_v22  ;;  %v229_v32 = vrot.slane %v5344_v2, 1  ;;  %v232_v38 = vrot.slane %v5355_v4, 7  ;;  %428 = vmatpush.msrb.mxu1 %v390_v33  ;;  %v460_v14 = vld [vmem:[#allocation2 + $0x18] sm:$0xff] }
  0x34   :  { %v207_v36 = vsel %vm206_vm5, %v205_v16, %v204_v29  ;;  %v219_v37 = vsel %vm200_vm3, %v218_v24, %v217_v30  ;;  %v234_v39 = vrot.slane %v5360_v5, 6  ;;  %v236_v44 = vrot.slane %v5369_v9, 5  ;;  %531 = vmatpush.msrb.mxu3 %v5413_v34  ;;  %477 = vmatpush.msrb.mxu2 %v460_v14 }
  0x35   :  { %v210_v41 = vsel %vm209_vm6, %v208_v17, %v207_v36  ;;  %v221_v42 = vsel %vm203_vm4, %v220_v26, %v219_v37  ;;  %v230_v43 = vsel %vm194_vm1, %v229_v32, %v228_v8  ;;  %v238_v49 = vrot.slane %v5374_v10, 4  ;;  %429 = vmatpush.msrb.mxu1 %v389_v35 }
  0x36   :  { %v213_v46 = vsel %vm212_vm7, %v211_v18, %v210_v41  ;;  %v223_v47 = vsel %vm206_vm5, %v222_v27, %v221_v42  ;;  %v231_v48 = vsel %vm197_vm2, %v5350_v3, %v230_v43  ;;  %v240_v52 = vrot.slane %v5379_v11, 3  ;;  %532 = vmatpush.msrb.mxu3 %v5422_v40 }
  0x37   :  { %4466 = vmatmul.msk.f32.vlgmr.msra.gmra.mxu0 %vm317_vm8, %v213_v46  ;;  %v225_v50 = vsel %vm209_vm6, %v224_v28, %v223_v47  ;;  %v233_v51 = vsel %vm200_vm3, %v232_v38, %v231_v48  ;;  %v242_v53 = vrot.slane %v5339_v1, 3  ;;  %v243_v56 = vrot.slane %v5344_v2, 2  ;;  %430 = vmatpush.msrb.mxu1 %v388_v45 }
  0x38   :  { %v227_v54 = vsel %vm212_vm7, %v226_v31, %v225_v50  ;;  %v235_v55 = vsel %vm203_vm4, %v234_v39, %v233_v51  ;;  %v245_v57 = vrot.slane %v5350_v3, 1  ;;  %v248_v59 = vrot.slane %v5360_v5, 7 }
  0x39   :  { %v237_v58 = vsel %vm206_vm5, %v236_v44, %v235_v55  ;;  %v250_v60 = vrot.slane %v5369_v9, 6  ;;  %v252_v61 = vrot.slane %v5374_v10, 5  ;;  %v244_v63 = vsel %vm194_vm1, %v243_v56, %v242_v53 }
  0x3a   :  { %v239_v62 = vsel %vm209_vm6, %v238_v49, %v237_v58  ;;  %v254_v0 = vrot.slane %v5379_v11, 4  ;;  %v256_v6 = vrot.slane %v5339_v1, 4  ;;  %v246_v8 = vsel %vm197_vm2, %v245_v57, %v244_v63 }
  0x3b   :  { %v241_v7 = vsel %vm212_vm7, %v240_v52, %v239_v62  ;;  %v257_v12 = vrot.slane %v5344_v2, 3  ;;  %v259_v13 = vrot.slane %v5350_v3, 2  ;;  %v247_v15 = vsel %vm200_vm3, %v5355_v4, %v246_v8 }
  0x3c   :  { %4468 = vmatmul.msk.f32.vlgmr.msra.gmra.mxu1 %vm317_vm8, %v241_v7  ;;  %v261_v16 = vrot.slane %v5355_v4, 1  ;;  %v264_v17 = vrot.slane %v5369_v9, 7  ;;  %v266_v18 = vrot.slane %v5374_v10, 6  ;;  %v249_v21 = vsel %vm203_vm4, %v248_v59, %v247_v15 }
  0x3d   :  { %v258_v22 = vsel %vm194_vm1, %v257_v12, %v256_v6  ;;  %v268_v23 = vrot.slane %v5379_v11, 5  ;;  %v270_v24 = vrot.slane %v5339_v1, 5  ;;  %v251_v25 = vsel %vm206_vm5, %v250_v60, %v249_v21  ;;  %v5533_v21 = vld [vmem:[#allocation6 + $0x18] sm:$0xff] }
  0x3e   :  { %v260_v26 = vsel %vm197_vm2, %v259_v13, %v258_v22  ;;  %v271_v27 = vrot.slane %v5344_v2, 4  ;;  %v273_v28 = vrot.slane %v5350_v3, 3  ;;  %v253_v29 = vsel %vm209_vm6, %v252_v61, %v251_v25  ;;  %v5535_v22 = vld [vmem:[#allocation6 + $0x10] sm:$0xff] }
  0x3f   :  { %4467 = vmatmul.msk.f32.gmra.mxu0 %vm317_vm8, %v227_v54  ;;  %v262_v30 = vsel %vm200_vm3, %v261_v16, %v260_v26  ;;  %v275_v31 = vrot.slane %v5355_v4, 2  ;;  %v277_v32 = vrot.slane %v5360_v5, 1  ;;  %v255_v33 = vsel %vm212_vm7, %v254_v0, %v253_v29  ;;  %v458_v16 = vld [vmem:[#allocation2 + $0x8] sm:$0xff] }
  0x40   :  { %v263_v35 = vsel %vm203_vm4, %v5360_v5, %v262_v30  ;;  %v272_v36 = vsel %vm194_vm1, %v271_v27, %v270_v24  ;;  %v280_v39 = vrot.slane %v5374_v10, 7  ;;  %v284_v41 = vrot.slane %v5339_v1, 6  ;;  %v4713_v24 = vld [vmem:[%s7104_s12] ss:$0 sm:$0xff] }
  0x41   :  { %v265_v37 = vsel %vm206_vm5, %v264_v17, %v263_v35  ;;  %v274_v38 = vsel %vm197_vm2, %v273_v28, %v272_v36  ;;  %v285_v44 = vrot.slane %v5344_v2, 5  ;;  %v287_v45 = vrot.slane %v5350_v3, 4  ;;  %v387_v17 = vld [vmem:[%s7103_s14] sm:$0xff] }
  0x42   :  { %v267_v42 = vsel %vm209_vm6, %v266_v18, %v265_v37  ;;  %v276_v43 = vsel %vm200_vm3, %v275_v31, %v274_v38  ;;  %v289_v48 = vrot.slane %v5355_v4, 3  ;;  %v291_v49 = vrot.slane %v5360_v5, 2  ;;  %v457_v18 = vld [vmem:[#allocation2] sm:$0xff]  ;;  %431 = vmatpush.msrb.mxu1 %v387_v17  ;;  %v5587_v17 = vld [vmem:[#allocation4 + $0x38] sm:$0xff] }
  0x43   :  { %v269_v46 = vsel %vm212_vm7, %v268_v23, %v267_v42  ;;  %v278_v47 = vsel %vm203_vm4, %v277_v32, %v276_v43  ;;  %v282_v51 = vrot.slane %v5379_v11, 6  ;;  %v286_v52 = vsel %vm194_vm1, %v285_v44, %v284_v41  ;;  %v5541_v23 = vld [vmem:[#allocation6] sm:$0xff]  ;;  %839 = vmatpush.msrb.mxu0 %v5587_v17 }
  0x44   :  { %4469 = vmatmul.msk.f32.gmra.mxu1 %vm317_vm8, %v255_v33  ;;  %4470 = vmatmul.msk.f32.vlgmr.msra.gmra.mxu2 %vm317_vm8, %v269_v46  ;;  %v279_v50 = vsel %vm206_vm5, %v5369_v9, %v278_v47  ;;  %v293_v53 = vrot.slane %v5369_v9, 1  ;;  %v288_v54 = vsel %vm197_vm2, %v287_v45, %v286_v52  ;;  %v296_v55 = vrot.slane %v5379_v11, 7 }
  0x45   :  { %v298_v56 = vrot.slane %v5339_v1, 7  ;;  %v299_v57 = vrot.slane %v5344_v2, 6  ;;  %v281_v58 = vsel %vm209_vm6, %v280_v39, %v279_v50  ;;  %v290_v59 = vsel %vm200_vm3, %v289_v48, %v288_v54 }
  0x46   :  { %v301_v60 = vrot.slane %v5350_v3, 5  ;;  %v303_v61 = vrot.slane %v5355_v4, 4  ;;  %v292_v62 = vsel %vm203_vm4, %v291_v49, %v290_v59  ;;  %v305_v0 = vrot.slane %v5360_v5, 3 }
  0x47   :  { %v300_v63 = vsel %vm194_vm1, %v299_v57, %v298_v56  ;;  %v307_v6 = vrot.slane %v5369_v9, 2  ;;  %v294_v1 = vsel %vm206_vm5, %v293_v53, %v292_v62  ;;  %v283_v7 = vsel %vm212_vm7, %v282_v51, %v281_v58  ;;  %v5568_v51 = vld [vmem:[%s7076_s7] ss:$0 sm:$0xff] }
  0x48   :  { %v302_v2 = vsel %vm197_vm2, %v301_v60, %v300_v63  ;;  %v295_v8 = vsel %vm209_vm6, %v5374_v10, %v294_v1  ;;  %v309_v4 = vrot.slane %v5374_v10, 1  ;;  %v5178_v15 = vmov 0.0   ;;  %v459_v10 = vld [vmem:[#allocation2 + $0x10] sm:$0xff] }
  0x49   :  { %v304_v3 = vsel %vm200_vm3, %v303_v61, %v302_v2  ;;  %v297_v12 = vsel %vm212_vm7, %v296_v55, %v295_v8  ;;  %478 = vmatpush.msrb.mxu2 %v459_v10  ;;  %v5574_v61 = vld [vmem:[%s7078_s9] ss:$0 sm:$0xff] }
  0x4a   :  { %v306_v13 = vsel %vm203_vm4, %v305_v0, %v304_v3  ;;  %4472 = vmatmul.msk.f32.vlgmr.msra.gmra.mxu3 %vm317_vm8, %v297_v12  ;;  %v5579_v2 = vld [vmem:[%s7077_s8] ss:$0 sm:$0xff] }
  0x4b   :  { %v308_v5 = vsel %vm206_vm5, %v307_v6, %v306_v13  ;;  %479 = vmatpush.msrb.mxu2 %v458_v16  ;;  %557 = vmatpush.msra.mxu3 %v5533_v21 }
  0x4c   :  { %4471 = vmatmul.msk.f32.gmra.mxu2 %vm317_vm8, %v283_v7  ;;  %v310_v9 = vsel %vm209_vm6, %v309_v4, %v308_v5 }
  0x4d   :  { %v311_v14 = vsel %vm212_vm7, %v5379_v11, %v310_v9  ;;  %480 = vmatpush.msrb.mxu2 %v457_v18  ;;  %v5538_v11 = vld [vmem:[#allocation6 + $0x8] sm:$0xff]  ;;  %558 = vmatpush.msra.mxu3 %v5535_v22  ;;  %v5589_v18 = vld [vmem:[#allocation4 + $0x30] sm:$0xff] }
  0x4e   :  { %840 = vmatpush.msrb.mxu0 %v5589_v18 }
  0x4f   :  { %559 = vmatpush.msra.mxu3 %v5538_v11 }
  0x51   :  { %560 = vmatpush.msra.mxu3 %v5541_v23 }
  0x52   :  { %4473 = vmatmul.msk.f32.gmra.mxu3 %vm317_vm8, %v311_v14 }
  0x5a   :  { %533 = vmatmul.f32.vlgmr.msrb.gmra.mxu3 %v5178_v15 }
  0x5b   :  { %621 = vmatpush.msrb.mxu3 %v5587_v17 }
  0x5d   :  { %622 = vmatpush.msrb.mxu3 %v5589_v18 }
  0x62   :  { %561 = vmatmul.f32.vlgmr.msra.gmra.mxu3 %v5178_v15 }
  0xb4   :  { %v355_v25 = vpop.f32.mrf.mxu0 }
  0xb5   :  { %v356_v26 = vadd.f32 %v4713_v24, %v355_v25  ;;  %v5595_v25 = vld [vmem:[#allocation4 + $0x28] sm:$0xff] }
  0xb6   :  { %623 = vmatpush.msrb.mxu3 %v5595_v25  ;;  %841 = vmatpush.msrb.mxu0 %v5595_v25 }
  0xb7   :  { %v379_v27 = vmax.f32 %v356_v26, 0.0  ;;  %v5597_v26 = vld [vmem:[#allocation2 + $0x38] sm:$0xff] }
  0xb8   :  { %882 = vmatpush.msra.mxu2 %v5597_v26 }
  0xb9   :  { %4474 = vmatmul.msk.f32.vlgmr.msrb.gmra.mxu1 %vm391_vm9, %v379_v27  ;;  %4482 = vmatmul.msk.f32.vlgmr.msrb.gmra.mxu2 %vm391_vm9, %v379_v27  ;;  %v361_v29 = vpop.f32.mrf.mxu1  ;;  %v5601_v27 = vld [vmem:[#allocation6 + $0x30] sm:$0xff] }
  0xba   :  { %v362_v32 = vadd.f32 %v4713_v24, %v361_v29  ;;  %v5606_v29 = vld [vmem:[#allocation2 + $0x30] sm:$0xff] }
  0xbb   :  { %883 = vmatpush.msra.mxu2 %v5606_v29 }
  0xbc   :  { %v358_v28 = vpop.f32.mrf.mxu0  ;;  %v381_v33 = vmax.f32 %v362_v32, 0.0  ;;  %v5621_v32 = vld [vmem:[#allocation6 + $0x20] sm:$0xff] }
  0xbd   :  { %v359_v30 = vadd.f32 %v4713_v24, %v358_v28  ;;  %v5604_v28 = vld [vmem:[#allocation4 + $0x20] sm:$0xff] }
  0xbe   :  { %624 = vmatpush.msrb.mxu3 %v5604_v28  ;;  %842 = vmatpush.msrb.mxu0 %v5604_v28 }
  0xbf   :  { %v380_v31 = vmax.f32 %v359_v30, 0.0  ;;  %v5611_v30 = vld [vmem:[#allocation6 + $0x28] sm:$0xff]  ;;  %625 = vmatmul.f32.vlgmr.msrb.gmra.mxu3 %v5178_v15 }
  0xc0   :  { %955 = vmatpush.msra.mxu0 %v5391_v19 }
  0xc1   :  { %4475 = vmatmul.msk.f32.gmra.mxu1 %vm391_vm9, %v380_v31  ;;  %4483 = vmatmul.msk.f32.gmra.mxu2 %vm391_vm9, %v380_v31  ;;  %v364_v35 = vpop.f32.mrf.mxu1  ;;  %v5614_v31 = vld [vmem:[#allocation2 + $0x28] sm:$0xff] }
  0xc2   :  { %v365_v36 = vadd.f32 %v4713_v24, %v364_v35  ;;  %884 = vmatpush.msra.mxu2 %v5614_v31  ;;  %956 = vmatpush.msra.mxu0 %v5393_v20 }
  0xc4   :  { %v382_v38 = vmax.f32 %v365_v36, 0.0  ;;  %957 = vmatpush.msra.mxu0 %v5413_v34  ;;  %v5642_v36 = vld [vmem:[#allocation2 + $0x20] sm:$0xff] }
  0xc5   :  { %885 = vmatpush.msra.mxu2 %v5642_v36 }
  0xc6   :  { %958 = vmatpush.msra.mxu0 %v5422_v40 }
  0xc7   :  { %v367_v37 = vpop.f32.mrf.mxu2  ;;  %1032 = vmatpush.msrb.mxu2 %v5587_v17 }
  0xc8   :  { %v368_v39 = vadd.f32 %v4713_v24, %v367_v37  ;;  %v5654_v37 = vld [vmem:[%s7103_s14 + $0x30] sm:$0xff] }
  0xc9   :  { %4476 = vmatmul.msk.f32.gmra.mxu1 %vm391_vm9, %v381_v33  ;;  %4484 = vmatmul.msk.f32.gmra.mxu2 %vm391_vm9, %v381_v33 }
  0xca   :  { %v383_v41 = vmax.f32 %v368_v39, 0.0  ;;  %1033 = vmatpush.msrb.mxu2 %v5589_v18  ;;  %v5668_v39 = vld [vmem:[%s7103_s14 + $0x20] sm:$0xff] }
  0xcc   :  { %1034 = vmatpush.msrb.mxu2 %v5595_v25 }
  0xcd   :  { %v373_v44 = vpop.f32.mrf.mxu3 }
  0xce   :  { %v374_v46 = vadd.f32 %v4713_v24, %v373_v44  ;;  %1035 = vmatpush.msrb.mxu2 %v5604_v28 }
  0xcf   :  { %v370_v42 = vpop.f32.mrf.mxu2 }
  0xd0   :  { %v371_v43 = vadd.f32 %v4713_v24, %v370_v42  ;;  %v385_v47 = vmax.f32 %v374_v46, 0.0  ;;  %v5704_v46 = vld [vmem:[%s7076_s7 + $0x1] ss:$0 sm:$0xff] }
  0xd1   :  { %4477 = vmatmul.msk.f32.gmra.mxu1 %vm391_vm9, %v382_v38  ;;  %4485 = vmatmul.msk.f32.gmra.mxu2 %vm391_vm9, %v382_v38  ;;  %v5661_v38 = vld [vmem:[%s7103_s14 + $0x28] sm:$0xff] }
  0xd2   :  { %v384_v45 = vmax.f32 %v371_v43, 0.0 }
  0xd5   :  { %v376_v48 = vpop.f32.mrf.mxu3 }
  0xd6   :  { %v377_v49 = vadd.f32 %v4713_v24, %v376_v48  ;;  %v5592_v24 = vld [vmem:[#allocation6 + $0x38] sm:$0xff] }
  0xd7   :  { %859 = vmatpush.msra.mxu1 %v5592_v24  ;;  %651 = vmatpush.msra.mxu3 %v5592_v24 }
  0xd8   :  { %v386_v50 = vmax.f32 %v377_v49, 0.0 }
  0xd9   :  { %4478 = vmatmul.msk.f32.gmra.mxu1 %vm391_vm9, %v383_v41  ;;  %4486 = vmatmul.msk.f32.gmra.mxu2 %vm391_vm9, %v383_v41 }
  0xda   :  { %860 = vmatpush.msra.mxu1 %v5601_v27  ;;  %652 = vmatpush.msra.mxu3 %v5601_v27 }
  0xdc   :  { %861 = vmatpush.msra.mxu1 %v5611_v30  ;;  %653 = vmatpush.msra.mxu3 %v5611_v30 }
  0xdd   :  { %v534_v52 = vpop.f32.mrf.mxu3 }
  0xde   :  { %v535_v53 = vadd.f32 %v5568_v51, %v534_v52  ;;  %862 = vmatpush.msra.mxu1 %v5621_v32  ;;  %654 = vmatpush.msra.mxu3 %v5621_v32 }
  0xdf   :  { %655 = vmatmul.f32.vlgmr.msra.gmra.mxu3 %v5178_v15  ;;  %v5649_v15 = vld [vmem:[%s7103_s14 + $0x38] sm:$0xff] }
  0xe0   :  { %975 = vmatpush.msrb.mxu1 %v5533_v21  ;;  %689 = vmatpush.msrb.mxu3 %v5597_v26 }
  0xe1   :  { %4479 = vmatmul.msk.f32.gmra.mxu1 %vm391_vm9, %v384_v45  ;;  %4487 = vmatmul.msk.f32.gmra.mxu2 %vm391_vm9, %v384_v45 }
  0xe2   :  { %976 = vmatpush.msrb.mxu1 %v5535_v22  ;;  %690 = vmatpush.msrb.mxu3 %v5606_v29 }
  0xe4   :  { %977 = vmatpush.msrb.mxu1 %v5538_v11  ;;  %691 = vmatpush.msrb.mxu3 %v5614_v31 }
  0xe5   :  { %v562_v63 = vpop.f32.mrf.mxu3 }
  0xe6   :  { %v563_v7 = vadd.f32 %v5574_v61, %v562_v63  ;;  %978 = vmatpush.msrb.mxu1 %v5541_v23  ;;  %692 = vmatpush.msrb.mxu3 %v5642_v36 }
  0xe8   :  { %709 = vmatpush.msra.mxu3 %v5649_v15 }
  0xe9   :  { %4480 = vmatmul.msk.f32.gmra.mxu1 %vm391_vm9, %v385_v47  ;;  %4488 = vmatmul.msk.f32.gmra.mxu2 %vm391_vm9, %v385_v47 }
  0xea   :  { %710 = vmatpush.msra.mxu3 %v5654_v37 }
  0xec   :  { %711 = vmatpush.msra.mxu3 %v5661_v38 }
  0xee   :  { %712 = vmatpush.msra.mxu3 %v5668_v39 }
  0xf1   :  { %4481 = vmatmul.msk.f32.gmra.mxu1 %vm391_vm9, %v386_v50  ;;  %4489 = vmatmul.msk.f32.gmra.mxu2 %vm391_vm9, %v386_v50 }
 0x136   :  { %v433_v54 = vpop.f32.mrf.mxu1 }
 0x137   :  { %v565_v55 = vadd.f32 %v535_v53, %v433_v54 }
 0x139   :  { %v4490_v56 = vmul.f32 -1.442695, %v565_v55 }
 0x13b   :  { %4728 = vpow2.f32 %v4490_v56 }
 0x13c   :  { %v482_v3 = vpop.f32.mrf.mxu2 }
 0x13d   :  { %v483_v5 = vadd.f32 %v5579_v2, %v482_v3 }
 0x13e   :  { %v436_v54 = vpop.f32.mrf.mxu1 }
 0x141   :  { %v4729_v57 = vpop.eup %4728 }
 0x142   :  { %v569_v58 = vadd.f32 1.0, %v4729_v57  ;;  %v626_v43 = vpop.f32.mrf.mxu3 }
 0x143   :  { %v627_v47 = vadd.f32 %v5704_v46, %v626_v43 }
 0x144   :  { %4730 = vrcp.f32 %v569_v58  ;;  %v581_v0 = vand.u32 2147483648, %v569_v58  ;;  %v579_v1 = vand.u32 2147483647, %v569_v58  ;;  %vm575_vm11 = vweird.f32 %v569_v58 }
 0x146   :  { %v582_v4 = vor.u32 1.1754944e-38, %v581_v0  ;;  %vm580_vm13 = vcmp.eq.f32.partialorder %v579_v1, 8.507059e+37 }
 0x14a   :  { %v4731_v59 = vpop.eup %4730 }
 0x14b   :  { %v571_v60 = vmul.f32 %v4731_v59, %v569_v58  ;;  %vm576_vm10 = vweird.f32 %v4731_v59 }
 0x14c   :  { %vm577_vm12 = vmor %vm575_vm11, %vm576_vm10 }
 0x14d   :  { %v572_v62 = vsub.f32 1.0, %v571_v60 }
 0x14f   :  { %v573_v6 = vmul.f32 %v4731_v59, %v572_v62 }
 0x151   :  { %v574_v8 = vadd.f32 %v4731_v59, %v573_v6 }
 0x153   :  { %v578_v12 = vsel %vm577_vm12, %v4731_v59, %v574_v8 }
 0x154   :  { %v583_v13 = vsel %vm580_vm13, %v582_v4, %v578_v12 }
 0x155   :  { %v585_v9 = vmul.f32 %v583_v13, %v563_v7 }
 0x157   :  { %v586_v14 = vadd.f32 %v585_v9, %v483_v5 }
 0x159   :  { %4732 = vtanh.f32 %v586_v14 }
 0x15f   :  { %v5583_v10 = vpop.eup %4732 }
 0x160   :  { %v588_v16 = vsub.f32 0.0, %v5583_v10 }
 0x162   :  { %590 = vrot.lane.b32.xlu0 %v588_v16, %s5179_s13  ;;  %v656_v44 = vpop.f32.mrf.mxu3  ;;  %v5715_v16 = vld [vmem:[%s7078_s9 + $0x1] ss:$0 sm:$0xff] }
 0x1d4   :  { %v591_v33 = vpop.permute.xlu0 %590 }
 0x1d5   :  { %v593_v35 = vmul.f32 %v591_v33, %v583_v13 }
 0x1d7   :  { %595 = vrot.lane.b32.xlu0 %v593_v35, %s5180_s3 }
 0x249   :  { %v596_v41 = vpop.permute.xlu0 %595 }
 0x24a   :  { %v5675_v42 = vadd.f32 %v5583_v10, %v596_v41 }
 0x24c   :  { %4498 = vmatmul.msk.f32.vlgmr.msrb.gmra.mxu3 %vm391_vm9, %v5675_v42 }
 0x24d   :  { %762 = vmatpush.msrb.mxu3 %v5391_v19 }
 0x24f   :  { %763 = vmatpush.msrb.mxu3 %v5393_v20 }
 0x251   :  { %764 = vmatpush.msrb.mxu3 %v5413_v34 }
 0x253   :  { %765 = vmatpush.msrb.mxu3 %v5422_v40 }
 0x254   :  { %4499 = vmatmul.msk.f32.vlgmr.msra.gmra.mxu3 %vm391_vm9, %v5675_v42 }
 0x255   :  { %782 = vmatpush.msra.mxu3 %v5533_v21 }
 0x257   :  { %783 = vmatpush.msra.mxu3 %v5535_v22 }
 0x259   :  { %784 = vmatpush.msra.mxu3 %v5538_v11 }
 0x25b   :  { %785 = vmatpush.msra.mxu3 %v5541_v23 }
 0x25c   :  { %4501 = vmatmul.msk.f32.vlgmr.msrb.gmra.mxu3 %vm391_vm9, %v5675_v42 }
 0x25d   :  { %902 = vmatpush.msrb.mxu3 %v5649_v15 }
 0x25f   :  { %903 = vmatpush.msrb.mxu3 %v5654_v37 }
 0x261   :  { %904 = vmatpush.msrb.mxu3 %v5661_v38 }
 0x263   :  { %905 = vmatpush.msrb.mxu3 %v5668_v39 }
 0x264   :  { %4502 = vmatmul.msk.f32.vlgmr.msra.gmra.mxu3 %vm391_vm9, %v5675_v42 }
 0x265   :  { %1052 = vmatpush.msra.mxu3 %v5592_v24 }
 0x267   :  { %1053 = vmatpush.msra.mxu3 %v5601_v27 }
 0x269   :  { %1054 = vmatpush.msra.mxu3 %v5611_v30 }
 0x26b   :  { %1055 = vmatpush.msra.mxu3 %v5621_v32 }
 0x2cf   :  { %v694_v45 = vpop.f32.mrf.mxu3 }
 0x2d7   :  { %v714_v48 = vpop.f32.mrf.mxu3 }
 0x2d8   :  { %v715_v49 = vadd.f32 %v714_v48, %v627_v47 }
 0x2da   :  { %v4500_v50 = vmul.f32 -1.442695, %v715_v49  ;;  %v485_v49 = vpop.f32.mrf.mxu2 }
 0x2dc   :  { %4734 = vpow2.f32 %v4500_v50 }
 0x2df   :  { %v767_v52 = vpop.f32.mrf.mxu3 }
 0x2e0   :  { %v768_v53 = vadd.f32 %v5568_v51, %v767_v52 }
 0x2e2   :  { %v4735_v55 = vpop.eup %4734  ;;  %v790_v56 = vadd.f32 %v768_v53, %v436_v54  ;;  %v486_v53 = vadd.f32 %v5579_v2, %v485_v49  ;;  %v657_v54 = vadd.f32 %v5715_v16, %v656_v44 }
 0x2e3   :  { %v720_v57 = vadd.f32 1.0, %v4735_v55  ;;  %v5725_v55 = vld [vmem:[%s7077_s8 + $0x1] ss:$0 sm:$0xff] }
 0x2e4   :  { %v4503_v58 = vmul.f32 -1.442695, %v790_v56 }
 0x2e5   :  { %4736 = vrcp.f32 %v720_v57  ;;  %vm726_vm15 = vweird.f32 %v720_v57  ;;  %v732_v4 = vand.u32 2147483648, %v720_v57  ;;  %v730_v13 = vand.u32 2147483647, %v720_v57 }
 0x2e6   :  { %4738 = vpow2.f32 %v4503_v58 }
 0x2e7   :  { %v787_v10 = vpop.f32.mrf.mxu3  ;;  %v733_v41 = vor.u32 1.1754944e-38, %v732_v4 }
 0x2e8   :  { %v788_v47 = vadd.f32 %v5574_v61, %v787_v10 }
 0x2eb   :  { %v4737_v59 = vpop.eup %4736 }
 0x2ec   :  { %v4739_v60 = vpop.eup %4738  ;;  %v722_v62 = vmul.f32 %v4737_v59, %v720_v57  ;;  %vm727_vm14 = vweird.f32 %v4737_v59 }
 0x2ed   :  { %v794_v63 = vadd.f32 1.0, %v4739_v60  ;;  %vm5708_vm10 = vmor %vm726_vm15, %vm727_vm14  ;;  %vm731_vm14 = vcmp.eq.f32.partialorder %v730_v13, 8.507059e+37 }
 0x2ee   :  { %v723_v0 = vsub.f32 1.0, %v722_v62 }
 0x2ef   :  { %4740 = vrcp.f32 %v794_v63  ;;  %v806_v12 = vand.u32 2147483648, %v794_v63  ;;  %v804_v9 = vand.u32 2147483647, %v794_v63  ;;  %vm800_vm11 = vweird.f32 %v794_v63 }
 0x2f0   :  { %v724_v6 = vmul.f32 %v4737_v59, %v723_v0 }
 0x2f1   :  { %v807_v43 = vor.u32 1.1754944e-38, %v806_v12  ;;  %vm805_vm13 = vcmp.eq.f32.partialorder %v804_v9, 8.507059e+37 }
 0x2f2   :  { %v725_v3 = vadd.f32 %v4737_v59, %v724_v6 }
 0x2f4   :  { %v729_v35 = vsel %vm5708_vm10, %v4737_v59, %v725_v3  ;;  %v695_v59 = vadd.f32 %v5725_v55, %v694_v45 }
 0x2f5   :  { %v4741_v1 = vpop.eup %4740  ;;  %v734_v52 = vsel %vm731_vm14, %v733_v41, %v729_v35 }
 0x2f6   :  { %v796_v7 = vmul.f32 %v4741_v1, %v794_v63  ;;  %vm801_vm0 = vweird.f32 %v4741_v1  ;;  %v736_v58 = vmul.f32 %v734_v52, %v657_v54 }
 0x2f7   :  { %vm802_vm12 = vmor %vm800_vm11, %vm801_vm0 }
 0x2f8   :  { %v797_v8 = vsub.f32 1.0, %v796_v7  ;;  %v737_v60 = vadd.f32 %v736_v58, %v695_v59 }
 0x2fa   :  { %v798_v5 = vmul.f32 %v4741_v1, %v797_v8 }
 0x2fc   :  { %v799_v33 = vadd.f32 %v4741_v1, %v798_v5 }
 0x2fe   :  { %v803_v48 = vsel %vm802_vm12, %v4741_v1, %v799_v33 }
 0x2ff   :  { %v808_v50 = vsel %vm805_vm13, %v807_v43, %v803_v48 }
 0x300   :  { %v810_v56 = vmul.f32 %v808_v50, %v788_v47 }
 0x302   :  { %v811_v57 = vadd.f32 %v810_v56, %v486_v53 }
 0x304   :  { %4742 = vtanh.f32 %v811_v57 }
 0x305   :  { %4744 = vtanh.f32 %v737_v60 }
 0x30a   :  { %v4743_v62 = vpop.eup %4742 }
 0x30b   :  { %v813_v63 = vsub.f32 %v5675_v42, %v4743_v62  ;;  %v4745_v0 = vpop.eup %4744 }
 0x30c   :  { %v739_v44 = vsub.f32 0.0, %v4745_v0 }
 0x30d   :  { %815 = vrot.lane.b32.xlu1 %v813_v63, %s5179_s13 }
 0x315   :  { %741 = vrot.lane.b32.xlu1 %v739_v44, %s5179_s13 }
 0x37f   :  { %v816_v6 = vpop.permute.xlu1 %815 }
 0x380   :  { %v818_v1 = vmul.f32 %v816_v6, %v808_v50 }
 0x382   :  { %820 = vrot.lane.b32.xlu2 %v818_v1, %s5180_s3 }
 0x387   :  { %v742_v7 = vpop.permute.xlu1 %741 }
 0x388   :  { %v744_v8 = vmul.f32 %v742_v7, %v734_v52 }
 0x38a   :  { %746 = vrot.lane.b32.xlu2 %v744_v8, %s5180_s3 }
 0x3dc   :  { %v821_v45 = vpop.permute.xlu2 %820 }
 0x3dd   :  { %v5733_v3 = vadd.f32 %v4743_v62, %v821_v45 }
 0x3df   :  { %4506 = vmatmul.msk.f32.vlgmr.msra.gmra.mxu2 %vm391_vm9, %v5733_v3  ;;  %4507 = vmatmul.msk.f32.vlgmr.msrb.gmra.mxu3 %vm391_vm9, %v5733_v3 }
 0x3e0   :  { %1148 = vmatpush.msra.mxu2 %v5391_v19  ;;  %1168 = vmatpush.msrb.mxu3 %v5533_v21  ;;  %v439_v19 = vpop.f32.mrf.mxu1 }
 0x3e2   :  { %1149 = vmatpush.msra.mxu2 %v5393_v20  ;;  %1169 = vmatpush.msrb.mxu3 %v5535_v22  ;;  %v5773_v20 = vpop.f32.mrf.mxu2 }
 0x3e4   :  { %v747_v42 = vpop.permute.xlu2 %746  ;;  %1150 = vmatpush.msra.mxu2 %v5413_v34  ;;  %1170 = vmatpush.msrb.mxu3 %v5538_v11 }
 0x3e5   :  { %v5745_v4 = vadd.f32 %v4745_v0, %v747_v42 }
 0x3e6   :  { %1151 = vmatpush.msra.mxu2 %v5422_v40  ;;  %1171 = vmatpush.msrb.mxu3 %v5541_v23 }
 0x3e7   :  { %4504 = vmatmul.msk.f32.vlgmr.msrb.gmra.mxu0 %vm391_vm9, %v5745_v4  ;;  %4505 = vmatmul.msk.f32.vlgmr.msra.gmra.mxu1 %vm391_vm9, %v5745_v4 }
 0x3e8   :  { %1075 = vmatpush.msrb.mxu0 %v5597_v26  ;;  %1095 = vmatpush.msra.mxu1 %v5649_v15  ;;  %v5775_v34 = vpop.f32.mrf.mxu1 }
 0x3ea   :  { %1076 = vmatpush.msrb.mxu0 %v5606_v29  ;;  %1096 = vmatpush.msra.mxu1 %v5654_v37  ;;  %v5777_v40 = vpop.f32.mrf.mxu2 }
 0x3ec   :  { %1077 = vmatpush.msrb.mxu0 %v5614_v31  ;;  %1097 = vmatpush.msra.mxu1 %v5661_v38 }
 0x3ee   :  { %1078 = vmatpush.msrb.mxu0 %v5642_v36  ;;  %1098 = vmatpush.msra.mxu1 %v5668_v39 }
 0x3ef   :  { %4509 = vmatmul.msk.f32.vlgmr.msra.gmra.mxu0 %vm391_vm9, %v5733_v3  ;;  %4510 = vmatmul.msk.f32.vlgmr.msrb.gmra.mxu1 %vm391_vm9, %v5733_v3 }
 0x3f0   :  { %1225 = vmatpush.msra.mxu0 %v5587_v17  ;;  %1245 = vmatpush.msrb.mxu1 %v5592_v24  ;;  %v5779_v12 = vpop.f32.mrf.mxu1 }
 0x3f2   :  { %1226 = vmatpush.msra.mxu0 %v5589_v18  ;;  %1246 = vmatpush.msrb.mxu1 %v5601_v27  ;;  %v5781_v13 = vpop.f32.mrf.mxu2 }
 0x3f4   :  { %1227 = vmatpush.msra.mxu0 %v5595_v25  ;;  %1247 = vmatpush.msrb.mxu1 %v5611_v30 }
 0x3f6   :  { %1228 = vmatpush.msra.mxu0 %v5604_v28  ;;  %1248 = vmatpush.msrb.mxu1 %v5621_v32 }
 0x3f8   :  { %v5783_v5 = vpop.f32.mrf.mxu1 }
 0x3fa   :  { %v5786_v10 = vpop.f32.mrf.mxu2 }
 0x400   :  { %v5788_v43 = vpop.f32.mrf.mxu1 }
 0x402   :  { %v5791_v50 = vpop.f32.mrf.mxu2 }
 0x408   :  { %v5793_v56 = vpop.f32.mrf.mxu1 }
 0x40a   :  { %v5795_v59 = vpop.f32.mrf.mxu2 }
 0x462   :  { %v907_v33 = vpop.f32.mrf.mxu3  ;;  %v887_v45 = vpop.f32.mrf.mxu2 }
 0x464   :  { %v844_v9 = vpop.f32.mrf.mxu0  ;;  %v864_v0 = vpop.f32.mrf.mxu1 }
 0x465   :  { %v845_v14 = vadd.f32 %v5704_v46, %v844_v9 }
 0x467   :  { %v908_v35 = vadd.f32 %v907_v33, %v845_v14 }
 0x469   :  { %v4508_v41 = vmul.f32 -1.442695, %v908_v35  ;;  %v888_v35 = vadd.f32 %v5725_v55, %v887_v45 }
 0x46b   :  { %4746 = vpow2.f32 %v4508_v41 }
 0x46c   :  { %v960_v47 = vpop.f32.mrf.mxu0 }
 0x46d   :  { %v961_v48 = vadd.f32 %v5568_v51, %v960_v47 }
 0x46f   :  { %v983_v49 = vadd.f32 %v961_v48, %v439_v19  ;;  %v865_v19 = vadd.f32 %v5715_v16, %v864_v0 }
 0x471   :  { %v4747_v52 = vpop.eup %4746  ;;  %v4511_v53 = vmul.f32 -1.442695, %v983_v49 }
 0x472   :  { %v913_v54 = vadd.f32 1.0, %v4747_v52 }
 0x473   :  { %4748 = vpow2.f32 %v4511_v53 }
 0x474   :  { %4750 = vrcp.f32 %v913_v54  ;;  %v925_v44 = vand.u32 2147483648, %v913_v54  ;;  %v923_v1 = vand.u32 2147483647, %v913_v54  ;;  %vm919_vm0 = vweird.f32 %v913_v54 }
 0x476   :  { %v926_v42 = vor.u32 1.1754944e-38, %v925_v44  ;;  %vm924_vm11 = vcmp.eq.f32.partialorder %v923_v1, 8.507059e+37  ;;  %v489_v44 = vadd.f32 %v5579_v2, %v5773_v20 }
 0x479   :  { %v4749_v57 = vpop.eup %4748 }
 0x47a   :  { %v4751_v58 = vpop.eup %4750  ;;  %v987_v60 = vadd.f32 1.0, %v4749_v57 }
 0x47b   :  { %v915_v62 = vmul.f32 %v4751_v58, %v913_v54  ;;  %vm920_vm15 = vweird.f32 %v4751_v58  ;;  %v980_v54 = vpop.f32.mrf.mxu1 }
 0x47c   :  { %4752 = vrcp.f32 %v987_v60  ;;  %vm921_vm10 = vmor %vm919_vm0, %vm920_vm15  ;;  %v999_v48 = vand.u32 2147483648, %v987_v60  ;;  %v997_v53 = vand.u32 2147483647, %v987_v60  ;;  %vm993_vm13 = vweird.f32 %v987_v60 }
 0x47d   :  { %v916_v63 = vsub.f32 1.0, %v915_v62 }
 0x47e   :  { %v1000_v62 = vor.u32 1.1754944e-38, %v999_v48  ;;  %vm998_vm15 = vcmp.eq.f32.partialorder %v997_v53, 8.507059e+37  ;;  %v5850_v48 = vld [vmem:[#allocation4] sm:$0xff] }
 0x47f   :  { %v917_v6 = vmul.f32 %v4751_v58, %v916_v63 }
 0x481   :  { %v918_v7 = vadd.f32 %v4751_v58, %v917_v6 }
 0x482   :  { %v4753_v8 = vpop.eup %4752 }
 0x483   :  { %v922_v9 = vsel %vm921_vm10, %v4751_v58, %v918_v7  ;;  %v989_v14 = vmul.f32 %v4753_v8, %v987_v60  ;;  %vm994_vm12 = vweird.f32 %v4753_v8  ;;  %v981_v58 = vadd.f32 %v5574_v61, %v980_v54 }
 0x484   :  { %v927_v33 = vsel %vm924_vm11, %v926_v42, %v922_v9  ;;  %vm995_vm14 = vmor %vm993_vm13, %vm994_vm12 }
 0x485   :  { %v929_v41 = vmul.f32 %v927_v33, %v865_v19  ;;  %v990_v47 = vsub.f32 1.0, %v989_v14 }
 0x487   :  { %v930_v49 = vadd.f32 %v929_v41, %v888_v35  ;;  %v991_v52 = vmul.f32 %v4753_v8, %v990_v47  ;;  %v5838_v41 = vld [vmem:[#allocation4 + $0x10] sm:$0xff]  ;;  %v5844_v47 = vld [vmem:[#allocation4 + $0x8] sm:$0xff] }
 0x489   :  { %4754 = vtanh.f32 %v930_v49  ;;  %v992_v57 = vadd.f32 %v4753_v8, %v991_v52 }
 0x48b   :  { %v996_v63 = vsel %vm995_vm14, %v4753_v8, %v992_v57 }
 0x48c   :  { %v1001_v0 = vsel %vm998_vm15, %v1000_v62, %v996_v63 }
 0x48d   :  { %v1003_v6 = vmul.f32 %v1001_v0, %v981_v58 }
 0x48f   :  { %v4755_v1 = vpop.eup %4754  ;;  %v1004_v7 = vadd.f32 %v1003_v6, %v489_v44 }
 0x490   :  { %v932_v45 = vsub.f32 %v5745_v4, %v4755_v1 }
 0x491   :  { %4756 = vtanh.f32 %v1004_v7 }
 0x492   :  { %934 = vrot.lane.b32.xlu0 %v932_v45, %s5179_s13 }
 0x497   :  { %v4757_v42 = vpop.eup %4756 }
 0x498   :  { %v1006_v60 = vsub.f32 %v5733_v3, %v4757_v42 }
 0x49a   :  { %1008 = vrot.lane.b32.xlu1 %v1006_v60, %s5179_s13 }
 0x504   :  { %v935_v19 = vpop.permute.xlu0 %934 }
 0x505   :  { %v937_v8 = vmul.f32 %v935_v19, %v927_v33  ;;  %v5832_v33 = vld [vmem:[#allocation4 + $0x18] sm:$0xff] }
 0x507   :  { %939 = vrot.lane.b32.xlu2 %v937_v8, %s5180_s3 }
 0x50c   :  { %v1009_v9 = vpop.permute.xlu1 %1008 }
 0x50d   :  { %v1011_v14 = vmul.f32 %v1009_v9, %v1001_v0 }
 0x50f   :  { %1013 = vrot.lane.b32.xlu0 %v1011_v14, %s5180_s3 }
 0x561   :  { %v940_v20 = vpop.permute.xlu2 %939 }
 0x562   :  { %v5808_v35 = vadd.f32 %v4755_v1, %v940_v20 }
 0x564   :  { %4512 = vmatmul.msk.f32.vlgmr.msrb.gmra.mxu2 %vm391_vm9, %v5808_v35  ;;  %4513 = vmatmul.msk.f32.vlgmr.msra.gmra.mxu3 %vm391_vm9, %v5808_v35 }
 0x565   :  { %1288 = vmatpush.msra.mxu3 %v5649_v15  ;;  %1268 = vmatpush.msrb.mxu2 %v5597_v26 }
 0x567   :  { %1289 = vmatpush.msra.mxu3 %v5654_v37  ;;  %1269 = vmatpush.msrb.mxu2 %v5606_v29 }
 0x569   :  { %1290 = vmatpush.msra.mxu3 %v5661_v38  ;;  %1270 = vmatpush.msrb.mxu2 %v5614_v31 }
 0x56b   :  { %1291 = vmatpush.msra.mxu3 %v5668_v39  ;;  %1271 = vmatpush.msrb.mxu2 %v5642_v36 }
 0x581   :  { %v1014_v3 = vpop.permute.xlu0 %1013 }
 0x582   :  { %v5822_v4 = vadd.f32 %v4757_v42, %v1014_v3 }
 0x584   :  { %4514 = vmatmul.msk.f32.vlgmr.msrb.gmra.mxu0 %vm391_vm9, %v5822_v4  ;;  %4515 = vmatmul.msk.f32.vlgmr.msra.gmra.mxu1 %vm391_vm9, %v5822_v4 }
 0x585   :  { %4517 = vmatmul.msk.f32.vlgmr.msra.gmra.mxu2 %vm391_vm9, %v5822_v4  ;;  %4518 = vmatmul.msk.f32.vlgmr.msrb.gmra.mxu3 %vm391_vm9, %v5822_v4 }
 0x586   :  { %1341 = vmatpush.msrb.mxu0 %v5832_v33  ;;  %1361 = vmatpush.msra.mxu1 %v5533_v21 }
 0x587   :  { %1418 = vmatpush.msra.mxu2 %v5587_v17  ;;  %1438 = vmatpush.msrb.mxu3 %v5592_v24 }
 0x588   :  { %1342 = vmatpush.msrb.mxu0 %v5838_v41  ;;  %1362 = vmatpush.msra.mxu1 %v5535_v22 }
 0x589   :  { %1419 = vmatpush.msra.mxu2 %v5589_v18  ;;  %1439 = vmatpush.msrb.mxu3 %v5601_v27 }
 0x58a   :  { %1343 = vmatpush.msrb.mxu0 %v5844_v47  ;;  %1363 = vmatpush.msra.mxu1 %v5538_v11 }
 0x58b   :  { %1420 = vmatpush.msra.mxu2 %v5595_v25  ;;  %1440 = vmatpush.msrb.mxu3 %v5611_v30 }
 0x58c   :  { %1344 = vmatpush.msrb.mxu0 %v5850_v48  ;;  %1364 = vmatpush.msra.mxu1 %v5541_v23 }
 0x58d   :  { %1421 = vmatpush.msra.mxu2 %v5604_v28  ;;  %1441 = vmatpush.msrb.mxu3 %v5621_v32 }
 0x5e7   :  { %v1037_v49 = vpop.f32.mrf.mxu2  ;;  %v1057_v14 = vpop.f32.mrf.mxu3 }
 0x5e8   :  { %v1038_v52 = vadd.f32 %v5704_v46, %v1037_v49  ;;  %v1058_v49 = vadd.f32 %v5715_v16, %v1057_v14 }
 0x601   :  { %v1100_v53 = vpop.f32.mrf.mxu1  ;;  %v1080_v3 = vpop.f32.mrf.mxu0 }
 0x602   :  { %v1101_v54 = vadd.f32 %v1100_v53, %v1038_v52 }
 0x604   :  { %v4516_v57 = vmul.f32 -1.442695, %v1101_v54 }
 0x606   :  { %4758 = vpow2.f32 %v4516_v57  ;;  %v1081_v57 = vadd.f32 %v5725_v55, %v1080_v3 }
 0x608   :  { %v1153_v62 = vpop.f32.mrf.mxu2 }
 0x609   :  { %v1154_v58 = vadd.f32 %v5568_v51, %v1153_v62 }
 0x60b   :  { %v1176_v63 = vadd.f32 %v1154_v58, %v5775_v34 }
 0x60c   :  { %v4759_v0 = vpop.eup %4758 }
 0x60d   :  { %v1106_v44 = vadd.f32 1.0, %v4759_v0  ;;  %v4519_v6 = vmul.f32 -1.442695, %v1176_v63 }
 0x60f   :  { %4760 = vrcp.f32 %v1106_v44  ;;  %v1118_v19 = vand.u32 2147483648, %v1106_v44  ;;  %v1116_v9 = vand.u32 2147483647, %v1106_v44  ;;  %vm1112_vm10 = vweird.f32 %v1106_v44 }
 0x610   :  { %4762 = vpow2.f32 %v4519_v6 }
 0x611   :  { %v1119_v34 = vor.u32 1.1754944e-38, %v1118_v19  ;;  %vm1117_vm12 = vcmp.eq.f32.partialorder %v1116_v9, 8.507059e+37 }
 0x615   :  { %v4761_v1 = vpop.eup %4760 }
 0x616   :  { %v4763_v7 = vpop.eup %4762  ;;  %v1108_v45 = vmul.f32 %v4761_v1, %v1106_v44  ;;  %vm1113_vm0 = vweird.f32 %v4761_v1 }
 0x617   :  { %v1180_v42 = vadd.f32 1.0, %v4763_v7  ;;  %vm1114_vm11 = vmor %vm1112_vm10, %vm1113_vm0 }
 0x618   :  { %v1109_v60 = vsub.f32 1.0, %v1108_v45  ;;  %v1173_v45 = vpop.f32.mrf.mxu3 }
 0x619   :  { %4764 = vrcp.f32 %v1180_v42  ;;  %v1192_v6 = vand.u32 2147483648, %v1180_v42  ;;  %v1190_v44 = vand.u32 2147483647, %v1180_v42  ;;  %vm1186_vm14 = vweird.f32 %v1180_v42 }
 0x61a   :  { %v1110_v8 = vmul.f32 %v4761_v1, %v1109_v60 }
 0x61b   :  { %v1193_v19 = vor.u32 1.1754944e-38, %v1192_v6  ;;  %vm1191_vm0 = vcmp.eq.f32.partialorder %v1190_v44, 8.507059e+37 }
 0x61c   :  { %v1111_v20 = vadd.f32 %v4761_v1, %v1110_v8 }
 0x61e   :  { %v1115_v52 = vsel %vm1114_vm11, %v4761_v1, %v1111_v20  ;;  %v1174_v1 = vadd.f32 %v5574_v61, %v1173_v45  ;;  %v492_v20 = vadd.f32 %v5579_v2, %v5777_v40 }
 0x61f   :  { %v4765_v53 = vpop.eup %4764  ;;  %v1120_v54 = vsel %vm1117_vm12, %v1119_v34, %v1115_v52 }
 0x620   :  { %v1182_v62 = vmul.f32 %v4765_v53, %v1180_v42  ;;  %v1122_v58 = vmul.f32 %v1120_v54, %v1058_v49  ;;  %vm1187_vm13 = vweird.f32 %v4765_v53 }
 0x621   :  { %vm1188_vm15 = vmor %vm1186_vm14, %vm1187_vm13 }
 0x622   :  { %v1183_v63 = vsub.f32 1.0, %v1182_v62  ;;  %v1123_v0 = vadd.f32 %v1122_v58, %v1081_v57 }
 0x624   :  { %v1184_v7 = vmul.f32 %v4765_v53, %v1183_v63  ;;  %4766 = vtanh.f32 %v1123_v0 }
 0x626   :  { %v1185_v60 = vadd.f32 %v4765_v53, %v1184_v7 }
 0x628   :  { %v1189_v8 = vsel %vm1188_vm15, %v4765_v53, %v1185_v60 }
 0x629   :  { %v1194_v9 = vsel %vm1191_vm0, %v1193_v19, %v1189_v8 }
 0x62a   :  { %v4767_v14 = vpop.eup %4766  ;;  %v1196_v3 = vmul.f32 %v1194_v9, %v1174_v1 }
 0x62b   :  { %v1125_v34 = vsub.f32 %v5808_v35, %v4767_v14 }
 0x62c   :  { %v1197_v49 = vadd.f32 %v1196_v3, %v492_v20 }
 0x62d   :  { %1127 = vrot.lane.b32.xlu2 %v1125_v34, %s5179_s13 }
 0x62e   :  { %4768 = vtanh.f32 %v1197_v49 }
 0x634   :  { %v4769_v52 = vpop.eup %4768 }
 0x635   :  { %v1199_v42 = vsub.f32 %v5822_v4, %v4769_v52 }
 0x637   :  { %1201 = vrot.lane.b32.xlu1 %v1199_v42, %s5179_s13 }
 0x687   :  { %v1128_v57 = vpop.permute.xlu2 %1127 }
 0x688   :  { %v1130_v53 = vmul.f32 %v1128_v57, %v1120_v54 }
 0x68a   :  { %1132 = vrot.lane.b32.xlu1 %v1130_v53, %s5180_s3 }
 0x6a9   :  { %v1202_v62 = vpop.permute.xlu1 %1201 }
 0x6aa   :  { %v1204_v58 = vmul.f32 %v1202_v62, %v1194_v9 }
 0x6ac   :  { %1206 = vrot.lane.b32.xlu0 %v1204_v58, %s5180_s3 }
 0x6fc   :  { %v1133_v40 = vpop.permute.xlu1 %1132 }
 0x6fd   :  { %v5870_v63 = vadd.f32 %v4767_v14, %v1133_v40 }
 0x6ff   :  { %4520 = vmatmul.msk.f32.vlgmr.msra.gmra.mxu0 %vm391_vm9, %v5870_v63  ;;  %4521 = vmatmul.msk.f32.vlgmr.msrb.gmra.mxu1 %vm391_vm9, %v5870_v63 }
 0x700   :  { %1461 = vmatpush.msra.mxu0 %v5597_v26  ;;  %1481 = vmatpush.msrb.mxu1 %v5649_v15 }
 0x702   :  { %1462 = vmatpush.msra.mxu0 %v5606_v29  ;;  %1482 = vmatpush.msrb.mxu1 %v5654_v37 }
 0x704   :  { %1463 = vmatpush.msra.mxu0 %v5614_v31  ;;  %1483 = vmatpush.msrb.mxu1 %v5661_v38 }
 0x706   :  { %1464 = vmatpush.msra.mxu0 %v5642_v36  ;;  %1484 = vmatpush.msrb.mxu1 %v5668_v39 }
 0x71e   :  { %v1207_v35 = vpop.permute.xlu0 %1206 }
 0x71f   :  { %v5884_v4 = vadd.f32 %v4769_v52, %v1207_v35 }
 0x721   :  { %4522 = vmatmul.msk.f32.vlgmr.msrb.gmra.mxu2 %vm391_vm9, %v5884_v4  ;;  %4523 = vmatmul.msk.f32.vlgmr.msra.gmra.mxu3 %vm391_vm9, %v5884_v4 }
 0x722   :  { %4525 = vmatmul.msk.f32.vlgmr.msrb.gmra.mxu0 %vm391_vm9, %v5884_v4  ;;  %4526 = vmatmul.msk.f32.vlgmr.msra.gmra.mxu1 %vm391_vm9, %v5884_v4 }
 0x723   :  { %1534 = vmatpush.msrb.mxu2 %v5832_v33  ;;  %1554 = vmatpush.msra.mxu3 %v5533_v21 }
 0x724   :  { %1611 = vmatpush.msrb.mxu0 %v5587_v17  ;;  %1631 = vmatpush.msra.mxu1 %v5592_v24 }
 0x725   :  { %1535 = vmatpush.msrb.mxu2 %v5838_v41  ;;  %1555 = vmatpush.msra.mxu3 %v5535_v22 }
 0x726   :  { %1612 = vmatpush.msrb.mxu0 %v5589_v18  ;;  %1632 = vmatpush.msra.mxu1 %v5601_v27 }
 0x727   :  { %1536 = vmatpush.msrb.mxu2 %v5844_v47  ;;  %1556 = vmatpush.msra.mxu3 %v5538_v11 }
 0x728   :  { %1613 = vmatpush.msrb.mxu0 %v5595_v25  ;;  %1633 = vmatpush.msra.mxu1 %v5611_v30 }
 0x729   :  { %1537 = vmatpush.msrb.mxu2 %v5850_v48  ;;  %1557 = vmatpush.msra.mxu3 %v5541_v23 }
 0x72a   :  { %1614 = vmatpush.msrb.mxu0 %v5604_v28  ;;  %1634 = vmatpush.msra.mxu1 %v5621_v32 }
 0x77c   :  { %v1230_v21 = vpop.f32.mrf.mxu0  ;;  %v1250_v8 = vpop.f32.mrf.mxu1 }
 0x77d   :  { %v1231_v11 = vadd.f32 %v5704_v46, %v1230_v21 }
 0x79f   :  { %v1346_v22 = vpop.f32.mrf.mxu0  ;;  %v1366_v52 = vpop.f32.mrf.mxu1 }
 0x7a0   :  { %v1347_v54 = vadd.f32 %v5568_v51, %v1346_v22  ;;  %v1367_v35 = vadd.f32 %v5574_v61, %v1366_v52  ;;  %v5943_v52 = vld [vmem:[#allocation6 + $0x10] sm:$0xff] }
 0x7a2   :  { %v1369_v0 = vadd.f32 %v1347_v54, %v5779_v12 }
 0x7a4   :  { %v4527_v6 = vmul.f32 -1.442695, %v1369_v0  ;;  %v1293_v7 = vpop.f32.mrf.mxu3  ;;  %v495_v0 = vadd.f32 %v5579_v2, %v5781_v13 }
 0x7a5   :  { %v1294_v44 = vadd.f32 %v1293_v7, %v1231_v11 }
 0x7a6   :  { %4770 = vpow2.f32 %v4527_v6  ;;  %v1273_v6 = vpop.f32.mrf.mxu2 }
 0x7a7   :  { %v4524_v45 = vmul.f32 -1.442695, %v1294_v44  ;;  %v1251_v44 = vadd.f32 %v5715_v16, %v1250_v8  ;;  %v1274_v61 = vadd.f32 %v5725_v55, %v1273_v6 }
 0x7a9   :  { %4772 = vpow2.f32 %v4524_v45 }
 0x7ac   :  { %v4771_v60 = vpop.eup %4770 }
 0x7ad   :  { %v1373_v23 = vadd.f32 1.0, %v4771_v60 }
 0x7af   :  { %v4773_v19 = vpop.eup %4772  ;;  %4774 = vrcp.f32 %v1373_v23  ;;  %v1385_v12 = vand.u32 2147483648, %v1373_v23  ;;  %v1383_v49 = vand.u32 2147483647, %v1373_v23  ;;  %vm1379_vm11 = vweird.f32 %v1373_v23 }
 0x7b0   :  { %v1299_v1 = vadd.f32 1.0, %v4773_v19 }
 0x7b1   :  { %v1386_v62 = vor.u32 1.1754944e-38, %v1385_v12  ;;  %vm1384_vm14 = vcmp.eq.f32.partialorder %v1383_v49, 8.507059e+37  ;;  %v5933_v49 = vld [vmem:[#allocation6 + $0x18] sm:$0xff] }
 0x7b2   :  { %4776 = vrcp.f32 %v1299_v1  ;;  %v1311_v53 = vand.u32 2147483648, %v1299_v1  ;;  %v1309_v40 = vand.u32 2147483647, %v1299_v1  ;;  %vm1305_vm15 = vweird.f32 %v1299_v1 }
 0x7b4   :  { %v1312_v7 = vor.u32 1.1754944e-38, %v1311_v53 }
 0x7b5   :  { %v4775_v9 = vpop.eup %4774 }
 0x7b6   :  { %v1375_v14 = vmul.f32 %v4775_v9, %v1373_v23  ;;  %vm1380_vm10 = vweird.f32 %v4775_v9 }
 0x7b7   :  { %vm1381_vm12 = vmor %vm1379_vm11, %vm1380_vm10  ;;  %vm1310_vm10 = vcmp.eq.f32.partialorder %v1309_v40, 8.507059e+37 }
 0x7b8   :  { %v4777_v51 = vpop.eup %4776  ;;  %v1376_v20 = vsub.f32 1.0, %v1375_v14 }
 0x7b9   :  { %v1301_v3 = vmul.f32 %v4777_v51, %v1299_v1  ;;  %vm1306_vm13 = vweird.f32 %v4777_v51 }
 0x7ba   :  { %v1377_v34 = vmul.f32 %v4775_v9, %v1376_v20  ;;  %vm1307_vm0 = vmor %vm1305_vm15, %vm1306_vm13 }
 0x7bb   :  { %v1302_v42 = vsub.f32 1.0, %v1301_v3 }
 0x7bc   :  { %v1378_v57 = vadd.f32 %v4775_v9, %v1377_v34 }
 0x7bd   :  { %v1303_v58 = vmul.f32 %v4777_v51, %v1302_v42  ;;  %v5949_v42 = vld [vmem:[#allocation6 + $0x8] sm:$0xff] }
 0x7be   :  { %v1382_v21 = vsel %vm1381_vm12, %v4775_v9, %v1378_v57 }
 0x7bf   :  { %v1387_v22 = vsel %vm1384_vm14, %v1386_v62, %v1382_v21  ;;  %v1304_v54 = vadd.f32 %v4777_v51, %v1303_v58 }
 0x7c0   :  { %v1389_v11 = vmul.f32 %v1387_v22, %v1367_v35 }
 0x7c1   :  { %v1308_v45 = vsel %vm1307_vm0, %v4777_v51, %v1304_v54 }
 0x7c2   :  { %v1390_v60 = vadd.f32 %v1389_v11, %v495_v0  ;;  %v1313_v23 = vsel %vm1310_vm10, %v1312_v7, %v1308_v45 }
 0x7c3   :  { %v1315_v19 = vmul.f32 %v1313_v23, %v1251_v44 }
 0x7c4   :  { %4778 = vtanh.f32 %v1390_v60 }
 0x7c5   :  { %v1316_v9 = vadd.f32 %v1315_v19, %v1274_v61 }
 0x7c7   :  { %4780 = vtanh.f32 %v1316_v9 }
 0x7ca   :  { %v4779_v1 = vpop.eup %4778 }
 0x7cb   :  { %v1392_v14 = vsub.f32 %v5884_v4, %v4779_v1 }
 0x7cd   :  { %v4781_v2 = vpop.eup %4780  ;;  %1394 = vrot.lane.b32.xlu0 %v1392_v14, %s5179_s13 }
 0x7ce   :  { %v1318_v13 = vsub.f32 %v5870_v63, %v4781_v2 }
 0x7d0   :  { %1320 = vrot.lane.b32.xlu2 %v1318_v13, %s5179_s13 }
 0x82a   :  { %v1321_v8 = vpop.permute.xlu2 %1320 }
 0x82b   :  { %v1323_v51 = vmul.f32 %v1321_v8, %v1313_v23  ;;  %v5991_v8 = vld [vmem:[%s7077_s8] ss:$0 sm:$0xff] }
 0x82d   :  { %1325 = vrot.lane.b32.xlu1 %v1323_v51, %s5180_s3  ;;  %v498_v51 = vadd.f32 %v5991_v8, %v5786_v10 }
 0x83f   :  { %v1395_v20 = vpop.permute.xlu0 %1394 }
 0x840   :  { %v1397_v12 = vmul.f32 %v1395_v20, %v1387_v22 }
 0x842   :  { %1399 = vrot.lane.b32.xlu2 %v1397_v12, %s5180_s3 }
 0x89c   :  { %v1400_v3 = vpop.permute.xlu2 %1399 }
 0x89d   :  { %v5924_v34 = vadd.f32 %v4779_v1, %v1400_v3 }
 0x89f   :  { %4530 = vmatmul.msk.f32.vlgmr.msra.gmra.mxu0 %vm391_vm9, %v5924_v34  ;;  %4531 = vmatmul.msk.f32.vlgmr.msrb.gmra.mxu1 %vm391_vm9, %v5924_v34  ;;  %v1326_v63 = vpop.permute.xlu1 %1325 }
 0x8a0   :  { %v5930_v4 = vadd.f32 %v4781_v2, %v1326_v63  ;;  %1727 = vmatpush.msra.mxu0 %v5832_v33  ;;  %1747 = vmatpush.msrb.mxu1 %v5933_v49 }
 0x8a2   :  { %4528 = vmatmul.msk.f32.vlgmr.msra.gmra.mxu2 %vm391_vm9, %v5930_v4  ;;  %4529 = vmatmul.msk.f32.vlgmr.msrb.gmra.mxu3 %vm391_vm9, %v5930_v4 }
 0x8a3   :  { %1654 = vmatpush.msra.mxu2 %v5597_v26  ;;  %1674 = vmatpush.msrb.mxu3 %v5649_v15  ;;  %v5955_v26 = vld [vmem:[#allocation6] sm:$0xff] }
 0x8a4   :  { %1728 = vmatpush.msra.mxu0 %v5838_v41  ;;  %1748 = vmatpush.msrb.mxu1 %v5943_v52 }
 0x8a5   :  { %1655 = vmatpush.msra.mxu2 %v5606_v29  ;;  %1675 = vmatpush.msrb.mxu3 %v5654_v37 }
 0x8a6   :  { %1729 = vmatpush.msra.mxu0 %v5844_v47  ;;  %1749 = vmatpush.msrb.mxu1 %v5949_v42 }
 0x8a7   :  { %1656 = vmatpush.msra.mxu2 %v5614_v31  ;;  %1676 = vmatpush.msrb.mxu3 %v5661_v38 }
 0x8a8   :  { %1730 = vmatpush.msra.mxu0 %v5850_v48  ;;  %1750 = vmatpush.msrb.mxu1 %v5955_v26 }
 0x8a9   :  { %1657 = vmatpush.msra.mxu2 %v5642_v36  ;;  %1677 = vmatpush.msrb.mxu3 %v5668_v39 }
 0x8aa   :  { %4533 = vmatmul.msk.f32.vlgmr.msrb.gmra.mxu2 %vm391_vm9, %v5924_v34  ;;  %4534 = vmatmul.msk.f32.vlgmr.msra.gmra.mxu3 %vm391_vm9, %v5924_v34 }
 0x8ab   :  { %1804 = vmatpush.msrb.mxu2 %v5587_v17  ;;  %1824 = vmatpush.msra.mxu3 %v5592_v24 }
 0x8ad   :  { %1805 = vmatpush.msrb.mxu2 %v5589_v18  ;;  %1825 = vmatpush.msra.mxu3 %v5601_v27  ;;  %v5976_v18 = vld [vmem:[%s7076_s7] ss:$0 sm:$0xff] }
 0x8af   :  { %1806 = vmatpush.msrb.mxu2 %v5595_v25  ;;  %1826 = vmatpush.msra.mxu3 %v5611_v30 }
 0x8b1   :  { %1807 = vmatpush.msrb.mxu2 %v5604_v28  ;;  %1827 = vmatpush.msra.mxu3 %v5621_v32 }
 0x91c   :  { %v1486_v36 = vpop.f32.mrf.mxu1 }
 0x925   :  { %v1423_v29 = vpop.f32.mrf.mxu2  ;;  %v1443_v53 = vpop.f32.mrf.mxu3 }
 0x926   :  { %v1424_v31 = vadd.f32 %v5704_v46, %v1423_v29  ;;  %v1444_v54 = vadd.f32 %v5715_v16, %v1443_v53  ;;  %v5985_v16 = vld [vmem:[%s7078_s9] ss:$0 sm:$0xff]  ;;  %v6064_v53 = vld [vmem:[%s7076_s7 + $0x1] ss:$0 sm:$0xff] }
 0x928   :  { %v1487_v15 = vadd.f32 %v1486_v36, %v1424_v31 }
 0x92a   :  { %v4532_v17 = vmul.f32 -1.442695, %v1487_v15 }
 0x92c   :  { %4782 = vpow2.f32 %v4532_v17 }
 0x92d   :  { %v1539_v24 = vpop.f32.mrf.mxu2  ;;  %v1559_v9 = vpop.f32.mrf.mxu3 }
 0x92e   :  { %v1540_v25 = vadd.f32 %v5976_v18, %v1539_v24 }
 0x930   :  { %v1562_v27 = vadd.f32 %v1540_v25, %v5783_v5  ;;  %v1466_v5 = vpop.f32.mrf.mxu0 }
 0x931   :  { %v1467_v7 = vadd.f32 %v5725_v55, %v1466_v5  ;;  %v1560_v55 = vadd.f32 %v5985_v16, %v1559_v9 }
 0x932   :  { %v4783_v28 = vpop.eup %4782  ;;  %v4535_v30 = vmul.f32 -1.442695, %v1562_v27  ;;  %v4939_v27 = vld [vmem:[#allocation4 + $0x38] sm:$0xff] }
 0x933   :  { %v1492_v32 = vadd.f32 1.0, %v4783_v28  ;;  %v4940_v28 = vld [vmem:[#allocation6 + $0x38] sm:$0xff] }
 0x934   :  { %4784 = vpow2.f32 %v4535_v30  ;;  %v4941_v30 = vld [vmem:[#allocation4 + $0x30] sm:$0xff] }
 0x935   :  { %4786 = vrcp.f32 %v1492_v32  ;;  %v1504_v62 = vand.u32 2147483648, %v1492_v32  ;;  %v1502_v40 = vand.u32 2147483647, %v1492_v32  ;;  %vm1498_vm12 = vweird.f32 %v1492_v32 }
 0x937   :  { %v1505_v22 = vor.u32 1.1754944e-38, %v1504_v62  ;;  %vm1503_vm14 = vcmp.eq.f32.partialorder %v1502_v40, 8.507059e+37 }
 0x93a   :  { %v4785_v37 = vpop.eup %4784 }
 0x93b   :  { %v4787_v38 = vpop.eup %4786  ;;  %v1566_v39 = vadd.f32 1.0, %v4785_v37  ;;  %v4943_v37 = vld [vmem:[#allocation4 + $0x28] sm:$0xff] }
 0x93c   :  { %v1494_v46 = vmul.f32 %v4787_v38, %v1492_v32  ;;  %vm1499_vm11 = vweird.f32 %v4787_v38  ;;  %v4942_v32 = vld [vmem:[#allocation6 + $0x30] sm:$0xff] }
 0x93d   :  { %4788 = vrcp.f32 %v1566_v39  ;;  %vm1500_vm13 = vmor %vm1498_vm12, %vm1499_vm11  ;;  %v1578_v60 = vand.u32 2147483648, %v1566_v39  ;;  %v1576_v19 = vand.u32 2147483647, %v1566_v39  ;;  %vm1572_vm0 = vweird.f32 %v1566_v39 }
 0x93e   :  { %v1495_v57 = vsub.f32 1.0, %v1494_v46  ;;  %v4946_v46 = vld [vmem:[#allocation6 + $0x20] sm:$0xff] }
 0x93f   :  { %v1579_v14 = vor.u32 1.1754944e-38, %v1578_v60  ;;  %vm1577_vm11 = vcmp.eq.f32.partialorder %v1576_v19, 8.507059e+37 }
 0x940   :  { %v1496_v58 = vmul.f32 %v4787_v38, %v1495_v57 }
 0x942   :  { %v1497_v35 = vadd.f32 %v4787_v38, %v1496_v58 }
 0x943   :  { %v4789_v21 = vpop.eup %4788 }
 0x944   :  { %v1501_v0 = vsel %vm1500_vm13, %v4787_v38, %v1497_v35  ;;  %v1568_v11 = vmul.f32 %v4789_v21, %v1566_v39  ;;  %vm1573_vm15 = vweird.f32 %v4789_v21  ;;  %v4944_v38 = vld [vmem:[#allocation6 + $0x28] sm:$0xff]  ;;  %v4945_v39 = vld [vmem:[#allocation4 + $0x20] sm:$0xff] }
 0x945   :  { %v1506_v6 = vsel %vm1503_vm14, %v1505_v22, %v1501_v0  ;;  %vm1574_vm10 = vmor %vm1572_vm0, %vm1573_vm15 }
 0x946   :  { %v1508_v44 = vmul.f32 %v1506_v6, %v1444_v54  ;;  %v1569_v45 = vsub.f32 1.0, %v1568_v11 }
 0x948   :  { %v1509_v23 = vadd.f32 %v1508_v44, %v1467_v7  ;;  %v1570_v61 = vmul.f32 %v4789_v21, %v1569_v45 }
 0x94a   :  { %4790 = vtanh.f32 %v1509_v23  ;;  %v1571_v1 = vadd.f32 %v4789_v21, %v1570_v61 }
 0x94c   :  { %v1575_v2 = vsel %vm1574_vm10, %v4789_v21, %v1571_v1 }
 0x94d   :  { %v1580_v13 = vsel %vm1577_vm11, %v1579_v14, %v1575_v2  ;;  %v6072_v2 = vld [vmem:[%s7078_s9 + $0x1] ss:$0 sm:$0xff] }
 0x94e   :  { %v1582_v20 = vmul.f32 %v1580_v13, %v1560_v55 }
 0x950   :  { %v4791_v12 = vpop.eup %4790  ;;  %v1583_v3 = vadd.f32 %v1582_v20, %v498_v51 }
 0x951   :  { %v1511_v63 = vsub.f32 %v5930_v4, %v4791_v12 }
 0x952   :  { %4792 = vtanh.f32 %v1583_v3  ;;  %v6078_v3 = vld [vmem:[%s7077_s8 + $0x1] ss:$0 sm:$0xff] }
 0x953   :  { %1513 = vrot.lane.b32.xlu1 %v1511_v63, %s5179_s13 }
 0x958   :  { %v4793_v29 = vpop.eup %4792 }
 0x959   :  { %v1585_v31 = vsub.f32 %v5924_v34, %v4793_v29 }
 0x95b   :  { %1587 = vrot.lane.b32.xlu0 %v1585_v31, %s5179_s13 }
 0x9c5   :  { %v1514_v36 = vpop.permute.xlu1 %1513 }
 0x9c6   :  { %v1516_v15 = vmul.f32 %v1514_v36, %v1506_v6 }
 0x9c8   :  { %1518 = vrot.lane.b32.xlu0 %v1516_v15, %s5180_s3 }
 0x9cd   :  { %v1588_v17 = vpop.permute.xlu0 %1587 }
 0x9ce   :  { %v1590_v24 = vmul.f32 %v1588_v17, %v1580_v13 }
 0x9d0   :  { %1592 = vrot.lane.b32.xlu2 %v1590_v24, %s5180_s3 }
 0xa2a   :  { %v1593_v10 = vpop.permute.xlu2 %1592 }
 0xa2b   :  { %v6001_v25 = vadd.f32 %v4793_v29, %v1593_v10 }
 0xa2d   :  { %4538 = vmatmul.msk.f32.vlgmr.msra.gmra.mxu2 %vm391_vm9, %v6001_v25  ;;  %4539 = vmatmul.msk.f32.vlgmr.msrb.gmra.mxu3 %vm391_vm9, %v6001_v25 }
 0xa2e   :  { %1920 = vmatpush.msra.mxu2 %v5832_v33  ;;  %1940 = vmatpush.msrb.mxu3 %v5933_v49  ;;  %v6021_v33 = vld [vmem:[#allocation2 + $0x38] sm:$0xff]  ;;  %v6039_v49 = vld [vmem:[#allocation2 + $0x28] sm:$0xff] }
 0xa30   :  { %1921 = vmatpush.msra.mxu2 %v5838_v41  ;;  %1941 = vmatpush.msrb.mxu3 %v5943_v52  ;;  %v6027_v41 = vld [vmem:[%s7103_s14 + $0x38] sm:$0xff]  ;;  %v6045_v52 = vld [vmem:[%s7103_s14 + $0x28] sm:$0xff] }
 0xa32   :  { %1922 = vmatpush.msra.mxu2 %v5844_v47  ;;  %1942 = vmatpush.msrb.mxu3 %v5949_v42  ;;  %v6030_v47 = vld [vmem:[#allocation2 + $0x30] sm:$0xff]  ;;  %v6048_v42 = vld [vmem:[#allocation2 + $0x20] sm:$0xff] }
 0xa34   :  { %1923 = vmatpush.msra.mxu2 %v5850_v48  ;;  %1943 = vmatpush.msrb.mxu3 %v5955_v26  ;;  %v6036_v48 = vld [vmem:[%s7103_s14 + $0x30] sm:$0xff]  ;;  %v6054_v26 = vld [vmem:[%s7103_s14 + $0x20] sm:$0xff] }
 0xa3a   :  { %v1519_v34 = vpop.permute.xlu0 %1518 }
 0xa3b   :  { %v6015_v4 = vadd.f32 %v4791_v12, %v1519_v34 }
 0xa3d   :  { %4536 = vmatmul.msk.f32.vlgmr.msrb.gmra.mxu0 %vm391_vm9, %v6015_v4  ;;  %4537 = vmatmul.msk.f32.vlgmr.msra.gmra.mxu1 %vm391_vm9, %v6015_v4 }
 0xa3e   :  { %1847 = vmatpush.msrb.mxu0 %v6021_v33  ;;  %1867 = vmatpush.msra.mxu1 %v6027_v41 }
 0xa40   :  { %1848 = vmatpush.msrb.mxu0 %v6030_v47  ;;  %1868 = vmatpush.msra.mxu1 %v6036_v48 }
 0xa42   :  { %1849 = vmatpush.msrb.mxu0 %v6039_v49  ;;  %1869 = vmatpush.msra.mxu1 %v6045_v52 }
 0xa44   :  { %1850 = vmatpush.msrb.mxu0 %v6048_v42  ;;  %1870 = vmatpush.msra.mxu1 %v6054_v26 }
 0xa45   :  { %4541 = vmatmul.msk.f32.vlgmr.msra.gmra.mxu0 %vm391_vm9, %v6001_v25  ;;  %4542 = vmatmul.msk.f32.vlgmr.msrb.gmra.mxu1 %vm391_vm9, %v6001_v25 }
 0xa46   :  { %1997 = vmatpush.msra.mxu0 %v4939_v27  ;;  %2017 = vmatpush.msrb.mxu1 %v4940_v28 }
 0xa48   :  { %1998 = vmatpush.msra.mxu0 %v4941_v30  ;;  %2018 = vmatpush.msrb.mxu1 %v4942_v32 }
 0xa4a   :  { %1999 = vmatpush.msra.mxu0 %v4943_v37  ;;  %2019 = vmatpush.msrb.mxu1 %v4944_v38  ;;  %v501_v37 = vadd.f32 %v5991_v8, %v5791_v50 }
 0xa4c   :  { %2000 = vmatpush.msra.mxu0 %v4945_v39  ;;  %2020 = vmatpush.msrb.mxu1 %v4946_v46 }
 0xab0   :  { %v1679_v58 = vpop.f32.mrf.mxu3 }
 0xaba   :  { %v1616_v57 = vpop.f32.mrf.mxu0  ;;  %v1636_v23 = vpop.f32.mrf.mxu1 }
 0xabb   :  { %v1617_v62 = vadd.f32 %v6064_v53, %v1616_v57  ;;  %v1637_v13 = vadd.f32 %v6072_v2, %v1636_v23 }
 0xabd   :  { %v1680_v40 = vadd.f32 %v1679_v58, %v1617_v62 }
 0xabf   :  { %v4540_v35 = vmul.f32 -1.442695, %v1680_v40 }
 0xac1   :  { %4794 = vpow2.f32 %v4540_v35 }
 0xac2   :  { %v1732_v21 = vpop.f32.mrf.mxu0  ;;  %v1752_v10 = vpop.f32.mrf.mxu1 }
 0xac3   :  { %v1733_v5 = vadd.f32 %v5976_v18, %v1732_v21  ;;  %v1753_v28 = vadd.f32 %v5985_v16, %v1752_v10 }
 0xac5   :  { %v1755_v22 = vadd.f32 %v1733_v5, %v5788_v43  ;;  %v1659_v43 = vpop.f32.mrf.mxu2 }
 0xac6   :  { %v1660_v63 = vadd.f32 %v6078_v3, %v1659_v43 }
 0xac7   :  { %v4795_v54 = vpop.eup %4794  ;;  %v4543_v0 = vmul.f32 -1.442695, %v1755_v22 }
 0xac8   :  { %v1685_v11 = vadd.f32 1.0, %v4795_v54 }
 0xac9   :  { %4796 = vpow2.f32 %v4543_v0 }
 0xaca   :  { %4798 = vrcp.f32 %v1685_v11  ;;  %v1697_v61 = vand.u32 2147483648, %v1685_v11  ;;  %v1695_v9 = vand.u32 2147483647, %v1685_v11  ;;  %vm1691_vm13 = vweird.f32 %v1685_v11 }
 0xacc   :  { %v1698_v55 = vor.u32 1.1754944e-38, %v1697_v61  ;;  %vm1696_vm15 = vcmp.eq.f32.partialorder %v1695_v9, 8.507059e+37 }
 0xacf   :  { %v4797_v6 = vpop.eup %4796 }
 0xad0   :  { %v4799_v7 = vpop.eup %4798  ;;  %v1759_v44 = vadd.f32 1.0, %v4797_v6 }
 0xad1   :  { %v1687_v45 = vmul.f32 %v4799_v7, %v1685_v11  ;;  %vm1692_vm12 = vweird.f32 %v4799_v7 }
 0xad2   :  { %4800 = vrcp.f32 %v1759_v44  ;;  %vm1693_vm14 = vmor %vm1691_vm13, %vm1692_vm12  ;;  %v1771_v36 = vand.u32 2147483648, %v1759_v44  ;;  %v1769_v24 = vand.u32 2147483647, %v1759_v44  ;;  %vm1765_vm10 = vweird.f32 %v1759_v44 }
 0xad3   :  { %v1688_v60 = vsub.f32 1.0, %v1687_v45 }
 0xad4   :  { %v1772_v27 = vor.u32 1.1754944e-38, %v1771_v36  ;;  %vm1770_vm12 = vcmp.eq.f32.partialorder %v1769_v24, 8.507059e+37 }
 0xad5   :  { %v1689_v19 = vmul.f32 %v4799_v7, %v1688_v60 }
 0xad7   :  { %v1690_v1 = vadd.f32 %v4799_v7, %v1689_v19 }
 0xad8   :  { %v4801_v14 = vpop.eup %4800 }
 0xad9   :  { %v1694_v51 = vsel %vm1693_vm14, %v4799_v7, %v1690_v1  ;;  %v1761_v20 = vmul.f32 %v4801_v14, %v1759_v44  ;;  %vm1766_vm0 = vweird.f32 %v4801_v14 }
 0xada   :  { %v1699_v12 = vsel %vm1696_vm15, %v1698_v55, %v1694_v51  ;;  %vm1767_vm11 = vmor %vm1765_vm10, %vm1766_vm0 }
 0xadb   :  { %v1701_v29 = vmul.f32 %v1699_v12, %v1637_v13  ;;  %v1762_v31 = vsub.f32 1.0, %v1761_v20 }
 0xadd   :  { %v1702_v15 = vadd.f32 %v1701_v29, %v1660_v63  ;;  %v1763_v17 = vmul.f32 %v4801_v14, %v1762_v31 }
 0xadf   :  { %4802 = vtanh.f32 %v1702_v15  ;;  %v1764_v34 = vadd.f32 %v4801_v14, %v1763_v17 }
 0xae1   :  { %v1768_v30 = vsel %vm1767_vm11, %v4801_v14, %v1764_v34 }
 0xae2   :  { %v1773_v32 = vsel %vm1770_vm12, %v1772_v27, %v1768_v30  ;;  %v504_v30 = vadd.f32 %v5991_v8, %v5795_v59 }
 0xae3   :  { %v1775_v38 = vmul.f32 %v1773_v32, %v1753_v28 }
 0xae5   :  { %v4803_v39 = vpop.eup %4802  ;;  %v1776_v46 = vadd.f32 %v1775_v38, %v501_v37 }
 0xae6   :  { %v1704_v57 = vsub.f32 %v6015_v4, %v4803_v39 }
 0xae7   :  { %4804 = vtanh.f32 %v1776_v46 }
 0xae8   :  { %1706 = vrot.lane.b32.xlu1 %v1704_v57, %s5179_s13 }
 0xaed   :  { %v4805_v62 = vpop.eup %4804 }
 0xaee   :  { %v1778_v58 = vsub.f32 %v6001_v25, %v4805_v62 }
 0xaf0   :  { %1780 = vrot.lane.b32.xlu2 %v1778_v58, %s5179_s13 }
 0xb4a   :  { %v1781_v40 = vpop.permute.xlu2 %1780 }
 0xb4b   :  { %v1783_v35 = vmul.f32 %v1781_v40, %v1773_v32 }
 0xb4d   :  { %1785 = vrot.lane.b32.xlu1 %v1783_v35, %s5180_s3 }
 0xb5a   :  { %v1707_v21 = vpop.permute.xlu1 %1706 }
 0xb5b   :  { %v1709_v5 = vmul.f32 %v1707_v21, %v1699_v12 }
 0xb5d   :  { %1711 = vrot.lane.b32.xlu0 %v1709_v5, %s5180_s3 }
 0xbbf   :  { %v1786_v50 = vpop.permute.xlu1 %1785 }
 0xbc0   :  { %v6090_v22 = vadd.f32 %v4805_v62, %v1786_v50 }
 0xbc2   :  { %4546 = vmatmul.msk.f32.vlgmr.msrb.gmra.mxu0 %vm391_vm9, %v6090_v22  ;;  %4547 = vmatmul.msk.f32.vlgmr.msra.gmra.mxu1 %vm391_vm9, %v6090_v22 }
 0xbcf   :  { %v1712_v25 = vpop.permute.xlu0 %1711 }
 0xbd0   :  { %v6096_v4 = vadd.f32 %v4803_v39, %v1712_v25 }
 0xbd2   :  { %4544 = vmatmul.msk.f32.vlgmr.msrb.gmra.mxu2 %vm391_vm9, %v6096_v4  ;;  %4545 = vmatmul.msk.f32.vlgmr.msra.gmra.mxu3 %vm391_vm9, %v6096_v4 }
 0xbd3   :  { %2060 = vmatpush.msra.mxu3 %v6027_v41  ;;  %2040 = vmatpush.msrb.mxu2 %v6021_v33 }
 0xbd5   :  { %2061 = vmatpush.msra.mxu3 %v6036_v48  ;;  %2041 = vmatpush.msrb.mxu2 %v6030_v47 }
 0xbd7   :  { %2062 = vmatpush.msra.mxu3 %v6045_v52  ;;  %2042 = vmatpush.msrb.mxu2 %v6039_v49 }
 0xbd9   :  { %2063 = vmatpush.msra.mxu3 %v6054_v26  ;;  %2043 = vmatpush.msrb.mxu2 %v6048_v42 }
 0xbda   :  { %4549 = vmatmul.msk.f32.vlgmr.msra.gmra.mxu2 %vm391_vm9, %v6090_v22  ;;  %4550 = vmatmul.msk.f32.vlgmr.msrb.gmra.mxu3 %vm391_vm9, %v6090_v22 }
 0xc3f   :  { %v1872_v48 = vpop.f32.mrf.mxu1 }
 0xc55   :  { %v1809_v41 = vpop.f32.mrf.mxu2  ;;  %v1829_v23 = vpop.f32.mrf.mxu3 }
 0xc56   :  { %v1810_v33 = vadd.f32 %v6064_v53, %v1809_v41  ;;  %v1830_v43 = vadd.f32 %v6072_v2, %v1829_v23 }
 0xc58   :  { %v1873_v54 = vadd.f32 %v1872_v48, %v1810_v33 }
 0xc5a   :  { %v4548_v47 = vmul.f32 -1.442695, %v1873_v54 }
 0xc5c   :  { %4806 = vpow2.f32 %v4548_v47 }
 0xc5d   :  { %v1925_v52 = vpop.f32.mrf.mxu2  ;;  %v1945_v17 = vpop.f32.mrf.mxu3 }
 0xc5e   :  { %v1926_v49 = vadd.f32 %v5976_v18, %v1925_v52  ;;  %v1946_v34 = vadd.f32 %v5985_v16, %v1945_v17  ;;  %v6195_v17 = vld [vmem:[#allocation10 + $0x28] sm:$0xff] }
 0xc60   :  { %v1948_v26 = vadd.f32 %v1926_v49, %v5793_v56  ;;  %v1852_v56 = vpop.f32.mrf.mxu0 }
 0xc61   :  { %v1853_v20 = vadd.f32 %v6078_v3, %v1852_v56  ;;  %v6154_v56 = vld [vmem:[#allocation12 + $0x10] sm:$0xff] }
 0xc62   :  { %v4807_v0 = vpop.eup %4806  ;;  %v4551_v42 = vmul.f32 -1.442695, %v1948_v26 }
 0xc63   :  { %v1878_v11 = vadd.f32 1.0, %v4807_v0 }
 0xc64   :  { %4808 = vpow2.f32 %v4551_v42 }
 0xc65   :  { %4810 = vrcp.f32 %v1878_v11  ;;  %v1890_v61 = vand.u32 2147483648, %v1878_v11  ;;  %v1888_v9 = vand.u32 2147483647, %v1878_v11  ;;  %vm1884_vm14 = vweird.f32 %v1878_v11 }
 0xc67   :  { %v1891_v14 = vor.u32 1.1754944e-38, %v1890_v61  ;;  %vm1889_vm0 = vcmp.eq.f32.partialorder %v1888_v9, 8.507059e+37  ;;  %v6139_v9 = vld [vmem:[%s7079_s10 + $0x18] sm:$0xff] }
 0xc68   :  { %2124 = vmatpush.msrb.mxu0 %v6139_v9 }
 0xc6a   :  { %v4809_v6 = vpop.eup %4808 }
 0xc6b   :  { %v4811_v7 = vpop.eup %4810  ;;  %v1952_v44 = vadd.f32 1.0, %v4809_v6 }
 0xc6c   :  { %v1880_v45 = vmul.f32 %v4811_v7, %v1878_v11  ;;  %vm1885_vm13 = vweird.f32 %v4811_v7 }
 0xc6d   :  { %4812 = vrcp.f32 %v1952_v44  ;;  %vm1886_vm15 = vmor %vm1884_vm14, %vm1885_vm13  ;;  %v1964_v29 = vand.u32 2147483648, %v1952_v44  ;;  %v1962_v15 = vand.u32 2147483647, %v1952_v44  ;;  %vm1958_vm11 = vweird.f32 %v1952_v44 }
 0xc6e   :  { %v1881_v60 = vsub.f32 1.0, %v1880_v45 }
 0xc6f   :  { %v1965_v10 = vor.u32 1.1754944e-38, %v1964_v29  ;;  %vm1963_vm13 = vcmp.eq.f32.partialorder %v1962_v15, 8.507059e+37  ;;  %v6185_v29 = vld [vmem:[#allocation10 + $0x38] sm:$0xff]  ;;  %v6193_v15 = vld [vmem:[#allocation12 + $0x30] sm:$0xff] }
 0xc70   :  { %v1882_v19 = vmul.f32 %v4811_v7, %v1881_v60 }
 0xc72   :  { %v1883_v1 = vadd.f32 %v4811_v7, %v1882_v19 }
 0xc73   :  { %v4813_v18 = vpop.eup %4812 }
 0xc74   :  { %v1887_v55 = vsel %vm1886_vm15, %v4811_v7, %v1883_v1  ;;  %v1954_v13 = vmul.f32 %v4813_v18, %v1952_v44  ;;  %vm1959_vm10 = vweird.f32 %v4813_v18  ;;  %v6141_v1 = vld [vmem:[#allocation10 + $0x18] sm:$0xff] }
 0xc75   :  { %v1892_v51 = vsel %vm1889_vm0, %v1891_v14, %v1887_v55  ;;  %vm1960_vm12 = vmor %vm1958_vm11, %vm1959_vm10  ;;  %2153 = vmatpush.msra.mxu1 %v6141_v1  ;;  %v6160_v14 = vld [vmem:[%s7079_s10 + $0x8] sm:$0xff] }
 0xc76   :  { %v1894_v12 = vmul.f32 %v1892_v51, %v1830_v43  ;;  %v1955_v63 = vsub.f32 1.0, %v1954_v13  ;;  %v6162_v43 = vld [vmem:[#allocation10 + $0x8] sm:$0xff] }
 0xc77   :  { %v6166_v55 = vld [vmem:[#allocation12 + $0x8] sm:$0xff] }
 0xc78   :  { %v1895_v31 = vadd.f32 %v1894_v12, %v1853_v20  ;;  %v1956_v36 = vmul.f32 %v4813_v18, %v1955_v63  ;;  %v6176_v20 = vld [vmem:[%s7079_s10] sm:$0xff] }
 0xc79   :  { %v6178_v12 = vld [vmem:[#allocation10] sm:$0xff] }
 0xc7a   :  { %4814 = vtanh.f32 %v1895_v31  ;;  %v1957_v24 = vadd.f32 %v4813_v18, %v1956_v36  ;;  %v6180_v63 = vld [vmem:[#allocation12] sm:$0xff]  ;;  %v6187_v31 = vld [vmem:[#allocation12 + $0x38] sm:$0xff]  ;;  %v6189_v36 = vld [vmem:[#allocation10 + $0x30] sm:$0xff] }
 0xc7c   :  { %v1961_v27 = vsel %vm1960_vm12, %v4813_v18, %v1957_v24  ;;  %v6152_v18 = vld [vmem:[#allocation10 + $0x10] sm:$0xff]  ;;  %v6197_v24 = vld [vmem:[#allocation12 + $0x28] sm:$0xff] }
 0xc7d   :  { %v1966_v28 = vsel %vm1963_vm13, %v1965_v10, %v1961_v27  ;;  %2154 = vmatpush.msra.mxu1 %v6152_v18  ;;  %v6201_v10 = vld [vmem:[#allocation10 + $0x20] sm:$0xff]  ;;  %v6209_v27 = vld [vmem:[#allocation7 + $0x18] sm:$0xff] }
 0xc7e   :  { %v1968_v32 = vmul.f32 %v1966_v28, %v1946_v34  ;;  %v6203_v34 = vld [vmem:[#allocation12 + $0x20] sm:$0xff] }
 0xc7f   :  { %2155 = vmatpush.msra.mxu1 %v6162_v43 }
 0xc80   :  { %v4815_v37 = vpop.eup %4814  ;;  %v1969_v38 = vadd.f32 %v1968_v32, %v504_v30  ;;  %v6213_v30 = vld [vmem:[#allocation7 + $0x10] sm:$0xff] }
 0xc81   :  { %v1897_v39 = vsub.f32 %v6096_v4, %v4815_v37  ;;  %2156 = vmatpush.msra.mxu1 %v6178_v12 }
 0xc82   :  { %4816 = vtanh.f32 %v1969_v38  ;;  %v6244_v38 = vld [vmem:[#allocation9 + $0x10] sm:$0xff] }
 0xc83   :  { %1899 = vrot.lane.b32.xlu0 %v1897_v39, %s5179_s13  ;;  %v6247_v39 = vld [vmem:[#allocation7 + $0x8] sm:$0xff] }
 0xc88   :  { %v4817_v46 = vpop.eup %4816 }
 0xc89   :  { %v1971_v57 = vsub.f32 %v6090_v22, %v4817_v46 }
 0xc8b   :  { %1973 = vrot.lane.b32.xlu2 %v1971_v57, %s5179_s13  ;;  %v6253_v57 = vld [vmem:[#allocation7] sm:$0xff] }
 0xce5   :  { %v1974_v16 = vpop.permute.xlu2 %1973 }
 0xce6   :  { %v1976_v62 = vmul.f32 %v1974_v16, %v1966_v28  ;;  %v6211_v28 = vld [vmem:[#allocation9 + $0x18] sm:$0xff]  ;;  %v6255_v16 = vld [vmem:[#allocation9] sm:$0xff] }
 0xce7   :  { %2216 = vmatpush.msrb.mxu3 %v6211_v28 }
 0xce8   :  { %1978 = vrot.lane.b32.xlu1 %v1976_v62, %s5180_s3  ;;  %v6264_v62 = vld [vmem:[%s7080_s11] ss:$0 sm:$0xff] }
 0xce9   :  { %2217 = vmatpush.msrb.mxu3 %v6244_v38 }
 0xcf5   :  { %v1900_v58 = vpop.permute.xlu0 %1899 }
 0xcf6   :  { %v1902_v40 = vmul.f32 %v1900_v58, %v1892_v51 }
 0xcf8   :  { %1904 = vrot.lane.b32.xlu2 %v1902_v40, %s5180_s3 }
 0xd52   :  { %v1905_v59 = vpop.permute.xlu2 %1904 }
 0xd53   :  { %v1907_v8 = vadd.f32 %v4815_v37, %v1905_v59 }
 0xd55   :  { %4552 = vmatmul.msk.f32.vlgmr.msra.gmra.mxu0 %vm391_vm9, %v1907_v8  ;;  %4553 = vmatmul.msk.f32.vlgmr.msrb.gmra.mxu1 %vm391_vm9, %v1907_v8 }
 0xd56   :  { %2299 = vmatpush.msrb.mxu1 %v6185_v29 }
 0xd58   :  { %2300 = vmatpush.msrb.mxu1 %v6189_v36 }
 0xd5a   :  { %v1979_v35 = vpop.permute.xlu1 %1978  ;;  %2301 = vmatpush.msrb.mxu1 %v6195_v17 }
 0xd5b   :  { %v1981_v21 = vadd.f32 %v4817_v46, %v1979_v35  ;;  %v6249_v46 = vld [vmem:[#allocation9 + $0x8] sm:$0xff] }
 0xd5c   :  { %2302 = vmatpush.msrb.mxu1 %v6201_v10  ;;  %2218 = vmatpush.msrb.mxu3 %v6249_v46 }
 0xd5d   :  { %4554 = vmatmul.msk.f32.vlgmr.msrb.gmra.mxu2 %vm391_vm9, %v1981_v21  ;;  %4555 = vmatmul.msk.f32.vlgmr.msra.gmra.mxu3 %vm391_vm9, %v1981_v21 }
 0xd5e   :  { %2219 = vmatpush.msrb.mxu3 %v6255_v16 }
 0xdd2   :  { %v2002_v5 = vpop.f32.mrf.mxu0  ;;  %v2022_v0 = vpop.f32.mrf.mxu1 }
 0xdd3   :  { %v2003_v50 = vadd.f32 %v6064_v53, %v2002_v5  ;;  %v2023_v6 = vadd.f32 %v6072_v2, %v2022_v0  ;;  %v6143_v2 = vld [vmem:[#allocation12 + $0x18] sm:$0xff]  ;;  %v6283_v0 = vld [vmem:[%s7086_s17] ss:$0 sm:$0xff] }
 0xdd4   :  { %2181 = vmatpush.msra.mxu2 %v6143_v2 }
 0xdd6   :  { %2182 = vmatpush.msra.mxu2 %v6154_v56 }
 0xdd8   :  { %2183 = vmatpush.msra.mxu2 %v6166_v55 }
 0xdda   :  { %2184 = vmatpush.msra.mxu2 %v6180_v63 }
 0xddc   :  { %2329 = vmatpush.msrb.mxu2 %v6187_v31 }
 0xdde   :  { %2330 = vmatpush.msrb.mxu2 %v6193_v15 }
 0xde0   :  { %v2065_v22 = vpop.f32.mrf.mxu3  ;;  %v2045_v11 = vpop.f32.mrf.mxu2  ;;  %2331 = vmatpush.msrb.mxu2 %v6197_v24 }
 0xde1   :  { %v2066_v25 = vadd.f32 %v2065_v22, %v2003_v50  ;;  %v2046_v45 = vadd.f32 %v6078_v3, %v2045_v11  ;;  %v6150_v3 = vld [vmem:[%s7079_s10 + $0x10] sm:$0xff] }
 0xde2   :  { %2125 = vmatpush.msrb.mxu0 %v6150_v3  ;;  %2332 = vmatpush.msrb.mxu2 %v6203_v34 }
 0xde3   :  { %v4556_v4 = vmul.f32 -1.442695, %v2066_v25 }
 0xde4   :  { %2126 = vmatpush.msrb.mxu0 %v6160_v14 }
 0xde5   :  { %4818 = vpow2.f32 %v4556_v4 }
 0xde6   :  { %2127 = vmatpush.msrb.mxu0 %v6176_v20 }
 0xde8   :  { %2236 = vmatpush.msra.mxu0 %v6209_v27 }
 0xdea   :  { %2237 = vmatpush.msra.mxu0 %v6213_v30 }
 0xdeb   :  { %v4819_v41 = vpop.eup %4818 }
 0xdec   :  { %v2071_v33 = vadd.f32 1.0, %v4819_v41  ;;  %2238 = vmatpush.msra.mxu0 %v6247_v39 }
 0xdee   :  { %4820 = vrcp.f32 %v2071_v33  ;;  %v2083_v52 = vand.u32 2147483648, %v2071_v33  ;;  %v2081_v26 = vand.u32 2147483647, %v2071_v33  ;;  %vm2077_vm15 = vweird.f32 %v2071_v33  ;;  %2239 = vmatpush.msra.mxu0 %v6253_v57 }
 0xdf0   :  { %v2084_v53 = vor.u32 1.1754944e-38, %v2083_v52  ;;  %vm2082_vm10 = vcmp.eq.f32.partialorder %v2081_v26, 8.507059e+37 }
 0xdf4   :  { %v4821_v48 = vpop.eup %4820 }
 0xdf5   :  { %v2073_v54 = vmul.f32 %v4821_v48, %v2071_v33  ;;  %vm2078_vm14 = vweird.f32 %v4821_v48 }
 0xdf6   :  { %vm2079_vm0 = vmor %vm2077_vm15, %vm2078_vm14 }
 0xdf7   :  { %v2074_v47 = vsub.f32 1.0, %v2073_v54 }
 0xdf9   :  { %v2075_v49 = vmul.f32 %v4821_v48, %v2074_v47  ;;  %v6278_v47 = vld [vmem:[%s7087_s18] ss:$0 sm:$0xff] }
 0xdfb   :  { %v2076_v42 = vadd.f32 %v4821_v48, %v2075_v49 }
 0xdfd   :  { %v2080_v7 = vsel %vm2079_vm0, %v4821_v48, %v2076_v42 }
 0xdfe   :  { %v2085_v44 = vsel %vm2082_vm10, %v2084_v53, %v2080_v7 }
 0xdff   :  { %v2087_v60 = vmul.f32 %v2085_v44, %v2023_v6 }
 0xe01   :  { %v2088_v23 = vadd.f32 %v2087_v60, %v2046_v45 }
 0xe03   :  { %4822 = vtanh.f32 %v2088_v23 }
 0xe09   :  { %v4823_v61 = vpop.eup %4822 }
 0xe0a   :  { %v2090_v19 = vsub.f32 %v1907_v8, %v4823_v61  ;;  %v6272_v8 = vld [vmem:[%s7085_s16] ss:$0 sm:$0xff] }
 0xe0c   :  { %2092 = vrot.lane.b32.xlu0 %v2090_v19, %s5179_s13 }
 0xe7e   :  { %v2093_v13 = vpop.permute.xlu0 %2092 }
 0xe7f   :  { %v2095_v51 = vmul.f32 %v2093_v13, %v2085_v44  ;;  %v6289_v13 = vld [vmem:[#allocation7 + $0x38] sm:$0xff] }
 0xe81   :  { %2097 = vrot.lane.b32.xlu1 %v2095_v51, %s5180_s3  ;;  %v6291_v51 = vld [vmem:[#allocation9 + $0x38] sm:$0xff] }
 0xe82   :  { %2367 = vmatpush.msra.mxu3 %v6291_v51 }
 0xef3   :  { %v2098_v32 = vpop.permute.xlu1 %2097 }
 0xef4   :  { %v6218_v37 = vadd.f32 %v4823_v61, %v2098_v32  ;;  %v6293_v32 = vld [vmem:[#allocation7 + $0x30] sm:$0xff] }
 0xef6   :  { %4557 = vmatmul.msk.f32.vlgmr.msrb.gmra.mxu0 %vm391_vm9, %v6218_v37  ;;  %4558 = vmatmul.msk.f32.vlgmr.msra.gmra.mxu1 %vm391_vm9, %v6218_v37 }
 0xef7   :  { %4559 = vmatmul.msk.f32.vlgmr.msra.gmra.mxu2 %vm391_vm9, %v6218_v37  ;;  %2443 = vmatpush.msra.mxu1 %v6139_v9 }
 0xef8   :  { %2464 = vmatpush.msra.mxu2 %v6141_v1  ;;  %2387 = vmatpush.msrb.mxu0 %v6289_v13 }
 0xef9   :  { %2444 = vmatpush.msra.mxu1 %v6150_v3 }
 0xefa   :  { %2465 = vmatpush.msra.mxu2 %v6152_v18  ;;  %2388 = vmatpush.msrb.mxu0 %v6293_v32 }
 0xefb   :  { %2445 = vmatpush.msra.mxu1 %v6160_v14 }
 0xefc   :  { %2466 = vmatpush.msra.mxu2 %v6162_v43 }
 0xefd   :  { %2446 = vmatpush.msra.mxu1 %v6176_v20 }
 0xefe   :  { %4564 = vmatmul.msk.f32.vlgmr.msrb.gmra.mxu1 %vm391_vm9, %v6218_v37  ;;  %2467 = vmatpush.msra.mxu2 %v6178_v12 }
 0xeff   :  { %4566 = vmatmul.msk.f32.vlgmr.msrb.gmra.mxu2 %vm391_vm9, %v6218_v37  ;;  %2527 = vmatpush.msrb.mxu1 %v6209_v27 }
 0xf00   :  { %2580 = vmatpush.msrb.mxu2 %v6185_v29 }
 0xf01   :  { %2528 = vmatpush.msrb.mxu1 %v6213_v30 }
 0xf02   :  { %2581 = vmatpush.msrb.mxu2 %v6189_v36 }
 0xf03   :  { %2529 = vmatpush.msrb.mxu1 %v6247_v39 }
 0xf04   :  { %2582 = vmatpush.msrb.mxu2 %v6195_v17 }
 0xf05   :  { %2530 = vmatpush.msrb.mxu1 %v6253_v57 }
 0xf06   :  { %2583 = vmatpush.msrb.mxu2 %v6201_v10 }
 0xf73   :  { %v2129_v58 = vpop.f32.mrf.mxu0  ;;  %v2158_v35 = vpop.f32.mrf.mxu1 }
 0xf74   :  { %v2130_v40 = vadd.f32 %v6264_v62, %v2129_v58  ;;  %v2159_v21 = vadd.f32 %v6272_v8, %v2158_v35  ;;  %v6297_v58 = vld [vmem:[#allocation9 + $0x30] sm:$0xff] }
 0xf75   :  { %2368 = vmatpush.msra.mxu3 %v6297_v58 }
 0xf76   :  { %v2132_v59 = vmax.f32 %v2130_v40, 0.0  ;;  %v6299_v40 = vld [vmem:[#allocation7 + $0x28] sm:$0xff] }
 0xf77   :  { %2389 = vmatpush.msrb.mxu0 %v6299_v40 }
 0xf78   :  { %4560 = vmatmul.msk.f32.vlgmr.msrb.gmra.mxu3 %vm391_vm9, %v2132_v59  ;;  %4561 = vmatmul.msk.f32.vlgmr.msra.gmra.mxu0 %vm391_vm9, %v2132_v59  ;;  %v6301_v59 = vld [vmem:[#allocation9 + $0x28] sm:$0xff] }
 0xf79   :  { %2369 = vmatpush.msra.mxu3 %v6301_v59 }
 0xf7a   :  { %v2186_v26 = vpop.f32.mrf.mxu2 }
 0xf7b   :  { %v2187_v6 = vadd.f32 %v6278_v47, %v2186_v26 }
 0xff5   :  { %v2241_v5 = vpop.f32.mrf.mxu0 }
 0xff6   :  { %v2242_v50 = vadd.f32 %v2241_v5, %v2159_v21  ;;  %v6308_v5 = vld [vmem:[#allocation7 + $0x20] sm:$0xff] }
 0xff7   :  { %2390 = vmatpush.msrb.mxu0 %v6308_v5 }
 0xff8   :  { %v4562_v22 = vmul.f32 -1.442695, %v2242_v50  ;;  %v6310_v50 = vld [vmem:[#allocation9 + $0x20] sm:$0xff] }
 0xff9   :  { %2370 = vmatpush.msra.mxu3 %v6310_v50  ;;  %2507 = vmatpush.msra.mxu0 %v6211_v28 }
 0xffa   :  { %4824 = vpow2.f32 %v4562_v22 }
 0xffb   :  { %v2221_v11 = vpop.f32.mrf.mxu3  ;;  %2484 = vmatpush.msrb.mxu3 %v6143_v2  ;;  %2508 = vmatpush.msra.mxu0 %v6244_v38 }
 0xffc   :  { %v2222_v45 = vadd.f32 %v6283_v0, %v2221_v11 }
 0xffd   :  { %2485 = vmatpush.msrb.mxu3 %v6154_v56  ;;  %2509 = vmatpush.msra.mxu0 %v6249_v46 }
 0xfff   :  { %2486 = vmatpush.msrb.mxu3 %v6166_v55  ;;  %2510 = vmatpush.msra.mxu0 %v6255_v16 }
0x1000   :  { %v4825_v25 = vpop.eup %4824 }
0x1001   :  { %v2247_v4 = vadd.f32 1.0, %v4825_v25  ;;  %2487 = vmatpush.msrb.mxu3 %v6180_v63 }
0x1003   :  { %4826 = vrcp.f32 %v2247_v4  ;;  %v2259_v54 = vand.u32 2147483648, %v2247_v4  ;;  %v2257_v49 = vand.u32 2147483647, %v2247_v4  ;;  %vm2253_vm12 = vweird.f32 %v2247_v4 }
0x1005   :  { %v2260_v53 = vor.u32 1.1754944e-38, %v2259_v54  ;;  %vm2258_vm14 = vcmp.eq.f32.partialorder %v2257_v49, 8.507059e+37 }
0x1009   :  { %v4827_v41 = vpop.eup %4826 }
0x100a   :  { %v2249_v33 = vmul.f32 %v4827_v41, %v2247_v4  ;;  %vm2254_vm11 = vweird.f32 %v4827_v41  ;;  %v6351_v4 = vld [vmem:[%s7085_s16 + $0x1] ss:$0 sm:$0xff] }
0x100b   :  { %vm2255_vm13 = vmor %vm2253_vm12, %vm2254_vm11 }
0x100c   :  { %v2250_v48 = vsub.f32 1.0, %v2249_v33 }
0x100e   :  { %v2251_v52 = vmul.f32 %v4827_v41, %v2250_v48 }
0x1010   :  { %v2252_v42 = vadd.f32 %v4827_v41, %v2251_v52 }
0x1012   :  { %v2256_v7 = vsel %vm2255_vm13, %v4827_v41, %v2252_v42  ;;  %v2304_v41 = vpop.f32.mrf.mxu1 }
0x1013   :  { %v2261_v44 = vsel %vm2258_vm14, %v2260_v53, %v2256_v7  ;;  %v2305_v33 = vadd.f32 %v6351_v4, %v2304_v41  ;;  %v6357_v7 = vld [vmem:[%s7087_s18 + $0x1] ss:$0 sm:$0xff] }
0x1014   :  { %v2263_v60 = vmul.f32 %v2261_v44, %v2187_v6 }
0x1016   :  { %v2264_v23 = vadd.f32 %v2263_v60, %v2222_v45  ;;  %v2334_v60 = vpop.f32.mrf.mxu2 }
0x1018   :  { %4828 = vtanh.f32 %v2264_v23  ;;  %v6362_v23 = vld [vmem:[%s7086_s17 + $0x1] ss:$0 sm:$0xff] }
0x101e   :  { %v4829_v61 = vpop.eup %4828 }
0x101f   :  { %v2266_v19 = vsub.f32 %v6218_v37, %v4829_v61 }
0x1021   :  { %2268 = vrot.lane.b32.xlu2 %v2266_v19, %s5179_s13 }
0x107b   :  { %v2269_v35 = vpop.permute.xlu2 %2268 }
0x107c   :  { %v2271_v21 = vmul.f32 %v2269_v35, %v2261_v44 }
0x107e   :  { %2273 = vrot.lane.b32.xlu0 %v2271_v21, %s5180_s3  ;;  %v2335_v21 = vadd.f32 %v6357_v7, %v2334_v60 }
0x10f0   :  { %v2274_v22 = vpop.permute.xlu0 %2273 }
0x10f1   :  { %v6322_v25 = vadd.f32 %v4829_v61, %v2274_v22 }
0x10f3   :  { %4568 = vmatmul.msk.f32.vlgmr.msra.gmra.mxu3 %vm391_vm9, %v6322_v25  ;;  %4569 = vmatmul.msk.f32.vlgmr.msrb.gmra.mxu0 %vm391_vm9, %v6322_v25 }
0x10f4   :  { %4572 = vmatmul.msk.f32.vlgmr.msra.gmra.mxu2 %vm391_vm9, %v6322_v25  ;;  %2600 = vmatpush.msra.mxu3 %v6187_v31 }
0x10f5   :  { %2623 = vmatpush.msrb.mxu0 %v6291_v51  ;;  %2699 = vmatpush.msra.mxu2 %v6139_v9 }
0x10f6   :  { %2601 = vmatpush.msra.mxu3 %v6193_v15 }
0x10f7   :  { %2624 = vmatpush.msrb.mxu0 %v6297_v58  ;;  %2700 = vmatpush.msra.mxu2 %v6150_v3 }
0x10f8   :  { %2602 = vmatpush.msra.mxu3 %v6197_v24 }
0x10f9   :  { %2625 = vmatpush.msrb.mxu0 %v6301_v59  ;;  %2701 = vmatpush.msra.mxu2 %v6160_v14 }
0x10fa   :  { %2603 = vmatpush.msra.mxu3 %v6203_v34 }
0x10fb   :  { %4573 = vmatmul.msk.f32.vlgmr.msrb.gmra.mxu3 %vm391_vm9, %v6322_v25  ;;  %2626 = vmatpush.msrb.mxu0 %v6310_v50 }
0x10fc   :  { %2720 = vmatpush.msrb.mxu3 %v6141_v1  ;;  %2702 = vmatpush.msra.mxu2 %v6176_v20 }
0x10fe   :  { %2721 = vmatpush.msrb.mxu3 %v6152_v18 }
0x1100   :  { %2722 = vmatpush.msrb.mxu3 %v6162_v43 }
0x1102   :  { %2723 = vmatpush.msrb.mxu3 %v6178_v12 }
0x1170   :  { %v2392_v48 = vpop.f32.mrf.mxu0 }
0x1171   :  { %v2393_v54 = vadd.f32 %v2392_v48, %v2305_v33 }
0x1173   :  { %v4570_v52 = vmul.f32 -1.442695, %v2393_v54 }
0x1175   :  { %4830 = vpow2.f32 %v4570_v52 }
0x1176   :  { %v2372_v19 = vpop.f32.mrf.mxu3 }
0x1177   :  { %v2373_v33 = vadd.f32 %v6362_v23, %v2372_v19 }
0x117b   :  { %v4831_v49 = vpop.eup %4830 }
0x117c   :  { %v2398_v26 = vadd.f32 1.0, %v4831_v49 }
0x117e   :  { %4832 = vrcp.f32 %v2398_v26  ;;  %v2410_v6 = vand.u32 2147483648, %v2398_v26  ;;  %v2408_v45 = vand.u32 2147483647, %v2398_v26  ;;  %vm2404_vm0 = vweird.f32 %v2398_v26 }
0x1180   :  { %v2411_v35 = vor.u32 1.1754944e-38, %v2410_v6  ;;  %vm2409_vm11 = vcmp.eq.f32.partialorder %v2408_v45, 8.507059e+37  ;;  %v2469_v45 = vpop.f32.mrf.mxu2 }
0x1181   :  { %v2470_v60 = vadd.f32 %v6272_v8, %v2469_v45 }
0x1184   :  { %v4833_v42 = vpop.eup %4832 }
0x1185   :  { %v2400_v11 = vmul.f32 %v4833_v42, %v2398_v26  ;;  %vm2405_vm15 = vweird.f32 %v4833_v42 }
0x1186   :  { %vm2406_vm10 = vmor %vm2404_vm0, %vm2405_vm15 }
0x1187   :  { %v2401_v53 = vsub.f32 1.0, %v2400_v11 }
0x1189   :  { %v2402_v44 = vmul.f32 %v4833_v42, %v2401_v53 }
0x118b   :  { %v2403_v61 = vadd.f32 %v4833_v42, %v2402_v44 }
0x118d   :  { %v2407_v22 = vsel %vm2406_vm10, %v4833_v42, %v2403_v61 }
0x118e   :  { %v2412_v41 = vsel %vm2409_vm11, %v2411_v35, %v2407_v22 }
0x118f   :  { %v2414_v48 = vmul.f32 %v2412_v41, %v2335_v21 }
0x1191   :  { %v2415_v54 = vadd.f32 %v2414_v48, %v2373_v33 }
0x1193   :  { %4834 = vtanh.f32 %v2415_v54 }
0x1199   :  { %v4835_v52 = vpop.eup %4834 }
0x119a   :  { %v2417_v49 = vsub.f32 %v6218_v37, %v4835_v52 }
0x119c   :  { %2419 = vrot.lane.b32.xlu1 %v2417_v49, %s5179_s13 }
0x120e   :  { %v2420_v11 = vpop.permute.xlu1 %2419 }
0x120f   :  { %v2422_v26 = vmul.f32 %v2420_v11, %v2412_v41  ;;  %v2489_v11 = vpop.f32.mrf.mxu3 }
0x1211   :  { %2424 = vrot.lane.b32.xlu2 %v2422_v26, %s5180_s3 }
0x126b   :  { %v2425_v53 = vpop.permute.xlu2 %2424 }
0x126c   :  { %v6369_v6 = vadd.f32 %v4835_v52, %v2425_v53 }
0x126e   :  { %4571 = vmatmul.msk.f32.vlgmr.msra.gmra.mxu1 %vm391_vm9, %v6369_v6  ;;  %4577 = vmatmul.msk.f32.vlgmr.msrb.gmra.mxu2 %vm391_vm9, %v6369_v6 }
0x126f   :  { %4578 = vmatmul.msk.f32.vlgmr.msra.gmra.mxu3 %vm391_vm9, %v6369_v6  ;;  %2643 = vmatpush.msra.mxu1 %v6289_v13 }
0x1270   :  { %2836 = vmatpush.msra.mxu3 %v6185_v29  ;;  %2783 = vmatpush.msrb.mxu2 %v6209_v27 }
0x1271   :  { %2644 = vmatpush.msra.mxu1 %v6293_v32 }
0x1272   :  { %2837 = vmatpush.msra.mxu3 %v6189_v36  ;;  %2784 = vmatpush.msrb.mxu2 %v6213_v30 }
0x1273   :  { %2645 = vmatpush.msra.mxu1 %v6299_v40 }
0x1274   :  { %2838 = vmatpush.msra.mxu3 %v6195_v17  ;;  %2785 = vmatpush.msrb.mxu2 %v6247_v39 }
0x1275   :  { %2646 = vmatpush.msra.mxu1 %v6308_v5 }
0x1276   :  { %2839 = vmatpush.msra.mxu3 %v6201_v10  ;;  %2786 = vmatpush.msrb.mxu2 %v6253_v57 }
0x12eb   :  { %v2448_v37 = vpop.f32.mrf.mxu1 }
0x12ec   :  { %v2449_v42 = vadd.f32 %v6264_v62, %v2448_v37 }
0x12ee   :  { %v2451_v44 = vmax.f32 %v2449_v42, 0.0  ;;  %v2490_v42 = vadd.f32 %v6278_v47, %v2489_v11 }
0x12f0   :  { %4574 = vmatmul.msk.f32.vlgmr.msra.gmra.mxu0 %vm391_vm9, %v2451_v44  ;;  %4575 = vmatmul.msk.f32.vlgmr.msrb.gmra.mxu1 %vm391_vm9, %v2451_v44 }
0x12f1   :  { %2740 = vmatpush.msra.mxu0 %v6143_v2  ;;  %2763 = vmatpush.msrb.mxu1 %v6211_v28 }
0x12f3   :  { %2741 = vmatpush.msra.mxu0 %v6154_v56  ;;  %2764 = vmatpush.msrb.mxu1 %v6244_v38 }
0x12f5   :  { %2742 = vmatpush.msra.mxu0 %v6166_v55  ;;  %2765 = vmatpush.msrb.mxu1 %v6249_v46 }
0x12f7   :  { %2743 = vmatpush.msra.mxu0 %v6180_v63  ;;  %2766 = vmatpush.msrb.mxu1 %v6255_v16 }
0x136d   :  { %v2532_v61 = vpop.f32.mrf.mxu1  ;;  %v2512_v53 = vpop.f32.mrf.mxu0 }
0x136e   :  { %v2533_v19 = vadd.f32 %v2532_v61, %v2470_v60  ;;  %v2513_v60 = vadd.f32 %v6283_v0, %v2512_v53 }
0x1370   :  { %v4576_v35 = vmul.f32 -1.442695, %v2533_v19 }
0x1372   :  { %4836 = vpow2.f32 %v4576_v35 }
0x1378   :  { %v4837_v21 = vpop.eup %4836 }
0x1379   :  { %v2538_v22 = vadd.f32 1.0, %v4837_v21 }
0x137b   :  { %4838 = vrcp.f32 %v2538_v22  ;;  %v2550_v54 = vand.u32 2147483648, %v2538_v22  ;;  %v2548_v49 = vand.u32 2147483647, %v2538_v22  ;;  %vm2544_vm13 = vweird.f32 %v2538_v22 }
0x137d   :  { %v2551_v37 = vor.u32 1.1754944e-38, %v2550_v54  ;;  %vm2549_vm15 = vcmp.eq.f32.partialorder %v2548_v49, 8.507059e+37 }
0x1381   :  { %v4839_v41 = vpop.eup %4838 }
0x1382   :  { %v2540_v33 = vmul.f32 %v4839_v41, %v2538_v22  ;;  %vm2545_vm12 = vweird.f32 %v4839_v41 }
0x1383   :  { %vm2546_vm14 = vmor %vm2544_vm13, %vm2545_vm12 }
0x1384   :  { %v2541_v48 = vsub.f32 1.0, %v2540_v33 }
0x1386   :  { %v2542_v52 = vmul.f32 %v4839_v41, %v2541_v48 }
0x1388   :  { %v2543_v26 = vadd.f32 %v4839_v41, %v2542_v52 }
0x138a   :  { %v2547_v44 = vsel %vm2546_vm14, %v4839_v41, %v2543_v26 }
0x138b   :  { %v2552_v45 = vsel %vm2549_vm15, %v2551_v37, %v2547_v44 }
0x138c   :  { %v2554_v61 = vmul.f32 %v2552_v45, %v2490_v42 }
0x138e   :  { %v2555_v19 = vadd.f32 %v2554_v61, %v2513_v60 }
0x1390   :  { %4840 = vtanh.f32 %v2555_v19  ;;  %v2605_v19 = vpop.f32.mrf.mxu3 }
0x1396   :  { %v4841_v35 = vpop.eup %4840 }
0x1397   :  { %v2557_v21 = vsub.f32 %v6322_v25, %v4841_v35  ;;  %v2585_v25 = vpop.f32.mrf.mxu2 }
0x1398   :  { %v2586_v41 = vadd.f32 %v6351_v4, %v2585_v25 }
0x1399   :  { %2559 = vrot.lane.b32.xlu0 %v2557_v21, %s5179_s13 }
0x140b   :  { %v2560_v33 = vpop.permute.xlu0 %2559 }
0x140c   :  { %v2562_v22 = vmul.f32 %v2560_v33, %v2552_v45 }
0x140e   :  { %2564 = vrot.lane.b32.xlu1 %v2562_v22, %s5180_s3  ;;  %v2606_v22 = vadd.f32 %v6357_v7, %v2605_v19 }
0x1480   :  { %v2565_v48 = vpop.permute.xlu1 %2564 }
0x1481   :  { %v6406_v54 = vadd.f32 %v4841_v35, %v2565_v48 }
0x1483   :  { %4579 = vmatmul.msk.f32.vlgmr.msrb.gmra.mxu0 %vm391_vm9, %v6406_v54  ;;  %4580 = vmatmul.msk.f32.vlgmr.msra.gmra.mxu1 %vm391_vm9, %v6406_v54 }
0x1484   :  { %4583 = vmatmul.msk.f32.vlgmr.msrb.gmra.mxu3 %vm391_vm9, %v6406_v54  ;;  %2856 = vmatpush.msrb.mxu0 %v6187_v31 }
0x1485   :  { %2879 = vmatpush.msra.mxu1 %v6291_v51  ;;  %2955 = vmatpush.msrb.mxu3 %v6139_v9 }
0x1486   :  { %2857 = vmatpush.msrb.mxu0 %v6193_v15 }
0x1487   :  { %2880 = vmatpush.msra.mxu1 %v6297_v58  ;;  %2956 = vmatpush.msrb.mxu3 %v6150_v3 }
0x1488   :  { %2858 = vmatpush.msrb.mxu0 %v6197_v24 }
0x1489   :  { %2881 = vmatpush.msra.mxu1 %v6301_v59  ;;  %2957 = vmatpush.msrb.mxu3 %v6160_v14 }
0x148a   :  { %2859 = vmatpush.msrb.mxu0 %v6203_v34 }
0x148b   :  { %4584 = vmatmul.msk.f32.vlgmr.msra.gmra.mxu0 %vm391_vm9, %v6406_v54  ;;  %2882 = vmatpush.msra.mxu1 %v6310_v50 }
0x148c   :  { %2976 = vmatpush.msra.mxu0 %v6141_v1  ;;  %2958 = vmatpush.msrb.mxu3 %v6176_v20 }
0x148e   :  { %2977 = vmatpush.msra.mxu0 %v6152_v18 }
0x1490   :  { %2978 = vmatpush.msra.mxu0 %v6162_v43 }
0x1492   :  { %2979 = vmatpush.msra.mxu0 %v6178_v12 }
0x1500   :  { %v2648_v52 = vpop.f32.mrf.mxu1  ;;  %v2628_v21 = vpop.f32.mrf.mxu0 }
0x1501   :  { %v2649_v49 = vadd.f32 %v2648_v52, %v2586_v41  ;;  %v2629_v41 = vadd.f32 %v6362_v23, %v2628_v21 }
0x1503   :  { %v4581_v11 = vmul.f32 -1.442695, %v2649_v49 }
0x1505   :  { %4842 = vpow2.f32 %v4581_v11 }
0x1507   :  { %v2725_v19 = vpop.f32.mrf.mxu3 }
0x150b   :  { %v4843_v26 = vpop.eup %4842 }
0x150c   :  { %v2654_v53 = vadd.f32 1.0, %v4843_v26 }
0x150e   :  { %4844 = vrcp.f32 %v2654_v53  ;;  %v2666_v45 = vand.u32 2147483648, %v2654_v53  ;;  %v2664_v61 = vand.u32 2147483647, %v2654_v53  ;;  %vm2660_vm10 = vweird.f32 %v2654_v53 }
0x1510   :  { %v2667_v33 = vor.u32 1.1754944e-38, %v2666_v45  ;;  %vm2665_vm12 = vcmp.eq.f32.partialorder %v2664_v61, 8.507059e+37 }
0x1514   :  { %v4845_v37 = vpop.eup %4844 }
0x1515   :  { %v2656_v42 = vmul.f32 %v4845_v37, %v2654_v53  ;;  %vm2661_vm0 = vweird.f32 %v4845_v37 }
0x1516   :  { %vm2662_vm11 = vmor %vm2660_vm10, %vm2661_vm0 }
0x1517   :  { %v2657_v44 = vsub.f32 1.0, %v2656_v42 }
0x1519   :  { %v2658_v60 = vmul.f32 %v4845_v37, %v2657_v44 }
0x151b   :  { %v2659_v35 = vadd.f32 %v4845_v37, %v2658_v60 }
0x151d   :  { %v2663_v48 = vsel %vm2662_vm11, %v4845_v37, %v2659_v35  ;;  %v2726_v35 = vadd.f32 %v6272_v8, %v2725_v19 }
0x151e   :  { %v2668_v25 = vsel %vm2665_vm12, %v2667_v33, %v2663_v48 }
0x151f   :  { %v2670_v52 = vmul.f32 %v2668_v25, %v2606_v22 }
0x1521   :  { %v2671_v49 = vadd.f32 %v2670_v52, %v2629_v41 }
0x1523   :  { %4846 = vtanh.f32 %v2671_v49 }
0x1529   :  { %v4847_v11 = vpop.eup %4846 }
0x152a   :  { %v2673_v26 = vsub.f32 %v6369_v6, %v4847_v11 }
0x152c   :  { %2675 = vrot.lane.b32.xlu2 %v2673_v26, %s5179_s13 }
0x1586   :  { %v2676_v42 = vpop.permute.xlu2 %2675 }
0x1587   :  { %v2678_v53 = vmul.f32 %v2676_v42, %v2668_v25 }
0x1589   :  { %2680 = vrot.lane.b32.xlu0 %v2678_v53, %s5180_s3  ;;  %v2745_v53 = vpop.f32.mrf.mxu0 }
0x15fb   :  { %v2681_v44 = vpop.permute.xlu0 %2680 }
0x15fc   :  { %v6438_v45 = vadd.f32 %v4847_v11, %v2681_v44 }
0x15fe   :  { %4582 = vmatmul.msk.f32.vlgmr.msra.gmra.mxu2 %vm391_vm9, %v6438_v45  ;;  %4588 = vmatmul.msk.f32.vlgmr.msra.gmra.mxu3 %vm391_vm9, %v6438_v45 }
0x15ff   :  { %4589 = vmatmul.msk.f32.vlgmr.msrb.gmra.mxu0 %vm391_vm9, %v6438_v45  ;;  %2899 = vmatpush.msra.mxu2 %v6289_v13 }
0x1600   :  { %3092 = vmatpush.msrb.mxu0 %v6185_v29  ;;  %3039 = vmatpush.msra.mxu3 %v6209_v27 }
0x1601   :  { %2900 = vmatpush.msra.mxu2 %v6293_v32 }
0x1602   :  { %3093 = vmatpush.msrb.mxu0 %v6189_v36  ;;  %3040 = vmatpush.msra.mxu3 %v6213_v30 }
0x1603   :  { %2901 = vmatpush.msra.mxu2 %v6299_v40 }
0x1604   :  { %3094 = vmatpush.msrb.mxu0 %v6195_v17  ;;  %3041 = vmatpush.msra.mxu3 %v6247_v39 }
0x1605   :  { %2902 = vmatpush.msra.mxu2 %v6308_v5 }
0x1606   :  { %3095 = vmatpush.msrb.mxu0 %v6201_v10  ;;  %3042 = vmatpush.msra.mxu3 %v6253_v57 }
0x1681   :  { %v2704_v37 = vpop.f32.mrf.mxu2 }
0x1682   :  { %v2705_v60 = vadd.f32 %v6264_v62, %v2704_v37 }
0x1684   :  { %v2707_v61 = vmax.f32 %v2705_v60, 0.0 }
0x1686   :  { %4585 = vmatmul.msk.f32.vlgmr.msrb.gmra.mxu1 %vm391_vm9, %v2707_v61  ;;  %4586 = vmatmul.msk.f32.vlgmr.msrb.gmra.mxu2 %vm391_vm9, %v2707_v61  ;;  %v2746_v61 = vadd.f32 %v6278_v47, %v2745_v53 }
0x1687   :  { %2996 = vmatpush.msrb.mxu1 %v6143_v2  ;;  %3019 = vmatpush.msrb.mxu2 %v6211_v28 }
0x1689   :  { %2997 = vmatpush.msrb.mxu1 %v6154_v56  ;;  %3020 = vmatpush.msrb.mxu2 %v6244_v38 }
0x168b   :  { %2998 = vmatpush.msrb.mxu1 %v6166_v55  ;;  %3021 = vmatpush.msrb.mxu2 %v6249_v46 }
0x168d   :  { %2999 = vmatpush.msrb.mxu1 %v6180_v63  ;;  %3022 = vmatpush.msrb.mxu2 %v6255_v16 }
0x1703   :  { %v2768_v37 = vpop.f32.mrf.mxu1 }
0x1709   :  { %v2788_v21 = vpop.f32.mrf.mxu2 }
0x170a   :  { %v2789_v33 = vadd.f32 %v2788_v21, %v2726_v35  ;;  %v2769_v21 = vadd.f32 %v6283_v0, %v2768_v37 }
0x170c   :  { %v4587_v22 = vmul.f32 -1.442695, %v2789_v33 }
0x170e   :  { %4848 = vpow2.f32 %v4587_v22 }
0x1714   :  { %v4849_v48 = vpop.eup %4848 }
0x1715   :  { %v2794_v25 = vadd.f32 1.0, %v4849_v48 }
0x1717   :  { %4850 = vrcp.f32 %v2794_v25  ;;  %v2806_v11 = vand.u32 2147483648, %v2794_v25  ;;  %v2804_v42 = vand.u32 2147483647, %v2794_v25  ;;  %vm2800_vm14 = vweird.f32 %v2794_v25 }
0x1719   :  { %v2807_v60 = vor.u32 1.1754944e-38, %v2806_v11  ;;  %vm2805_vm0 = vcmp.eq.f32.partialorder %v2804_v42, 8.507059e+37 }
0x171d   :  { %v4851_v41 = vpop.eup %4850 }
0x171e   :  { %v2796_v52 = vmul.f32 %v4851_v41, %v2794_v25  ;;  %vm2801_vm13 = vweird.f32 %v4851_v41 }
0x171f   :  { %vm2802_vm15 = vmor %vm2800_vm14, %vm2801_vm13 }
0x1720   :  { %v2797_v49 = vsub.f32 1.0, %v2796_v52 }
0x1722   :  { %v2798_v26 = vmul.f32 %v4851_v41, %v2797_v49 }
0x1724   :  { %v2799_v44 = vadd.f32 %v4851_v41, %v2798_v26 }
0x1726   :  { %v2803_v19 = vsel %vm2802_vm15, %v4851_v41, %v2799_v44 }
0x1727   :  { %v2808_v35 = vsel %vm2805_vm0, %v2807_v60, %v2803_v19 }
0x1728   :  { %v2810_v33 = vmul.f32 %v2808_v35, %v2746_v61 }
0x172a   :  { %v2811_v22 = vadd.f32 %v2810_v33, %v2769_v21 }
0x172c   :  { %4852 = vtanh.f32 %v2811_v22 }
0x1732   :  { %v4853_v48 = vpop.eup %4852 }
0x1733   :  { %v2813_v52 = vsub.f32 %v6406_v54, %v4853_v48 }
0x1735   :  { %2815 = vrot.lane.b32.xlu1 %v2813_v52, %s5179_s13 }
0x17a7   :  { %v2816_v49 = vpop.permute.xlu1 %2815 }
0x17a8   :  { %v2818_v25 = vmul.f32 %v2816_v49, %v2808_v35 }
0x17aa   :  { %2820 = vrot.lane.b32.xlu2 %v2818_v25, %s5180_s3 }
0x1804   :  { %v2821_v11 = vpop.permute.xlu2 %2820 }
0x1805   :  { %v6475_v26 = vadd.f32 %v4853_v48, %v2821_v11 }
0x1807   :  { %4590 = vmatmul.msk.f32.vlgmr.msra.gmra.mxu1 %vm391_vm9, %v6475_v26  ;;  %4591 = vmatmul.msk.f32.vlgmr.msra.gmra.mxu2 %vm391_vm9, %v6475_v26 }
0x1808   :  { %4594 = vmatmul.msk.f32.vlgmr.msra.gmra.mxu0 %vm391_vm9, %v6475_v26  ;;  %3112 = vmatpush.msra.mxu1 %v6187_v31 }
0x1809   :  { %3135 = vmatpush.msra.mxu2 %v6291_v51  ;;  %3211 = vmatpush.msra.mxu0 %v6139_v9  ;;  %v2841_v9 = vpop.f32.mrf.mxu3 }
0x180a   :  { %3113 = vmatpush.msra.mxu1 %v6193_v15 }
0x180b   :  { %3136 = vmatpush.msra.mxu2 %v6297_v58  ;;  %3212 = vmatpush.msra.mxu0 %v6150_v3  ;;  %v2842_v3 = vadd.f32 %v6351_v4, %v2841_v9 }
0x180c   :  { %3114 = vmatpush.msra.mxu1 %v6197_v24 }
0x180d   :  { %3137 = vmatpush.msra.mxu2 %v6301_v59  ;;  %3213 = vmatpush.msra.mxu0 %v6160_v14 }
0x180e   :  { %3115 = vmatpush.msra.mxu1 %v6203_v34 }
0x180f   :  { %4595 = vmatmul.msk.f32.vlgmr.msrb.gmra.mxu1 %vm391_vm9, %v6475_v26  ;;  %3138 = vmatpush.msra.mxu2 %v6310_v50 }
0x1810   :  { %3232 = vmatpush.msrb.mxu1 %v6141_v1  ;;  %3214 = vmatpush.msra.mxu0 %v6176_v20 }
0x1812   :  { %3233 = vmatpush.msrb.mxu1 %v6152_v18 }
0x1814   :  { %3234 = vmatpush.msrb.mxu1 %v6162_v43  ;;  %v2861_v43 = vpop.f32.mrf.mxu0 }
0x1815   :  { %v2862_v35 = vadd.f32 %v6357_v7, %v2861_v43 }
0x1816   :  { %3235 = vmatpush.msrb.mxu1 %v6178_v12 }
0x1884   :  { %v2884_v12 = vpop.f32.mrf.mxu1 }
0x1885   :  { %v2885_v22 = vadd.f32 %v6362_v23, %v2884_v12 }
0x188a   :  { %v2904_v14 = vpop.f32.mrf.mxu2 }
0x188b   :  { %v2905_v54 = vadd.f32 %v2904_v14, %v2842_v3 }
0x188d   :  { %v4592_v41 = vmul.f32 -1.442695, %v2905_v54 }
0x188f   :  { %4854 = vpow2.f32 %v4592_v41 }
0x1895   :  { %v4855_v42 = vpop.eup %4854 }
0x1896   :  { %v2910_v53 = vadd.f32 1.0, %v4855_v42 }
0x1898   :  { %4856 = vrcp.f32 %v2910_v53  ;;  %v2922_v20 = vand.u32 2147483648, %v2910_v53  ;;  %v2920_v18 = vand.u32 2147483647, %v2910_v53  ;;  %vm2916_vm11 = vweird.f32 %v2910_v53 }
0x189a   :  { %v2923_v19 = vor.u32 1.1754944e-38, %v2922_v20  ;;  %vm2921_vm13 = vcmp.eq.f32.partialorder %v2920_v18, 8.507059e+37 }
0x189e   :  { %v4857_v44 = vpop.eup %4856 }
0x189f   :  { %v2912_v1 = vmul.f32 %v4857_v44, %v2910_v53  ;;  %vm2917_vm10 = vweird.f32 %v4857_v44 }
0x18a0   :  { %vm2918_vm12 = vmor %vm2916_vm11, %vm2917_vm10 }
0x18a1   :  { %v2913_v37 = vsub.f32 1.0, %v2912_v1 }
0x18a3   :  { %v2914_v60 = vmul.f32 %v4857_v44, %v2913_v37 }
0x18a5   :  { %v2915_v61 = vadd.f32 %v4857_v44, %v2914_v60 }
0x18a7   :  { %v2919_v21 = vsel %vm2918_vm12, %v4857_v44, %v2915_v61 }
0x18a8   :  { %v2924_v33 = vsel %vm2921_vm13, %v2923_v19, %v2919_v21 }
0x18a9   :  { %v2926_v48 = vmul.f32 %v2924_v33, %v2862_v35 }
0x18ab   :  { %v2927_v52 = vadd.f32 %v2926_v48, %v2885_v22 }
0x18ad   :  { %4858 = vtanh.f32 %v2927_v52 }
0x18b3   :  { %v4859_v49 = vpop.eup %4858 }
0x18b4   :  { %v2929_v25 = vsub.f32 %v6438_v45, %v4859_v49 }
0x18b6   :  { %2931 = vrot.lane.b32.xlu0 %v2929_v25, %s5179_s13 }
0x1928   :  { %v2932_v11 = vpop.permute.xlu0 %2931 }
0x1929   :  { %v2934_v9 = vmul.f32 %v2932_v11, %v2924_v33 }
0x192b   :  { %2936 = vrot.lane.b32.xlu1 %v2934_v9, %s5180_s3 }
0x199d   :  { %v2937_v3 = vpop.permute.xlu1 %2936 }
0x199e   :  { %v6507_v14 = vadd.f32 %v4859_v49, %v2937_v3 }
0x19a0   :  { %4593 = vmatmul.msk.f32.vlgmr.msrb.gmra.mxu3 %vm391_vm9, %v6507_v14  ;;  %4599 = vmatmul.msk.f32.vlgmr.msrb.gmra.mxu0 %vm391_vm9, %v6507_v14 }
0x19a1   :  { %4600 = vmatmul.msk.f32.vlgmr.msra.gmra.mxu1 %vm391_vm9, %v6507_v14  ;;  %3155 = vmatpush.msrb.mxu3 %v6289_v13 }
0x19a2   :  { %3348 = vmatpush.msra.mxu1 %v6185_v29  ;;  %3295 = vmatpush.msrb.mxu0 %v6209_v27 }
0x19a3   :  { %3156 = vmatpush.msrb.mxu3 %v6293_v32 }
0x19a4   :  { %3349 = vmatpush.msra.mxu1 %v6189_v36  ;;  %3296 = vmatpush.msrb.mxu0 %v6213_v30  ;;  %v2981_v36 = vpop.f32.mrf.mxu0 }
0x19a5   :  { %3157 = vmatpush.msrb.mxu3 %v6299_v40 }
0x19a6   :  { %3350 = vmatpush.msra.mxu1 %v6195_v17  ;;  %3297 = vmatpush.msrb.mxu0 %v6247_v39  ;;  %v2982_v17 = vadd.f32 %v6272_v8, %v2981_v36 }
0x19a7   :  { %3158 = vmatpush.msrb.mxu3 %v6308_v5 }
0x19a8   :  { %3351 = vmatpush.msra.mxu1 %v6201_v10  ;;  %3298 = vmatpush.msrb.mxu0 %v6253_v57 }
0x1a23   :  { %v2960_v29 = vpop.f32.mrf.mxu3 }
0x1a24   :  { %v2961_v27 = vadd.f32 %v6264_v62, %v2960_v29 }
0x1a26   :  { %v2963_v54 = vmax.f32 %v2961_v27, 0.0 }
0x1a28   :  { %4596 = vmatmul.msk.f32.vlgmr.msrb.gmra.mxu2 %vm391_vm9, %v2963_v54  ;;  %4597 = vmatmul.msk.f32.vlgmr.msra.gmra.mxu3 %vm391_vm9, %v2963_v54 }
0x1a29   :  { %3252 = vmatpush.msrb.mxu2 %v6143_v2  ;;  %3275 = vmatpush.msra.mxu3 %v6211_v28 }
0x1a2b   :  { %3253 = vmatpush.msrb.mxu2 %v6154_v56  ;;  %3276 = vmatpush.msra.mxu3 %v6244_v38 }
0x1a2d   :  { %3254 = vmatpush.msrb.mxu2 %v6166_v55  ;;  %3277 = vmatpush.msra.mxu3 %v6249_v46 }
0x1a2f   :  { %3255 = vmatpush.msrb.mxu2 %v6180_v63  ;;  %3278 = vmatpush.msra.mxu3 %v6255_v16  ;;  %v3001_v63 = vpop.f32.mrf.mxu1 }
0x1a30   :  { %v3002_v42 = vadd.f32 %v6278_v47, %v3001_v63  ;;  %v6557_v47 = vld [vmem:[%s7079_s10 + $0x18] sm:$0xff] }
0x1a31   :  { %v6616_v63 = vld [vmem:[#allocation7 + $0x18] sm:$0xff] }
0x1a37   :  { %v3117_v3 = vpop.f32.mrf.mxu1 }
0x1a38   :  { %v3118_v36 = vadd.f32 %v6357_v7, %v3117_v3 }
0x1aab   :  { %v3044_v10 = vpop.f32.mrf.mxu3  ;;  %v3024_v16 = vpop.f32.mrf.mxu2 }
0x1aac   :  { %v3045_v30 = vadd.f32 %v3044_v10, %v2982_v17  ;;  %v3025_v1 = vadd.f32 %v6283_v0, %v3024_v16  ;;  %v6565_v0 = vld [vmem:[%s7079_s10 + $0x10] sm:$0xff] }
0x1aad   :  { %v6623_v16 = vld [vmem:[#allocation7 + $0x10] sm:$0xff] }
0x1aae   :  { %v4598_v2 = vmul.f32 -1.442695, %v3045_v30 }
0x1ab0   :  { %4860 = vpow2.f32 %v4598_v2 }
0x1ab6   :  { %v4861_v28 = vpop.eup %4860 }
0x1ab7   :  { %v3050_v39 = vadd.f32 1.0, %v4861_v28 }
0x1ab9   :  { %4862 = vrcp.f32 %v3050_v39  ;;  %v3062_v55 = vand.u32 2147483648, %v3050_v39  ;;  %v3060_v46 = vand.u32 2147483647, %v3050_v39  ;;  %vm3056_vm15 = vweird.f32 %v3050_v39 }
0x1abb   :  { %v3063_v8 = vor.u32 1.1754944e-38, %v3062_v55  ;;  %vm3061_vm10 = vcmp.eq.f32.partialorder %v3060_v46, 8.507059e+37  ;;  %v6613_v46 = vld [vmem:[#allocation10 + $0x38] sm:$0xff] }
0x1abf   :  { %v4863_v56 = vpop.eup %4862 }
0x1ac0   :  { %v3052_v38 = vmul.f32 %v4863_v56, %v3050_v39  ;;  %vm3057_vm14 = vweird.f32 %v4863_v56 }
0x1ac1   :  { %vm3058_vm0 = vmor %vm3056_vm15, %vm3057_vm14 }
0x1ac2   :  { %v3053_v57 = vsub.f32 1.0, %v3052_v38 }
0x1ac4   :  { %v3054_v62 = vmul.f32 %v4863_v56, %v3053_v57 }
0x1ac6   :  { %v3055_v41 = vadd.f32 %v4863_v56, %v3054_v62 }
0x1ac8   :  { %v3059_v53 = vsel %vm3058_vm0, %v4863_v56, %v3055_v41  ;;  %v6620_v41 = vld [vmem:[#allocation10 + $0x30] sm:$0xff] }
0x1ac9   :  { %v3064_v44 = vsel %vm3061_vm10, %v3063_v8, %v3059_v53  ;;  %v6630_v8 = vld [vmem:[#allocation7 + $0x8] sm:$0xff] }
0x1aca   :  { %v3066_v37 = vmul.f32 %v3064_v44, %v3002_v42  ;;  %v6637_v42 = vld [vmem:[#allocation7] sm:$0xff] }
0x1acc   :  { %v3067_v20 = vadd.f32 %v3066_v37, %v3025_v1  ;;  %v6651_v37 = vld [vmem:[#allocation9 + $0x18] sm:$0xff] }
0x1ace   :  { %4864 = vtanh.f32 %v3067_v20  ;;  %v6654_v20 = vld [vmem:[#allocation12 + $0x10] sm:$0xff] }
0x1ad4   :  { %v4865_v60 = vpop.eup %4864 }
0x1ad5   :  { %v3069_v18 = vsub.f32 %v6475_v26, %v4865_v60 }
0x1ad7   :  { %3071 = vrot.lane.b32.xlu2 %v3069_v18, %s5179_s13  ;;  %v6660_v18 = vld [vmem:[#allocation12 + $0x8] sm:$0xff] }
0x1b31   :  { %v3072_v43 = vpop.permute.xlu2 %3071 }
0x1b32   :  { %v3074_v61 = vmul.f32 %v3072_v43, %v3064_v44  ;;  %v6663_v43 = vld [vmem:[#allocation9 + $0x8] sm:$0xff] }
0x1b34   :  { %3076 = vrot.lane.b32.xlu0 %v3074_v61, %s5180_s3  ;;  %v6666_v61 = vld [vmem:[#allocation12] sm:$0xff] }
0x1ba6   :  { %v3077_v12 = vpop.permute.xlu0 %3076 }
0x1ba7   :  { %v6544_v19 = vadd.f32 %v4865_v60, %v3077_v12  ;;  %v6657_v60 = vld [vmem:[#allocation9 + $0x10] sm:$0xff]  ;;  %v6669_v12 = vld [vmem:[#allocation9] sm:$0xff] }
0x1ba9   :  { %4601 = vmatmul.msk.f32.vlgmr.msra.gmra.mxu2 %vm391_vm9, %v6544_v19  ;;  %4602 = vmatmul.msk.f32.vlgmr.msrb.gmra.mxu3 %vm391_vm9, %v6544_v19 }
0x1baa   :  { %4605 = vmatmul.msk.f32.vlgmr.msrb.gmra.mxu1 %vm391_vm9, %v6544_v19  ;;  %3368 = vmatpush.msra.mxu2 %v6187_v31  ;;  %v6573_v31 = vld [vmem:[%s7079_s10 + $0x8] sm:$0xff] }
0x1bab   :  { %3391 = vmatpush.msrb.mxu3 %v6291_v51  ;;  %3467 = vmatpush.msrb.mxu1 %v6557_v47  ;;  %v6589_v51 = vld [vmem:[#allocation10 + $0x10] sm:$0xff] }
0x1bac   :  { %3369 = vmatpush.msra.mxu2 %v6193_v15  ;;  %v6580_v15 = vld [vmem:[#allocation10 + $0x18] sm:$0xff] }
0x1bad   :  { %3392 = vmatpush.msrb.mxu3 %v6297_v58  ;;  %3468 = vmatpush.msrb.mxu1 %v6565_v0  ;;  %v6595_v58 = vld [vmem:[#allocation10] sm:$0xff] }
0x1bae   :  { %3370 = vmatpush.msra.mxu2 %v6197_v24  ;;  %v6586_v24 = vld [vmem:[%s7079_s10] sm:$0xff] }
0x1baf   :  { %3393 = vmatpush.msrb.mxu3 %v6301_v59  ;;  %3469 = vmatpush.msrb.mxu1 %v6573_v31  ;;  %v3097_v59 = vpop.f32.mrf.mxu0 }
0x1bb0   :  { %3371 = vmatpush.msra.mxu2 %v6203_v34  ;;  %v6592_v34 = vld [vmem:[#allocation10 + $0x8] sm:$0xff] }
0x1bb1   :  { %4606 = vmatmul.msk.f32.vlgmr.msrb.gmra.mxu2 %vm391_vm9, %v6544_v19  ;;  %3394 = vmatpush.msrb.mxu3 %v6310_v50  ;;  %v3098_v50 = vadd.f32 %v6351_v4, %v3097_v59 }
0x1bb2   :  { %3488 = vmatpush.msrb.mxu2 %v6580_v15  ;;  %3470 = vmatpush.msrb.mxu1 %v6586_v24 }
0x1bb4   :  { %3489 = vmatpush.msrb.mxu2 %v6589_v51 }
0x1bb6   :  { %3490 = vmatpush.msrb.mxu2 %v6592_v34 }
0x1bb8   :  { %3491 = vmatpush.msrb.mxu2 %v6595_v58 }
0x1c27   :  { %v3237_v59 = vpop.f32.mrf.mxu1 }
0x1c2c   :  { %v3160_v26 = vpop.f32.mrf.mxu3  ;;  %v3140_v27 = vpop.f32.mrf.mxu2 }
0x1c2d   :  { %v3161_v35 = vadd.f32 %v3160_v26, %v3098_v50  ;;  %v3141_v30 = vadd.f32 %v6362_v23, %v3140_v27  ;;  %v6675_v50 = vld [vmem:[%s7085_s16] ss:$0 sm:$0xff] }
0x1c2e   :  { %v3238_v26 = vadd.f32 %v6675_v50, %v3237_v59 }
0x1c2f   :  { %v4603_v21 = vmul.f32 -1.442695, %v3161_v35 }
0x1c31   :  { %4866 = vpow2.f32 %v4603_v21 }
0x1c37   :  { %v4867_v33 = vpop.eup %4866 }
0x1c38   :  { %v3166_v22 = vadd.f32 1.0, %v4867_v33 }
0x1c3a   :  { %4868 = vrcp.f32 %v3166_v22  ;;  %v3178_v25 = vand.u32 2147483648, %v3166_v22  ;;  %v3176_v9 = vand.u32 2147483647, %v3166_v22  ;;  %vm3172_vm12 = vweird.f32 %v3166_v22 }
0x1c3c   :  { %v3179_v54 = vor.u32 1.1754944e-38, %v3178_v25  ;;  %vm3177_vm14 = vcmp.eq.f32.partialorder %v3176_v9, 8.507059e+37 }
0x1c40   :  { %v4869_v48 = vpop.eup %4868 }
0x1c41   :  { %v3168_v52 = vmul.f32 %v4869_v48, %v3166_v22  ;;  %vm3173_vm11 = vweird.f32 %v4869_v48 }
0x1c42   :  { %vm3174_vm13 = vmor %vm3172_vm12, %vm3173_vm11 }
0x1c43   :  { %v3169_v49 = vsub.f32 1.0, %v3168_v52 }
0x1c45   :  { %v3170_v11 = vmul.f32 %v4869_v48, %v3169_v49 }
0x1c47   :  { %v3171_v29 = vadd.f32 %v4869_v48, %v3170_v11 }
0x1c49   :  { %v3175_v17 = vsel %vm3174_vm13, %v4869_v48, %v3171_v29  ;;  %v3257_v29 = vpop.f32.mrf.mxu2 }
0x1c4a   :  { %v3180_v10 = vsel %vm3177_vm14, %v3179_v54, %v3175_v17  ;;  %v6681_v17 = vld [vmem:[%s7087_s18] ss:$0 sm:$0xff] }
0x1c4b   :  { %v3182_v2 = vmul.f32 %v3180_v10, %v3118_v36 }
0x1c4d   :  { %v3183_v28 = vadd.f32 %v3182_v2, %v3141_v30 }
0x1c4f   :  { %4870 = vtanh.f32 %v3183_v28  ;;  %v6687_v28 = vld [vmem:[%s7086_s17] ss:$0 sm:$0xff] }
0x1c55   :  { %v4871_v39 = vpop.eup %4870 }
0x1c56   :  { %v3185_v56 = vsub.f32 %v6507_v14, %v4871_v39 }
0x1c58   :  { %3187 = vrot.lane.b32.xlu1 %v3185_v56, %s5179_s13 }
0x1cca   :  { %v3188_v38 = vpop.permute.xlu1 %3187 }
0x1ccb   :  { %v3190_v57 = vmul.f32 %v3188_v38, %v3180_v10  ;;  %v3258_v10 = vadd.f32 %v6681_v17, %v3257_v29 }
0x1ccd   :  { %3192 = vrot.lane.b32.xlu2 %v3190_v57, %s5180_s3 }
0x1d27   :  { %v3193_v55 = vpop.permute.xlu2 %3192 }
0x1d28   :  { %v6604_v62 = vadd.f32 %v4871_v39, %v3193_v55 }
0x1d2a   :  { %4604 = vmatmul.msk.f32.vlgmr.msra.gmra.mxu0 %vm391_vm9, %v6604_v62  ;;  %4610 = vmatmul.msk.f32.vlgmr.msra.gmra.mxu1 %vm391_vm9, %v6604_v62 }
0x1d2b   :  { %4611 = vmatmul.msk.f32.vlgmr.msra.gmra.mxu2 %vm391_vm9, %v6604_v62  ;;  %3411 = vmatpush.msra.mxu0 %v6289_v13  ;;  %v6627_v13 = vld [vmem:[#allocation10 + $0x28] sm:$0xff] }
0x1d2c   :  { %3604 = vmatpush.msra.mxu2 %v6613_v46  ;;  %3551 = vmatpush.msra.mxu1 %v6616_v63 }
0x1d2d   :  { %3412 = vmatpush.msra.mxu0 %v6293_v32  ;;  %v6634_v32 = vld [vmem:[#allocation10 + $0x20] sm:$0xff] }
0x1d2e   :  { %3605 = vmatpush.msra.mxu2 %v6620_v41  ;;  %3552 = vmatpush.msra.mxu1 %v6623_v16 }
0x1d2f   :  { %3413 = vmatpush.msra.mxu0 %v6299_v40  ;;  %v6643_v40 = vld [vmem:[%s7080_s11] ss:$0 sm:$0xff] }
0x1d30   :  { %3606 = vmatpush.msra.mxu2 %v6627_v13  ;;  %3553 = vmatpush.msra.mxu1 %v6630_v8 }
0x1d31   :  { %3414 = vmatpush.msra.mxu0 %v6308_v5  ;;  %v6648_v5 = vld [vmem:[#allocation12 + $0x18] sm:$0xff] }
0x1d32   :  { %3607 = vmatpush.msra.mxu2 %v6634_v32  ;;  %3554 = vmatpush.msra.mxu1 %v6637_v42 }
0x1da7   :  { %v3216_v53 = vpop.f32.mrf.mxu0 }
0x1da8   :  { %v3217_v44 = vadd.f32 %v6643_v40, %v3216_v53 }
0x1daa   :  { %v3219_v1 = vmax.f32 %v3217_v44, 0.0 }
0x1dac   :  { %4607 = vmatmul.msk.f32.vlgmr.msra.gmra.mxu3 %vm391_vm9, %v3219_v1  ;;  %4608 = vmatmul.msk.f32.vlgmr.msrb.gmra.mxu0 %vm391_vm9, %v3219_v1 }
0x1dad   :  { %3508 = vmatpush.msra.mxu3 %v6648_v5  ;;  %3531 = vmatpush.msrb.mxu0 %v6651_v37 }
0x1daf   :  { %3509 = vmatpush.msra.mxu3 %v6654_v20  ;;  %3532 = vmatpush.msrb.mxu0 %v6657_v60 }
0x1db1   :  { %3510 = vmatpush.msra.mxu3 %v6660_v18  ;;  %3533 = vmatpush.msrb.mxu0 %v6663_v43 }
0x1db3   :  { %3511 = vmatpush.msra.mxu3 %v6666_v61  ;;  %3534 = vmatpush.msrb.mxu0 %v6669_v12 }
0x1e29   :  { %v3300_v35 = vpop.f32.mrf.mxu0 }
0x1e2a   :  { %v3301_v21 = vadd.f32 %v3300_v35, %v3238_v26  ;;  %v6701_v26 = vld [vmem:[#allocation12 + $0x38] sm:$0xff]  ;;  %v6708_v35 = vld [vmem:[#allocation12 + $0x30] sm:$0xff] }
0x1e2c   :  { %v4609_v33 = vmul.f32 -1.442695, %v3301_v21  ;;  %v6711_v21 = vld [vmem:[#allocation9 + $0x30] sm:$0xff] }
0x1e2e   :  { %4872 = vpow2.f32 %v4609_v33  ;;  %v6715_v33 = vld [vmem:[#allocation12 + $0x28] sm:$0xff] }
0x1e2f   :  { %v3280_v54 = vpop.f32.mrf.mxu3 }
0x1e30   :  { %v3281_v39 = vadd.f32 %v6687_v28, %v3280_v54 }
0x1e34   :  { %v4873_v22 = vpop.eup %4872 }
0x1e35   :  { %v3306_v48 = vadd.f32 1.0, %v4873_v22  ;;  %v6718_v22 = vld [vmem:[#allocation9 + $0x28] sm:$0xff] }
0x1e37   :  { %4874 = vrcp.f32 %v3306_v48  ;;  %v3318_v11 = vand.u32 2147483648, %v3306_v48  ;;  %v3316_v3 = vand.u32 2147483647, %v3306_v48  ;;  %vm3312_vm0 = vweird.f32 %v3306_v48 }
0x1e39   :  { %v3319_v36 = vor.u32 1.1754944e-38, %v3318_v11  ;;  %vm3317_vm11 = vcmp.eq.f32.partialorder %v3316_v3, 8.507059e+37 }
0x1e3d   :  { %v4875_v52 = vpop.eup %4874 }
0x1e3e   :  { %v3308_v49 = vmul.f32 %v4875_v52, %v3306_v48  ;;  %vm3313_vm15 = vweird.f32 %v4875_v52  ;;  %v6722_v48 = vld [vmem:[#allocation12 + $0x20] sm:$0xff] }
0x1e3f   :  { %vm3314_vm10 = vmor %vm3312_vm0, %vm3313_vm15 }
0x1e40   :  { %v3309_v25 = vsub.f32 1.0, %v3308_v49  ;;  %v3353_v49 = vpop.f32.mrf.mxu1 }
0x1e42   :  { %v3310_v9 = vmul.f32 %v4875_v52, %v3309_v25  ;;  %v3354_v25 = vadd.f32 %v6351_v4, %v3353_v49 }
0x1e44   :  { %v3311_v27 = vadd.f32 %v4875_v52, %v3310_v9 }
0x1e46   :  { %v3315_v30 = vsel %vm3314_vm10, %v4875_v52, %v3311_v27  ;;  %v6727_v52 = vld [vmem:[#allocation9 + $0x20] sm:$0xff] }
0x1e47   :  { %v3320_v2 = vsel %vm3317_vm11, %v3319_v36, %v3315_v30 }
0x1e48   :  { %v3322_v56 = vmul.f32 %v3320_v2, %v3258_v10 }
0x1e4a   :  { %v3323_v38 = vadd.f32 %v3322_v56, %v3281_v39  ;;  %v3373_v56 = vpop.f32.mrf.mxu2 }
0x1e4c   :  { %4876 = vtanh.f32 %v3323_v38 }
0x1e52   :  { %v4877_v57 = vpop.eup %4876 }
0x1e53   :  { %v3325_v55 = vsub.f32 %v6544_v19, %v4877_v57  ;;  %v6704_v19 = vld [vmem:[#allocation9 + $0x38] sm:$0xff] }
0x1e55   :  { %3327 = vrot.lane.b32.xlu0 %v3325_v55, %s5179_s13  ;;  %v3374_v55 = vadd.f32 %v6357_v7, %v3373_v56  ;;  %v6749_v7 = vld [vmem:[#allocation7 + $0x38] sm:$0xff] }
0x1ec7   :  { %v3328_v53 = vpop.permute.xlu0 %3327 }
0x1ec8   :  { %v3330_v44 = vmul.f32 %v3328_v53, %v3320_v2 }
0x1eca   :  { %3332 = vrot.lane.b32.xlu1 %v3330_v44, %s5180_s3 }
0x1f3c   :  { %v3333_v1 = vpop.permute.xlu1 %3332 }
0x1f3d   :  { %v6693_v59 = vadd.f32 %v4877_v57, %v3333_v1 }
0x1f3f   :  { %4612 = vmatmul.msk.f32.vlgmr.msrb.gmra.mxu3 %vm391_vm9, %v6693_v59  ;;  %4613 = vmatmul.msk.f32.vlgmr.msra.gmra.mxu0 %vm391_vm9, %v6693_v59 }
0x1f40   :  { %4616 = vmatmul.msk.f32.vlgmr.msrb.gmra.mxu2 %vm391_vm9, %v6693_v59  ;;  %3624 = vmatpush.msrb.mxu3 %v6701_v26 }
0x1f41   :  { %3647 = vmatpush.msra.mxu0 %v6704_v19  ;;  %3723 = vmatpush.msrb.mxu2 %v6557_v47 }
0x1f42   :  { %3625 = vmatpush.msrb.mxu3 %v6708_v35 }
0x1f43   :  { %3648 = vmatpush.msra.mxu0 %v6711_v21  ;;  %3724 = vmatpush.msrb.mxu2 %v6565_v0 }
0x1f44   :  { %3626 = vmatpush.msrb.mxu3 %v6715_v33 }
0x1f45   :  { %3649 = vmatpush.msra.mxu0 %v6718_v22  ;;  %3725 = vmatpush.msrb.mxu2 %v6573_v31 }
0x1f46   :  { %3627 = vmatpush.msrb.mxu3 %v6722_v48 }
0x1f47   :  { %4617 = vmatmul.msk.f32.vlgmr.msra.gmra.mxu3 %vm391_vm9, %v6693_v59  ;;  %3650 = vmatpush.msra.mxu0 %v6727_v52 }
0x1f48   :  { %3744 = vmatpush.msra.mxu3 %v6580_v15  ;;  %3726 = vmatpush.msrb.mxu2 %v6586_v24 }
0x1f4a   :  { %3745 = vmatpush.msra.mxu3 %v6589_v51 }
0x1f4c   :  { %3746 = vmatpush.msra.mxu3 %v6592_v34 }
0x1f4e   :  { %3747 = vmatpush.msra.mxu3 %v6595_v58 }
0x1fbc   :  { %v3416_v11 = vpop.f32.mrf.mxu0 }
0x1fbd   :  { %v3417_v9 = vadd.f32 %v3416_v11, %v3354_v25 }
0x1fbf   :  { %v4614_v3 = vmul.f32 -1.442695, %v3417_v9 }
0x1fc1   :  { %4878 = vpow2.f32 %v4614_v3 }
0x1fc2   :  { %v3396_v57 = vpop.f32.mrf.mxu3 }
0x1fc3   :  { %v3397_v1 = vadd.f32 %v6362_v23, %v3396_v57  ;;  %v6754_v23 = vld [vmem:[#allocation7 + $0x30] sm:$0xff]  ;;  %v3493_v56 = vpop.f32.mrf.mxu2 }
0x1fc7   :  { %v4879_v29 = vpop.eup %4878 }
0x1fc8   :  { %v3422_v27 = vadd.f32 1.0, %v4879_v29 }
0x1fca   :  { %4880 = vrcp.f32 %v3422_v27  ;;  %v3434_v30 = vand.u32 2147483648, %v3422_v27  ;;  %v3432_v39 = vand.u32 2147483647, %v3422_v27  ;;  %vm3428_vm13 = vweird.f32 %v3422_v27 }
0x1fcc   :  { %v3435_v4 = vor.u32 1.1754944e-38, %v3434_v30  ;;  %vm3433_vm15 = vcmp.eq.f32.partialorder %v3432_v39, 8.507059e+37 }
0x1fd0   :  { %v4881_v54 = vpop.eup %4880 }
0x1fd1   :  { %v3424_v36 = vmul.f32 %v4881_v54, %v3422_v27  ;;  %vm3429_vm12 = vweird.f32 %v4881_v54 }
0x1fd2   :  { %vm3430_vm14 = vmor %vm3428_vm13, %vm3429_vm12 }
0x1fd3   :  { %v3425_v10 = vsub.f32 1.0, %v3424_v36 }
0x1fd5   :  { %v3426_v2 = vmul.f32 %v4881_v54, %v3425_v10  ;;  %v6764_v10 = vld [vmem:[#allocation7 + $0x20] sm:$0xff] }
0x1fd7   :  { %v3427_v38 = vadd.f32 %v4881_v54, %v3426_v2 }
0x1fd9   :  { %v3431_v53 = vsel %vm3430_vm14, %v4881_v54, %v3427_v38  ;;  %v6759_v54 = vld [vmem:[#allocation7 + $0x28] sm:$0xff]  ;;  %v3494_v38 = vadd.f32 %v6675_v50, %v3493_v56 }
0x1fda   :  { %v3436_v44 = vsel %vm3433_vm15, %v3435_v4, %v3431_v53 }
0x1fdb   :  { %v3438_v49 = vmul.f32 %v3436_v44, %v3374_v55 }
0x1fdd   :  { %v3439_v25 = vadd.f32 %v3438_v49, %v3397_v1 }
0x1fdf   :  { %4882 = vtanh.f32 %v3439_v25 }
0x1fe5   :  { %v4883_v11 = vpop.eup %4882 }
0x1fe6   :  { %v3441_v9 = vsub.f32 %v6604_v62, %v4883_v11 }
0x1fe8   :  { %3443 = vrot.lane.b32.xlu2 %v3441_v9, %s5179_s13 }
0x2042   :  { %v3444_v3 = vpop.permute.xlu2 %3443 }
0x2043   :  { %v3446_v29 = vmul.f32 %v3444_v3, %v3436_v44 }
0x2045   :  { %3448 = vrot.lane.b32.xlu0 %v3446_v29, %s5180_s3  ;;  %v3513_v29 = vpop.f32.mrf.mxu3 }
0x20b7   :  { %v3449_v27 = vpop.permute.xlu0 %3448 }
0x20b8   :  { %v6741_v36 = vadd.f32 %v4883_v11, %v3449_v27 }
0x20ba   :  { %4615 = vmatmul.msk.f32.vlgmr.msrb.gmra.mxu1 %vm391_vm9, %v6741_v36  ;;  %4621 = vmatmul.msk.f32.vlgmr.msra.gmra.mxu2 %vm391_vm9, %v6741_v36 }
0x20bb   :  { %4622 = vmatmul.msk.f32.vlgmr.msrb.gmra.mxu3 %vm391_vm9, %v6741_v36  ;;  %3667 = vmatpush.msrb.mxu1 %v6749_v7 }
0x20bc   :  { %3860 = vmatpush.msrb.mxu3 %v6613_v46  ;;  %3807 = vmatpush.msra.mxu2 %v6616_v63 }
0x20bd   :  { %3668 = vmatpush.msrb.mxu1 %v6754_v23 }
0x20be   :  { %3861 = vmatpush.msrb.mxu3 %v6620_v41  ;;  %3808 = vmatpush.msra.mxu2 %v6623_v16 }
0x20bf   :  { %3669 = vmatpush.msrb.mxu1 %v6759_v54 }
0x20c0   :  { %3862 = vmatpush.msrb.mxu3 %v6627_v13  ;;  %3809 = vmatpush.msra.mxu2 %v6630_v8 }
0x20c1   :  { %3670 = vmatpush.msrb.mxu1 %v6764_v10 }
0x20c2   :  { %3863 = vmatpush.msrb.mxu3 %v6634_v32  ;;  %3810 = vmatpush.msra.mxu2 %v6637_v42 }
0x2137   :  { %v3472_v30 = vpop.f32.mrf.mxu1 }
0x2138   :  { %v3473_v2 = vadd.f32 %v6643_v40, %v3472_v30 }
0x213a   :  { %v3475_v39 = vmax.f32 %v3473_v2, 0.0 }
0x213c   :  { %4618 = vmatmul.msk.f32.vlgmr.msrb.gmra.mxu0 %vm391_vm9, %v3475_v39  ;;  %4619 = vmatmul.msk.f32.vlgmr.msra.gmra.mxu1 %vm391_vm9, %v3475_v39  ;;  %v3514_v39 = vadd.f32 %v6681_v17, %v3513_v29 }
0x213d   :  { %3764 = vmatpush.msrb.mxu0 %v6648_v5  ;;  %3787 = vmatpush.msra.mxu1 %v6651_v37 }
0x213f   :  { %3765 = vmatpush.msrb.mxu0 %v6654_v20  ;;  %3788 = vmatpush.msra.mxu1 %v6657_v60 }
0x2141   :  { %3766 = vmatpush.msrb.mxu0 %v6660_v18  ;;  %3789 = vmatpush.msra.mxu1 %v6663_v43 }
0x2143   :  { %3767 = vmatpush.msrb.mxu0 %v6666_v61  ;;  %3790 = vmatpush.msra.mxu1 %v6669_v12 }
0x21b9   :  { %v3556_v57 = vpop.f32.mrf.mxu1  ;;  %v3536_v30 = vpop.f32.mrf.mxu0 }
0x21ba   :  { %v3557_v4 = vadd.f32 %v3556_v57, %v3494_v38  ;;  %v3537_v57 = vadd.f32 %v6687_v28, %v3536_v30 }
0x21bc   :  { %v4620_v55 = vmul.f32 -1.442695, %v3557_v4 }
0x21be   :  { %4884 = vpow2.f32 %v4620_v55 }
0x21c4   :  { %v4885_v53 = vpop.eup %4884 }
0x21c5   :  { %v3562_v44 = vadd.f32 1.0, %v4885_v53 }
0x21c7   :  { %4886 = vrcp.f32 %v3562_v44  ;;  %v3574_v11 = vand.u32 2147483648, %v3562_v44  ;;  %v3572_v3 = vand.u32 2147483647, %v3562_v44  ;;  %vm3568_vm10 = vweird.f32 %v3562_v44 }
0x21c9   :  { %v3575_v2 = vor.u32 1.1754944e-38, %v3574_v11  ;;  %vm3573_vm12 = vcmp.eq.f32.partialorder %v3572_v3, 8.507059e+37 }
0x21cd   :  { %v4887_v1 = vpop.eup %4886 }
0x21ce   :  { %v3564_v49 = vmul.f32 %v4887_v1, %v3562_v44  ;;  %vm3569_vm0 = vweird.f32 %v4887_v1 }
0x21cf   :  { %vm3570_vm11 = vmor %vm3568_vm10, %vm3569_vm0 }
0x21d0   :  { %v3565_v25 = vsub.f32 1.0, %v3564_v49 }
0x21d2   :  { %v3566_v9 = vmul.f32 %v4887_v1, %v3565_v25 }
0x21d4   :  { %v3567_v27 = vadd.f32 %v4887_v1, %v3566_v9 }
0x21d6   :  { %v3571_v56 = vsel %vm3570_vm11, %v4887_v1, %v3567_v27 }
0x21d7   :  { %v3576_v38 = vsel %vm3573_vm12, %v3575_v2, %v3571_v56  ;;  %v3629_v2 = vpop.f32.mrf.mxu3 }
0x21d8   :  { %v3578_v4 = vmul.f32 %v3576_v38, %v3514_v39 }
0x21da   :  { %v3579_v55 = vadd.f32 %v3578_v4, %v3537_v57  ;;  %v6821_v57 = vld [vmem:[%s7087_s18 + $0x1] ss:$0 sm:$0xff] }
0x21db   :  { %v3630_v4 = vadd.f32 %v6821_v57, %v3629_v2 }
0x21dc   :  { %4888 = vtanh.f32 %v3579_v55 }
0x21e2   :  { %v4889_v53 = vpop.eup %4888 }
0x21e3   :  { %v3581_v49 = vsub.f32 %v6693_v59, %v4889_v53 }
0x21e5   :  { %3583 = vrot.lane.b32.xlu1 %v3581_v49, %s5179_s13  ;;  %v6827_v49 = vld [vmem:[%s7086_s17 + $0x1] ss:$0 sm:$0xff] }
0x2257   :  { %v3584_v25 = vpop.permute.xlu1 %3583 }
0x2258   :  { %v3586_v44 = vmul.f32 %v3584_v25, %v3576_v38 }
0x225a   :  { %3588 = vrot.lane.b32.xlu2 %v3586_v44, %s5180_s3 }
0x22b4   :  { %v3589_v11 = vpop.permute.xlu2 %3588 }
0x22b5   :  { %v6786_v9 = vadd.f32 %v4889_v53, %v3589_v11 }
0x22b7   :  { %4623 = vmatmul.msk.f32.vlgmr.msra.gmra.mxu0 %vm391_vm9, %v6786_v9  ;;  %4624 = vmatmul.msk.f32.vlgmr.msrb.gmra.mxu1 %vm391_vm9, %v6786_v9 }
0x22b8   :  { %4627 = vmatmul.msk.f32.vlgmr.msra.gmra.mxu3 %vm391_vm9, %v6786_v9  ;;  %3880 = vmatpush.msra.mxu0 %v6701_v26 }
0x22b9   :  { %3903 = vmatpush.msrb.mxu1 %v6704_v19  ;;  %3979 = vmatpush.msra.mxu3 %v6557_v47  ;;  %v3609_v47 = vpop.f32.mrf.mxu2 }
0x22ba   :  { %3881 = vmatpush.msra.mxu0 %v6708_v35 }
0x22bb   :  { %3904 = vmatpush.msrb.mxu1 %v6711_v21  ;;  %3980 = vmatpush.msra.mxu3 %v6565_v0  ;;  %v6815_v0 = vld [vmem:[%s7085_s16 + $0x1] ss:$0 sm:$0xff] }
0x22bc   :  { %3882 = vmatpush.msra.mxu0 %v6715_v33 }
0x22bd   :  { %3905 = vmatpush.msrb.mxu1 %v6718_v22  ;;  %3981 = vmatpush.msra.mxu3 %v6573_v31  ;;  %v3610_v31 = vadd.f32 %v6815_v0, %v3609_v47 }
0x22be   :  { %3883 = vmatpush.msra.mxu0 %v6722_v48 }
0x22bf   :  { %4628 = vmatmul.msk.f32.vlgmr.msrb.gmra.mxu0 %vm391_vm9, %v6786_v9  ;;  %3906 = vmatpush.msrb.mxu1 %v6727_v52 }
0x22c0   :  { %4000 = vmatpush.msrb.mxu0 %v6580_v15  ;;  %3982 = vmatpush.msra.mxu3 %v6586_v24 }
0x22c2   :  { %4001 = vmatpush.msrb.mxu0 %v6589_v51 }
0x22c4   :  { %4002 = vmatpush.msrb.mxu0 %v6592_v34 }
0x22c6   :  { %4003 = vmatpush.msrb.mxu0 %v6595_v58 }
0x2334   :  { %v3672_v59 = vpop.f32.mrf.mxu1  ;;  %v3652_v56 = vpop.f32.mrf.mxu0 }
0x2335   :  { %v3673_v1 = vadd.f32 %v3672_v59, %v3610_v31  ;;  %v3653_v25 = vadd.f32 %v6827_v49, %v3652_v56 }
0x2337   :  { %v4625_v3 = vmul.f32 -1.442695, %v3673_v1 }
0x2339   :  { %4890 = vpow2.f32 %v4625_v3 }
0x233f   :  { %v4891_v15 = vpop.eup %4890 }
0x2340   :  { %v3678_v24 = vadd.f32 1.0, %v4891_v15 }
0x2342   :  { %4892 = vrcp.f32 %v3678_v24  ;;  %v3690_v27 = vand.u32 2147483648, %v3678_v24  ;;  %v3688_v30 = vand.u32 2147483647, %v3678_v24  ;;  %vm3684_vm14 = vweird.f32 %v3678_v24 }
0x2344   :  { %v3691_v38 = vor.u32 1.1754944e-38, %v3690_v27  ;;  %vm3689_vm0 = vcmp.eq.f32.partialorder %v3688_v30, 8.507059e+37 }
0x2348   :  { %v4893_v51 = vpop.eup %4892 }
0x2349   :  { %v3680_v29 = vmul.f32 %v4893_v51, %v3678_v24  ;;  %vm3685_vm13 = vweird.f32 %v4893_v51 }
0x234a   :  { %vm3686_vm15 = vmor %vm3684_vm14, %vm3685_vm13 }
0x234b   :  { %v3681_v34 = vsub.f32 1.0, %v3680_v29 }
0x234d   :  { %v3682_v58 = vmul.f32 %v4893_v51, %v3681_v34 }
0x234f   :  { %v3683_v39 = vadd.f32 %v4893_v51, %v3682_v58 }
0x2351   :  { %v3687_v55 = vsel %vm3686_vm15, %v4893_v51, %v3683_v39 }
0x2352   :  { %v3692_v53 = vsel %vm3689_vm0, %v3691_v38, %v3687_v55 }
0x2353   :  { %v3694_v44 = vmul.f32 %v3692_v53, %v3630_v4 }
0x2355   :  { %v3695_v11 = vadd.f32 %v3694_v44, %v3653_v25 }
0x2357   :  { %4894 = vtanh.f32 %v3695_v11 }
0x235d   :  { %v4895_v47 = vpop.eup %4894 }
0x235e   :  { %v3697_v31 = vsub.f32 %v6741_v36, %v4895_v47 }
0x2360   :  { %3699 = vrot.lane.b32.xlu0 %v3697_v31, %s5179_s13 }
0x23d2   :  { %v3700_v59 = vpop.permute.xlu0 %3699 }
0x23d3   :  { %v3702_v1 = vmul.f32 %v3700_v59, %v3692_v53 }
0x23d5   :  { %3704 = vrot.lane.b32.xlu1 %v3702_v1, %s5180_s3 }
0x2447   :  { %v3705_v3 = vpop.permute.xlu1 %3704 }
0x2448   :  { %v6833_v15 = vadd.f32 %v4895_v47, %v3705_v3 }
0x244a   :  { %4626 = vmatmul.msk.f32.vlgmr.msrb.gmra.mxu2 %vm391_vm9, %v6833_v15  ;;  %4632 = vmatmul.msk.f32.vlgmr.msrb.gmra.mxu3 %vm391_vm9, %v6833_v15 }
0x244b   :  { %4633 = vmatmul.msk.f32.vlgmr.msra.gmra.mxu0 %vm391_vm9, %v6833_v15  ;;  %3923 = vmatpush.msrb.mxu2 %v6749_v7 }
0x244c   :  { %4116 = vmatpush.msra.mxu0 %v6613_v46  ;;  %4063 = vmatpush.msrb.mxu3 %v6616_v63 }
0x244d   :  { %3924 = vmatpush.msrb.mxu2 %v6754_v23 }
0x244e   :  { %4117 = vmatpush.msra.mxu0 %v6620_v41  ;;  %4064 = vmatpush.msrb.mxu3 %v6623_v16  ;;  %v3749_v41 = vpop.f32.mrf.mxu3 }
0x244f   :  { %3925 = vmatpush.msrb.mxu2 %v6759_v54  ;;  %v3750_v16 = vadd.f32 %v6675_v50, %v3749_v41 }
0x2450   :  { %4118 = vmatpush.msra.mxu0 %v6627_v13  ;;  %4065 = vmatpush.msrb.mxu3 %v6630_v8 }
0x2451   :  { %3926 = vmatpush.msrb.mxu2 %v6764_v10 }
0x2452   :  { %4119 = vmatpush.msra.mxu0 %v6634_v32  ;;  %4066 = vmatpush.msrb.mxu3 %v6637_v42 }
0x24cd   :  { %v3728_v46 = vpop.f32.mrf.mxu2 }
0x24ce   :  { %v3729_v63 = vadd.f32 %v6643_v40, %v3728_v46 }
0x24d0   :  { %v3731_v24 = vmax.f32 %v3729_v63, 0.0 }
0x24d2   :  { %4629 = vmatmul.msk.f32.vlgmr.msra.gmra.mxu1 %vm391_vm9, %v3731_v24  ;;  %4630 = vmatmul.msk.f32.vlgmr.msra.gmra.mxu2 %vm391_vm9, %v3731_v24 }
0x24d3   :  { %4020 = vmatpush.msra.mxu1 %v6648_v5  ;;  %4043 = vmatpush.msra.mxu2 %v6651_v37 }
0x24d5   :  { %4021 = vmatpush.msra.mxu1 %v6654_v20  ;;  %4044 = vmatpush.msra.mxu2 %v6657_v60 }
0x24d7   :  { %4022 = vmatpush.msra.mxu1 %v6660_v18  ;;  %4045 = vmatpush.msra.mxu2 %v6663_v43 }
0x24d9   :  { %4023 = vmatpush.msra.mxu1 %v6666_v61  ;;  %4046 = vmatpush.msra.mxu2 %v6669_v12  ;;  %v3769_v61 = vpop.f32.mrf.mxu0 }
0x24da   :  { %v3770_v27 = vadd.f32 %v6681_v17, %v3769_v61 }
0x24e1   :  { %v3885_v3 = vpop.f32.mrf.mxu0 }
0x24e2   :  { %v3886_v24 = vadd.f32 %v6821_v57, %v3885_v3 }
0x254f   :  { %v3792_v12 = vpop.f32.mrf.mxu1 }
0x2550   :  { %v3793_v2 = vadd.f32 %v6687_v28, %v3792_v12 }
0x2555   :  { %v3812_v13 = vpop.f32.mrf.mxu2 }
0x2556   :  { %v3813_v8 = vadd.f32 %v3812_v13, %v3750_v16 }
0x2558   :  { %v4631_v32 = vmul.f32 -1.442695, %v3813_v8 }
0x255a   :  { %4896 = vpow2.f32 %v4631_v32 }
0x2560   :  { %v4897_v42 = vpop.eup %4896 }
0x2561   :  { %v3818_v5 = vadd.f32 1.0, %v4897_v42 }
0x2563   :  { %4898 = vrcp.f32 %v3818_v5  ;;  %v3830_v18 = vand.u32 2147483648, %v3818_v5  ;;  %v3828_v43 = vand.u32 2147483647, %v3818_v5  ;;  %vm3824_vm11 = vweird.f32 %v3818_v5 }
0x2565   :  { %v3831_v34 = vor.u32 1.1754944e-38, %v3830_v18  ;;  %vm3829_vm13 = vcmp.eq.f32.partialorder %v3828_v43, 8.507059e+37  ;;  %v4222_v18 = vld [vmem:[%s7088_s19 + $0x10] sm:$0xff]  ;;  %v4220_v43 = vld [vmem:[%s7088_s19] sm:$0xff] }
0x2569   :  { %v4899_v37 = vpop.eup %4898 }
0x256a   :  { %v3820_v20 = vmul.f32 %v4899_v37, %v3818_v5  ;;  %vm3825_vm10 = vweird.f32 %v4899_v37 }
0x256b   :  { %vm3826_vm12 = vmor %vm3824_vm11, %vm3825_vm10 }
0x256c   :  { %v3821_v60 = vsub.f32 1.0, %v3820_v20 }
0x256e   :  { %v3822_v51 = vmul.f32 %v4899_v37, %v3821_v60  ;;  %v4223_v60 = vld [vmem:[%s7088_s19 + $0x18] sm:$0xff] }
0x2570   :  { %v3823_v29 = vadd.f32 %v4899_v37, %v3822_v51  ;;  %v4221_v51 = vld [vmem:[%s7088_s19 + $0x8] sm:$0xff] }
0x2572   :  { %v3827_v58 = vsel %vm3826_vm12, %v4899_v37, %v3823_v29 }
0x2573   :  { %v3832_v30 = vsel %vm3829_vm13, %v3831_v34, %v3827_v58 }
0x2574   :  { %v3834_v39 = vmul.f32 %v3832_v30, %v3770_v27 }
0x2576   :  { %v3835_v56 = vadd.f32 %v3834_v39, %v3793_v2 }
0x2578   :  { %4900 = vtanh.f32 %v3835_v56 }
0x257e   :  { %v4901_v38 = vpop.eup %4900 }
0x257f   :  { %v3837_v4 = vsub.f32 %v6786_v9, %v4901_v38  ;;  %v3865_v9 = vpop.f32.mrf.mxu3 }
0x2581   :  { %3839 = vrot.lane.b32.xlu2 %v3837_v4, %s5179_s13 }
0x25db   :  { %v3840_v55 = vpop.permute.xlu2 %3839 }
0x25dc   :  { %v3842_v53 = vmul.f32 %v3840_v55, %v3832_v30 }
0x25de   :  { %3844 = vrot.lane.b32.xlu0 %v3842_v53, %s5180_s3 }
0x2650   :  { %v3845_v25 = vpop.permute.xlu0 %3844 }
0x2651   :  { %v6870_v44 = vadd.f32 %v4901_v38, %v3845_v25 }
0x2653   :  { %4634 = vmatmul.msk.f32.vlgmr.msrb.gmra.mxu1 %vm391_vm9, %v6870_v44  ;;  %4635 = vmatmul.msk.f32.vlgmr.msrb.gmra.mxu2 %vm391_vm9, %v6870_v44 }
0x2654   :  { %4638 = vmatmul.msk.f32.vlgmr.msrb.gmra.mxu0 %vm391_vm9, %v6870_v44  ;;  %4136 = vmatpush.msrb.mxu1 %v6701_v26  ;;  %v3866_v26 = vadd.f32 %v6815_v0, %v3865_v9 }
0x2655   :  { %4159 = vmatpush.msrb.mxu2 %v6704_v19  ;;  %4243 = vmatpush.msrb.mxu0 %v4223_v60 }
0x2656   :  { %4137 = vmatpush.msrb.mxu1 %v6708_v35 }
0x2657   :  { %4160 = vmatpush.msrb.mxu2 %v6711_v21  ;;  %4244 = vmatpush.msrb.mxu0 %v4222_v18 }
0x2658   :  { %4138 = vmatpush.msrb.mxu1 %v6715_v33 }
0x2659   :  { %4161 = vmatpush.msrb.mxu2 %v6718_v22  ;;  %4245 = vmatpush.msrb.mxu0 %v4221_v51 }
0x265a   :  { %4139 = vmatpush.msrb.mxu1 %v6722_v48 }
0x265b   :  { %4639 = vmatmul.msk.f32.vlgmr.msra.gmra.mxu1 %vm391_vm9, %v6870_v44  ;;  %4162 = vmatpush.msrb.mxu2 %v6727_v52 }
0x265c   :  { %4246 = vmatpush.msrb.mxu0 %v4220_v43 }
0x26d0   :  { %v3908_v52 = vpop.f32.mrf.mxu1 }
0x26d1   :  { %v3909_v13 = vadd.f32 %v6827_v49, %v3908_v52 }
0x26d6   :  { %v3928_v11 = vpop.f32.mrf.mxu2 }
0x26d7   :  { %v3929_v19 = vadd.f32 %v3928_v11, %v3866_v26 }
0x26d8   :  { %v4025_v2 = vpop.f32.mrf.mxu1 }
0x26d9   :  { %v4636_v47 = vmul.f32 -1.442695, %v3929_v19  ;;  %v4026_v38 = vadd.f32 %v6681_v17, %v4025_v2 }
0x26db   :  { %4902 = vpow2.f32 %v4636_v47 }
0x26e1   :  { %v4903_v35 = vpop.eup %4902 }
0x26e2   :  { %v3934_v21 = vadd.f32 1.0, %v4903_v35 }
0x26e4   :  { %4904 = vrcp.f32 %v3934_v21  ;;  %v3946_v59 = vand.u32 2147483648, %v3934_v21  ;;  %v3944_v1 = vand.u32 2147483647, %v3934_v21  ;;  %vm3940_vm15 = vweird.f32 %v3934_v21 }
0x26e6   :  { %v3947_v63 = vor.u32 1.1754944e-38, %v3946_v59  ;;  %vm3945_vm10 = vcmp.eq.f32.partialorder %v3944_v1, 8.507059e+37 }
0x26ea   :  { %v4905_v33 = vpop.eup %4904 }
0x26eb   :  { %v3936_v31 = vmul.f32 %v4905_v33, %v3934_v21  ;;  %vm3941_vm14 = vweird.f32 %v4905_v33 }
0x26ec   :  { %vm3942_vm0 = vmor %vm3940_vm15, %vm3941_vm14 }
0x26ed   :  { %v3937_v22 = vsub.f32 1.0, %v3936_v31 }
0x26ef   :  { %v3938_v48 = vmul.f32 %v4905_v33, %v3937_v22 }
0x26f1   :  { %v3939_v46 = vadd.f32 %v4905_v33, %v3938_v48 }
0x26f3   :  { %v3943_v41 = vsel %vm3942_vm0, %v4905_v33, %v3939_v46 }
0x26f4   :  { %v3948_v16 = vsel %vm3945_vm10, %v3947_v63, %v3943_v41 }
0x26f5   :  { %v3950_v8 = vmul.f32 %v3948_v16, %v3886_v24 }
0x26f7   :  { %v3951_v32 = vadd.f32 %v3950_v8, %v3909_v13 }
0x26f9   :  { %4906 = vtanh.f32 %v3951_v32 }
0x26ff   :  { %v4907_v42 = vpop.eup %4906 }
0x2700   :  { %v3953_v5 = vsub.f32 %v6833_v15, %v4907_v42 }
0x2702   :  { %3955 = vrot.lane.b32.xlu1 %v3953_v5, %s5179_s13 }
0x2774   :  { %v3956_v37 = vpop.permute.xlu1 %3955 }
0x2775   :  { %v3958_v20 = vmul.f32 %v3956_v37, %v3948_v16 }
0x2777   :  { %3960 = vrot.lane.b32.xlu2 %v3958_v20, %s5180_s3 }
0x27d1   :  { %v3961_v61 = vpop.permute.xlu2 %3960 }
0x27d2   :  { %v6906_v29 = vadd.f32 %v4907_v42, %v3961_v61 }
0x27d4   :  { %4637 = vmatmul.msk.f32.vlgmr.msra.gmra.mxu3 %vm391_vm9, %v6906_v29  ;;  %4643 = vmatmul.msk.f32.vlgmr.msra.gmra.mxu0 %vm391_vm9, %v6906_v29 }
0x27d5   :  { %4644 = vmatmul.msk.f32.vlgmr.msrb.gmra.mxu1 %vm391_vm9, %v6906_v29  ;;  %4179 = vmatpush.msra.mxu3 %v6749_v7 }
0x27d7   :  { %4180 = vmatpush.msra.mxu3 %v6754_v23 }
0x27d9   :  { %4181 = vmatpush.msra.mxu3 %v6759_v54 }
0x27db   :  { %4182 = vmatpush.msra.mxu3 %v6764_v10 }
0x27dc   :  { %4648 = vmatmul.msk.f32.vlgmr.msrb.gmra.mxu0 %vm391_vm9, %v6369_v6 }
0x27e4   :  { %4649 = vmatmul.msk.f32.gmra.mxu0 %vm391_vm9, %v6438_v45  ;;  %v4005_v45 = vpop.f32.mrf.mxu0 }
0x27ec   :  { %4650 = vmatmul.msk.f32.gmra.mxu0 %vm391_vm9, %v6507_v14  ;;  %v4006_v14 = vadd.f32 %v6675_v50, %v4005_v45  ;;  %v6953_v45 = vld [vmem:[%s7089_s20] ss:$0 sm:$0xff] }
0x27f4   :  { %4651 = vmatmul.msk.f32.gmra.mxu0 %vm391_vm9, %v6604_v62 }
0x27fc   :  { %4652 = vmatmul.msk.f32.gmra.mxu0 %vm391_vm9, %v6741_v36 }
0x2804   :  { %4653 = vmatmul.msk.f32.gmra.mxu0 %vm391_vm9, %v6833_v15 }
0x280c   :  { %4654 = vmatmul.msk.f32.gmra.mxu0 %vm391_vm9, %v6906_v29 }
0x2851   :  { %v4121_v17 = vpop.f32.mrf.mxu0 }
0x2852   :  { %v4141_v24 = vpop.f32.mrf.mxu1 }
0x2853   :  { %v4142_v13 = vadd.f32 %v6821_v57, %v4141_v24 }
0x2857   :  { %v3984_v7 = vpop.f32.mrf.mxu3 }
0x2858   :  { %v3985_v6 = vadd.f32 %v6643_v40, %v3984_v7 }
0x2859   :  { %v4248_v57 = vpop.f32.mrf.mxu0 }
0x285a   :  { %v3987_v23 = vmax.f32 %v3985_v6, 0.0 }
0x285c   :  { %4640 = vmatmul.msk.f32.vlgmr.msra.gmra.mxu2 %vm391_vm9, %v3987_v23  ;;  %4641 = vmatmul.msk.f32.vlgmr.msrb.gmra.mxu3 %vm391_vm9, %v3987_v23 }
0x2861   :  { %v4251_v7 = vpop.f32.mrf.mxu0 }
0x2869   :  { %v4254_v6 = vpop.f32.mrf.mxu0 }
0x28df   :  { %v4068_v62 = vpop.f32.mrf.mxu3  ;;  %v4048_v56 = vpop.f32.mrf.mxu2 }
0x28e0   :  { %v4069_v54 = vadd.f32 %v4068_v62, %v4006_v14  ;;  %v4049_v53 = vadd.f32 %v6687_v28, %v4048_v56  ;;  %v4122_v28 = vadd.f32 %v6815_v0, %v4121_v17  ;;  %v4249_v14 = vadd.f32 %v6953_v45, %v4248_v57 }
0x28e2   :  { %v4642_v36 = vmul.f32 -1.442695, %v4069_v54  ;;  %v4255_v54 = vadd.f32 %v6953_v45, %v4254_v6  ;;  %v4320_v56 = vrot.slane %v4249_v14, 6 }
0x28e4   :  { %4908 = vpow2.f32 %v4642_v36  ;;  %v4296_v36 = vrot.slane %v4249_v14, 3  ;;  %v4675_v17 = vrot.slane %v4255_v54, 10 }
0x28ea   :  { %v4909_v10 = vpop.eup %4908 }
0x28eb   :  { %v4074_v15 = vadd.f32 1.0, %v4909_v10 }
0x28ed   :  { %4910 = vrcp.f32 %v4074_v15  ;;  %v4086_v58 = vand.u32 2147483648, %v4074_v15  ;;  %v4084_v30 = vand.u32 2147483647, %v4074_v15  ;;  %vm4080_vm12 = vweird.f32 %v4074_v15 }
0x28ef   :  { %v4087_v50 = vor.u32 1.1754944e-38, %v4086_v58  ;;  %vm4085_vm14 = vcmp.eq.f32.partialorder %v4084_v30, 8.507059e+37 }
0x28f3   :  { %v4911_v12 = vpop.eup %4910 }
0x28f4   :  { %v4076_v34 = vmul.f32 %v4911_v12, %v4074_v15  ;;  %vm4081_vm11 = vweird.f32 %v4911_v12 }
0x28f5   :  { %vm4082_vm13 = vmor %vm4080_vm12, %vm4081_vm11 }
0x28f6   :  { %v4077_v27 = vsub.f32 1.0, %v4076_v34  ;;  %v4312_v34 = vrot.slane %v4249_v14, 5 }
0x28f8   :  { %v4078_v40 = vmul.f32 %v4911_v12, %v4077_v27 }
0x28fa   :  { %v4079_v39 = vadd.f32 %v4911_v12, %v4078_v40  ;;  %v4280_v40 = vrot.slane %v4249_v14, 1 }
0x28fc   :  { %v4083_v4 = vsel %vm4082_vm13, %v4911_v12, %v4079_v39  ;;  %v4304_v12 = vrot.slane %v4249_v14, 4  ;;  %v4288_v39 = vrot.slane %v4249_v14, 2 }
0x28fd   :  { %v4088_v55 = vsel %vm4085_vm14, %v4087_v50, %v4083_v4  ;;  %v4328_v50 = vrot.slane %v4249_v14, 7  ;;  %v4322_v4 = vrot.slane %v4255_v54, 6 }
0x28fe   :  { %v4090_v25 = vmul.f32 %v4088_v55, %v4026_v38 }
0x2900   :  { %v4091_v9 = vadd.f32 %v4090_v25, %v4049_v53 }
0x2902   :  { %4912 = vtanh.f32 %v4091_v9 }
0x2908   :  { %v4913_v26 = vpop.eup %4912 }
0x2909   :  { %v4093_v11 = vsub.f32 %v6870_v44, %v4913_v26 }
0x290b   :  { %4095 = vrot.lane.b32.xlu0 %v4093_v11, %s5179_s13  ;;  %v4657_v11 = vrot.slane %v4255_v54, 7 }
0x297d   :  { %v4096_v19 = vpop.permute.xlu0 %4095 }
0x297e   :  { %v4098_v47 = vmul.f32 %v4096_v19, %v4088_v55  ;;  %v4669_v19 = vrot.slane %v4255_v54, 9 }
0x2980   :  { %4100 = vrot.lane.b32.xlu1 %v4098_v47, %s5180_s3 }
0x29f2   :  { %v4101_v35 = vpop.permute.xlu1 %4100 }
0x29f3   :  { %v4103_v21 = vadd.f32 %v4913_v26, %v4101_v35 }
0x29f5   :  { %4645 = vmatmul.msk.f32.vlgmr.msrb.gmra.mxu2 %vm391_vm9, %v4103_v21  ;;  %4646 = vmatmul.msk.f32.vlgmr.msra.gmra.mxu3 %vm391_vm9, %v4103_v21 }
0x2a78   :  { %v4184_v33 = vpop.f32.mrf.mxu3  ;;  %v4164_v16 = vpop.f32.mrf.mxu2 }
0x2a79   :  { %v4185_v31 = vadd.f32 %v4184_v33, %v4122_v28  ;;  %v4165_v42 = vadd.f32 %v6827_v49, %v4164_v16  ;;  %v4257_v49 = vpop.f32.mrf.mxu0  ;;  %v4681_v28 = vrot.slane %v4255_v54, 11 }
0x2a7a   :  { %v4258_v9 = vadd.f32 %v6953_v45, %v4257_v49 }
0x2a7b   :  { %v4647_v22 = vmul.f32 -1.442695, %v4185_v31 }
0x2a7c   :  { %v4676_v24 = vrot.slane %v4258_v9, 9 }
0x2a7d   :  { %4914 = vpow2.f32 %v4647_v22  ;;  %v4415_v22 = vrot.slane %v4322_v4, 6 }
0x2a81   :  { %v4260_v23 = vpop.f32.mrf.mxu0 }
0x2a83   :  { %v4915_v44 = vpop.eup %4914 }
0x2a84   :  { %v4190_v59 = vadd.f32 1.0, %v4915_v44  ;;  %v4692_v44 = vrot.slane %v4255_v54, 13 }
0x2a86   :  { %4916 = vrcp.f32 %v4190_v59  ;;  %v4202_v46 = vand.u32 2147483648, %v4190_v59  ;;  %v4200_v63 = vand.u32 2147483647, %v4190_v59  ;;  %vm4196_vm0 = vweird.f32 %v4190_v59 }
0x2a88   :  { %v4203_v0 = vor.u32 1.1754944e-38, %v4202_v46  ;;  %vm4201_vm11 = vcmp.eq.f32.partialorder %v4200_v63, 8.507059e+37 }
0x2a89   :  { %v4263_v15 = vpop.f32.mrf.mxu0 }
0x2a8c   :  { %v4917_v48 = vpop.eup %4916 }
0x2a8d   :  { %v4192_v1 = vmul.f32 %v4917_v48, %v4190_v59  ;;  %vm4197_vm15 = vweird.f32 %v4917_v48 }
0x2a8e   :  { %vm4198_vm10 = vmor %vm4196_vm0, %vm4197_vm15 }
0x2a8f   :  { %v4193_v3 = vsub.f32 1.0, %v4192_v1  ;;  %v4658_v1 = vrot.slane %v4258_v9, 6 }
0x2a91   :  { %v4194_v52 = vmul.f32 %v4917_v48, %v4193_v3  ;;  %v4261_v3 = vadd.f32 %v6953_v45, %v4260_v23 }
0x2a93   :  { %v4195_v41 = vadd.f32 %v4917_v48, %v4194_v52  ;;  %v4664_v52 = vrot.slane %v4258_v9, 7  ;;  %v4659_v57 = vrot.slane %v4261_v3, 5  ;;  %v4665_v49 = vrot.slane %v4261_v3, 6 }
0x2a94   :  { %v4671_v23 = vrot.slane %v4261_v3, 7 }
0x2a95   :  { %v4199_v8 = vsel %vm4198_vm10, %v4917_v48, %v4195_v41  ;;  %v4315_v48 = vrot.slane %v4258_v9, 5 }
0x2a96   :  { %v4204_v32 = vsel %vm4201_vm11, %v4203_v0, %v4199_v8  ;;  %v4687_v0 = vrot.slane %v4258_v9, 11  ;;  %v4266_v8 = vpop.f32.mrf.mxu0 }
0x2a97   :  { %v4206_v5 = vmul.f32 %v4204_v32, %v4142_v13  ;;  %v6975_v13 = vadd.f32 %v6953_v45, %v4263_v15 }
0x2a99   :  { %v4207_v37 = vadd.f32 %v4206_v5, %v4165_v42 }
0x2a9b   :  { %4918 = vtanh.f32 %v4207_v37  ;;  %v4693_v37 = vrot.slane %v4258_v9, 12 }
0x2aa1   :  { %v4919_v20 = vpop.eup %4918 }
0x2aa2   :  { %v4209_v60 = vsub.f32 %v6906_v29, %v4919_v20  ;;  %v4252_v29 = vadd.f32 %v6953_v45, %v4251_v7  ;;  %v6985_v7 = vadd.f32 %v6953_v45, %v4266_v8 }
0x2aa4   :  { %4211 = vrot.lane.b32.xlu2 %v4209_v60, %s5179_s13  ;;  %v4329_v62 = vrot.slane %v4252_v29, 7  ;;  %v4662_v10 = vrot.slane %v4252_v29, 9  ;;  %v4668_v27 = vrot.slane %v4252_v29, 10  ;;  %v4674_v58 = vrot.slane %v4252_v29, 11 }
0x2aa5   :  { %v4680_v30 = vrot.slane %v4252_v29, 12  ;;  %v4686_v2 = vrot.slane %v4252_v29, 13  ;;  %v4344_v53 = vsel %vm194_vm1, %v4252_v29, %v4280_v40  ;;  %v4301_v29 = vrot.slane %v6975_v13, 3 }
0x2aa6   :  { %v4427_v38 = vrot.slane %v4329_v62, 7  ;;  %v4336_v55 = vsel %vm194_vm1, %v4329_v62, %v4249_v14  ;;  %v4358_v25 = vsel %vm194_vm1, %v4662_v10, %v4288_v39  ;;  %v4386_v26 = vsel %vm194_vm1, %v4674_v58, %v4304_v12 }
0x2aa7   :  { %v4372_v47 = vsel %vm194_vm1, %v4668_v27, %v4296_v36  ;;  %v4400_v35 = vsel %vm194_vm1, %v4680_v30, %v4312_v34  ;;  %v4414_v21 = vsel %vm194_vm1, %v4686_v2, %v4320_v56  ;;  %v4360_v31 = vsel %vm197_vm2, %v4255_v54, %v4358_v25 }
0x2aa8   :  { %v4428_v33 = vsel %vm194_vm1, %v4427_v38, %v4328_v50  ;;  %v4337_v59 = vsel %vm197_vm2, %v4322_v4, %v4336_v55  ;;  %v4346_v46 = vsel %vm197_vm2, %v4657_v11, %v4344_v53  ;;  %v4374_v63 = vsel %vm197_vm2, %v4669_v19, %v4372_v47 }
0x2aa9   :  { %v4388_v41 = vsel %vm197_vm2, %v4675_v17, %v4386_v26  ;;  %v4402_v16 = vsel %vm197_vm2, %v4681_v28, %v4400_v35  ;;  %v4430_v42 = vsel %vm197_vm2, %v4692_v44, %v4428_v33  ;;  %v4376_v5 = vsel %vm200_vm3, %v4258_v9, %v4374_v63 }
0x2aaa   :  { %v4348_v60 = vsel %vm200_vm3, %v4658_v1, %v4346_v46  ;;  %v4432_v14 = vsel %vm200_vm3, %v4693_v37, %v4430_v42  ;;  %v4682_v62 = vrot.slane %v4261_v3, 9  ;;  %v4688_v54 = vrot.slane %v4261_v3, 10 }
0x2aab   :  { %v4694_v36 = vrot.slane %v4261_v3, 11  ;;  %v4660_v12 = vrot.slane %v6975_v13, 4  ;;  %v4350_v27 = vsel %vm203_vm4, %v4659_v57, %v4348_v60  ;;  %v4666_v58 = vrot.slane %v6975_v13, 5 }
0x2aac   :  { %v4677_v40 = vrot.slane %v6975_v13, 7  ;;  %v4294_v30 = vrot.slane %v6985_v7, 2  ;;  %v4378_v39 = vsel %vm203_vm4, %v4671_v23, %v4376_v5  ;;  %v4379_v56 = vrot.slane %v4301_v29, 3 }
0x2aad   :  { %v4695_v50 = vrot.slane %v6975_v13, 10  ;;  %v4434_v38 = vsel %vm203_vm4, %v4694_v36, %v4432_v14  ;;  %v4696_v53 = vrot.slane %v6985_v7, 9  ;;  %v4352_v26 = vsel %vm206_vm5, %v4660_v12, %v4350_v27 }
0x2aae   :  { %v4689_v11 = vrot.slane %v6975_v13, 9  ;;  %v4367_v35 = vrot.slane %v4294_v30, 2  ;;  %v4380_v28 = vsel %vm206_vm5, %v4379_v56, %v4378_v39  ;;  %v4661_v33 = vrot.slane %v6985_v7, 3 }
0x2ab0   :  { %v4354_v37 = vsel %vm209_vm6, %v4661_v33, %v4352_v26 }
0x2afe   :  { %v4212_v18 = vpop.permute.xlu2 %4211 }
0x2aff   :  { %v4214_v51 = vmul.f32 %v4212_v18, %v4204_v32  ;;  %v4416_v32 = vsel %vm197_vm2, %v4415_v22, %v4414_v21  ;;  %v4403_v18 = vrot.slane %v4315_v48, 5  ;;  %v4672_v21 = vrot.slane %v6985_v7, 5 }
0x2b00   :  { %v4418_v6 = vsel %vm200_vm3, %v4687_v0, %v4416_v32  ;;  %v4436_v22 = vsel %vm206_vm5, %v4695_v50, %v4434_v38 }
0x2b01   :  { %4216 = vrot.lane.b32.xlu0 %v4214_v51, %s5180_s3  ;;  %v4308_v51 = vrot.slane %v4261_v3, 4  ;;  %v4404_v34 = vsel %vm200_vm3, %v4403_v18, %v4402_v16  ;;  %v4420_v55 = vsel %vm203_vm4, %v4688_v54, %v4418_v6  ;;  %v4438_v1 = vsel %vm209_vm6, %v4696_v53, %v4436_v22 }
0x2b02   :  { %v4406_v4 = vsel %vm203_vm4, %v4682_v62, %v4404_v34 }
0x2b03   :  { %v4391_v15 = vrot.slane %v4308_v51, 4  ;;  %v4408_v5 = vsel %vm206_vm5, %v6975_v13, %v4406_v4 }
0x2b73   :  { %v4217_v43 = vpop.permute.xlu0 %4216 }
0x2b74   :  { %v4219_v61 = vadd.f32 %v4919_v20, %v4217_v43  ;;  %v4338_v20 = vsel %vm200_vm3, %v4315_v48, %v4337_v59  ;;  %v4362_v43 = vsel %vm200_vm3, %v4664_v52, %v4360_v31  ;;  %v4678_v59 = vrot.slane %v6985_v7, 6 }
0x2b75   :  { %v4339_v10 = vsel %vm203_vm4, %v4308_v51, %v4338_v20  ;;  %v4364_v2 = vsel %vm203_vm4, %v4665_v49, %v4362_v43  ;;  %v4684_v48 = vrot.slane %v6985_v7, 7  ;;  %v4422_v51 = vsel %vm206_vm5, %v4689_v11, %v4420_v55 }
0x2b76   :  { %4655 = vmatmul.msk.f32.gmra.mxu0 %vm391_vm9, %v4219_v61  ;;  %v4390_v61 = vsel %vm200_vm3, %v4676_v24, %v4388_v41  ;;  %v4340_v9 = vsel %vm206_vm5, %v4301_v29, %v4339_v10  ;;  %v4366_v19 = vsel %vm206_vm5, %v4666_v58, %v4364_v2  ;;  %v4382_v41 = vsel %vm209_vm6, %v4672_v21, %v4380_v28 }
0x2b77   :  { %v4392_v25 = vsel %vm203_vm4, %v4391_v15, %v4390_v61  ;;  %v4341_v44 = vsel %vm209_vm6, %v4294_v30, %v4340_v9  ;;  %v4368_v24 = vsel %vm209_vm6, %v4367_v35, %v4366_v19  ;;  %v4410_v18 = vsel %vm209_vm6, %v4684_v48, %v4408_v5 }
0x2b78   :  { %v4394_v47 = vsel %vm206_vm5, %v4677_v40, %v4392_v25  ;;  %v4424_v13 = vsel %vm209_vm6, %v6985_v7, %v4422_v51 }
0x2b79   :  { %v4396_v20 = vsel %vm209_vm6, %v4678_v59, %v4394_v47 }
0x2bf3   :  { %v4269_v17 = vpop.f32.mrf.mxu0 }
0x2bf4   :  { %v4270_v31 = vadd.f32 %v6953_v45, %v4269_v17 }
0x2bf6   :  { %v4287_v3 = vrot.slane %v4270_v31, 1  ;;  %v4667_v46 = vrot.slane %v4270_v31, 3  ;;  %v4673_v52 = vrot.slane %v4270_v31, 4  ;;  %v4679_v63 = vrot.slane %v4270_v31, 5 }
0x2bf7   :  { %v4685_v16 = vrot.slane %v4270_v31, 6  ;;  %v4440_v45 = vsel %vm212_vm7, %v4270_v31, %v4438_v1  ;;  %v4691_v42 = vrot.slane %v4270_v31, 7 }
0x2bf8   :  { %v4342_v0 = vsel %vm212_vm7, %v4287_v3, %v4341_v44  ;;  %v4355_v8 = vrot.slane %v4287_v3, 1  ;;  %v4370_v32 = vsel %vm212_vm7, %v4667_v46, %v4368_v24  ;;  %4456 = vst.msk [vmem:[%s7090_s21 + $0x38] sm:$0xff] %vm317_vm8, %v4440_v45  ;;  %v4384_v60 = vsel %vm212_vm7, %v4673_v52, %v4382_v41 }
0x2bf9   :  { %4449 = vst.msk [vmem:[%s7090_s21] sm:$0xff] %vm317_vm8, %v4342_v0  ;;  %v4398_v61 = vsel %vm212_vm7, %v4679_v63, %v4396_v20  ;;  %v4412_v57 = vsel %vm212_vm7, %v4685_v16, %v4410_v18  ;;  %v4426_v6 = vsel %vm212_vm7, %v4691_v42, %v4424_v13 }
0x2bfa   :  { %v4356_v43 = vsel %vm212_vm7, %v4355_v8, %v4354_v37  ;;  %4451 = vst.msk [vmem:[%s7090_s21 + $0x10] sm:$0xff] %vm317_vm8, %v4370_v32 }
0x2bfb   :  { %4450 = vst.msk [vmem:[%s7090_s21 + $0x8] sm:$0xff] %vm317_vm8, %v4356_v43 }
0x2bfc   :  { %4452 = vst.msk [vmem:[%s7090_s21 + $0x18] sm:$0xff] %vm317_vm8, %v4384_v60 }
0x2bfd   :  { %4453 = vst.msk [vmem:[%s7090_s21 + $0x20] sm:$0xff] %vm317_vm8, %v4398_v61 }
0x2bfe   :  { %4454 = vst.msk [vmem:[%s7090_s21 + $0x28] sm:$0xff] %vm317_vm8, %v4412_v57 }
0x2bff   :  { %4455 = vst.msk [vmem:[%s7090_s21 + $0x30] sm:$0xff] %vm317_vm8, %v4426_v6 }
0x2c00   :  { %4461 = vsyncpa [#allocation3], 1 }
0x2c01   :  { %4462 = vsyncpa [#allocation5], 1 }
0x2c02   :  { %4463 = vsyncpa [#allocation8], 1 }
0x2c03   :  { %4464 = vsyncpa [#allocation11], 1 }

</bundles_post_ra>
